<compile_context>
chip_gen: v7x
topology: tpu7x:2x2x1
jax: 0.10.0
libtpu: 0.0.40
codegen_flags: <defaults>
</compile_context>

<pallas_src>
import jax
import jax.numpy as jnp
from jax.experimental import pallas as pl
from jax.experimental.pallas import tpu as pltpu


def _coord_att_kernel(x_ref, whT_ref, bh_ref, wwT_ref, bw_ref,
                      w1_ref, b1_ref, w2_ref, b2_ref, w3_ref, b3_ref,
                      o_ref):
    """x_ref: (H, W, C, NB)   o_ref: (H, W, O, NB)   (batch on the lane axis)."""
    f32 = jnp.float32
    H, W = x_ref.shape[0], x_ref.shape[1]

    # --- depthwise (1,7)/(7,1) pools with folded BN: unrolled VPU plane FMAs ----
    # xh[i, c, n] = sum_j x[i, j, c, n] * wh[c, j] + bh[c]
    xh = bh_ref[...].astype(f32)                                   # (1, C, 1)
    for j in range(W):
        xh = xh + x_ref[:, j].astype(f32) * whT_ref[j].astype(f32)  # (H, C, NB)
    # xw[j, c, n] = sum_i x[i, j, c, n] * ww[c, i] + bw[c]
    xw = bw_ref[...].astype(f32)
    for i in range(H):
        xw = xw + x_ref[i].astype(f32) * wwT_ref[i].astype(f32)     # (W, C, NB)

    w1 = w1_ref[...]
    b1 = b1_ref[...]

    def gate(xp_s, w_out_ref, b_out_ref):
        """One spatial position for all NB lanes: (C, NB) -> sigmoid gate (O, NB)."""
        # conv1 (1x1, BN1 folded) + h_swish, on the MXU (K = C on sublanes).
        y = jnp.dot(w1, xp_s, preferred_element_type=jnp.float32) + b1        # (M, NB)
        y = y * (jnp.clip(y + 3.0, 0.0, 6.0) * (1.0 / 6.0))                    # h_swish
        # conv2 / conv3 (1x1) + sigmoid.
        z = jnp.dot(w_out_ref[...], y, preferred_element_type=jnp.float32) \
            + b_out_ref[...]                                                   # (O, NB)
        return 1.0 / (1.0 + jnp.exp(-z))                                       # sigmoid

    ah = [gate(xh[i], w2_ref, b2_ref) for i in range(H)]   # per-row gates,  (O, NB)
    aw = [gate(xw[j], w3_ref, b3_ref) for j in range(W)]   # per-col gates,  (O, NB)

    # out[i, j, o, n] = a_h[o, i, n] * a_w[o, j, n]  (the .expand + multiply)
    # 49 lane-dense (O, NB) stores — no masked partial stores.
    for i in range(H):
        for j in range(W):
            o_ref[i, j] = (ah[i] * aw[j]).astype(o_ref.dtype)


def _round_up(a, b):
    return (a + b - 1) // b * b


def coord_att(x: jax.Array, p: dict, eps: float = 1e-5, block_n: int | None = None) -> jax.Array:
    """Fused CoordAtt forward (inference-mode BatchNorm folded into convs)."""
    N, C, H, W = x.shape
    assert H == 7 and W == 7, "CoordAtt's (1,7)/(7,1) valid convs + expand require 7x7 input"
    M = p["w1"].shape[0]
    O = p["w2"].shape[0]
    f32 = jnp.float32

    # --- Fold eval-mode BatchNorm into the (bias-free) depthwise convs and conv1.
    # TODO(synk): training-mode BatchNorm (batch statistics) has no clean Pallas
    # equivalent here; inference-mode running stats are folded instead.
    s_h = p["bn_h_gamma"] / jnp.sqrt(p["bn_h_var"] + eps)
    whT = (p["wh"] * s_h[:, None]).T.reshape(W, 1, C, 1).astype(f32)   # whT[j,0,c,0]
    bh = (p["bn_h_beta"] - p["bn_h_mean"] * s_h).reshape(1, C, 1).astype(f32)

    s_w = p["bn_w_gamma"] / jnp.sqrt(p["bn_w_var"] + eps)
    wwT = (p["ww"] * s_w[:, None]).T.reshape(H, 1, C, 1).astype(f32)   # wwT[i,0,c,0]
    bw = (p["bn_w_beta"] - p["bn_w_mean"] * s_w).reshape(1, C, 1).astype(f32)

    s1 = p["bn1_gamma"] / jnp.sqrt(p["bn1_var"] + eps)
    w1 = (p["w1"] * s1[:, None]).astype(f32)                           # (M, C)
    b1 = (((p["b1"] - p["bn1_mean"]) * s1 + p["bn1_beta"]).reshape(M, 1)).astype(f32)

    w2 = p["w2"].astype(f32); b2 = p["b2"].reshape(O, 1).astype(f32)   # (O, M), (O, 1)
    w3 = p["w3"].astype(f32); b3 = p["b3"].reshape(O, 1).astype(f32)

    # --- Batch tiling: batch rides the 128-lane axis, NB multiple of 128.
    if block_n is None:
        nb = min(512, _round_up(N, 128))
        # Prefer >= 2 grid steps when possible so v7x's two TensorCores both work.
        if N > 128 and _round_up(N, nb) // nb < 2:
            nb = max(128, _round_up(pl.cdiv(N, 2), 128))
    else:
        nb = max(128, _round_up(block_n, 128))
    # Keep the double-buffered per-step footprint comfortably inside scoped VMEM.
    while nb > 128 and 3 * 4 * H * W * nb * (C + O) > 48 * 1024 * 1024:
        nb -= 128
    n_pad = _round_up(N, nb)
    grid_n = n_pad // nb

    # Batch-last layout (lane-dense); zero-pad batch to a multiple of the block.
    xt = jnp.transpose(x, (2, 3, 1, 0))                                # (H, W, C, N)
    if n_pad != N:
        xt = jnp.pad(xt, ((0, 0), (0, 0), (0, 0), (0, n_pad - N)))

    io_bytes = 4 * H * W * nb * (C + O)                                # one in + one out block
    vmem_limit = int(min(48 * 1024 * 1024, max(24 * 1024 * 1024, 3 * io_bytes)))

    idx2 = lambda n: (0, 0)
    idx3 = lambda n: (0, 0, 0)
    idx4 = lambda n: (0, 0, 0, 0)

    out_t = pl.pallas_call(
        _coord_att_kernel,
        out_shape=jax.ShapeDtypeStruct((H, W, O, n_pad), x.dtype),
        grid_spec=pltpu.PrefetchScalarGridSpec(
            num_scalar_prefetch=0,
            grid=(grid_n,),
            in_specs=[
                pl.BlockSpec((H, W, C, nb), lambda n: (0, 0, 0, n)),   # x (batch-last)
                pl.BlockSpec((W, 1, C, 1), idx4),                      # whT (BN folded)
                pl.BlockSpec((1, C, 1), idx3),                         # bh
                pl.BlockSpec((H, 1, C, 1), idx4),                      # wwT (BN folded)
                pl.BlockSpec((1, C, 1), idx3),                         # bw
                pl.BlockSpec((M, C), idx2),                            # w1 (BN1 folded)
                pl.BlockSpec((M, 1), idx2),                            # b1
                pl.BlockSpec((O, M), idx2),                            # w2
                pl.BlockSpec((O, 1), idx2),                            # b2
                pl.BlockSpec((O, M), idx2),                            # w3
                pl.BlockSpec((O, 1), idx2),                            # b3
            ],
            out_specs=pl.BlockSpec((H, W, O, nb), lambda n: (0, 0, 0, n)),
        ),
        compiler_params=pltpu.CompilerParams(
            dimension_semantics=("parallel",),
            vmem_limit_bytes=vmem_limit,
        ),
    )(xt, whT, bh, wwT, bw, w1, b1, w2, b2, w3, b3)

    # Back to the module's NCHW layout; drop the batch padding.
    return jnp.transpose(out_t, (3, 2, 0, 1))[:N]


# ----------------------------- pure-JAX reference ---------------------------------

def coord_att_ref(x, p, eps=1e-5):
    """Unfused reference that mirrors the PyTorch forward (BN in eval mode)."""
    N, C, H, W = x.shape

    def bn(z, g, b, m, v):
        return (z - m[None, :, None]) / jnp.sqrt(v[None, :, None] + eps) \
            * g[None, :, None] + b[None, :, None]

    hp = "highest"
    xh = jnp.einsum("nchw,cw->nch", x, p["wh"], precision=hp)            # Linear_h
    xh = bn(xh, p["bn_h_gamma"], p["bn_h_beta"], p["bn_h_mean"], p["bn_h_var"])
    xw = jnp.einsum("nchw,ch->ncw", x, p["ww"], precision=hp)            # Linear_w
    xw = bn(xw, p["bn_w_gamma"], p["bn_w_beta"], p["bn_w_mean"], p["bn_w_var"])
    y = jnp.concatenate([xh, xw], axis=2)                                # (N, C, H+W)
    y = jnp.einsum("mc,ncp->nmp", p["w1"], y, precision=hp) + p["b1"][None, :, None]
    y = bn(y, p["bn1_gamma"], p["bn1_beta"], p["bn1_mean"], p["bn1_var"])
    y = y * jnp.clip(y + 3.0, 0.0, 6.0) / 6.0                            # h_swish
    yh, yw = y[:, :, :H], y[:, :, H:]
    ah = jax.nn.sigmoid(jnp.einsum("om,nmi->noi", p["w2"], yh, precision=hp)
                        + p["b2"][None, :, None])                        # (N, O, H)
    aw = jax.nn.sigmoid(jnp.einsum("om,nmj->noj", p["w3"], yw, precision=hp)
                        + p["b3"][None, :, None])                        # (N, O, W)
    return ah[:, :, :, None] * aw[:, :, None, :]                         # (N, O, H, W)


def init_params(key, inp, oup, groups=32):
    mip = max(8, inp // groups)
    ks = jax.random.split(key, 20)
    nrm = lambda k, s, sc: sc * jax.random.normal(k, s, jnp.float32)
    uni = lambda k, s: jax.random.uniform(k, s, jnp.float32, 0.5, 1.5)
    return dict(
        wh=nrm(ks[0], (inp, 7), 0.3),
        bn_h_gamma=uni(ks[1], (inp,)), bn_h_beta=nrm(ks[2], (inp,), 0.1),
        bn_h_mean=nrm(ks[3], (inp,), 0.1), bn_h_var=uni(ks[4], (inp,)),
        ww=nrm(ks[5], (inp, 7), 0.3),
        bn_w_gamma=uni(ks[6], (inp,)), bn_w_beta=nrm(ks[7], (inp,), 0.1),
        bn_w_mean=nrm(ks[8], (inp,), 0.1), bn_w_var=uni(ks[9], (inp,)),
        w1=nrm(ks[10], (mip, inp), 0.2), b1=nrm(ks[11], (mip,), 0.1),
        bn1_gamma=uni(ks[12], (mip,)), bn1_beta=nrm(ks[13], (mip,), 0.1),
        bn1_mean=nrm(ks[14], (mip,), 0.1), bn1_var=uni(ks[15], (mip,)),
        w2=nrm(ks[16], (oup, mip), 0.3), b2=nrm(ks[17], (oup,), 0.1),
        w3=nrm(ks[18], (oup, mip), 0.3), b3=nrm(ks[19], (oup,), 0.1),
    )


if __name__ == "__main__":
    key = jax.random.PRNGKey(0)
    N, INP, OUP, GROUPS = 200, 32, 32, 32        # mip = max(8, 32 // 32) = 8
    H = W = 7                                    # required by the module's conv kernels
    # N = 200 exercises the batched grid (2 steps of NB = 128) and batch padding.

    kx, kp = jax.random.split(key)
    x = jax.random.normal(kx, (N, INP, H, W), dtype=jnp.float32)
    params = init_params(kp, INP, OUP, GROUPS)

    out = coord_att(x, params)
    out = jax.block_until_ready(out)

    ref = coord_att_ref(x, params)
    assert out.shape == (N, OUP, H, W) and out.dtype == x.dtype
    assert jnp.allclose(out, ref, atol=1e-3, rtol=1e-3), \
        float(jnp.max(jnp.abs(out - ref)))
    print("KERNEL_OK")
</pallas_src>

<mosaic_0001>
module attributes {stable_mosaic.version = 11 : i64} {
  func.func @_coord_att_kernel(%arg0: i32, %arg1: memref<7x7x32x128xf32, #tpu.memory_space<vmem>>, %arg2: memref<7x1x32x1xf32, #tpu.memory_space<vmem>>, %arg3: memref<1x32x1xf32, #tpu.memory_space<vmem>>, %arg4: memref<7x1x32x1xf32, #tpu.memory_space<vmem>>, %arg5: memref<1x32x1xf32, #tpu.memory_space<vmem>>, %arg6: memref<8x32xf32, #tpu.memory_space<vmem>>, %arg7: memref<8x1xf32, #tpu.memory_space<vmem>>, %arg8: memref<32x8xf32, #tpu.memory_space<vmem>>, %arg9: memref<32x1xf32, #tpu.memory_space<vmem>>, %arg10: memref<32x8xf32, #tpu.memory_space<vmem>>, %arg11: memref<32x1xf32, #tpu.memory_space<vmem>>, %arg12: memref<7x7x32x128xf32, #tpu.memory_space<vmem>>) attributes {dimension_semantics = [#tpu.dimension_semantics<parallel>], iteration_bounds = array<i64: 2>, scalar_prefetch = 0 : i64, scratch_operands = 0 : i64, tpu.core_type = #tpu.core_type<tc>, window_params = [{transform_indices = @transform_0, window_bounds = array<i64: 7, 7, 32, 128>}, {pipeline_mode = #tpu.pipeline_mode<synchronous>, transform_indices = @transform_1, window_bounds = array<i64: 7, 1, 32, 1>}, {pipeline_mode = #tpu.pipeline_mode<synchronous>, transform_indices = @transform_2, window_bounds = array<i64: 1, 32, 1>}, {pipeline_mode = #tpu.pipeline_mode<synchronous>, transform_indices = @transform_3, window_bounds = array<i64: 7, 1, 32, 1>}, {pipeline_mode = #tpu.pipeline_mode<synchronous>, transform_indices = @transform_4, window_bounds = array<i64: 1, 32, 1>}, {pipeline_mode = #tpu.pipeline_mode<synchronous>, transform_indices = @transform_5, window_bounds = array<i64: 8, 32>}, {pipeline_mode = #tpu.pipeline_mode<synchronous>, transform_indices = @transform_6, window_bounds = array<i64: 8, 1>}, {pipeline_mode = #tpu.pipeline_mode<synchronous>, transform_indices = @transform_7, window_bounds = array<i64: 32, 8>}, {pipeline_mode = #tpu.pipeline_mode<synchronous>, transform_indices = @transform_8, window_bounds = array<i64: 32, 1>}, {pipeline_mode = #tpu.pipeline_mode<synchronous>, transform_indices = @transform_9, window_bounds = array<i64: 32, 8>}, {pipeline_mode = #tpu.pipeline_mode<synchronous>, transform_indices = @transform_10, window_bounds = array<i64: 32, 1>}, {transform_indices = @transform_11, window_bounds = array<i64: 7, 7, 32, 128>}]} {
    %c0 = arith.constant 0 : index
    %c0_0 = arith.constant 0 : index
    %c0_1 = arith.constant 0 : index
    %0 = vector.load %arg3[%c0, %c0_0, %c0_1] : memref<1x32x1xf32, #tpu.memory_space<vmem>>, vector<1x32x1xf32>
    %c0_2 = arith.constant 0 : index
    %c0_3 = arith.constant 0 : index
    %c0_4 = arith.constant 0 : index
    %c0_5 = arith.constant 0 : index
    %1 = vector.load %arg1[%c0_2, %c0_3, %c0_4, %c0_5] : memref<7x7x32x128xf32, #tpu.memory_space<vmem>>, vector<7x1x32x128xf32>
    %2 = vector.shape_cast %1 : vector<7x1x32x128xf32> to vector<7x32x128xf32>
    %c0_6 = arith.constant 0 : index
    %c0_7 = arith.constant 0 : index
    %c0_8 = arith.constant 0 : index
    %c0_9 = arith.constant 0 : index
    %3 = vector.load %arg2[%c0_6, %c0_7, %c0_8, %c0_9] : memref<7x1x32x1xf32, #tpu.memory_space<vmem>>, vector<1x1x32x1xf32>
    %4 = vector.shape_cast %3 : vector<1x1x32x1xf32> to vector<1x32x1xf32>
    %5 = vector.broadcast %4 : vector<1x32x1xf32> to vector<7x32x128xf32>
    %6 = arith.mulf %2, %5 : vector<7x32x128xf32>
    %7 = vector.broadcast %0 : vector<1x32x1xf32> to vector<7x32x128xf32>
    %8 = arith.addf %7, %6 : vector<7x32x128xf32>
    %c0_10 = arith.constant 0 : index
    %c1 = arith.constant 1 : index
    %c0_11 = arith.constant 0 : index
    %c0_12 = arith.constant 0 : index
    %9 = vector.load %arg1[%c0_10, %c1, %c0_11, %c0_12] : memref<7x7x32x128xf32, #tpu.memory_space<vmem>>, vector<7x1x32x128xf32>
    %10 = vector.shape_cast %9 : vector<7x1x32x128xf32> to vector<7x32x128xf32>
    %c1_13 = arith.constant 1 : index
    %c0_14 = arith.constant 0 : index
    %c0_15 = arith.constant 0 : index
    %c0_16 = arith.constant 0 : index
    %11 = vector.load %arg2[%c1_13, %c0_14, %c0_15, %c0_16] : memref<7x1x32x1xf32, #tpu.memory_space<vmem>>, vector<1x1x32x1xf32>
    %12 = vector.shape_cast %11 : vector<1x1x32x1xf32> to vector<1x32x1xf32>
    %13 = vector.broadcast %12 : vector<1x32x1xf32> to vector<7x32x128xf32>
    %14 = arith.mulf %10, %13 : vector<7x32x128xf32>
    %15 = arith.addf %8, %14 : vector<7x32x128xf32>
    %c0_17 = arith.constant 0 : index
    %c2 = arith.constant 2 : index
    %c0_18 = arith.constant 0 : index
    %c0_19 = arith.constant 0 : index
    %16 = vector.load %arg1[%c0_17, %c2, %c0_18, %c0_19] : memref<7x7x32x128xf32, #tpu.memory_space<vmem>>, vector<7x1x32x128xf32>
    %17 = vector.shape_cast %16 : vector<7x1x32x128xf32> to vector<7x32x128xf32>
    %c2_20 = arith.constant 2 : index
    %c0_21 = arith.constant 0 : index
    %c0_22 = arith.constant 0 : index
    %c0_23 = arith.constant 0 : index
    %18 = vector.load %arg2[%c2_20, %c0_21, %c0_22, %c0_23] : memref<7x1x32x1xf32, #tpu.memory_space<vmem>>, vector<1x1x32x1xf32>
    %19 = vector.shape_cast %18 : vector<1x1x32x1xf32> to vector<1x32x1xf32>
    %20 = vector.broadcast %19 : vector<1x32x1xf32> to vector<7x32x128xf32>
    %21 = arith.mulf %17, %20 : vector<7x32x128xf32>
    %22 = arith.addf %15, %21 : vector<7x32x128xf32>
    %c0_24 = arith.constant 0 : index
    %c3 = arith.constant 3 : index
    %c0_25 = arith.constant 0 : index
    %c0_26 = arith.constant 0 : index
    %23 = vector.load %arg1[%c0_24, %c3, %c0_25, %c0_26] : memref<7x7x32x128xf32, #tpu.memory_space<vmem>>, vector<7x1x32x128xf32>
    %24 = vector.shape_cast %23 : vector<7x1x32x128xf32> to vector<7x32x128xf32>
    %c3_27 = arith.constant 3 : index
    %c0_28 = arith.constant 0 : index
    %c0_29 = arith.constant 0 : index
    %c0_30 = arith.constant 0 : index
    %25 = vector.load %arg2[%c3_27, %c0_28, %c0_29, %c0_30] : memref<7x1x32x1xf32, #tpu.memory_space<vmem>>, vector<1x1x32x1xf32>
    %26 = vector.shape_cast %25 : vector<1x1x32x1xf32> to vector<1x32x1xf32>
    %27 = vector.broadcast %26 : vector<1x32x1xf32> to vector<7x32x128xf32>
    %28 = arith.mulf %24, %27 : vector<7x32x128xf32>
    %29 = arith.addf %22, %28 : vector<7x32x128xf32>
    %c0_31 = arith.constant 0 : index
    %c4 = arith.constant 4 : index
    %c0_32 = arith.constant 0 : index
    %c0_33 = arith.constant 0 : index
    %30 = vector.load %arg1[%c0_31, %c4, %c0_32, %c0_33] : memref<7x7x32x128xf32, #tpu.memory_space<vmem>>, vector<7x1x32x128xf32>
    %31 = vector.shape_cast %30 : vector<7x1x32x128xf32> to vector<7x32x128xf32>
    %c4_34 = arith.constant 4 : index
    %c0_35 = arith.constant 0 : index
    %c0_36 = arith.constant 0 : index
    %c0_37 = arith.constant 0 : index
    %32 = vector.load %arg2[%c4_34, %c0_35, %c0_36, %c0_37] : memref<7x1x32x1xf32, #tpu.memory_space<vmem>>, vector<1x1x32x1xf32>
    %33 = vector.shape_cast %32 : vector<1x1x32x1xf32> to vector<1x32x1xf32>
    %34 = vector.broadcast %33 : vector<1x32x1xf32> to vector<7x32x128xf32>
    %35 = arith.mulf %31, %34 : vector<7x32x128xf32>
    %36 = arith.addf %29, %35 : vector<7x32x128xf32>
    %c0_38 = arith.constant 0 : index
    %c5 = arith.constant 5 : index
    %c0_39 = arith.constant 0 : index
    %c0_40 = arith.constant 0 : index
    %37 = vector.load %arg1[%c0_38, %c5, %c0_39, %c0_40] : memref<7x7x32x128xf32, #tpu.memory_space<vmem>>, vector<7x1x32x128xf32>
    %38 = vector.shape_cast %37 : vector<7x1x32x128xf32> to vector<7x32x128xf32>
    %c5_41 = arith.constant 5 : index
    %c0_42 = arith.constant 0 : index
    %c0_43 = arith.constant 0 : index
    %c0_44 = arith.constant 0 : index
    %39 = vector.load %arg2[%c5_41, %c0_42, %c0_43, %c0_44] : memref<7x1x32x1xf32, #tpu.memory_space<vmem>>, vector<1x1x32x1xf32>
    %40 = vector.shape_cast %39 : vector<1x1x32x1xf32> to vector<1x32x1xf32>
    %41 = vector.broadcast %40 : vector<1x32x1xf32> to vector<7x32x128xf32>
    %42 = arith.mulf %38, %41 : vector<7x32x128xf32>
    %43 = arith.addf %36, %42 : vector<7x32x128xf32>
    %c0_45 = arith.constant 0 : index
    %c6 = arith.constant 6 : index
    %c0_46 = arith.constant 0 : index
    %c0_47 = arith.constant 0 : index
    %44 = vector.load %arg1[%c0_45, %c6, %c0_46, %c0_47] : memref<7x7x32x128xf32, #tpu.memory_space<vmem>>, vector<7x1x32x128xf32>
    %45 = vector.shape_cast %44 : vector<7x1x32x128xf32> to vector<7x32x128xf32>
    %c6_48 = arith.constant 6 : index
    %c0_49 = arith.constant 0 : index
    %c0_50 = arith.constant 0 : index
    %c0_51 = arith.constant 0 : index
    %46 = vector.load %arg2[%c6_48, %c0_49, %c0_50, %c0_51] : memref<7x1x32x1xf32, #tpu.memory_space<vmem>>, vector<1x1x32x1xf32>
    %47 = vector.shape_cast %46 : vector<1x1x32x1xf32> to vector<1x32x1xf32>
    %48 = vector.broadcast %47 : vector<1x32x1xf32> to vector<7x32x128xf32>
    %49 = arith.mulf %45, %48 : vector<7x32x128xf32>
    %50 = arith.addf %43, %49 : vector<7x32x128xf32>
    %c0_52 = arith.constant 0 : index
    %c0_53 = arith.constant 0 : index
    %c0_54 = arith.constant 0 : index
    %51 = vector.load %arg5[%c0_52, %c0_53, %c0_54] : memref<1x32x1xf32, #tpu.memory_space<vmem>>, vector<1x32x1xf32>
    %c0_55 = arith.constant 0 : index
    %c0_56 = arith.constant 0 : index
    %c0_57 = arith.constant 0 : index
    %c0_58 = arith.constant 0 : index
    %52 = vector.load %arg1[%c0_55, %c0_56, %c0_57, %c0_58] : memref<7x7x32x128xf32, #tpu.memory_space<vmem>>, vector<1x7x32x128xf32>
    %53 = vector.shape_cast %52 : vector<1x7x32x128xf32> to vector<7x32x128xf32>
    %c0_59 = arith.constant 0 : index
    %c0_60 = arith.constant 0 : index
    %c0_61 = arith.constant 0 : index
    %c0_62 = arith.constant 0 : index
    %54 = vector.load %arg4[%c0_59, %c0_60, %c0_61, %c0_62] : memref<7x1x32x1xf32, #tpu.memory_space<vmem>>, vector<1x1x32x1xf32>
    %55 = vector.shape_cast %54 : vector<1x1x32x1xf32> to vector<1x32x1xf32>
    %56 = vector.broadcast %55 : vector<1x32x1xf32> to vector<7x32x128xf32>
    %57 = arith.mulf %53, %56 : vector<7x32x128xf32>
    %58 = vector.broadcast %51 : vector<1x32x1xf32> to vector<7x32x128xf32>
    %59 = arith.addf %58, %57 : vector<7x32x128xf32>
    %c1_63 = arith.constant 1 : index
    %c0_64 = arith.constant 0 : index
    %c0_65 = arith.constant 0 : index
    %c0_66 = arith.constant 0 : index
    %60 = vector.load %arg1[%c1_63, %c0_64, %c0_65, %c0_66] : memref<7x7x32x128xf32, #tpu.memory_space<vmem>>, vector<1x7x32x128xf32>
    %61 = vector.shape_cast %60 : vector<1x7x32x128xf32> to vector<7x32x128xf32>
    %c1_67 = arith.constant 1 : index
    %c0_68 = arith.constant 0 : index
    %c0_69 = arith.constant 0 : index
    %c0_70 = arith.constant 0 : index
    %62 = vector.load %arg4[%c1_67, %c0_68, %c0_69, %c0_70] : memref<7x1x32x1xf32, #tpu.memory_space<vmem>>, vector<1x1x32x1xf32>
    %63 = vector.shape_cast %62 : vector<1x1x32x1xf32> to vector<1x32x1xf32>
    %64 = vector.broadcast %63 : vector<1x32x1xf32> to vector<7x32x128xf32>
    %65 = arith.mulf %61, %64 : vector<7x32x128xf32>
    %66 = arith.addf %59, %65 : vector<7x32x128xf32>
    %c2_71 = arith.constant 2 : index
    %c0_72 = arith.constant 0 : index
    %c0_73 = arith.constant 0 : index
    %c0_74 = arith.constant 0 : index
    %67 = vector.load %arg1[%c2_71, %c0_72, %c0_73, %c0_74] : memref<7x7x32x128xf32, #tpu.memory_space<vmem>>, vector<1x7x32x128xf32>
    %68 = vector.shape_cast %67 : vector<1x7x32x128xf32> to vector<7x32x128xf32>
    %c2_75 = arith.constant 2 : index
    %c0_76 = arith.constant 0 : index
    %c0_77 = arith.constant 0 : index
    %c0_78 = arith.constant 0 : index
    %69 = vector.load %arg4[%c2_75, %c0_76, %c0_77, %c0_78] : memref<7x1x32x1xf32, #tpu.memory_space<vmem>>, vector<1x1x32x1xf32>
    %70 = vector.shape_cast %69 : vector<1x1x32x1xf32> to vector<1x32x1xf32>
    %71 = vector.broadcast %70 : vector<1x32x1xf32> to vector<7x32x128xf32>
    %72 = arith.mulf %68, %71 : vector<7x32x128xf32>
    %73 = arith.addf %66, %72 : vector<7x32x128xf32>
    %c3_79 = arith.constant 3 : index
    %c0_80 = arith.constant 0 : index
    %c0_81 = arith.constant 0 : index
    %c0_82 = arith.constant 0 : index
    %74 = vector.load %arg1[%c3_79, %c0_80, %c0_81, %c0_82] : memref<7x7x32x128xf32, #tpu.memory_space<vmem>>, vector<1x7x32x128xf32>
    %75 = vector.shape_cast %74 : vector<1x7x32x128xf32> to vector<7x32x128xf32>
    %c3_83 = arith.constant 3 : index
    %c0_84 = arith.constant 0 : index
    %c0_85 = arith.constant 0 : index
    %c0_86 = arith.constant 0 : index
    %76 = vector.load %arg4[%c3_83, %c0_84, %c0_85, %c0_86] : memref<7x1x32x1xf32, #tpu.memory_space<vmem>>, vector<1x1x32x1xf32>
    %77 = vector.shape_cast %76 : vector<1x1x32x1xf32> to vector<1x32x1xf32>
    %78 = vector.broadcast %77 : vector<1x32x1xf32> to vector<7x32x128xf32>
    %79 = arith.mulf %75, %78 : vector<7x32x128xf32>
    %80 = arith.addf %73, %79 : vector<7x32x128xf32>
    %c4_87 = arith.constant 4 : index
    %c0_88 = arith.constant 0 : index
    %c0_89 = arith.constant 0 : index
    %c0_90 = arith.constant 0 : index
    %81 = vector.load %arg1[%c4_87, %c0_88, %c0_89, %c0_90] : memref<7x7x32x128xf32, #tpu.memory_space<vmem>>, vector<1x7x32x128xf32>
    %82 = vector.shape_cast %81 : vector<1x7x32x128xf32> to vector<7x32x128xf32>
    %c4_91 = arith.constant 4 : index
    %c0_92 = arith.constant 0 : index
    %c0_93 = arith.constant 0 : index
    %c0_94 = arith.constant 0 : index
    %83 = vector.load %arg4[%c4_91, %c0_92, %c0_93, %c0_94] : memref<7x1x32x1xf32, #tpu.memory_space<vmem>>, vector<1x1x32x1xf32>
    %84 = vector.shape_cast %83 : vector<1x1x32x1xf32> to vector<1x32x1xf32>
    %85 = vector.broadcast %84 : vector<1x32x1xf32> to vector<7x32x128xf32>
    %86 = arith.mulf %82, %85 : vector<7x32x128xf32>
    %87 = arith.addf %80, %86 : vector<7x32x128xf32>
    %c5_95 = arith.constant 5 : index
    %c0_96 = arith.constant 0 : index
    %c0_97 = arith.constant 0 : index
    %c0_98 = arith.constant 0 : index
    %88 = vector.load %arg1[%c5_95, %c0_96, %c0_97, %c0_98] : memref<7x7x32x128xf32, #tpu.memory_space<vmem>>, vector<1x7x32x128xf32>
    %89 = vector.shape_cast %88 : vector<1x7x32x128xf32> to vector<7x32x128xf32>
    %c5_99 = arith.constant 5 : index
    %c0_100 = arith.constant 0 : index
    %c0_101 = arith.constant 0 : index
    %c0_102 = arith.constant 0 : index
    %90 = vector.load %arg4[%c5_99, %c0_100, %c0_101, %c0_102] : memref<7x1x32x1xf32, #tpu.memory_space<vmem>>, vector<1x1x32x1xf32>
    %91 = vector.shape_cast %90 : vector<1x1x32x1xf32> to vector<1x32x1xf32>
    %92 = vector.broadcast %91 : vector<1x32x1xf32> to vector<7x32x128xf32>
    %93 = arith.mulf %89, %92 : vector<7x32x128xf32>
    %94 = arith.addf %87, %93 : vector<7x32x128xf32>
    %c6_103 = arith.constant 6 : index
    %c0_104 = arith.constant 0 : index
    %c0_105 = arith.constant 0 : index
    %c0_106 = arith.constant 0 : index
    %95 = vector.load %arg1[%c6_103, %c0_104, %c0_105, %c0_106] : memref<7x7x32x128xf32, #tpu.memory_space<vmem>>, vector<1x7x32x128xf32>
    %96 = vector.shape_cast %95 : vector<1x7x32x128xf32> to vector<7x32x128xf32>
    %c6_107 = arith.constant 6 : index
    %c0_108 = arith.constant 0 : index
    %c0_109 = arith.constant 0 : index
    %c0_110 = arith.constant 0 : index
    %97 = vector.load %arg4[%c6_107, %c0_108, %c0_109, %c0_110] : memref<7x1x32x1xf32, #tpu.memory_space<vmem>>, vector<1x1x32x1xf32>
    %98 = vector.shape_cast %97 : vector<1x1x32x1xf32> to vector<1x32x1xf32>
    %99 = vector.broadcast %98 : vector<1x32x1xf32> to vector<7x32x128xf32>
    %100 = arith.mulf %96, %99 : vector<7x32x128xf32>
    %101 = arith.addf %94, %100 : vector<7x32x128xf32>
    %c0_111 = arith.constant 0 : index
    %c0_112 = arith.constant 0 : index
    %102 = vector.load %arg6[%c0_111, %c0_112] : memref<8x32xf32, #tpu.memory_space<vmem>>, vector<8x32xf32>
    %c0_113 = arith.constant 0 : index
    %c0_114 = arith.constant 0 : index
    %103 = vector.load %arg7[%c0_113, %c0_114] : memref<8x1xf32, #tpu.memory_space<vmem>>, vector<8x1xf32>
    %104 = vector.extract_strided_slice %50 {offsets = [0, 0, 0], sizes = [1, 32, 128], strides = [1, 1, 1]} : vector<7x32x128xf32> to vector<1x32x128xf32>
    %105 = vector.shape_cast %104 : vector<1x32x128xf32> to vector<32x128xf32>
    %cst = arith.constant dense<0.000000e+00> : vector<8x128xf32>
    %106 = tpu.matmul %102, %105, %cst {dimension_numbers = #tpu.dot_dimension_numbers<[1], [0], [0], [1], [0, 0, 1, 1], [], []>} : vector<8x32xf32>, vector<32x128xf32>, vector<8x128xf32> -> vector<8x128xf32>
    %107 = vector.broadcast %103 : vector<8x1xf32> to vector<8x128xf32>
    %108 = arith.addf %106, %107 : vector<8x128xf32>
    %cst_115 = arith.constant 3.000000e+00 : f32
    %109 = vector.broadcast %cst_115 : f32 to vector<8x128xf32>
    %110 = arith.addf %108, %109 : vector<8x128xf32>
    %cst_116 = arith.constant 0.000000e+00 : f32
    %cst_117 = arith.constant 6.000000e+00 : f32
    %111 = vector.broadcast %cst_116 : f32 to vector<8x128xf32>
    %112 = arith.maximumf %111, %110 : vector<8x128xf32>
    %113 = vector.broadcast %cst_117 : f32 to vector<8x128xf32>
    %114 = arith.minimumf %113, %112 : vector<8x128xf32>
    %cst_118 = arith.constant 0.166666672 : f32
    %115 = vector.broadcast %cst_118 : f32 to vector<8x128xf32>
    %116 = arith.mulf %114, %115 : vector<8x128xf32>
    %117 = arith.mulf %108, %116 : vector<8x128xf32>
    %c0_119 = arith.constant 0 : index
    %c0_120 = arith.constant 0 : index
    %118 = vector.load %arg8[%c0_119, %c0_120] : memref<32x8xf32, #tpu.memory_space<vmem>>, vector<32x8xf32>
    %cst_121 = arith.constant dense<0.000000e+00> : vector<32x128xf32>
    %119 = tpu.matmul %118, %117, %cst_121 {dimension_numbers = #tpu.dot_dimension_numbers<[1], [0], [0], [1], [0, 0, 1, 1], [], []>} : vector<32x8xf32>, vector<8x128xf32>, vector<32x128xf32> -> vector<32x128xf32>
    %c0_122 = arith.constant 0 : index
    %c0_123 = arith.constant 0 : index
    %120 = vector.load %arg9[%c0_122, %c0_123] : memref<32x1xf32, #tpu.memory_space<vmem>>, vector<32x1xf32>
    %121 = vector.broadcast %120 : vector<32x1xf32> to vector<32x128xf32>
    %122 = arith.addf %119, %121 : vector<32x128xf32>
    %cst_124 = arith.constant 0.000000e+00 : f32
    %123 = vector.broadcast %cst_124 : f32 to vector<32x128xf32>
    %124 = arith.subf %123, %122 : vector<32x128xf32>
    %125 = math.exp %124 : vector<32x128xf32>
    %cst_125 = arith.constant 1.000000e+00 : f32
    %126 = vector.broadcast %cst_125 : f32 to vector<32x128xf32>
    %127 = arith.addf %126, %125 : vector<32x128xf32>
    %cst_126 = arith.constant 1.000000e+00 : f32
    %128 = vector.broadcast %cst_126 : f32 to vector<32x128xf32>
    %129 = arith.divf %128, %127 : vector<32x128xf32>
    %130 = vector.extract_strided_slice %50 {offsets = [1, 0, 0], sizes = [1, 32, 128], strides = [1, 1, 1]} : vector<7x32x128xf32> to vector<1x32x128xf32>
    %131 = vector.shape_cast %130 : vector<1x32x128xf32> to vector<32x128xf32>
    %cst_127 = arith.constant dense<0.000000e+00> : vector<8x128xf32>
    %132 = tpu.matmul %102, %131, %cst_127 {dimension_numbers = #tpu.dot_dimension_numbers<[1], [0], [0], [1], [0, 0, 1, 1], [], []>} : vector<8x32xf32>, vector<32x128xf32>, vector<8x128xf32> -> vector<8x128xf32>
    %133 = vector.broadcast %103 : vector<8x1xf32> to vector<8x128xf32>
    %134 = arith.addf %132, %133 : vector<8x128xf32>
    %cst_128 = arith.constant 3.000000e+00 : f32
    %135 = vector.broadcast %cst_128 : f32 to vector<8x128xf32>
    %136 = arith.addf %134, %135 : vector<8x128xf32>
    %cst_129 = arith.constant 0.000000e+00 : f32
    %cst_130 = arith.constant 6.000000e+00 : f32
    %137 = vector.broadcast %cst_129 : f32 to vector<8x128xf32>
    %138 = arith.maximumf %137, %136 : vector<8x128xf32>
    %139 = vector.broadcast %cst_130 : f32 to vector<8x128xf32>
    %140 = arith.minimumf %139, %138 : vector<8x128xf32>
    %cst_131 = arith.constant 0.166666672 : f32
    %141 = vector.broadcast %cst_131 : f32 to vector<8x128xf32>
    %142 = arith.mulf %140, %141 : vector<8x128xf32>
    %143 = arith.mulf %134, %142 : vector<8x128xf32>
    %c0_132 = arith.constant 0 : index
    %c0_133 = arith.constant 0 : index
    %144 = vector.load %arg8[%c0_132, %c0_133] : memref<32x8xf32, #tpu.memory_space<vmem>>, vector<32x8xf32>
    %cst_134 = arith.constant dense<0.000000e+00> : vector<32x128xf32>
    %145 = tpu.matmul %144, %143, %cst_134 {dimension_numbers = #tpu.dot_dimension_numbers<[1], [0], [0], [1], [0, 0, 1, 1], [], []>} : vector<32x8xf32>, vector<8x128xf32>, vector<32x128xf32> -> vector<32x128xf32>
    %c0_135 = arith.constant 0 : index
    %c0_136 = arith.constant 0 : index
    %146 = vector.load %arg9[%c0_135, %c0_136] : memref<32x1xf32, #tpu.memory_space<vmem>>, vector<32x1xf32>
    %147 = vector.broadcast %146 : vector<32x1xf32> to vector<32x128xf32>
    %148 = arith.addf %145, %147 : vector<32x128xf32>
    %cst_137 = arith.constant 0.000000e+00 : f32
    %149 = vector.broadcast %cst_137 : f32 to vector<32x128xf32>
    %150 = arith.subf %149, %148 : vector<32x128xf32>
    %151 = math.exp %150 : vector<32x128xf32>
    %cst_138 = arith.constant 1.000000e+00 : f32
    %152 = vector.broadcast %cst_138 : f32 to vector<32x128xf32>
    %153 = arith.addf %152, %151 : vector<32x128xf32>
    %cst_139 = arith.constant 1.000000e+00 : f32
    %154 = vector.broadcast %cst_139 : f32 to vector<32x128xf32>
    %155 = arith.divf %154, %153 : vector<32x128xf32>
    %156 = vector.extract_strided_slice %50 {offsets = [2, 0, 0], sizes = [1, 32, 128], strides = [1, 1, 1]} : vector<7x32x128xf32> to vector<1x32x128xf32>
    %157 = vector.shape_cast %156 : vector<1x32x128xf32> to vector<32x128xf32>
    %cst_140 = arith.constant dense<0.000000e+00> : vector<8x128xf32>
    %158 = tpu.matmul %102, %157, %cst_140 {dimension_numbers = #tpu.dot_dimension_numbers<[1], [0], [0], [1], [0, 0, 1, 1], [], []>} : vector<8x32xf32>, vector<32x128xf32>, vector<8x128xf32> -> vector<8x128xf32>
    %159 = vector.broadcast %103 : vector<8x1xf32> to vector<8x128xf32>
    %160 = arith.addf %158, %159 : vector<8x128xf32>
    %cst_141 = arith.constant 3.000000e+00 : f32
    %161 = vector.broadcast %cst_141 : f32 to vector<8x128xf32>
    %162 = arith.addf %160, %161 : vector<8x128xf32>
    %cst_142 = arith.constant 0.000000e+00 : f32
    %cst_143 = arith.constant 6.000000e+00 : f32
    %163 = vector.broadcast %cst_142 : f32 to vector<8x128xf32>
    %164 = arith.maximumf %163, %162 : vector<8x128xf32>
    %165 = vector.broadcast %cst_143 : f32 to vector<8x128xf32>
    %166 = arith.minimumf %165, %164 : vector<8x128xf32>
    %cst_144 = arith.constant 0.166666672 : f32
    %167 = vector.broadcast %cst_144 : f32 to vector<8x128xf32>
    %168 = arith.mulf %166, %167 : vector<8x128xf32>
    %169 = arith.mulf %160, %168 : vector<8x128xf32>
    %c0_145 = arith.constant 0 : index
    %c0_146 = arith.constant 0 : index
    %170 = vector.load %arg8[%c0_145, %c0_146] : memref<32x8xf32, #tpu.memory_space<vmem>>, vector<32x8xf32>
    %cst_147 = arith.constant dense<0.000000e+00> : vector<32x128xf32>
    %171 = tpu.matmul %170, %169, %cst_147 {dimension_numbers = #tpu.dot_dimension_numbers<[1], [0], [0], [1], [0, 0, 1, 1], [], []>} : vector<32x8xf32>, vector<8x128xf32>, vector<32x128xf32> -> vector<32x128xf32>
    %c0_148 = arith.constant 0 : index
    %c0_149 = arith.constant 0 : index
    %172 = vector.load %arg9[%c0_148, %c0_149] : memref<32x1xf32, #tpu.memory_space<vmem>>, vector<32x1xf32>
    %173 = vector.broadcast %172 : vector<32x1xf32> to vector<32x128xf32>
    %174 = arith.addf %171, %173 : vector<32x128xf32>
    %cst_150 = arith.constant 0.000000e+00 : f32
    %175 = vector.broadcast %cst_150 : f32 to vector<32x128xf32>
    %176 = arith.subf %175, %174 : vector<32x128xf32>
    %177 = math.exp %176 : vector<32x128xf32>
    %cst_151 = arith.constant 1.000000e+00 : f32
    %178 = vector.broadcast %cst_151 : f32 to vector<32x128xf32>
    %179 = arith.addf %178, %177 : vector<32x128xf32>
    %cst_152 = arith.constant 1.000000e+00 : f32
    %180 = vector.broadcast %cst_152 : f32 to vector<32x128xf32>
    %181 = arith.divf %180, %179 : vector<32x128xf32>
    %182 = vector.extract_strided_slice %50 {offsets = [3, 0, 0], sizes = [1, 32, 128], strides = [1, 1, 1]} : vector<7x32x128xf32> to vector<1x32x128xf32>
    %183 = vector.shape_cast %182 : vector<1x32x128xf32> to vector<32x128xf32>
    %cst_153 = arith.constant dense<0.000000e+00> : vector<8x128xf32>
    %184 = tpu.matmul %102, %183, %cst_153 {dimension_numbers = #tpu.dot_dimension_numbers<[1], [0], [0], [1], [0, 0, 1, 1], [], []>} : vector<8x32xf32>, vector<32x128xf32>, vector<8x128xf32> -> vector<8x128xf32>
    %185 = vector.broadcast %103 : vector<8x1xf32> to vector<8x128xf32>
    %186 = arith.addf %184, %185 : vector<8x128xf32>
    %cst_154 = arith.constant 3.000000e+00 : f32
    %187 = vector.broadcast %cst_154 : f32 to vector<8x128xf32>
    %188 = arith.addf %186, %187 : vector<8x128xf32>
    %cst_155 = arith.constant 0.000000e+00 : f32
    %cst_156 = arith.constant 6.000000e+00 : f32
    %189 = vector.broadcast %cst_155 : f32 to vector<8x128xf32>
    %190 = arith.maximumf %189, %188 : vector<8x128xf32>
    %191 = vector.broadcast %cst_156 : f32 to vector<8x128xf32>
    %192 = arith.minimumf %191, %190 : vector<8x128xf32>
    %cst_157 = arith.constant 0.166666672 : f32
    %193 = vector.broadcast %cst_157 : f32 to vector<8x128xf32>
    %194 = arith.mulf %192, %193 : vector<8x128xf32>
    %195 = arith.mulf %186, %194 : vector<8x128xf32>
    %c0_158 = arith.constant 0 : index
    %c0_159 = arith.constant 0 : index
    %196 = vector.load %arg8[%c0_158, %c0_159] : memref<32x8xf32, #tpu.memory_space<vmem>>, vector<32x8xf32>
    %cst_160 = arith.constant dense<0.000000e+00> : vector<32x128xf32>
    %197 = tpu.matmul %196, %195, %cst_160 {dimension_numbers = #tpu.dot_dimension_numbers<[1], [0], [0], [1], [0, 0, 1, 1], [], []>} : vector<32x8xf32>, vector<8x128xf32>, vector<32x128xf32> -> vector<32x128xf32>
    %c0_161 = arith.constant 0 : index
    %c0_162 = arith.constant 0 : index
    %198 = vector.load %arg9[%c0_161, %c0_162] : memref<32x1xf32, #tpu.memory_space<vmem>>, vector<32x1xf32>
    %199 = vector.broadcast %198 : vector<32x1xf32> to vector<32x128xf32>
    %200 = arith.addf %197, %199 : vector<32x128xf32>
    %cst_163 = arith.constant 0.000000e+00 : f32
    %201 = vector.broadcast %cst_163 : f32 to vector<32x128xf32>
    %202 = arith.subf %201, %200 : vector<32x128xf32>
    %203 = math.exp %202 : vector<32x128xf32>
    %cst_164 = arith.constant 1.000000e+00 : f32
    %204 = vector.broadcast %cst_164 : f32 to vector<32x128xf32>
    %205 = arith.addf %204, %203 : vector<32x128xf32>
    %cst_165 = arith.constant 1.000000e+00 : f32
    %206 = vector.broadcast %cst_165 : f32 to vector<32x128xf32>
    %207 = arith.divf %206, %205 : vector<32x128xf32>
    %208 = vector.extract_strided_slice %50 {offsets = [4, 0, 0], sizes = [1, 32, 128], strides = [1, 1, 1]} : vector<7x32x128xf32> to vector<1x32x128xf32>
    %209 = vector.shape_cast %208 : vector<1x32x128xf32> to vector<32x128xf32>
    %cst_166 = arith.constant dense<0.000000e+00> : vector<8x128xf32>
    %210 = tpu.matmul %102, %209, %cst_166 {dimension_numbers = #tpu.dot_dimension_numbers<[1], [0], [0], [1], [0, 0, 1, 1], [], []>} : vector<8x32xf32>, vector<32x128xf32>, vector<8x128xf32> -> vector<8x128xf32>
    %211 = vector.broadcast %103 : vector<8x1xf32> to vector<8x128xf32>
    %212 = arith.addf %210, %211 : vector<8x128xf32>
    %cst_167 = arith.constant 3.000000e+00 : f32
    %213 = vector.broadcast %cst_167 : f32 to vector<8x128xf32>
    %214 = arith.addf %212, %213 : vector<8x128xf32>
    %cst_168 = arith.constant 0.000000e+00 : f32
    %cst_169 = arith.constant 6.000000e+00 : f32
    %215 = vector.broadcast %cst_168 : f32 to vector<8x128xf32>
    %216 = arith.maximumf %215, %214 : vector<8x128xf32>
    %217 = vector.broadcast %cst_169 : f32 to vector<8x128xf32>
    %218 = arith.minimumf %217, %216 : vector<8x128xf32>
    %cst_170 = arith.constant 0.166666672 : f32
    %219 = vector.broadcast %cst_170 : f32 to vector<8x128xf32>
    %220 = arith.mulf %218, %219 : vector<8x128xf32>
    %221 = arith.mulf %212, %220 : vector<8x128xf32>
    %c0_171 = arith.constant 0 : index
    %c0_172 = arith.constant 0 : index
    %222 = vector.load %arg8[%c0_171, %c0_172] : memref<32x8xf32, #tpu.memory_space<vmem>>, vector<32x8xf32>
    %cst_173 = arith.constant dense<0.000000e+00> : vector<32x128xf32>
    %223 = tpu.matmul %222, %221, %cst_173 {dimension_numbers = #tpu.dot_dimension_numbers<[1], [0], [0], [1], [0, 0, 1, 1], [], []>} : vector<32x8xf32>, vector<8x128xf32>, vector<32x128xf32> -> vector<32x128xf32>
    %c0_174 = arith.constant 0 : index
    %c0_175 = arith.constant 0 : index
    %224 = vector.load %arg9[%c0_174, %c0_175] : memref<32x1xf32, #tpu.memory_space<vmem>>, vector<32x1xf32>
    %225 = vector.broadcast %224 : vector<32x1xf32> to vector<32x128xf32>
    %226 = arith.addf %223, %225 : vector<32x128xf32>
    %cst_176 = arith.constant 0.000000e+00 : f32
    %227 = vector.broadcast %cst_176 : f32 to vector<32x128xf32>
    %228 = arith.subf %227, %226 : vector<32x128xf32>
    %229 = math.exp %228 : vector<32x128xf32>
    %cst_177 = arith.constant 1.000000e+00 : f32
    %230 = vector.broadcast %cst_177 : f32 to vector<32x128xf32>
    %231 = arith.addf %230, %229 : vector<32x128xf32>
    %cst_178 = arith.constant 1.000000e+00 : f32
    %232 = vector.broadcast %cst_178 : f32 to vector<32x128xf32>
    %233 = arith.divf %232, %231 : vector<32x128xf32>
    %234 = vector.extract_strided_slice %50 {offsets = [5, 0, 0], sizes = [1, 32, 128], strides = [1, 1, 1]} : vector<7x32x128xf32> to vector<1x32x128xf32>
    %235 = vector.shape_cast %234 : vector<1x32x128xf32> to vector<32x128xf32>
    %cst_179 = arith.constant dense<0.000000e+00> : vector<8x128xf32>
    %236 = tpu.matmul %102, %235, %cst_179 {dimension_numbers = #tpu.dot_dimension_numbers<[1], [0], [0], [1], [0, 0, 1, 1], [], []>} : vector<8x32xf32>, vector<32x128xf32>, vector<8x128xf32> -> vector<8x128xf32>
    %237 = vector.broadcast %103 : vector<8x1xf32> to vector<8x128xf32>
    %238 = arith.addf %236, %237 : vector<8x128xf32>
    %cst_180 = arith.constant 3.000000e+00 : f32
    %239 = vector.broadcast %cst_180 : f32 to vector<8x128xf32>
    %240 = arith.addf %238, %239 : vector<8x128xf32>
    %cst_181 = arith.constant 0.000000e+00 : f32
    %cst_182 = arith.constant 6.000000e+00 : f32
    %241 = vector.broadcast %cst_181 : f32 to vector<8x128xf32>
    %242 = arith.maximumf %241, %240 : vector<8x128xf32>
    %243 = vector.broadcast %cst_182 : f32 to vector<8x128xf32>
    %244 = arith.minimumf %243, %242 : vector<8x128xf32>
    %cst_183 = arith.constant 0.166666672 : f32
    %245 = vector.broadcast %cst_183 : f32 to vector<8x128xf32>
    %246 = arith.mulf %244, %245 : vector<8x128xf32>
    %247 = arith.mulf %238, %246 : vector<8x128xf32>
    %c0_184 = arith.constant 0 : index
    %c0_185 = arith.constant 0 : index
    %248 = vector.load %arg8[%c0_184, %c0_185] : memref<32x8xf32, #tpu.memory_space<vmem>>, vector<32x8xf32>
    %cst_186 = arith.constant dense<0.000000e+00> : vector<32x128xf32>
    %249 = tpu.matmul %248, %247, %cst_186 {dimension_numbers = #tpu.dot_dimension_numbers<[1], [0], [0], [1], [0, 0, 1, 1], [], []>} : vector<32x8xf32>, vector<8x128xf32>, vector<32x128xf32> -> vector<32x128xf32>
    %c0_187 = arith.constant 0 : index
    %c0_188 = arith.constant 0 : index
    %250 = vector.load %arg9[%c0_187, %c0_188] : memref<32x1xf32, #tpu.memory_space<vmem>>, vector<32x1xf32>
    %251 = vector.broadcast %250 : vector<32x1xf32> to vector<32x128xf32>
    %252 = arith.addf %249, %251 : vector<32x128xf32>
    %cst_189 = arith.constant 0.000000e+00 : f32
    %253 = vector.broadcast %cst_189 : f32 to vector<32x128xf32>
    %254 = arith.subf %253, %252 : vector<32x128xf32>
    %255 = math.exp %254 : vector<32x128xf32>
    %cst_190 = arith.constant 1.000000e+00 : f32
    %256 = vector.broadcast %cst_190 : f32 to vector<32x128xf32>
    %257 = arith.addf %256, %255 : vector<32x128xf32>
    %cst_191 = arith.constant 1.000000e+00 : f32
    %258 = vector.broadcast %cst_191 : f32 to vector<32x128xf32>
    %259 = arith.divf %258, %257 : vector<32x128xf32>
    %260 = vector.extract_strided_slice %50 {offsets = [6, 0, 0], sizes = [1, 32, 128], strides = [1, 1, 1]} : vector<7x32x128xf32> to vector<1x32x128xf32>
    %261 = vector.shape_cast %260 : vector<1x32x128xf32> to vector<32x128xf32>
    %cst_192 = arith.constant dense<0.000000e+00> : vector<8x128xf32>
    %262 = tpu.matmul %102, %261, %cst_192 {dimension_numbers = #tpu.dot_dimension_numbers<[1], [0], [0], [1], [0, 0, 1, 1], [], []>} : vector<8x32xf32>, vector<32x128xf32>, vector<8x128xf32> -> vector<8x128xf32>
    %263 = vector.broadcast %103 : vector<8x1xf32> to vector<8x128xf32>
    %264 = arith.addf %262, %263 : vector<8x128xf32>
    %cst_193 = arith.constant 3.000000e+00 : f32
    %265 = vector.broadcast %cst_193 : f32 to vector<8x128xf32>
    %266 = arith.addf %264, %265 : vector<8x128xf32>
    %cst_194 = arith.constant 0.000000e+00 : f32
    %cst_195 = arith.constant 6.000000e+00 : f32
    %267 = vector.broadcast %cst_194 : f32 to vector<8x128xf32>
    %268 = arith.maximumf %267, %266 : vector<8x128xf32>
    %269 = vector.broadcast %cst_195 : f32 to vector<8x128xf32>
    %270 = arith.minimumf %269, %268 : vector<8x128xf32>
    %cst_196 = arith.constant 0.166666672 : f32
    %271 = vector.broadcast %cst_196 : f32 to vector<8x128xf32>
    %272 = arith.mulf %270, %271 : vector<8x128xf32>
    %273 = arith.mulf %264, %272 : vector<8x128xf32>
    %c0_197 = arith.constant 0 : index
    %c0_198 = arith.constant 0 : index
    %274 = vector.load %arg8[%c0_197, %c0_198] : memref<32x8xf32, #tpu.memory_space<vmem>>, vector<32x8xf32>
    %cst_199 = arith.constant dense<0.000000e+00> : vector<32x128xf32>
    %275 = tpu.matmul %274, %273, %cst_199 {dimension_numbers = #tpu.dot_dimension_numbers<[1], [0], [0], [1], [0, 0, 1, 1], [], []>} : vector<32x8xf32>, vector<8x128xf32>, vector<32x128xf32> -> vector<32x128xf32>
    %c0_200 = arith.constant 0 : index
    %c0_201 = arith.constant 0 : index
    %276 = vector.load %arg9[%c0_200, %c0_201] : memref<32x1xf32, #tpu.memory_space<vmem>>, vector<32x1xf32>
    %277 = vector.broadcast %276 : vector<32x1xf32> to vector<32x128xf32>
    %278 = arith.addf %275, %277 : vector<32x128xf32>
    %cst_202 = arith.constant 0.000000e+00 : f32
    %279 = vector.broadcast %cst_202 : f32 to vector<32x128xf32>
    %280 = arith.subf %279, %278 : vector<32x128xf32>
    %281 = math.exp %280 : vector<32x128xf32>
    %cst_203 = arith.constant 1.000000e+00 : f32
    %282 = vector.broadcast %cst_203 : f32 to vector<32x128xf32>
    %283 = arith.addf %282, %281 : vector<32x128xf32>
    %cst_204 = arith.constant 1.000000e+00 : f32
    %284 = vector.broadcast %cst_204 : f32 to vector<32x128xf32>
    %285 = arith.divf %284, %283 : vector<32x128xf32>
    %286 = vector.extract_strided_slice %101 {offsets = [0, 0, 0], sizes = [1, 32, 128], strides = [1, 1, 1]} : vector<7x32x128xf32> to vector<1x32x128xf32>
    %287 = vector.shape_cast %286 : vector<1x32x128xf32> to vector<32x128xf32>
    %cst_205 = arith.constant dense<0.000000e+00> : vector<8x128xf32>
    %288 = tpu.matmul %102, %287, %cst_205 {dimension_numbers = #tpu.dot_dimension_numbers<[1], [0], [0], [1], [0, 0, 1, 1], [], []>} : vector<8x32xf32>, vector<32x128xf32>, vector<8x128xf32> -> vector<8x128xf32>
    %289 = vector.broadcast %103 : vector<8x1xf32> to vector<8x128xf32>
    %290 = arith.addf %288, %289 : vector<8x128xf32>
    %cst_206 = arith.constant 3.000000e+00 : f32
    %291 = vector.broadcast %cst_206 : f32 to vector<8x128xf32>
    %292 = arith.addf %290, %291 : vector<8x128xf32>
    %cst_207 = arith.constant 0.000000e+00 : f32
    %cst_208 = arith.constant 6.000000e+00 : f32
    %293 = vector.broadcast %cst_207 : f32 to vector<8x128xf32>
    %294 = arith.maximumf %293, %292 : vector<8x128xf32>
    %295 = vector.broadcast %cst_208 : f32 to vector<8x128xf32>
    %296 = arith.minimumf %295, %294 : vector<8x128xf32>
    %cst_209 = arith.constant 0.166666672 : f32
    %297 = vector.broadcast %cst_209 : f32 to vector<8x128xf32>
    %298 = arith.mulf %296, %297 : vector<8x128xf32>
    %299 = arith.mulf %290, %298 : vector<8x128xf32>
    %c0_210 = arith.constant 0 : index
    %c0_211 = arith.constant 0 : index
    %300 = vector.load %arg10[%c0_210, %c0_211] : memref<32x8xf32, #tpu.memory_space<vmem>>, vector<32x8xf32>
    %cst_212 = arith.constant dense<0.000000e+00> : vector<32x128xf32>
    %301 = tpu.matmul %300, %299, %cst_212 {dimension_numbers = #tpu.dot_dimension_numbers<[1], [0], [0], [1], [0, 0, 1, 1], [], []>} : vector<32x8xf32>, vector<8x128xf32>, vector<32x128xf32> -> vector<32x128xf32>
    %c0_213 = arith.constant 0 : index
    %c0_214 = arith.constant 0 : index
    %302 = vector.load %arg11[%c0_213, %c0_214] : memref<32x1xf32, #tpu.memory_space<vmem>>, vector<32x1xf32>
    %303 = vector.broadcast %302 : vector<32x1xf32> to vector<32x128xf32>
    %304 = arith.addf %301, %303 : vector<32x128xf32>
    %cst_215 = arith.constant 0.000000e+00 : f32
    %305 = vector.broadcast %cst_215 : f32 to vector<32x128xf32>
    %306 = arith.subf %305, %304 : vector<32x128xf32>
    %307 = math.exp %306 : vector<32x128xf32>
    %cst_216 = arith.constant 1.000000e+00 : f32
    %308 = vector.broadcast %cst_216 : f32 to vector<32x128xf32>
    %309 = arith.addf %308, %307 : vector<32x128xf32>
    %cst_217 = arith.constant 1.000000e+00 : f32
    %310 = vector.broadcast %cst_217 : f32 to vector<32x128xf32>
    %311 = arith.divf %310, %309 : vector<32x128xf32>
    %312 = vector.extract_strided_slice %101 {offsets = [1, 0, 0], sizes = [1, 32, 128], strides = [1, 1, 1]} : vector<7x32x128xf32> to vector<1x32x128xf32>
    %313 = vector.shape_cast %312 : vector<1x32x128xf32> to vector<32x128xf32>
    %cst_218 = arith.constant dense<0.000000e+00> : vector<8x128xf32>
    %314 = tpu.matmul %102, %313, %cst_218 {dimension_numbers = #tpu.dot_dimension_numbers<[1], [0], [0], [1], [0, 0, 1, 1], [], []>} : vector<8x32xf32>, vector<32x128xf32>, vector<8x128xf32> -> vector<8x128xf32>
    %315 = vector.broadcast %103 : vector<8x1xf32> to vector<8x128xf32>
    %316 = arith.addf %314, %315 : vector<8x128xf32>
    %cst_219 = arith.constant 3.000000e+00 : f32
    %317 = vector.broadcast %cst_219 : f32 to vector<8x128xf32>
    %318 = arith.addf %316, %317 : vector<8x128xf32>
    %cst_220 = arith.constant 0.000000e+00 : f32
    %cst_221 = arith.constant 6.000000e+00 : f32
    %319 = vector.broadcast %cst_220 : f32 to vector<8x128xf32>
    %320 = arith.maximumf %319, %318 : vector<8x128xf32>
    %321 = vector.broadcast %cst_221 : f32 to vector<8x128xf32>
    %322 = arith.minimumf %321, %320 : vector<8x128xf32>
    %cst_222 = arith.constant 0.166666672 : f32
    %323 = vector.broadcast %cst_222 : f32 to vector<8x128xf32>
    %324 = arith.mulf %322, %323 : vector<8x128xf32>
    %325 = arith.mulf %316, %324 : vector<8x128xf32>
    %c0_223 = arith.constant 0 : index
    %c0_224 = arith.constant 0 : index
    %326 = vector.load %arg10[%c0_223, %c0_224] : memref<32x8xf32, #tpu.memory_space<vmem>>, vector<32x8xf32>
    %cst_225 = arith.constant dense<0.000000e+00> : vector<32x128xf32>
    %327 = tpu.matmul %326, %325, %cst_225 {dimension_numbers = #tpu.dot_dimension_numbers<[1], [0], [0], [1], [0, 0, 1, 1], [], []>} : vector<32x8xf32>, vector<8x128xf32>, vector<32x128xf32> -> vector<32x128xf32>
    %c0_226 = arith.constant 0 : index
    %c0_227 = arith.constant 0 : index
    %328 = vector.load %arg11[%c0_226, %c0_227] : memref<32x1xf32, #tpu.memory_space<vmem>>, vector<32x1xf32>
    %329 = vector.broadcast %328 : vector<32x1xf32> to vector<32x128xf32>
    %330 = arith.addf %327, %329 : vector<32x128xf32>
    %cst_228 = arith.constant 0.000000e+00 : f32
    %331 = vector.broadcast %cst_228 : f32 to vector<32x128xf32>
    %332 = arith.subf %331, %330 : vector<32x128xf32>
    %333 = math.exp %332 : vector<32x128xf32>
    %cst_229 = arith.constant 1.000000e+00 : f32
    %334 = vector.broadcast %cst_229 : f32 to vector<32x128xf32>
    %335 = arith.addf %334, %333 : vector<32x128xf32>
    %cst_230 = arith.constant 1.000000e+00 : f32
    %336 = vector.broadcast %cst_230 : f32 to vector<32x128xf32>
    %337 = arith.divf %336, %335 : vector<32x128xf32>
    %338 = vector.extract_strided_slice %101 {offsets = [2, 0, 0], sizes = [1, 32, 128], strides = [1, 1, 1]} : vector<7x32x128xf32> to vector<1x32x128xf32>
    %339 = vector.shape_cast %338 : vector<1x32x128xf32> to vector<32x128xf32>
    %cst_231 = arith.constant dense<0.000000e+00> : vector<8x128xf32>
    %340 = tpu.matmul %102, %339, %cst_231 {dimension_numbers = #tpu.dot_dimension_numbers<[1], [0], [0], [1], [0, 0, 1, 1], [], []>} : vector<8x32xf32>, vector<32x128xf32>, vector<8x128xf32> -> vector<8x128xf32>
    %341 = vector.broadcast %103 : vector<8x1xf32> to vector<8x128xf32>
    %342 = arith.addf %340, %341 : vector<8x128xf32>
    %cst_232 = arith.constant 3.000000e+00 : f32
    %343 = vector.broadcast %cst_232 : f32 to vector<8x128xf32>
    %344 = arith.addf %342, %343 : vector<8x128xf32>
    %cst_233 = arith.constant 0.000000e+00 : f32
    %cst_234 = arith.constant 6.000000e+00 : f32
    %345 = vector.broadcast %cst_233 : f32 to vector<8x128xf32>
    %346 = arith.maximumf %345, %344 : vector<8x128xf32>
    %347 = vector.broadcast %cst_234 : f32 to vector<8x128xf32>
    %348 = arith.minimumf %347, %346 : vector<8x128xf32>
    %cst_235 = arith.constant 0.166666672 : f32
    %349 = vector.broadcast %cst_235 : f32 to vector<8x128xf32>
    %350 = arith.mulf %348, %349 : vector<8x128xf32>
    %351 = arith.mulf %342, %350 : vector<8x128xf32>
    %c0_236 = arith.constant 0 : index
    %c0_237 = arith.constant 0 : index
    %352 = vector.load %arg10[%c0_236, %c0_237] : memref<32x8xf32, #tpu.memory_space<vmem>>, vector<32x8xf32>
    %cst_238 = arith.constant dense<0.000000e+00> : vector<32x128xf32>
    %353 = tpu.matmul %352, %351, %cst_238 {dimension_numbers = #tpu.dot_dimension_numbers<[1], [0], [0], [1], [0, 0, 1, 1], [], []>} : vector<32x8xf32>, vector<8x128xf32>, vector<32x128xf32> -> vector<32x128xf32>
    %c0_239 = arith.constant 0 : index
    %c0_240 = arith.constant 0 : index
    %354 = vector.load %arg11[%c0_239, %c0_240] : memref<32x1xf32, #tpu.memory_space<vmem>>, vector<32x1xf32>
    %355 = vector.broadcast %354 : vector<32x1xf32> to vector<32x128xf32>
    %356 = arith.addf %353, %355 : vector<32x128xf32>
    %cst_241 = arith.constant 0.000000e+00 : f32
    %357 = vector.broadcast %cst_241 : f32 to vector<32x128xf32>
    %358 = arith.subf %357, %356 : vector<32x128xf32>
    %359 = math.exp %358 : vector<32x128xf32>
    %cst_242 = arith.constant 1.000000e+00 : f32
    %360 = vector.broadcast %cst_242 : f32 to vector<32x128xf32>
    %361 = arith.addf %360, %359 : vector<32x128xf32>
    %cst_243 = arith.constant 1.000000e+00 : f32
    %362 = vector.broadcast %cst_243 : f32 to vector<32x128xf32>
    %363 = arith.divf %362, %361 : vector<32x128xf32>
    %364 = vector.extract_strided_slice %101 {offsets = [3, 0, 0], sizes = [1, 32, 128], strides = [1, 1, 1]} : vector<7x32x128xf32> to vector<1x32x128xf32>
    %365 = vector.shape_cast %364 : vector<1x32x128xf32> to vector<32x128xf32>
    %cst_244 = arith.constant dense<0.000000e+00> : vector<8x128xf32>
    %366 = tpu.matmul %102, %365, %cst_244 {dimension_numbers = #tpu.dot_dimension_numbers<[1], [0], [0], [1], [0, 0, 1, 1], [], []>} : vector<8x32xf32>, vector<32x128xf32>, vector<8x128xf32> -> vector<8x128xf32>
    %367 = vector.broadcast %103 : vector<8x1xf32> to vector<8x128xf32>
    %368 = arith.addf %366, %367 : vector<8x128xf32>
    %cst_245 = arith.constant 3.000000e+00 : f32
    %369 = vector.broadcast %cst_245 : f32 to vector<8x128xf32>
    %370 = arith.addf %368, %369 : vector<8x128xf32>
    %cst_246 = arith.constant 0.000000e+00 : f32
    %cst_247 = arith.constant 6.000000e+00 : f32
    %371 = vector.broadcast %cst_246 : f32 to vector<8x128xf32>
    %372 = arith.maximumf %371, %370 : vector<8x128xf32>
    %373 = vector.broadcast %cst_247 : f32 to vector<8x128xf32>
    %374 = arith.minimumf %373, %372 : vector<8x128xf32>
    %cst_248 = arith.constant 0.166666672 : f32
    %375 = vector.broadcast %cst_248 : f32 to vector<8x128xf32>
    %376 = arith.mulf %374, %375 : vector<8x128xf32>
    %377 = arith.mulf %368, %376 : vector<8x128xf32>
    %c0_249 = arith.constant 0 : index
    %c0_250 = arith.constant 0 : index
    %378 = vector.load %arg10[%c0_249, %c0_250] : memref<32x8xf32, #tpu.memory_space<vmem>>, vector<32x8xf32>
    %cst_251 = arith.constant dense<0.000000e+00> : vector<32x128xf32>
    %379 = tpu.matmul %378, %377, %cst_251 {dimension_numbers = #tpu.dot_dimension_numbers<[1], [0], [0], [1], [0, 0, 1, 1], [], []>} : vector<32x8xf32>, vector<8x128xf32>, vector<32x128xf32> -> vector<32x128xf32>
    %c0_252 = arith.constant 0 : index
    %c0_253 = arith.constant 0 : index
    %380 = vector.load %arg11[%c0_252, %c0_253] : memref<32x1xf32, #tpu.memory_space<vmem>>, vector<32x1xf32>
    %381 = vector.broadcast %380 : vector<32x1xf32> to vector<32x128xf32>
    %382 = arith.addf %379, %381 : vector<32x128xf32>
    %cst_254 = arith.constant 0.000000e+00 : f32
    %383 = vector.broadcast %cst_254 : f32 to vector<32x128xf32>
    %384 = arith.subf %383, %382 : vector<32x128xf32>
    %385 = math.exp %384 : vector<32x128xf32>
    %cst_255 = arith.constant 1.000000e+00 : f32
    %386 = vector.broadcast %cst_255 : f32 to vector<32x128xf32>
    %387 = arith.addf %386, %385 : vector<32x128xf32>
    %cst_256 = arith.constant 1.000000e+00 : f32
    %388 = vector.broadcast %cst_256 : f32 to vector<32x128xf32>
    %389 = arith.divf %388, %387 : vector<32x128xf32>
    %390 = vector.extract_strided_slice %101 {offsets = [4, 0, 0], sizes = [1, 32, 128], strides = [1, 1, 1]} : vector<7x32x128xf32> to vector<1x32x128xf32>
    %391 = vector.shape_cast %390 : vector<1x32x128xf32> to vector<32x128xf32>
    %cst_257 = arith.constant dense<0.000000e+00> : vector<8x128xf32>
    %392 = tpu.matmul %102, %391, %cst_257 {dimension_numbers = #tpu.dot_dimension_numbers<[1], [0], [0], [1], [0, 0, 1, 1], [], []>} : vector<8x32xf32>, vector<32x128xf32>, vector<8x128xf32> -> vector<8x128xf32>
    %393 = vector.broadcast %103 : vector<8x1xf32> to vector<8x128xf32>
    %394 = arith.addf %392, %393 : vector<8x128xf32>
    %cst_258 = arith.constant 3.000000e+00 : f32
    %395 = vector.broadcast %cst_258 : f32 to vector<8x128xf32>
    %396 = arith.addf %394, %395 : vector<8x128xf32>
    %cst_259 = arith.constant 0.000000e+00 : f32
    %cst_260 = arith.constant 6.000000e+00 : f32
    %397 = vector.broadcast %cst_259 : f32 to vector<8x128xf32>
    %398 = arith.maximumf %397, %396 : vector<8x128xf32>
    %399 = vector.broadcast %cst_260 : f32 to vector<8x128xf32>
    %400 = arith.minimumf %399, %398 : vector<8x128xf32>
    %cst_261 = arith.constant 0.166666672 : f32
    %401 = vector.broadcast %cst_261 : f32 to vector<8x128xf32>
    %402 = arith.mulf %400, %401 : vector<8x128xf32>
    %403 = arith.mulf %394, %402 : vector<8x128xf32>
    %c0_262 = arith.constant 0 : index
    %c0_263 = arith.constant 0 : index
    %404 = vector.load %arg10[%c0_262, %c0_263] : memref<32x8xf32, #tpu.memory_space<vmem>>, vector<32x8xf32>
    %cst_264 = arith.constant dense<0.000000e+00> : vector<32x128xf32>
    %405 = tpu.matmul %404, %403, %cst_264 {dimension_numbers = #tpu.dot_dimension_numbers<[1], [0], [0], [1], [0, 0, 1, 1], [], []>} : vector<32x8xf32>, vector<8x128xf32>, vector<32x128xf32> -> vector<32x128xf32>
    %c0_265 = arith.constant 0 : index
    %c0_266 = arith.constant 0 : index
    %406 = vector.load %arg11[%c0_265, %c0_266] : memref<32x1xf32, #tpu.memory_space<vmem>>, vector<32x1xf32>
    %407 = vector.broadcast %406 : vector<32x1xf32> to vector<32x128xf32>
    %408 = arith.addf %405, %407 : vector<32x128xf32>
    %cst_267 = arith.constant 0.000000e+00 : f32
    %409 = vector.broadcast %cst_267 : f32 to vector<32x128xf32>
    %410 = arith.subf %409, %408 : vector<32x128xf32>
    %411 = math.exp %410 : vector<32x128xf32>
    %cst_268 = arith.constant 1.000000e+00 : f32
    %412 = vector.broadcast %cst_268 : f32 to vector<32x128xf32>
    %413 = arith.addf %412, %411 : vector<32x128xf32>
    %cst_269 = arith.constant 1.000000e+00 : f32
    %414 = vector.broadcast %cst_269 : f32 to vector<32x128xf32>
    %415 = arith.divf %414, %413 : vector<32x128xf32>
    %416 = vector.extract_strided_slice %101 {offsets = [5, 0, 0], sizes = [1, 32, 128], strides = [1, 1, 1]} : vector<7x32x128xf32> to vector<1x32x128xf32>
    %417 = vector.shape_cast %416 : vector<1x32x128xf32> to vector<32x128xf32>
    %cst_270 = arith.constant dense<0.000000e+00> : vector<8x128xf32>
    %418 = tpu.matmul %102, %417, %cst_270 {dimension_numbers = #tpu.dot_dimension_numbers<[1], [0], [0], [1], [0, 0, 1, 1], [], []>} : vector<8x32xf32>, vector<32x128xf32>, vector<8x128xf32> -> vector<8x128xf32>
    %419 = vector.broadcast %103 : vector<8x1xf32> to vector<8x128xf32>
    %420 = arith.addf %418, %419 : vector<8x128xf32>
    %cst_271 = arith.constant 3.000000e+00 : f32
    %421 = vector.broadcast %cst_271 : f32 to vector<8x128xf32>
    %422 = arith.addf %420, %421 : vector<8x128xf32>
    %cst_272 = arith.constant 0.000000e+00 : f32
    %cst_273 = arith.constant 6.000000e+00 : f32
    %423 = vector.broadcast %cst_272 : f32 to vector<8x128xf32>
    %424 = arith.maximumf %423, %422 : vector<8x128xf32>
    %425 = vector.broadcast %cst_273 : f32 to vector<8x128xf32>
    %426 = arith.minimumf %425, %424 : vector<8x128xf32>
    %cst_274 = arith.constant 0.166666672 : f32
    %427 = vector.broadcast %cst_274 : f32 to vector<8x128xf32>
    %428 = arith.mulf %426, %427 : vector<8x128xf32>
    %429 = arith.mulf %420, %428 : vector<8x128xf32>
    %c0_275 = arith.constant 0 : index
    %c0_276 = arith.constant 0 : index
    %430 = vector.load %arg10[%c0_275, %c0_276] : memref<32x8xf32, #tpu.memory_space<vmem>>, vector<32x8xf32>
    %cst_277 = arith.constant dense<0.000000e+00> : vector<32x128xf32>
    %431 = tpu.matmul %430, %429, %cst_277 {dimension_numbers = #tpu.dot_dimension_numbers<[1], [0], [0], [1], [0, 0, 1, 1], [], []>} : vector<32x8xf32>, vector<8x128xf32>, vector<32x128xf32> -> vector<32x128xf32>
    %c0_278 = arith.constant 0 : index
    %c0_279 = arith.constant 0 : index
    %432 = vector.load %arg11[%c0_278, %c0_279] : memref<32x1xf32, #tpu.memory_space<vmem>>, vector<32x1xf32>
    %433 = vector.broadcast %432 : vector<32x1xf32> to vector<32x128xf32>
    %434 = arith.addf %431, %433 : vector<32x128xf32>
    %cst_280 = arith.constant 0.000000e+00 : f32
    %435 = vector.broadcast %cst_280 : f32 to vector<32x128xf32>
    %436 = arith.subf %435, %434 : vector<32x128xf32>
    %437 = math.exp %436 : vector<32x128xf32>
    %cst_281 = arith.constant 1.000000e+00 : f32
    %438 = vector.broadcast %cst_281 : f32 to vector<32x128xf32>
    %439 = arith.addf %438, %437 : vector<32x128xf32>
    %cst_282 = arith.constant 1.000000e+00 : f32
    %440 = vector.broadcast %cst_282 : f32 to vector<32x128xf32>
    %441 = arith.divf %440, %439 : vector<32x128xf32>
    %442 = vector.extract_strided_slice %101 {offsets = [6, 0, 0], sizes = [1, 32, 128], strides = [1, 1, 1]} : vector<7x32x128xf32> to vector<1x32x128xf32>
    %443 = vector.shape_cast %442 : vector<1x32x128xf32> to vector<32x128xf32>
    %cst_283 = arith.constant dense<0.000000e+00> : vector<8x128xf32>
    %444 = tpu.matmul %102, %443, %cst_283 {dimension_numbers = #tpu.dot_dimension_numbers<[1], [0], [0], [1], [0, 0, 1, 1], [], []>} : vector<8x32xf32>, vector<32x128xf32>, vector<8x128xf32> -> vector<8x128xf32>
    %445 = vector.broadcast %103 : vector<8x1xf32> to vector<8x128xf32>
    %446 = arith.addf %444, %445 : vector<8x128xf32>
    %cst_284 = arith.constant 3.000000e+00 : f32
    %447 = vector.broadcast %cst_284 : f32 to vector<8x128xf32>
    %448 = arith.addf %446, %447 : vector<8x128xf32>
    %cst_285 = arith.constant 0.000000e+00 : f32
    %cst_286 = arith.constant 6.000000e+00 : f32
    %449 = vector.broadcast %cst_285 : f32 to vector<8x128xf32>
    %450 = arith.maximumf %449, %448 : vector<8x128xf32>
    %451 = vector.broadcast %cst_286 : f32 to vector<8x128xf32>
    %452 = arith.minimumf %451, %450 : vector<8x128xf32>
    %cst_287 = arith.constant 0.166666672 : f32
    %453 = vector.broadcast %cst_287 : f32 to vector<8x128xf32>
    %454 = arith.mulf %452, %453 : vector<8x128xf32>
    %455 = arith.mulf %446, %454 : vector<8x128xf32>
    %c0_288 = arith.constant 0 : index
    %c0_289 = arith.constant 0 : index
    %456 = vector.load %arg10[%c0_288, %c0_289] : memref<32x8xf32, #tpu.memory_space<vmem>>, vector<32x8xf32>
    %cst_290 = arith.constant dense<0.000000e+00> : vector<32x128xf32>
    %457 = tpu.matmul %456, %455, %cst_290 {dimension_numbers = #tpu.dot_dimension_numbers<[1], [0], [0], [1], [0, 0, 1, 1], [], []>} : vector<32x8xf32>, vector<8x128xf32>, vector<32x128xf32> -> vector<32x128xf32>
    %c0_291 = arith.constant 0 : index
    %c0_292 = arith.constant 0 : index
    %458 = vector.load %arg11[%c0_291, %c0_292] : memref<32x1xf32, #tpu.memory_space<vmem>>, vector<32x1xf32>
    %459 = vector.broadcast %458 : vector<32x1xf32> to vector<32x128xf32>
    %460 = arith.addf %457, %459 : vector<32x128xf32>
    %cst_293 = arith.constant 0.000000e+00 : f32
    %461 = vector.broadcast %cst_293 : f32 to vector<32x128xf32>
    %462 = arith.subf %461, %460 : vector<32x128xf32>
    %463 = math.exp %462 : vector<32x128xf32>
    %cst_294 = arith.constant 1.000000e+00 : f32
    %464 = vector.broadcast %cst_294 : f32 to vector<32x128xf32>
    %465 = arith.addf %464, %463 : vector<32x128xf32>
    %cst_295 = arith.constant 1.000000e+00 : f32
    %466 = vector.broadcast %cst_295 : f32 to vector<32x128xf32>
    %467 = arith.divf %466, %465 : vector<32x128xf32>
    %468 = arith.mulf %129, %311 : vector<32x128xf32>
    %c0_296 = arith.constant 0 : index
    %c0_297 = arith.constant 0 : index
    %c0_298 = arith.constant 0 : index
    %c0_299 = arith.constant 0 : index
    %469 = vector.load %arg12[%c0_296, %c0_297, %c0_298, %c0_299] : memref<7x7x32x128xf32, #tpu.memory_space<vmem>>, vector<1x1x32x128xf32>
    %470 = vector.shape_cast %469 : vector<1x1x32x128xf32> to vector<32x128xf32>
    %471 = vector.shape_cast %468 : vector<32x128xf32> to vector<1x1x32x128xf32>
    tpu.vector_store %arg12[%c0_296, %c0_297, %c0_298, %c0_299], %471 {strides = array<i32>} : memref<7x7x32x128xf32, #tpu.memory_space<vmem>>, vector<1x1x32x128xf32>,
    %472 = arith.mulf %129, %337 : vector<32x128xf32>
    %c0_300 = arith.constant 0 : index
    %c1_301 = arith.constant 1 : index
    %c0_302 = arith.constant 0 : index
    %c0_303 = arith.constant 0 : index
    %473 = vector.load %arg12[%c0_300, %c1_301, %c0_302, %c0_303] : memref<7x7x32x128xf32, #tpu.memory_space<vmem>>, vector<1x1x32x128xf32>
    %474 = vector.shape_cast %473 : vector<1x1x32x128xf32> to vector<32x128xf32>
    %475 = vector.shape_cast %472 : vector<32x128xf32> to vector<1x1x32x128xf32>
    tpu.vector_store %arg12[%c0_300, %c1_301, %c0_302, %c0_303], %475 {strides = array<i32>} : memref<7x7x32x128xf32, #tpu.memory_space<vmem>>, vector<1x1x32x128xf32>,
    %476 = arith.mulf %129, %363 : vector<32x128xf32>
    %c0_304 = arith.constant 0 : index
    %c2_305 = arith.constant 2 : index
    %c0_306 = arith.constant 0 : index
    %c0_307 = arith.constant 0 : index
    %477 = vector.load %arg12[%c0_304, %c2_305, %c0_306, %c0_307] : memref<7x7x32x128xf32, #tpu.memory_space<vmem>>, vector<1x1x32x128xf32>
    %478 = vector.shape_cast %477 : vector<1x1x32x128xf32> to vector<32x128xf32>
    %479 = vector.shape_cast %476 : vector<32x128xf32> to vector<1x1x32x128xf32>
    tpu.vector_store %arg12[%c0_304, %c2_305, %c0_306, %c0_307], %479 {strides = array<i32>} : memref<7x7x32x128xf32, #tpu.memory_space<vmem>>, vector<1x1x32x128xf32>,
    %480 = arith.mulf %129, %389 : vector<32x128xf32>
    %c0_308 = arith.constant 0 : index
    %c3_309 = arith.constant 3 : index
    %c0_310 = arith.constant 0 : index
    %c0_311 = arith.constant 0 : index
    %481 = vector.load %arg12[%c0_308, %c3_309, %c0_310, %c0_311] : memref<7x7x32x128xf32, #tpu.memory_space<vmem>>, vector<1x1x32x128xf32>
    %482 = vector.shape_cast %481 : vector<1x1x32x128xf32> to vector<32x128xf32>
    %483 = vector.shape_cast %480 : vector<32x128xf32> to vector<1x1x32x128xf32>
    tpu.vector_store %arg12[%c0_308, %c3_309, %c0_310, %c0_311], %483 {strides = array<i32>} : memref<7x7x32x128xf32, #tpu.memory_space<vmem>>, vector<1x1x32x128xf32>,
    %484 = arith.mulf %129, %415 : vector<32x128xf32>
    %c0_312 = arith.constant 0 : index
    %c4_313 = arith.constant 4 : index
    %c0_314 = arith.constant 0 : index
    %c0_315 = arith.constant 0 : index
    %485 = vector.load %arg12[%c0_312, %c4_313, %c0_314, %c0_315] : memref<7x7x32x128xf32, #tpu.memory_space<vmem>>, vector<1x1x32x128xf32>
    %486 = vector.shape_cast %485 : vector<1x1x32x128xf32> to vector<32x128xf32>
    %487 = vector.shape_cast %484 : vector<32x128xf32> to vector<1x1x32x128xf32>
    tpu.vector_store %arg12[%c0_312, %c4_313, %c0_314, %c0_315], %487 {strides = array<i32>} : memref<7x7x32x128xf32, #tpu.memory_space<vmem>>, vector<1x1x32x128xf32>,
    %488 = arith.mulf %129, %441 : vector<32x128xf32>
    %c0_316 = arith.constant 0 : index
    %c5_317 = arith.constant 5 : index
    %c0_318 = arith.constant 0 : index
    %c0_319 = arith.constant 0 : index
    %489 = vector.load %arg12[%c0_316, %c5_317, %c0_318, %c0_319] : memref<7x7x32x128xf32, #tpu.memory_space<vmem>>, vector<1x1x32x128xf32>
    %490 = vector.shape_cast %489 : vector<1x1x32x128xf32> to vector<32x128xf32>
    %491 = vector.shape_cast %488 : vector<32x128xf32> to vector<1x1x32x128xf32>
    tpu.vector_store %arg12[%c0_316, %c5_317, %c0_318, %c0_319], %491 {strides = array<i32>} : memref<7x7x32x128xf32, #tpu.memory_space<vmem>>, vector<1x1x32x128xf32>,
    %492 = arith.mulf %129, %467 : vector<32x128xf32>
    %c0_320 = arith.constant 0 : index
    %c6_321 = arith.constant 6 : index
    %c0_322 = arith.constant 0 : index
    %c0_323 = arith.constant 0 : index
    %493 = vector.load %arg12[%c0_320, %c6_321, %c0_322, %c0_323] : memref<7x7x32x128xf32, #tpu.memory_space<vmem>>, vector<1x1x32x128xf32>
    %494 = vector.shape_cast %493 : vector<1x1x32x128xf32> to vector<32x128xf32>
    %495 = vector.shape_cast %492 : vector<32x128xf32> to vector<1x1x32x128xf32>
    tpu.vector_store %arg12[%c0_320, %c6_321, %c0_322, %c0_323], %495 {strides = array<i32>} : memref<7x7x32x128xf32, #tpu.memory_space<vmem>>, vector<1x1x32x128xf32>,
    %496 = arith.mulf %155, %311 : vector<32x128xf32>
    %c1_324 = arith.constant 1 : index
    %c0_325 = arith.constant 0 : index
    %c0_326 = arith.constant 0 : index
    %c0_327 = arith.constant 0 : index
    %497 = vector.load %arg12[%c1_324, %c0_325, %c0_326, %c0_327] : memref<7x7x32x128xf32, #tpu.memory_space<vmem>>, vector<1x1x32x128xf32>
    %498 = vector.shape_cast %497 : vector<1x1x32x128xf32> to vector<32x128xf32>
    %499 = vector.shape_cast %496 : vector<32x128xf32> to vector<1x1x32x128xf32>
    tpu.vector_store %arg12[%c1_324, %c0_325, %c0_326, %c0_327], %499 {strides = array<i32>} : memref<7x7x32x128xf32, #tpu.memory_space<vmem>>, vector<1x1x32x128xf32>,
    %500 = arith.mulf %155, %337 : vector<32x128xf32>
    %c1_328 = arith.constant 1 : index
    %c1_329 = arith.constant 1 : index
    %c0_330 = arith.constant 0 : index
    %c0_331 = arith.constant 0 : index
    %501 = vector.load %arg12[%c1_328, %c1_329, %c0_330, %c0_331] : memref<7x7x32x128xf32, #tpu.memory_space<vmem>>, vector<1x1x32x128xf32>
    %502 = vector.shape_cast %501 : vector<1x1x32x128xf32> to vector<32x128xf32>
    %503 = vector.shape_cast %500 : vector<32x128xf32> to vector<1x1x32x128xf32>
    tpu.vector_store %arg12[%c1_328, %c1_329, %c0_330, %c0_331], %503 {strides = array<i32>} : memref<7x7x32x128xf32, #tpu.memory_space<vmem>>, vector<1x1x32x128xf32>,
    %504 = arith.mulf %155, %363 : vector<32x128xf32>
    %c1_332 = arith.constant 1 : index
    %c2_333 = arith.constant 2 : index
    %c0_334 = arith.constant 0 : index
    %c0_335 = arith.constant 0 : index
    %505 = vector.load %arg12[%c1_332, %c2_333, %c0_334, %c0_335] : memref<7x7x32x128xf32, #tpu.memory_space<vmem>>, vector<1x1x32x128xf32>
    %506 = vector.shape_cast %505 : vector<1x1x32x128xf32> to vector<32x128xf32>
    %507 = vector.shape_cast %504 : vector<32x128xf32> to vector<1x1x32x128xf32>
    tpu.vector_store %arg12[%c1_332, %c2_333, %c0_334, %c0_335], %507 {strides = array<i32>} : memref<7x7x32x128xf32, #tpu.memory_space<vmem>>, vector<1x1x32x128xf32>,
    %508 = arith.mulf %155, %389 : vector<32x128xf32>
    %c1_336 = arith.constant 1 : index
    %c3_337 = arith.constant 3 : index
    %c0_338 = arith.constant 0 : index
    %c0_339 = arith.constant 0 : index
    %509 = vector.load %arg12[%c1_336, %c3_337, %c0_338, %c0_339] : memref<7x7x32x128xf32, #tpu.memory_space<vmem>>, vector<1x1x32x128xf32>
    %510 = vector.shape_cast %509 : vector<1x1x32x128xf32> to vector<32x128xf32>
    %511 = vector.shape_cast %508 : vector<32x128xf32> to vector<1x1x32x128xf32>
    tpu.vector_store %arg12[%c1_336, %c3_337, %c0_338, %c0_339], %511 {strides = array<i32>} : memref<7x7x32x128xf32, #tpu.memory_space<vmem>>, vector<1x1x32x128xf32>,
    %512 = arith.mulf %155, %415 : vector<32x128xf32>
    %c1_340 = arith.constant 1 : index
    %c4_341 = arith.constant 4 : index
    %c0_342 = arith.constant 0 : index
    %c0_343 = arith.constant 0 : index
    %513 = vector.load %arg12[%c1_340, %c4_341, %c0_342, %c0_343] : memref<7x7x32x128xf32, #tpu.memory_space<vmem>>, vector<1x1x32x128xf32>
    %514 = vector.shape_cast %513 : vector<1x1x32x128xf32> to vector<32x128xf32>
    %515 = vector.shape_cast %512 : vector<32x128xf32> to vector<1x1x32x128xf32>
    tpu.vector_store %arg12[%c1_340, %c4_341, %c0_342, %c0_343], %515 {strides = array<i32>} : memref<7x7x32x128xf32, #tpu.memory_space<vmem>>, vector<1x1x32x128xf32>,
    %516 = arith.mulf %155, %441 : vector<32x128xf32>
    %c1_344 = arith.constant 1 : index
    %c5_345 = arith.constant 5 : index
    %c0_346 = arith.constant 0 : index
    %c0_347 = arith.constant 0 : index
    %517 = vector.load %arg12[%c1_344, %c5_345, %c0_346, %c0_347] : memref<7x7x32x128xf32, #tpu.memory_space<vmem>>, vector<1x1x32x128xf32>
    %518 = vector.shape_cast %517 : vector<1x1x32x128xf32> to vector<32x128xf32>
    %519 = vector.shape_cast %516 : vector<32x128xf32> to vector<1x1x32x128xf32>
    tpu.vector_store %arg12[%c1_344, %c5_345, %c0_346, %c0_347], %519 {strides = array<i32>} : memref<7x7x32x128xf32, #tpu.memory_space<vmem>>, vector<1x1x32x128xf32>,
    %520 = arith.mulf %155, %467 : vector<32x128xf32>
    %c1_348 = arith.constant 1 : index
    %c6_349 = arith.constant 6 : index
    %c0_350 = arith.constant 0 : index
    %c0_351 = arith.constant 0 : index
    %521 = vector.load %arg12[%c1_348, %c6_349, %c0_350, %c0_351] : memref<7x7x32x128xf32, #tpu.memory_space<vmem>>, vector<1x1x32x128xf32>
    %522 = vector.shape_cast %521 : vector<1x1x32x128xf32> to vector<32x128xf32>
    %523 = vector.shape_cast %520 : vector<32x128xf32> to vector<1x1x32x128xf32>
    tpu.vector_store %arg12[%c1_348, %c6_349, %c0_350, %c0_351], %523 {strides = array<i32>} : memref<7x7x32x128xf32, #tpu.memory_space<vmem>>, vector<1x1x32x128xf32>,
    %524 = arith.mulf %181, %311 : vector<32x128xf32>
    %c2_352 = arith.constant 2 : index
    %c0_353 = arith.constant 0 : index
    %c0_354 = arith.constant 0 : index
    %c0_355 = arith.constant 0 : index
    %525 = vector.load %arg12[%c2_352, %c0_353, %c0_354, %c0_355] : memref<7x7x32x128xf32, #tpu.memory_space<vmem>>, vector<1x1x32x128xf32>
    %526 = vector.shape_cast %525 : vector<1x1x32x128xf32> to vector<32x128xf32>
    %527 = vector.shape_cast %524 : vector<32x128xf32> to vector<1x1x32x128xf32>
    tpu.vector_store %arg12[%c2_352, %c0_353, %c0_354, %c0_355], %527 {strides = array<i32>} : memref<7x7x32x128xf32, #tpu.memory_space<vmem>>, vector<1x1x32x128xf32>,
    %528 = arith.mulf %181, %337 : vector<32x128xf32>
    %c2_356 = arith.constant 2 : index
    %c1_357 = arith.constant 1 : index
    %c0_358 = arith.constant 0 : index
    %c0_359 = arith.constant 0 : index
    %529 = vector.load %arg12[%c2_356, %c1_357, %c0_358, %c0_359] : memref<7x7x32x128xf32, #tpu.memory_space<vmem>>, vector<1x1x32x128xf32>
    %530 = vector.shape_cast %529 : vector<1x1x32x128xf32> to vector<32x128xf32>
    %531 = vector.shape_cast %528 : vector<32x128xf32> to vector<1x1x32x128xf32>
    tpu.vector_store %arg12[%c2_356, %c1_357, %c0_358, %c0_359], %531 {strides = array<i32>} : memref<7x7x32x128xf32, #tpu.memory_space<vmem>>, vector<1x1x32x128xf32>,
    %532 = arith.mulf %181, %363 : vector<32x128xf32>
    %c2_360 = arith.constant 2 : index
    %c2_361 = arith.constant 2 : index
    %c0_362 = arith.constant 0 : index
    %c0_363 = arith.constant 0 : index
    %533 = vector.load %arg12[%c2_360, %c2_361, %c0_362, %c0_363] : memref<7x7x32x128xf32, #tpu.memory_space<vmem>>, vector<1x1x32x128xf32>
    %534 = vector.shape_cast %533 : vector<1x1x32x128xf32> to vector<32x128xf32>
    %535 = vector.shape_cast %532 : vector<32x128xf32> to vector<1x1x32x128xf32>
    tpu.vector_store %arg12[%c2_360, %c2_361, %c0_362, %c0_363], %535 {strides = array<i32>} : memref<7x7x32x128xf32, #tpu.memory_space<vmem>>, vector<1x1x32x128xf32>,
    %536 = arith.mulf %181, %389 : vector<32x128xf32>
    %c2_364 = arith.constant 2 : index
    %c3_365 = arith.constant 3 : index
    %c0_366 = arith.constant 0 : index
    %c0_367 = arith.constant 0 : index
    %537 = vector.load %arg12[%c2_364, %c3_365, %c0_366, %c0_367] : memref<7x7x32x128xf32, #tpu.memory_space<vmem>>, vector<1x1x32x128xf32>
    %538 = vector.shape_cast %537 : vector<1x1x32x128xf32> to vector<32x128xf32>
    %539 = vector.shape_cast %536 : vector<32x128xf32> to vector<1x1x32x128xf32>
    tpu.vector_store %arg12[%c2_364, %c3_365, %c0_366, %c0_367], %539 {strides = array<i32>} : memref<7x7x32x128xf32, #tpu.memory_space<vmem>>, vector<1x1x32x128xf32>,
    %540 = arith.mulf %181, %415 : vector<32x128xf32>
    %c2_368 = arith.constant 2 : index
    %c4_369 = arith.constant 4 : index
    %c0_370 = arith.constant 0 : index
    %c0_371 = arith.constant 0 : index
    %541 = vector.load %arg12[%c2_368, %c4_369, %c0_370, %c0_371] : memref<7x7x32x128xf32, #tpu.memory_space<vmem>>, vector<1x1x32x128xf32>
    %542 = vector.shape_cast %541 : vector<1x1x32x128xf32> to vector<32x128xf32>
    %543 = vector.shape_cast %540 : vector<32x128xf32> to vector<1x1x32x128xf32>
    tpu.vector_store %arg12[%c2_368, %c4_369, %c0_370, %c0_371], %543 {strides = array<i32>} : memref<7x7x32x128xf32, #tpu.memory_space<vmem>>, vector<1x1x32x128xf32>,
    %544 = arith.mulf %181, %441 : vector<32x128xf32>
    %c2_372 = arith.constant 2 : index
    %c5_373 = arith.constant 5 : index
    %c0_374 = arith.constant 0 : index
    %c0_375 = arith.constant 0 : index
    %545 = vector.load %arg12[%c2_372, %c5_373, %c0_374, %c0_375] : memref<7x7x32x128xf32, #tpu.memory_space<vmem>>, vector<1x1x32x128xf32>
    %546 = vector.shape_cast %545 : vector<1x1x32x128xf32> to vector<32x128xf32>
    %547 = vector.shape_cast %544 : vector<32x128xf32> to vector<1x1x32x128xf32>
    tpu.vector_store %arg12[%c2_372, %c5_373, %c0_374, %c0_375], %547 {strides = array<i32>} : memref<7x7x32x128xf32, #tpu.memory_space<vmem>>, vector<1x1x32x128xf32>,
    %548 = arith.mulf %181, %467 : vector<32x128xf32>
    %c2_376 = arith.constant 2 : index
    %c6_377 = arith.constant 6 : index
    %c0_378 = arith.constant 0 : index
    %c0_379 = arith.constant 0 : index
    %549 = vector.load %arg12[%c2_376, %c6_377, %c0_378, %c0_379] : memref<7x7x32x128xf32, #tpu.memory_space<vmem>>, vector<1x1x32x128xf32>
    %550 = vector.shape_cast %549 : vector<1x1x32x128xf32> to vector<32x128xf32>
    %551 = vector.shape_cast %548 : vector<32x128xf32> to vector<1x1x32x128xf32>
    tpu.vector_store %arg12[%c2_376, %c6_377, %c0_378, %c0_379], %551 {strides = array<i32>} : memref<7x7x32x128xf32, #tpu.memory_space<vmem>>, vector<1x1x32x128xf32>,
    %552 = arith.mulf %207, %311 : vector<32x128xf32>
    %c3_380 = arith.constant 3 : index
    %c0_381 = arith.constant 0 : index
    %c0_382 = arith.constant 0 : index
    %c0_383 = arith.constant 0 : index
    %553 = vector.load %arg12[%c3_380, %c0_381, %c0_382, %c0_383] : memref<7x7x32x128xf32, #tpu.memory_space<vmem>>, vector<1x1x32x128xf32>
    %554 = vector.shape_cast %553 : vector<1x1x32x128xf32> to vector<32x128xf32>
    %555 = vector.shape_cast %552 : vector<32x128xf32> to vector<1x1x32x128xf32>
    tpu.vector_store %arg12[%c3_380, %c0_381, %c0_382, %c0_383], %555 {strides = array<i32>} : memref<7x7x32x128xf32, #tpu.memory_space<vmem>>, vector<1x1x32x128xf32>,
    %556 = arith.mulf %207, %337 : vector<32x128xf32>
    %c3_384 = arith.constant 3 : index
    %c1_385 = arith.constant 1 : index
    %c0_386 = arith.constant 0 : index
    %c0_387 = arith.constant 0 : index
    %557 = vector.load %arg12[%c3_384, %c1_385, %c0_386, %c0_387] : memref<7x7x32x128xf32, #tpu.memory_space<vmem>>, vector<1x1x32x128xf32>
    %558 = vector.shape_cast %557 : vector<1x1x32x128xf32> to vector<32x128xf32>
    %559 = vector.shape_cast %556 : vector<32x128xf32> to vector<1x1x32x128xf32>
    tpu.vector_store %arg12[%c3_384, %c1_385, %c0_386, %c0_387], %559 {strides = array<i32>} : memref<7x7x32x128xf32, #tpu.memory_space<vmem>>, vector<1x1x32x128xf32>,
    %560 = arith.mulf %207, %363 : vector<32x128xf32>
    %c3_388 = arith.constant 3 : index
    %c2_389 = arith.constant 2 : index
    %c0_390 = arith.constant 0 : index
    %c0_391 = arith.constant 0 : index
    %561 = vector.load %arg12[%c3_388, %c2_389, %c0_390, %c0_391] : memref<7x7x32x128xf32, #tpu.memory_space<vmem>>, vector<1x1x32x128xf32>
    %562 = vector.shape_cast %561 : vector<1x1x32x128xf32> to vector<32x128xf32>
    %563 = vector.shape_cast %560 : vector<32x128xf32> to vector<1x1x32x128xf32>
    tpu.vector_store %arg12[%c3_388, %c2_389, %c0_390, %c0_391], %563 {strides = array<i32>} : memref<7x7x32x128xf32, #tpu.memory_space<vmem>>, vector<1x1x32x128xf32>,
    %564 = arith.mulf %207, %389 : vector<32x128xf32>
    %c3_392 = arith.constant 3 : index
    %c3_393 = arith.constant 3 : index
    %c0_394 = arith.constant 0 : index
    %c0_395 = arith.constant 0 : index
    %565 = vector.load %arg12[%c3_392, %c3_393, %c0_394, %c0_395] : memref<7x7x32x128xf32, #tpu.memory_space<vmem>>, vector<1x1x32x128xf32>
    %566 = vector.shape_cast %565 : vector<1x1x32x128xf32> to vector<32x128xf32>
    %567 = vector.shape_cast %564 : vector<32x128xf32> to vector<1x1x32x128xf32>
    tpu.vector_store %arg12[%c3_392, %c3_393, %c0_394, %c0_395], %567 {strides = array<i32>} : memref<7x7x32x128xf32, #tpu.memory_space<vmem>>, vector<1x1x32x128xf32>,
    %568 = arith.mulf %207, %415 : vector<32x128xf32>
    %c3_396 = arith.constant 3 : index
    %c4_397 = arith.constant 4 : index
    %c0_398 = arith.constant 0 : index
    %c0_399 = arith.constant 0 : index
    %569 = vector.load %arg12[%c3_396, %c4_397, %c0_398, %c0_399] : memref<7x7x32x128xf32, #tpu.memory_space<vmem>>, vector<1x1x32x128xf32>
    %570 = vector.shape_cast %569 : vector<1x1x32x128xf32> to vector<32x128xf32>
    %571 = vector.shape_cast %568 : vector<32x128xf32> to vector<1x1x32x128xf32>
    tpu.vector_store %arg12[%c3_396, %c4_397, %c0_398, %c0_399], %571 {strides = array<i32>} : memref<7x7x32x128xf32, #tpu.memory_space<vmem>>, vector<1x1x32x128xf32>,
    %572 = arith.mulf %207, %441 : vector<32x128xf32>
    %c3_400 = arith.constant 3 : index
    %c5_401 = arith.constant 5 : index
    %c0_402 = arith.constant 0 : index
    %c0_403 = arith.constant 0 : index
    %573 = vector.load %arg12[%c3_400, %c5_401, %c0_402, %c0_403] : memref<7x7x32x128xf32, #tpu.memory_space<vmem>>, vector<1x1x32x128xf32>
    %574 = vector.shape_cast %573 : vector<1x1x32x128xf32> to vector<32x128xf32>
    %575 = vector.shape_cast %572 : vector<32x128xf32> to vector<1x1x32x128xf32>
    tpu.vector_store %arg12[%c3_400, %c5_401, %c0_402, %c0_403], %575 {strides = array<i32>} : memref<7x7x32x128xf32, #tpu.memory_space<vmem>>, vector<1x1x32x128xf32>,
    %576 = arith.mulf %207, %467 : vector<32x128xf32>
    %c3_404 = arith.constant 3 : index
    %c6_405 = arith.constant 6 : index
    %c0_406 = arith.constant 0 : index
    %c0_407 = arith.constant 0 : index
    %577 = vector.load %arg12[%c3_404, %c6_405, %c0_406, %c0_407] : memref<7x7x32x128xf32, #tpu.memory_space<vmem>>, vector<1x1x32x128xf32>
    %578 = vector.shape_cast %577 : vector<1x1x32x128xf32> to vector<32x128xf32>
    %579 = vector.shape_cast %576 : vector<32x128xf32> to vector<1x1x32x128xf32>
    tpu.vector_store %arg12[%c3_404, %c6_405, %c0_406, %c0_407], %579 {strides = array<i32>} : memref<7x7x32x128xf32, #tpu.memory_space<vmem>>, vector<1x1x32x128xf32>,
    %580 = arith.mulf %233, %311 : vector<32x128xf32>
    %c4_408 = arith.constant 4 : index
    %c0_409 = arith.constant 0 : index
    %c0_410 = arith.constant 0 : index
    %c0_411 = arith.constant 0 : index
    %581 = vector.load %arg12[%c4_408, %c0_409, %c0_410, %c0_411] : memref<7x7x32x128xf32, #tpu.memory_space<vmem>>, vector<1x1x32x128xf32>
    %582 = vector.shape_cast %581 : vector<1x1x32x128xf32> to vector<32x128xf32>
    %583 = vector.shape_cast %580 : vector<32x128xf32> to vector<1x1x32x128xf32>
    tpu.vector_store %arg12[%c4_408, %c0_409, %c0_410, %c0_411], %583 {strides = array<i32>} : memref<7x7x32x128xf32, #tpu.memory_space<vmem>>, vector<1x1x32x128xf32>,
    %584 = arith.mulf %233, %337 : vector<32x128xf32>
    %c4_412 = arith.constant 4 : index
    %c1_413 = arith.constant 1 : index
    %c0_414 = arith.constant 0 : index
    %c0_415 = arith.constant 0 : index
    %585 = vector.load %arg12[%c4_412, %c1_413, %c0_414, %c0_415] : memref<7x7x32x128xf32, #tpu.memory_space<vmem>>, vector<1x1x32x128xf32>
    %586 = vector.shape_cast %585 : vector<1x1x32x128xf32> to vector<32x128xf32>
    %587 = vector.shape_cast %584 : vector<32x128xf32> to vector<1x1x32x128xf32>
    tpu.vector_store %arg12[%c4_412, %c1_413, %c0_414, %c0_415], %587 {strides = array<i32>} : memref<7x7x32x128xf32, #tpu.memory_space<vmem>>, vector<1x1x32x128xf32>,
    %588 = arith.mulf %233, %363 : vector<32x128xf32>
    %c4_416 = arith.constant 4 : index
    %c2_417 = arith.constant 2 : index
    %c0_418 = arith.constant 0 : index
    %c0_419 = arith.constant 0 : index
    %589 = vector.load %arg12[%c4_416, %c2_417, %c0_418, %c0_419] : memref<7x7x32x128xf32, #tpu.memory_space<vmem>>, vector<1x1x32x128xf32>
    %590 = vector.shape_cast %589 : vector<1x1x32x128xf32> to vector<32x128xf32>
    %591 = vector.shape_cast %588 : vector<32x128xf32> to vector<1x1x32x128xf32>
    tpu.vector_store %arg12[%c4_416, %c2_417, %c0_418, %c0_419], %591 {strides = array<i32>} : memref<7x7x32x128xf32, #tpu.memory_space<vmem>>, vector<1x1x32x128xf32>,
    %592 = arith.mulf %233, %389 : vector<32x128xf32>
    %c4_420 = arith.constant 4 : index
    %c3_421 = arith.constant 3 : index
    %c0_422 = arith.constant 0 : index
    %c0_423 = arith.constant 0 : index
    %593 = vector.load %arg12[%c4_420, %c3_421, %c0_422, %c0_423] : memref<7x7x32x128xf32, #tpu.memory_space<vmem>>, vector<1x1x32x128xf32>
    %594 = vector.shape_cast %593 : vector<1x1x32x128xf32> to vector<32x128xf32>
    %595 = vector.shape_cast %592 : vector<32x128xf32> to vector<1x1x32x128xf32>
    tpu.vector_store %arg12[%c4_420, %c3_421, %c0_422, %c0_423], %595 {strides = array<i32>} : memref<7x7x32x128xf32, #tpu.memory_space<vmem>>, vector<1x1x32x128xf32>,
    %596 = arith.mulf %233, %415 : vector<32x128xf32>
    %c4_424 = arith.constant 4 : index
    %c4_425 = arith.constant 4 : index
    %c0_426 = arith.constant 0 : index
    %c0_427 = arith.constant 0 : index
    %597 = vector.load %arg12[%c4_424, %c4_425, %c0_426, %c0_427] : memref<7x7x32x128xf32, #tpu.memory_space<vmem>>, vector<1x1x32x128xf32>
    %598 = vector.shape_cast %597 : vector<1x1x32x128xf32> to vector<32x128xf32>
    %599 = vector.shape_cast %596 : vector<32x128xf32> to vector<1x1x32x128xf32>
    tpu.vector_store %arg12[%c4_424, %c4_425, %c0_426, %c0_427], %599 {strides = array<i32>} : memref<7x7x32x128xf32, #tpu.memory_space<vmem>>, vector<1x1x32x128xf32>,
    %600 = arith.mulf %233, %441 : vector<32x128xf32>
    %c4_428 = arith.constant 4 : index
    %c5_429 = arith.constant 5 : index
    %c0_430 = arith.constant 0 : index
    %c0_431 = arith.constant 0 : index
    %601 = vector.load %arg12[%c4_428, %c5_429, %c0_430, %c0_431] : memref<7x7x32x128xf32, #tpu.memory_space<vmem>>, vector<1x1x32x128xf32>
    %602 = vector.shape_cast %601 : vector<1x1x32x128xf32> to vector<32x128xf32>
    %603 = vector.shape_cast %600 : vector<32x128xf32> to vector<1x1x32x128xf32>
    tpu.vector_store %arg12[%c4_428, %c5_429, %c0_430, %c0_431], %603 {strides = array<i32>} : memref<7x7x32x128xf32, #tpu.memory_space<vmem>>, vector<1x1x32x128xf32>,
    %604 = arith.mulf %233, %467 : vector<32x128xf32>
    %c4_432 = arith.constant 4 : index
    %c6_433 = arith.constant 6 : index
    %c0_434 = arith.constant 0 : index
    %c0_435 = arith.constant 0 : index
    %605 = vector.load %arg12[%c4_432, %c6_433, %c0_434, %c0_435] : memref<7x7x32x128xf32, #tpu.memory_space<vmem>>, vector<1x1x32x128xf32>
    %606 = vector.shape_cast %605 : vector<1x1x32x128xf32> to vector<32x128xf32>
    %607 = vector.shape_cast %604 : vector<32x128xf32> to vector<1x1x32x128xf32>
    tpu.vector_store %arg12[%c4_432, %c6_433, %c0_434, %c0_435], %607 {strides = array<i32>} : memref<7x7x32x128xf32, #tpu.memory_space<vmem>>, vector<1x1x32x128xf32>,
    %608 = arith.mulf %259, %311 : vector<32x128xf32>
    %c5_436 = arith.constant 5 : index
    %c0_437 = arith.constant 0 : index
    %c0_438 = arith.constant 0 : index
    %c0_439 = arith.constant 0 : index
    %609 = vector.load %arg12[%c5_436, %c0_437, %c0_438, %c0_439] : memref<7x7x32x128xf32, #tpu.memory_space<vmem>>, vector<1x1x32x128xf32>
    %610 = vector.shape_cast %609 : vector<1x1x32x128xf32> to vector<32x128xf32>
    %611 = vector.shape_cast %608 : vector<32x128xf32> to vector<1x1x32x128xf32>
    tpu.vector_store %arg12[%c5_436, %c0_437, %c0_438, %c0_439], %611 {strides = array<i32>} : memref<7x7x32x128xf32, #tpu.memory_space<vmem>>, vector<1x1x32x128xf32>,
    %612 = arith.mulf %259, %337 : vector<32x128xf32>
    %c5_440 = arith.constant 5 : index
    %c1_441 = arith.constant 1 : index
    %c0_442 = arith.constant 0 : index
    %c0_443 = arith.constant 0 : index
    %613 = vector.load %arg12[%c5_440, %c1_441, %c0_442, %c0_443] : memref<7x7x32x128xf32, #tpu.memory_space<vmem>>, vector<1x1x32x128xf32>
    %614 = vector.shape_cast %613 : vector<1x1x32x128xf32> to vector<32x128xf32>
    %615 = vector.shape_cast %612 : vector<32x128xf32> to vector<1x1x32x128xf32>
    tpu.vector_store %arg12[%c5_440, %c1_441, %c0_442, %c0_443], %615 {strides = array<i32>} : memref<7x7x32x128xf32, #tpu.memory_space<vmem>>, vector<1x1x32x128xf32>,
    %616 = arith.mulf %259, %363 : vector<32x128xf32>
    %c5_444 = arith.constant 5 : index
    %c2_445 = arith.constant 2 : index
    %c0_446 = arith.constant 0 : index
    %c0_447 = arith.constant 0 : index
    %617 = vector.load %arg12[%c5_444, %c2_445, %c0_446, %c0_447] : memref<7x7x32x128xf32, #tpu.memory_space<vmem>>, vector<1x1x32x128xf32>
    %618 = vector.shape_cast %617 : vector<1x1x32x128xf32> to vector<32x128xf32>
    %619 = vector.shape_cast %616 : vector<32x128xf32> to vector<1x1x32x128xf32>
    tpu.vector_store %arg12[%c5_444, %c2_445, %c0_446, %c0_447], %619 {strides = array<i32>} : memref<7x7x32x128xf32, #tpu.memory_space<vmem>>, vector<1x1x32x128xf32>,
    %620 = arith.mulf %259, %389 : vector<32x128xf32>
    %c5_448 = arith.constant 5 : index
    %c3_449 = arith.constant 3 : index
    %c0_450 = arith.constant 0 : index
    %c0_451 = arith.constant 0 : index
    %621 = vector.load %arg12[%c5_448, %c3_449, %c0_450, %c0_451] : memref<7x7x32x128xf32, #tpu.memory_space<vmem>>, vector<1x1x32x128xf32>
    %622 = vector.shape_cast %621 : vector<1x1x32x128xf32> to vector<32x128xf32>
    %623 = vector.shape_cast %620 : vector<32x128xf32> to vector<1x1x32x128xf32>
    tpu.vector_store %arg12[%c5_448, %c3_449, %c0_450, %c0_451], %623 {strides = array<i32>} : memref<7x7x32x128xf32, #tpu.memory_space<vmem>>, vector<1x1x32x128xf32>,
    %624 = arith.mulf %259, %415 : vector<32x128xf32>
    %c5_452 = arith.constant 5 : index
    %c4_453 = arith.constant 4 : index
    %c0_454 = arith.constant 0 : index
    %c0_455 = arith.constant 0 : index
    %625 = vector.load %arg12[%c5_452, %c4_453, %c0_454, %c0_455] : memref<7x7x32x128xf32, #tpu.memory_space<vmem>>, vector<1x1x32x128xf32>
    %626 = vector.shape_cast %625 : vector<1x1x32x128xf32> to vector<32x128xf32>
    %627 = vector.shape_cast %624 : vector<32x128xf32> to vector<1x1x32x128xf32>
    tpu.vector_store %arg12[%c5_452, %c4_453, %c0_454, %c0_455], %627 {strides = array<i32>} : memref<7x7x32x128xf32, #tpu.memory_space<vmem>>, vector<1x1x32x128xf32>,
    %628 = arith.mulf %259, %441 : vector<32x128xf32>
    %c5_456 = arith.constant 5 : index
    %c5_457 = arith.constant 5 : index
    %c0_458 = arith.constant 0 : index
    %c0_459 = arith.constant 0 : index
    %629 = vector.load %arg12[%c5_456, %c5_457, %c0_458, %c0_459] : memref<7x7x32x128xf32, #tpu.memory_space<vmem>>, vector<1x1x32x128xf32>
    %630 = vector.shape_cast %629 : vector<1x1x32x128xf32> to vector<32x128xf32>
    %631 = vector.shape_cast %628 : vector<32x128xf32> to vector<1x1x32x128xf32>
    tpu.vector_store %arg12[%c5_456, %c5_457, %c0_458, %c0_459], %631 {strides = array<i32>} : memref<7x7x32x128xf32, #tpu.memory_space<vmem>>, vector<1x1x32x128xf32>,
    %632 = arith.mulf %259, %467 : vector<32x128xf32>
    %c5_460 = arith.constant 5 : index
    %c6_461 = arith.constant 6 : index
    %c0_462 = arith.constant 0 : index
    %c0_463 = arith.constant 0 : index
    %633 = vector.load %arg12[%c5_460, %c6_461, %c0_462, %c0_463] : memref<7x7x32x128xf32, #tpu.memory_space<vmem>>, vector<1x1x32x128xf32>
    %634 = vector.shape_cast %633 : vector<1x1x32x128xf32> to vector<32x128xf32>
    %635 = vector.shape_cast %632 : vector<32x128xf32> to vector<1x1x32x128xf32>
    tpu.vector_store %arg12[%c5_460, %c6_461, %c0_462, %c0_463], %635 {strides = array<i32>} : memref<7x7x32x128xf32, #tpu.memory_space<vmem>>, vector<1x1x32x128xf32>,
    %636 = arith.mulf %285, %311 : vector<32x128xf32>
    %c6_464 = arith.constant 6 : index
    %c0_465 = arith.constant 0 : index
    %c0_466 = arith.constant 0 : index
    %c0_467 = arith.constant 0 : index
    %637 = vector.load %arg12[%c6_464, %c0_465, %c0_466, %c0_467] : memref<7x7x32x128xf32, #tpu.memory_space<vmem>>, vector<1x1x32x128xf32>
    %638 = vector.shape_cast %637 : vector<1x1x32x128xf32> to vector<32x128xf32>
    %639 = vector.shape_cast %636 : vector<32x128xf32> to vector<1x1x32x128xf32>
    tpu.vector_store %arg12[%c6_464, %c0_465, %c0_466, %c0_467], %639 {strides = array<i32>} : memref<7x7x32x128xf32, #tpu.memory_space<vmem>>, vector<1x1x32x128xf32>,
    %640 = arith.mulf %285, %337 : vector<32x128xf32>
    %c6_468 = arith.constant 6 : index
    %c1_469 = arith.constant 1 : index
    %c0_470 = arith.constant 0 : index
    %c0_471 = arith.constant 0 : index
    %641 = vector.load %arg12[%c6_468, %c1_469, %c0_470, %c0_471] : memref<7x7x32x128xf32, #tpu.memory_space<vmem>>, vector<1x1x32x128xf32>
    %642 = vector.shape_cast %641 : vector<1x1x32x128xf32> to vector<32x128xf32>
    %643 = vector.shape_cast %640 : vector<32x128xf32> to vector<1x1x32x128xf32>
    tpu.vector_store %arg12[%c6_468, %c1_469, %c0_470, %c0_471], %643 {strides = array<i32>} : memref<7x7x32x128xf32, #tpu.memory_space<vmem>>, vector<1x1x32x128xf32>,
    %644 = arith.mulf %285, %363 : vector<32x128xf32>
    %c6_472 = arith.constant 6 : index
    %c2_473 = arith.constant 2 : index
    %c0_474 = arith.constant 0 : index
    %c0_475 = arith.constant 0 : index
    %645 = vector.load %arg12[%c6_472, %c2_473, %c0_474, %c0_475] : memref<7x7x32x128xf32, #tpu.memory_space<vmem>>, vector<1x1x32x128xf32>
    %646 = vector.shape_cast %645 : vector<1x1x32x128xf32> to vector<32x128xf32>
    %647 = vector.shape_cast %644 : vector<32x128xf32> to vector<1x1x32x128xf32>
    tpu.vector_store %arg12[%c6_472, %c2_473, %c0_474, %c0_475], %647 {strides = array<i32>} : memref<7x7x32x128xf32, #tpu.memory_space<vmem>>, vector<1x1x32x128xf32>,
    %648 = arith.mulf %285, %389 : vector<32x128xf32>
    %c6_476 = arith.constant 6 : index
    %c3_477 = arith.constant 3 : index
    %c0_478 = arith.constant 0 : index
    %c0_479 = arith.constant 0 : index
    %649 = vector.load %arg12[%c6_476, %c3_477, %c0_478, %c0_479] : memref<7x7x32x128xf32, #tpu.memory_space<vmem>>, vector<1x1x32x128xf32>
    %650 = vector.shape_cast %649 : vector<1x1x32x128xf32> to vector<32x128xf32>
    %651 = vector.shape_cast %648 : vector<32x128xf32> to vector<1x1x32x128xf32>
    tpu.vector_store %arg12[%c6_476, %c3_477, %c0_478, %c0_479], %651 {strides = array<i32>} : memref<7x7x32x128xf32, #tpu.memory_space<vmem>>, vector<1x1x32x128xf32>,
    %652 = arith.mulf %285, %415 : vector<32x128xf32>
    %c6_480 = arith.constant 6 : index
    %c4_481 = arith.constant 4 : index
    %c0_482 = arith.constant 0 : index
    %c0_483 = arith.constant 0 : index
    %653 = vector.load %arg12[%c6_480, %c4_481, %c0_482, %c0_483] : memref<7x7x32x128xf32, #tpu.memory_space<vmem>>, vector<1x1x32x128xf32>
    %654 = vector.shape_cast %653 : vector<1x1x32x128xf32> to vector<32x128xf32>
    %655 = vector.shape_cast %652 : vector<32x128xf32> to vector<1x1x32x128xf32>
    tpu.vector_store %arg12[%c6_480, %c4_481, %c0_482, %c0_483], %655 {strides = array<i32>} : memref<7x7x32x128xf32, #tpu.memory_space<vmem>>, vector<1x1x32x128xf32>,
    %656 = arith.mulf %285, %441 : vector<32x128xf32>
    %c6_484 = arith.constant 6 : index
    %c5_485 = arith.constant 5 : index
    %c0_486 = arith.constant 0 : index
    %c0_487 = arith.constant 0 : index
    %657 = vector.load %arg12[%c6_484, %c5_485, %c0_486, %c0_487] : memref<7x7x32x128xf32, #tpu.memory_space<vmem>>, vector<1x1x32x128xf32>
    %658 = vector.shape_cast %657 : vector<1x1x32x128xf32> to vector<32x128xf32>
    %659 = vector.shape_cast %656 : vector<32x128xf32> to vector<1x1x32x128xf32>
    tpu.vector_store %arg12[%c6_484, %c5_485, %c0_486, %c0_487], %659 {strides = array<i32>} : memref<7x7x32x128xf32, #tpu.memory_space<vmem>>, vector<1x1x32x128xf32>,
    %660 = arith.mulf %285, %467 : vector<32x128xf32>
    %c6_488 = arith.constant 6 : index
    %c6_489 = arith.constant 6 : index
    %c0_490 = arith.constant 0 : index
    %c0_491 = arith.constant 0 : index
    %661 = vector.load %arg12[%c6_488, %c6_489, %c0_490, %c0_491] : memref<7x7x32x128xf32, #tpu.memory_space<vmem>>, vector<1x1x32x128xf32>
    %662 = vector.shape_cast %661 : vector<1x1x32x128xf32> to vector<32x128xf32>
    %663 = vector.shape_cast %660 : vector<32x128xf32> to vector<1x1x32x128xf32>
    tpu.vector_store %arg12[%c6_488, %c6_489, %c0_490, %c0_491], %663 {strides = array<i32>} : memref<7x7x32x128xf32, #tpu.memory_space<vmem>>, vector<1x1x32x128xf32>,
    return
  }
  func.func @transform_0(%arg0: i32) -> (i32, i32, i32, i32) {
    %c0_i32 = arith.constant 0 : i32
    %c0_i32_0 = arith.constant 0 : i32
    %c0_i32_1 = arith.constant 0 : i32
    %c0_i32_2 = arith.constant 0 : i32
    return %c0_i32, %c0_i32_0, %c0_i32_1, %arg0 : i32, i32, i32, i32
  }
  func.func @transform_1(%arg0: i32) -> (i32, i32, i32, i32) {
    %c0_i32 = arith.constant 0 : i32
    %c0_i32_0 = arith.constant 0 : i32
    %c0_i32_1 = arith.constant 0 : i32
    %c0_i32_2 = arith.constant 0 : i32
    %c0_i32_3 = arith.constant 0 : i32
    return %c0_i32, %c0_i32_0, %c0_i32_1, %c0_i32_2 : i32, i32, i32, i32
  }
  func.func @transform_2(%arg0: i32) -> (i32, i32, i32) {
    %c0_i32 = arith.constant 0 : i32
    %c0_i32_0 = arith.constant 0 : i32
    %c0_i32_1 = arith.constant 0 : i32
    %c0_i32_2 = arith.constant 0 : i32
    return %c0_i32, %c0_i32_0, %c0_i32_1 : i32, i32, i32
  }
  func.func @transform_3(%arg0: i32) -> (i32, i32, i32, i32) {
    %c0_i32 = arith.constant 0 : i32
    %c0_i32_0 = arith.constant 0 : i32
    %c0_i32_1 = arith.constant 0 : i32
    %c0_i32_2 = arith.constant 0 : i32
    %c0_i32_3 = arith.constant 0 : i32
    return %c0_i32, %c0_i32_0, %c0_i32_1, %c0_i32_2 : i32, i32, i32, i32
  }
  func.func @transform_4(%arg0: i32) -> (i32, i32, i32) {
    %c0_i32 = arith.constant 0 : i32
    %c0_i32_0 = arith.constant 0 : i32
    %c0_i32_1 = arith.constant 0 : i32
    %c0_i32_2 = arith.constant 0 : i32
    return %c0_i32, %c0_i32_0, %c0_i32_1 : i32, i32, i32
  }
  func.func @transform_5(%arg0: i32) -> (i32, i32) {
    %c0_i32 = arith.constant 0 : i32
    %c0_i32_0 = arith.constant 0 : i32
    %c0_i32_1 = arith.constant 0 : i32
    return %c0_i32, %c0_i32_0 : i32, i32
  }
  func.func @transform_6(%arg0: i32) -> (i32, i32) {
    %c0_i32 = arith.constant 0 : i32
    %c0_i32_0 = arith.constant 0 : i32
    %c0_i32_1 = arith.constant 0 : i32
    return %c0_i32, %c0_i32_0 : i32, i32
  }
  func.func @transform_7(%arg0: i32) -> (i32, i32) {
    %c0_i32 = arith.constant 0 : i32
    %c0_i32_0 = arith.constant 0 : i32
    %c0_i32_1 = arith.constant 0 : i32
    return %c0_i32, %c0_i32_0 : i32, i32
  }
  func.func @transform_8(%arg0: i32) -> (i32, i32) {
    %c0_i32 = arith.constant 0 : i32
    %c0_i32_0 = arith.constant 0 : i32
    %c0_i32_1 = arith.constant 0 : i32
    return %c0_i32, %c0_i32_0 : i32, i32
  }
  func.func @transform_9(%arg0: i32) -> (i32, i32) {
    %c0_i32 = arith.constant 0 : i32
    %c0_i32_0 = arith.constant 0 : i32
    %c0_i32_1 = arith.constant 0 : i32
    return %c0_i32, %c0_i32_0 : i32, i32
  }
  func.func @transform_10(%arg0: i32) -> (i32, i32) {
    %c0_i32 = arith.constant 0 : i32
    %c0_i32_0 = arith.constant 0 : i32
    %c0_i32_1 = arith.constant 0 : i32
    return %c0_i32, %c0_i32_0 : i32, i32
  }
  func.func @transform_11(%arg0: i32) -> (i32, i32, i32, i32) {
    %c0_i32 = arith.constant 0 : i32
    %c0_i32_0 = arith.constant 0 : i32
    %c0_i32_1 = arith.constant 0 : i32
    %c0_i32_2 = arith.constant 0 : i32
    return %c0_i32, %c0_i32_0, %c0_i32_1, %arg0 : i32, i32, i32, i32
  }
}

</mosaic_0001>

<bundles_post_ra>
// kernel: tpu_custom_call.1
= control target key start
LH: loop header
LB: loop body
LE: loop exit
PB: predicated region body
PF: predicated region fallthrough
CT: control target
= control target key end

     0   :  { %16 = vsyncpa [#allocation3], 0  ;;  %s10166_s0 = inlined_call_operand.hbm [shape: f32[7,7,32,256], index: 0, kind: input, shape index: {}]   ;;  %s10167_s1 = inlined_call_operand.vmem [shape: f32[7,1,32,1], index: 1, kind: input, shape index: {}]   ;;  %s10168_s2 = inlined_call_operand.vmem [shape: f32[1,32,1], index: 2, kind: input, shape index: {}]   ;;  %s10169_s3 = inlined_call_operand.vmem [shape: f32[7,1,32,1], index: 3, kind: input, shape index: {}]   ;;  %s10170_s4 = inlined_call_operand.vmem [shape: f32[1,32,1], index: 4, kind: input, shape index: {}]   ;;  %s10171_s5 = inlined_call_operand.hbm [shape: f32[8,32], index: 5, kind: input, shape index: {}]   ;;  %s10172_s6 = inlined_call_operand.vmem [shape: f32[8,1], index: 6, kind: input, shape index: {}]   ;;  %s10173_s7 = inlined_call_operand.vmem [shape: f32[32,8], index: 7, kind: input, shape index: {}]   ;;  %s10174_s8 = inlined_call_operand.vmem [shape: f32[32,1], index: 8, kind: input, shape index: {}]   ;;  %s10175_s9 = inlined_call_operand.vmem [shape: f32[32,8], index: 9, kind: input, shape index: {}]   ;;  %s10176_s10 = inlined_call_operand.vmem [shape: f32[32,1], index: 10, kind: input, shape index: {}]   ;;  %s10177_s11 = inlined_call_operand.hbm [shape: f32[7,7,32,256], index: 11, kind: output, shape index: {}]  }
   0x1   :  { %18 = vsyncpa [#allocation3 + $0x1], 0 }
   0x2   :  { %19 = vsyncpa [#allocation6], 0 }
   0x3   :  { %20 = vsyncpa [#allocation4], 0 }
   0x4   :  { %22 = vsyncpa [#allocation4 + $0x1], 0  ;;  %s6869_s17 = smov 0   ;;  %s6871_s18 = smov 0  }
   0x5   :  { %s6873_s19 = smov 0   ;;  %s6875_s20 = smov 0  }
   0x6 LB: > { %10319 = sst [smem:[#allocation11_spill]] %s6782_s17  ;;  %s6890_s21 = sadd.s32 4294967295, %s6794_s20   ;;  %s6794_s20 = sphi %s6875_s20, %s10797_s20   ;;  %s6790_s19 = sphi %s6873_s19, %s10799_s19   ;;  %s6786_s18 = sphi %s6871_s18, %s10801_s18   ;;  %s6782_s17 = sphi %s6869_s17, %s10800_s17  }
   0x7   : > { %10320 = sst [smem:[#allocation12_spill]] %s6790_s19  ;;  %s5205_s22 = sadd.s32 4294967294, %s6794_s20  }
   0x8   : > { %s6894_s23 = sadd.s32 1, %s6794_s20   ;;  %s35_s24 = sadd.s32 1, %s6790_s19 }
   0x9   : > { %10321 = sst [smem:[#allocation13_spill]] %s6894_s23  ;;  %s32_s25 = ssub.s32 %s6794_s20, %s6894_s23 }
   0xa   : > { %p42_p0 = scmp.ne.s32.totalorder %s6790_s19, %s6786_s18  ;;  %p33_p1 = scmp.eq.s32.totalorder %s32_s25, 0 }
   0xb   : > { %p43_p2 = scmp.eq.s32.totalorder %s6794_s20, 0  ;;  %p48_p3 = scmp.ne.s32.totalorder %s6786_s18, %s6782_s17 }
   0xc   : > { %p10178_p4 = scmp.eq.s32.totalorder %s6890_s21, 0  ;;  %p282_p7 = scmp.eq.s32.totalorder %s6890_s21, 1 }
   0xd   : > { %s6906_s26 = scalar_select %p33_p1, %s6790_s19, %s35_s24  }
   0xe   : > { %p6908_p5 = por %p43_p2, %p42_p0  ;;  %p6914_p6 = por %p10178_p4, %p48_p3 }
   0xf   : > { %10322 = sst [smem:[#allocation14_spill]] %s6906_s26  ;;  %p288_p8 = scmp.eq.s32.totalorder %s5205_s22, 1 }
  0x10   : > { %s10324_s28 = scalar_select %p6914_p6, 1, 0 }
  0x11   : > { %p5206_p9 = scmp.ge.s32.totalorder %s6794_s20, 1  ;;  %p295_p10 = scmp.lt.s32.totalorder %s6794_s20, 3 }
  0x12   : > { %p6921_p11 = por %p282_p7, %p42_p0  ;;  %p6925_p12 = por %p288_p8, %p48_p3 }
  0x13   : > { %p6929_p13 = pnand %p5206_p9, %p295_p10  ;;  %s6796_s13 = smov [#allocation5]  }
  0x14   : > { %s10325_s29 = scalar_select %p6921_p11, 1, 0 }
  0x15   : > { %s10327_s30 = scalar_select %p6925_p12, 1, 0 }
  0x16   : > { %10326 = sst [smem:[#allocation15_spill]] %s10325_s29  ;;  %p6361_p2 = pneg %p6929_p13 }
  0x17   : > { %10328 = sst [smem:[#allocation16_spill]] %s10327_s30  ;;  %s320_s14 = sshll.u32 %s6796_s13, 4  ;;  %s321_s14 = int_to_ptr.vmem [resolvable:$true] %s320_s14 }
  0x18   : > { %s10329_s12 = scalar_select %p6929_p13, 1, 0 }
  0x19   : > { %p6374_p4 = scmp.lt.s32.totalorder %s6794_s20, 2  ;;  %p10330_p0 = scmp.eq.s32.totalorder %s6890_s21, 0 }
  0x1a   : > { %s346_s16 = sand.u32 1, %s6790_s19   ;;  %s6666_s23 = scalar_lea.hbm %s10171_s5, 128 }
  0x1b   : > { %p6939_p7 = pnand %p6361_p2, %p10330_p0  ;;  %p6946_p3 = pnand %p6374_p4, %p6908_p5 }
  0x1c   : > { %s6351_s24 = smul.u32 1568, %s346_s16  ;;  %p6667_p8 = scmp.ne.s32.totalorder %s10171_s5, %s6666_s23 }
  0x1d   : > { %s10332_s22 = scalar_select %p6946_p3, 1, 0 }
  0x1e   : > { %p6668_p9 = pneg %p6939_p7  ;;  %p6673_p4 = scmp.lt.u32.totalorder %s6666_s23, %s10171_s5 }
  0x20   : > { %p6669_p10 = pnand %p6668_p9, %p6667_p8 }
  0x22   : > { %p6670_p2 = pneg %p6669_p10 }
  0x24   : > { %p6675_p5 = pnand %p6673_p4, %p6670_p2 }
  0x26   : > { %6678 = shalt.err (!%p6675_p5)
}
  0x27   : > { %s6679_s27 = scalar_lea.vmem %s321_s14, 128  ;;  %p6687_p11 = scmp.lt.s32.totalorder %s321_s14, %s321_s14 }
  0x28   : > { %p6680_p0 = scmp.ne.s32.totalorder %s321_s14, %s6679_s27  ;;  %p6688_p6 = scmp.lt.s32.totalorder %s6679_s27, %s6679_s27 }
  0x2a   : > { %p6682_p1 = pnand %p6680_p0, %p6668_p9  ;;  %p6689_p13 = por %p6688_p6, %p6687_p11 }
  0x2c   : > { %p6683_p12 = pneg %p6682_p1 }
  0x2e   : > { %p6690_p3 = pnand %p6689_p13, %p6683_p12 }
  0x30   : > { %6693 = shalt.err (!%p6690_p3)
}
  0x31   : > { %6364 = dma.hbm_to_vmem [thread:$0]  (!%p6939_p7), %s10171_s5, 128, %s321_s14, [#allocation6]  }
  0x32   : > { %s5209_s17 = sshll.u32 %s6794_s20, 7  ;;  %s350_s19 = scalar_lea.vmem [#allocation2], %s6351_s24 }
  0x33   : > { %s356_s23 = sshll.u32 %s350_s19, 4  ;;  %s6970_s29 = scalar_lea.hbm %s10166_s0, %s5209_s17  ;;  %s6972_s23 = int_to_ptr.vmem [resolvable:$true] %s356_s23 }
  0x34   : > { %s6974_s15 = scalar_lea.sflag [#allocation3], %s346_s16  ;;  %s6694_s27 = scalar_lea.hbm %s6970_s29, 25088 }
  0x35   : > { %p6695_p6 = scmp.ne.s32.totalorder %s6970_s29, %s6694_s27  ;;  %p10333_p11 = scmp.ne.s32.totalorder %s10332_s22, 0 }
  0x36   : > { %s6699_s26 = scalar_lea.hbm %s10166_s0, 50176  ;;  %p6700_p7 = scmp.lt.u32.totalorder %s6970_s29, %s10166_s0 }
  0x37   : > { %p6696_p12 = pneg %p10333_p11  ;;  %p6701_p3 = scmp.lt.u32.totalorder %s6699_s26, %s6694_s27 }
  0x38   : > { %p6703_p9 = scmp.lt.u32.totalorder %s6694_s27, %s6970_s29 }
  0x39   : > { %p6697_p13 = pnand %p6696_p12, %p6695_p6  ;;  %p6702_p8 = por %p6701_p3, %p6700_p7 }
  0x3b   : > { %p6698_p1 = pneg %p6697_p13  ;;  %p6704_p10 = por %p6703_p9, %p6702_p8 }
  0x3d   : > { %p6705_p2 = pnand %p6704_p10, %p6698_p1 }
  0x3f   : > { %6708 = shalt.err (!%p6705_p2)
}
  0x40   : > { %s6709_s16 = scalar_lea.vmem %s6972_s23, 25088  ;;  %s6797_s19 = smov [#allocation2]  }
  0x41   : > { %p6710_p4 = scmp.ne.s32.totalorder %s6972_s23, %s6709_s16  ;;  %s6714_s25 = sshll.u32 %s6797_s19, 4  ;;  %s6715_s25 = int_to_ptr.vmem [resolvable:$false] %s6714_s25 }
  0x42   : > { %s6716_s13 = scalar_lea.vmem %s6715_s25, 50176  ;;  %p6717_p6 = scmp.lt.s32.totalorder %s6972_s23, %s6715_s25 }
  0x43   : > { %p6712_p5 = pnand %p6710_p4, %p6696_p12  ;;  %p6718_p13 = scmp.lt.s32.totalorder %s6716_s13, %s6709_s16 }
  0x45   : > { %p6713_p0 = pneg %p6712_p5  ;;  %p6719_p7 = por %p6718_p13, %p6717_p6 }
  0x47   : > { %p6720_p3 = pnand %p6719_p7, %p6713_p0 }
  0x49   : > { %6723 = shalt.err (!%p6720_p3)
}
  0x4a   : > { %s6798_s27 = smov 256   ;;  %s6799_s14 = smov 128  }
  0x4b   : > { %s6800_s24 = smov 8   ;;  %p10334_p12 = scmp.ne.s32.totalorder %s10329_s12, 0 }
  0x4c   : > { %6368 = dma.hbm_to_vmem [thread:$0]  (!%p10333_p11), %s6970_s29, 25088, %s6972_s23, %s6974_s15, %s6798_s27, %s6799_s14, %s6800_s24  }
  0x4d   : > { %368 = sbr.rel (%p10334_p12) target bundleno = 1614 (0x64e), region = 64 }
  0x54   : > { %s7005_s26 = sand.u32 1, %s6786_s18   ;;  %p10335_p1 = scmp.ne.s32.totalorder %s10324_s28, 0 }
  0x55   : > { %s6352_s30 = smul.u32 1568, %s7005_s26  ;;  %s371_s17 = scalar_lea.sflag [#allocation3], %s7005_s26 }
  0x57   : > { %s7011_s16 = scalar_lea.vmem [#allocation2], %s6352_s30 }
  0x58   : > { %6769 = dma.done.wait (%p10335_p1), %s371_s17, 25088  }
  0x59   : > { %6771 = vsyncadd (%p10335_p1), %s371_s17, 4294942208  ;;  %p10336_p11 = scmp.eq.s32.totalorder %s6890_s21, 0 }
  0x5b   : > { %6773 = dma.done.wait (%p10336_p11), [#allocation6], 128   ;;  %p10337_p8 = pmov %p10336_p11 }
  0x5c   : > { %v6801_v0 = vmov 0   ;;  %v449_v1 = vld [vmem:[%s10167_s1] sm:$0xff]  ;;  %v450_v3 = vld [vmem:[%s10167_s1 + $0x8] sm:$0xff]  ;;  %v451_v7 = vld [vmem:[%s10167_s1 + $0x10] sm:$0xff]  ;;  %v10192_v33 = vmov 0.0|0.0   ;;  %vm6803_vm0 = vmmov 0  }
  0x5d   : > { %6775 = vsyncadd (%p10337_p8), [#allocation6], 4294967168  ;;  %6421 = vset.pattern.permute.xlu1 %v6801_v0  ;;  %6420 = vset.pattern.permute.xlu0 %v6801_v0  ;;  %v417_v2 = vld [vmem:[%s10168_s2] sm:$0xff]  ;;  %v418_v4 = vld [vmem:[%s10168_s2 + $0x8] sm:$0xff]  ;;  %v10190_v42 = vmov 0.0   ;;  %vm2008_vm1 = vcmask 261120  }
  0x5e   : > { %455 = vperm.xlu0 %6420, %v449_v1   ;;  %503 = vperm.xlu1 %6421, %v417_v2   ;;  %v5240_v5 = vld [vmem:[%s10167_s1 + $0x20] sm:$0xff]  ;;  %v5241_v6 = vld [vmem:[%s10167_s1 + $0x28] sm:$0xff]  ;;  %v452_v8 = vld [vmem:[%s10167_s1 + $0x18] sm:$0xff]  ;;  %vm2115_vm2 = vcmask 64512   ;;  %s9631_s15 = scalar_lea.vmem [#allocation7], %s6352_s30  ;;  %s5858_s30 = sshll.u32 %s6890_s21, 7 }
  0x5f   : > { %v5272_v9 = vld [vmem:[%s10167_s1 + $0x40] sm:$0xff]  ;;  %v5273_v10 = vld [vmem:[%s10167_s1 + $0x48] sm:$0xff]  ;;  %v419_v11 = vld [vmem:[%s10168_s2 + $0x10] sm:$0xff]  ;;  %6267 = vmatprep.subr.bf16.mxu0 %v10192_v33  ;;  %6009 = vmatprep.mubr.msk.f32.mxu0 %vm6803_vm0, %v10190_v42  ;;  %s5122_s19 = sshll.u32 %s9631_s15, 4  ;;  %s10096_s13 = scalar_lea.hbm %s10177_s11, %s5858_s30  ;;  %s10106_s19 = int_to_ptr.vmem [resolvable:$true] %s5122_s19 }
  0x60   : > { %v420_v12 = vld [vmem:[%s10168_s2 + $0x18] sm:$0xff]  ;;  %v5242_v13 = vld [vmem:[%s10167_s1 + $0x30] sm:$0xff]  ;;  %v5304_v15 = vld [vmem:[%s10167_s1 + $0x60] sm:$0xff]  ;;  %s10791_s27 = sld [smem:[#allocation15_spill]]  ;;  %s5110_s14 = scalar_lea.sflag [#allocation4], %s7005_s26 }
  0x61   : > { %v5243_v14 = vld [vmem:[%s10167_s1 + $0x38] sm:$0xff]  ;;  %v5305_v16 = vld [vmem:[%s10167_s1 + $0x68] sm:$0xff]  ;;  %v5274_v17 = vld [vmem:[%s10167_s1 + $0x50] sm:$0xff]  ;;  %s6805_s24 = smov [#allocation7]  }
  0x62   : > { %460 = vperm.xlu0 %6420, %v450_v3   ;;  %508 = vperm.xlu1 %6421, %v418_v4   ;;  %v5275_v18 = vld [vmem:[%s10167_s1 + $0x58] sm:$0xff]  ;;  %v5336_v19 = vld [vmem:[%s10167_s1 + $0x80] sm:$0xff]  ;;  %v5337_v20 = vld [vmem:[%s10167_s1 + $0x88] sm:$0xff]  ;;  %s6728_s17 = sshll.u32 %s6805_s24, 4  ;;  %s6729_s17 = int_to_ptr.vmem [resolvable:$false] %s6728_s17 }
  0x63   : > { %v5306_v21 = vld [vmem:[%s10167_s1 + $0x70] sm:$0xff]  ;;  %v5307_v22 = vld [vmem:[%s10167_s1 + $0x78] sm:$0xff]  ;;  %v5368_v23 = vld [vmem:[%s10167_s1 + $0xa0] sm:$0xff]  ;;  %s6730_s29 = scalar_lea.vmem %s6729_s17, 50176  ;;  %p6731_p5 = scmp.lt.s32.totalorder %s10106_s19, %s6729_s17 }
  0x64   : > { %v5369_v24 = vld [vmem:[%s10167_s1 + $0xa8] sm:$0xff]  ;;  %v5338_v25 = vld [vmem:[%s10167_s1 + $0x90] sm:$0xff]  ;;  %v5339_v26 = vld [vmem:[%s10167_s1 + $0x98] sm:$0xff] }
  0x65   : > { %v5400_v27 = vld [vmem:[%s10167_s1 + $0xc0] sm:$0xff]  ;;  %v5401_v28 = vld [vmem:[%s10167_s1 + $0xc8] sm:$0xff]  ;;  %v5370_v29 = vld [vmem:[%s10167_s1 + $0xb0] sm:$0xff] }
  0x66   : > { %585 = vperm.xlu0 %6420, %v5240_v5   ;;  %590 = vperm.xlu1 %6421, %v5241_v6   ;;  %v5371_v30 = vld [vmem:[%s10167_s1 + $0xb8] sm:$0xff]  ;;  %v5402_v31 = vld [vmem:[%s10167_s1 + $0xd0] sm:$0xff]  ;;  %v2002_v34 = vld [vmem:[%s10172_s6] sm:$0xff]  ;;  %p10792_p10 = scmp.ne.s32.totalorder %s10791_s27, 0 }
  0x67   : > { %v5403_v32 = vld [vmem:[%s10167_s1 + $0xd8] sm:$0xff]  ;;  %v1241_v35 = vld [vmem:[%s10169_s3] sm:$0xff]  ;;  %v1242_v36 = vld [vmem:[%s10169_s3 + $0x8] sm:$0xff] }
  0x68   : > { %v1209_v37 = vld [vmem:[%s10170_s4] sm:$0xff]  ;;  %v1210_v38 = vld [vmem:[%s10170_s4 + $0x8] sm:$0xff]  ;;  %v1243_v41 = vld [vmem:[%s10169_s3 + $0x10] sm:$0xff] }
  0x69   : > { %v5432_v39 = vld [vmem:[%s10169_s3 + $0x20] sm:$0xff]  ;;  %v5433_v40 = vld [vmem:[%s10169_s3 + $0x28] sm:$0xff]  ;;  %v1244_v43 = vld [vmem:[%s10169_s3 + $0x18] sm:$0xff] }
  0x6a   : > { %465 = vperm.xlu0 %6420, %v451_v7   ;;  %470 = vperm.xlu1 %6421, %v452_v8   ;;  %v5464_v44 = vld [vmem:[%s10169_s3 + $0x40] sm:$0xff]  ;;  %v5465_v45 = vld [vmem:[%s10169_s3 + $0x48] sm:$0xff]  ;;  %v1211_v46 = vld [vmem:[%s10170_s4 + $0x10] sm:$0xff] }
  0x6b   : > { %v1212_v47 = vld [vmem:[%s10170_s4 + $0x18] sm:$0xff]  ;;  %v5434_v48 = vld [vmem:[%s10169_s3 + $0x30] sm:$0xff]  ;;  %v5496_v50 = vld [vmem:[%s10169_s3 + $0x60] sm:$0xff] }
  0x6c   : > { %v5435_v49 = vld [vmem:[%s10169_s3 + $0x38] sm:$0xff]  ;;  %v5497_v51 = vld [vmem:[%s10169_s3 + $0x68] sm:$0xff]  ;;  %v5466_v52 = vld [vmem:[%s10169_s3 + $0x50] sm:$0xff] }
  0x6d   : > { %v5467_v53 = vld [vmem:[%s10169_s3 + $0x58] sm:$0xff]  ;;  %v5528_v54 = vld [vmem:[%s10169_s3 + $0x80] sm:$0xff]  ;;  %v5529_v55 = vld [vmem:[%s10169_s3 + $0x88] sm:$0xff] }
  0x6e   : > { %695 = vperm.xlu0 %6420, %v5272_v9   ;;  %700 = vperm.xlu1 %6421, %v5273_v10   ;;  %v5498_v56 = vld [vmem:[%s10169_s3 + $0x70] sm:$0xff]  ;;  %v5499_v57 = vld [vmem:[%s10169_s3 + $0x78] sm:$0xff]  ;;  %v5560_v58 = vld [vmem:[%s10169_s3 + $0xa0] sm:$0xff] }
  0x6f   : > { %v5561_v59 = vld [vmem:[%s10169_s3 + $0xa8] sm:$0xff]  ;;  %v5530_v60 = vld [vmem:[%s10169_s3 + $0x90] sm:$0xff]  ;;  %v5531_v61 = vld [vmem:[%s10169_s3 + $0x98] sm:$0xff] }
  0x70   : > { %v5592_v62 = vld [vmem:[%s10169_s3 + $0xc0] sm:$0xff]  ;;  %v5593_v63 = vld [vmem:[%s10169_s3 + $0xc8] sm:$0xff]  ;;  %v5562_v0 = vld [vmem:[%s10169_s3 + $0xb0] sm:$0xff] }
  0x71   : > { %v5563_v1 = vld [vmem:[%s10169_s3 + $0xb8] sm:$0xff]  ;;  %v5594_v2 = vld [vmem:[%s10169_s3 + $0xd0] sm:$0xff]  ;;  %v425_v3 = vld [vmem:[%s7011_s16 + $0xe0] sm:$0xff] }
  0x72   : > { %513 = vperm.xlu0 %6420, %v419_v11   ;;  %518 = vperm.xlu1 %6421, %v420_v12   ;;  %v429_v4 = vld [vmem:[%s7011_s16 + $0x1c0] sm:$0xff]  ;;  %v5595_v6 = vld [vmem:[%s10169_s3 + $0xd8] sm:$0xff] }
  0x73   : > { %v437_v5 = vld [vmem:[%s7011_s16 + $0x380] sm:$0xff] }
  0x74   : > { %v441_v7 = vld [vmem:[%s7011_s16 + $0x460] sm:$0xff] }
  0x75   : > { %v445_v8 = vld [vmem:[%s7011_s16 + $0x540] sm:$0xff] }
  0x76   : > { %595 = vperm.xlu0 %6420, %v5242_v13   ;;  %600 = vperm.xlu1 %6421, %v5243_v14   ;;  %v2091_v9 = vld [vmem:[%s10174_s8] sm:$0xff]  ;;  %v426_v14 = vld [vmem:[%s7011_s16 + $0xe8] sm:$0xff] }
  0x77   : > { %v5264_v42 = vld [vmem:[%s7011_s16 + $0x4a0] sm:$0xff] }
  0x78   : > { %v5268_v33 = vld [vmem:[%s7011_s16 + $0x580] sm:$0xff] }
  0x7a   : > { %805 = vperm.xlu0 %6420, %v5304_v15   ;;  %810 = vperm.xlu1 %6421, %v5305_v16  }
  0x7e   : > { %705 = vperm.xlu0 %6420, %v5274_v17   ;;  %710 = vperm.xlu1 %6421, %v5275_v18   ;;  %v430_v18 = vld [vmem:[%s7011_s16 + $0x1c8] sm:$0xff] }
  0x82   : > { %915 = vperm.xlu0 %6420, %v5336_v19   ;;  %920 = vperm.xlu1 %6421, %v5337_v20   ;;  %v438_v19 = vld [vmem:[%s7011_s16 + $0x388] sm:$0xff] }
  0x83   : > { %v2092_v20 = vld [vmem:[%s10174_s8 + $0x8] sm:$0xff] }
  0x86   : > { %815 = vperm.xlu0 %6420, %v5306_v21   ;;  %820 = vperm.xlu1 %6421, %v5307_v22  }
  0x8a   : > { %1025 = vperm.xlu0 %6420, %v5368_v23   ;;  %1030 = vperm.xlu1 %6421, %v5369_v24   ;;  %v442_v23 = vld [vmem:[%s7011_s16 + $0x468] sm:$0xff] }
  0x8b   : > { %v446_v24 = vld [vmem:[%s7011_s16 + $0x548] sm:$0xff] }
  0x8e   : > { %925 = vperm.xlu0 %6420, %v5338_v25   ;;  %930 = vperm.xlu1 %6421, %v5339_v26   ;;  %v2093_v25 = vld [vmem:[%s10174_s8 + $0x10] sm:$0xff] }
  0x92   : > { %1135 = vperm.xlu0 %6420, %v5400_v27   ;;  %1140 = vperm.xlu1 %6421, %v5401_v28  }
  0x96   : > { %1035 = vperm.xlu0 %6420, %v5370_v29   ;;  %1040 = vperm.xlu1 %6421, %v5371_v30  }
  0x9a   : > { %1145 = vperm.xlu0 %6420, %v5402_v31   ;;  %1150 = vperm.xlu1 %6421, %v5403_v32  }
  0x9e   : > { %2005 = vperm.xlu0 %6420, %v2002_v34   ;;  %1247 = vperm.xlu1 %6421, %v1241_v35   ;;  %v5216_v34 = vld [vmem:[%s7011_s16 + $0x100] sm:$0xff] }
  0x9f   : > { %v5220_v35 = vld [vmem:[%s7011_s16 + $0x1e0] sm:$0xff] }
  0xa2   : > { %1252 = vperm.xlu0 %6420, %v1242_v36   ;;  %1295 = vperm.xlu1 %6421, %v1209_v37   ;;  %v5228_v36 = vld [vmem:[%s7011_s16 + $0x3a0] sm:$0xff] }
  0xa6   : > { %1300 = vperm.xlu0 %6420, %v1210_v38   ;;  %1377 = vperm.xlu1 %6421, %v5432_v39  }
  0xaa   : > { %1382 = vperm.xlu0 %6420, %v5433_v40   ;;  %1257 = vperm.xlu1 %6421, %v1243_v41   ;;  %v5232_v40 = vld [vmem:[%s7011_s16 + $0x480] sm:$0xff] }
  0xab   : > { %v5236_v41 = vld [vmem:[%s7011_s16 + $0x560] sm:$0xff] }
  0xae   : > { %1262 = vperm.xlu0 %6420, %v1244_v43   ;;  %1487 = vperm.xlu1 %6421, %v5464_v44   ;;  %v2094_v43 = vld [vmem:[%s10174_s8 + $0x18] sm:$0xff] }
  0xb2   : > { %1492 = vperm.xlu0 %6420, %v5465_v45   ;;  %1305 = vperm.xlu1 %6421, %v1211_v46   ;;  %v5217_v46 = vld [vmem:[%s7011_s16 + $0x108] sm:$0xff] }
  0xb6   : > { %1310 = vperm.xlu0 %6420, %v1212_v47   ;;  %1387 = vperm.xlu1 %6421, %v5434_v48   ;;  %v5221_v47 = vld [vmem:[%s7011_s16 + $0x1e8] sm:$0xff]  ;;  %v3420_v48 = vld [vmem:[%s10176_s10] sm:$0xff] }
  0xba   : > { %1392 = vperm.xlu0 %6420, %v5435_v49   ;;  %1597 = vperm.xlu1 %6421, %v5496_v50  }
  0xbe   : > { %1602 = vperm.xlu0 %6420, %v5497_v51   ;;  %1497 = vperm.xlu1 %6421, %v5466_v52  }
  0xc2   : > { %1502 = vperm.xlu0 %6420, %v5467_v53   ;;  %1707 = vperm.xlu1 %6421, %v5528_v54  }
  0xc6   : > { %1712 = vperm.xlu0 %6420, %v5529_v55   ;;  %1607 = vperm.xlu1 %6421, %v5498_v56  }
  0xca   : > { %1612 = vperm.xlu0 %6420, %v5499_v57   ;;  %1817 = vperm.xlu1 %6421, %v5560_v58   ;;  %v5229_v57 = vld [vmem:[%s7011_s16 + $0x3a8] sm:$0xff] }
  0xce   : > { %1822 = vperm.xlu0 %6420, %v5561_v59   ;;  %1717 = vperm.xlu1 %6421, %v5530_v60   ;;  %v5233_v60 = vld [vmem:[%s7011_s16 + $0x488] sm:$0xff] }
  0xd2   : > { %1722 = vperm.xlu0 %6420, %v5531_v61   ;;  %1927 = vperm.xlu1 %6421, %v5592_v62   ;;  %v5237_v61 = vld [vmem:[%s7011_s16 + $0x568] sm:$0xff] }
  0xd6   : > { %1932 = vperm.xlu0 %6420, %v5593_v63   ;;  %1827 = vperm.xlu1 %6421, %v5562_v0   ;;  %v3421_v0 = vld [vmem:[%s10176_s10 + $0x8] sm:$0xff] }
  0xda   : > { %1832 = vperm.xlu0 %6420, %v5563_v1   ;;  %1937 = vperm.xlu1 %6421, %v5594_v2  }
  0xdd   : > { %v7227_v10 = vpop.permute.xlu0 %455  ;;  %v7229_v11 = vpop.permute.xlu1 %503 }
  0xde   : > { %v477_v12 = vmul.f32 %v7227_v10, %v425_v3  ;;  %v481_v13 = vmul.f32 %v7227_v10, %v429_v4  ;;  %1942 = vperm.xlu0 %6420, %v5595_v6   ;;  %v489_v15 = vmul.f32 %v7227_v10, %v437_v5  ;;  %v493_v16 = vmul.f32 %v7227_v10, %v441_v7  ;;  %v3422_v4 = vld [vmem:[%s10176_s10 + $0x10] sm:$0xff] }
  0xdf   : > { %v497_v17 = vmul.f32 %v7227_v10, %v445_v8  ;;  %2097 = vperm.xlu1 %6421, %v2091_v9  }
  0xe0   : > { %v525_v21 = vadd.f32 %v7229_v11, %v477_v12  ;;  %v529_v22 = vadd.f32 %v7229_v11, %v481_v13  ;;  %v537_v26 = vadd.f32 %v7229_v11, %v489_v15  ;;  %v541_v27 = vadd.f32 %v7229_v11, %v493_v16 }
  0xe1   : > { %v545_v28 = vadd.f32 %v7229_v11, %v497_v17  ;;  %v7252_v29 = vpop.permute.xlu0 %460  ;;  %v7254_v30 = vpop.permute.xlu1 %508  ;;  %v3423_v17 = vld [vmem:[%s10176_s10 + $0x18] sm:$0xff] }
  0xe2   : > { %v478_v31 = vmul.f32 %v7252_v29, %v426_v14  ;;  %v482_v32 = vmul.f32 %v7252_v29, %v430_v18  ;;  %2102 = vperm.xlu0 %6420, %v2092_v20   ;;  %v490_v37 = vmul.f32 %v7252_v29, %v438_v19  ;;  %v494_v38 = vmul.f32 %v7252_v29, %v442_v23  ;;  %v433_v18 = vld [vmem:[%s7011_s16 + $0x2a0] sm:$0xff]  ;;  %v439_v23 = vld [vmem:[%s7011_s16 + $0x390] sm:$0xff] }
  0xe3   : > { %v498_v39 = vmul.f32 %v7252_v29, %v446_v24  ;;  %2107 = vperm.xlu1 %6421, %v2093_v25  }
  0xe4   : > { %v526_v44 = vadd.f32 %v7254_v30, %v478_v31  ;;  %v530_v45 = vadd.f32 %v7254_v30, %v482_v32  ;;  %v538_v49 = vadd.f32 %v7254_v30, %v490_v37  ;;  %v542_v50 = vadd.f32 %v7254_v30, %v494_v38  ;;  %v432_v31 = vld [vmem:[%s7011_s16 + $0x1d8] sm:$0xff] }
  0xe5   : > { %v546_v51 = vadd.f32 %v7254_v30, %v498_v39  ;;  %v7279_v52 = vpop.permute.xlu0 %585  ;;  %v7281_v53 = vpop.permute.xlu1 %590  ;;  %v440_v32 = vld [vmem:[%s7011_s16 + $0x398] sm:$0xff]  ;;  %v7348_v39 = vld [vmem:[%s7011_s16] sm:$0xff] }
  0xe6   : > { %v607_v54 = vmul.f32 %v5216_v34, %v7279_v52  ;;  %v611_v55 = vmul.f32 %v5220_v35, %v7279_v52  ;;  %v619_v56 = vmul.f32 %v5228_v36, %v7279_v52  ;;  %2112 = vperm.xlu0 %6420, %v2094_v43   ;;  %v623_v58 = vmul.f32 %v5232_v40, %v7279_v52  ;;  %v444_v34 = vld [vmem:[%s7011_s16 + $0x478] sm:$0xff] }
  0xe7   : > { %v627_v59 = vmul.f32 %v5236_v41, %v7279_v52  ;;  %v608_v62 = vmul.f32 %v5217_v46, %v7281_v53  ;;  %v612_v63 = vmul.f32 %v5221_v47, %v7281_v53  ;;  %3426 = vperm.xlu1 %6421, %v3420_v48   ;;  %v620_v7 = vmul.f32 %v5229_v57, %v7281_v53  ;;  %v448_v38 = vld [vmem:[%s7011_s16 + $0x558] sm:$0xff]  ;;  %v7359_v47 = vld [vmem:[%s7011_s16 + $0x8] sm:$0xff] }
  0xe8   : > { %v7296_v1 = vadd.f32 %v607_v54, %v525_v21  ;;  %v7298_v2 = vadd.f32 %v611_v55, %v529_v22  ;;  %v7300_v3 = vadd.f32 %v619_v56, %v537_v26  ;;  %v7305_v5 = vadd.f32 %v623_v58, %v541_v27  ;;  %v427_v21 = vld [vmem:[%s7011_s16 + $0xf0] sm:$0xff]  ;;  %10346 = vst [vmem:[#allocation25_spill] sm:$0xff] %v7348_v39  ;;  %v434_v48 = vld [vmem:[%s7011_s16 + $0x2a8] sm:$0xff]  ;;  %v5224_v55 = vld [vmem:[%s7011_s16 + $0x2c0] sm:$0xff] }
  0xe9   : > { %v7307_v6 = vadd.f32 %v627_v59, %v545_v28  ;;  %v7310_v8 = vpop.permute.xlu0 %465  ;;  %v7312_v9 = vpop.permute.xlu1 %470  ;;  %v624_v12 = vmul.f32 %v5233_v60, %v7281_v53  ;;  %v628_v13 = vmul.f32 %v5237_v61, %v7281_v53  ;;  %v7316_v14 = vadd.f32 %v608_v62, %v526_v44  ;;  %v431_v22 = vld [vmem:[%s7011_s16 + $0x1d0] sm:$0xff]  ;;  %v428_v28 = vld [vmem:[%s7011_s16 + $0xf8] sm:$0xff]  ;;  %10347 = vst [vmem:[#allocation26_spill] sm:$0xff] %v7359_v47 }
  0xea   : > { %10338 = vst [vmem:[#allocation17_spill] sm:$0xff] %v7298_v2  ;;  %10339 = vst [vmem:[#allocation18_spill] sm:$0xff] %v7300_v3  ;;  %v7318_v15 = vadd.f32 %v612_v63, %v530_v45  ;;  %3431 = vperm.xlu0 %6420, %v3421_v0   ;;  %v7320_v16 = vadd.f32 %v620_v7, %v538_v49  ;;  %v443_v26 = vld [vmem:[%s7011_s16 + $0x470] sm:$0xff]  ;;  %v485_v35 = vmul.f32 %v7227_v10, %v433_v18  ;;  %v5225_v18 = vld [vmem:[%s7011_s16 + $0x2c8] sm:$0xff] }
  0xeb   : > { %10340 = vst [vmem:[#allocation19_spill] sm:$0xff] %v7305_v5  ;;  %10341 = vst [vmem:[#allocation20_spill] sm:$0xff] %v7307_v6  ;;  %3436 = vperm.xlu1 %6421, %v3422_v4   ;;  %v7326_v19 = vadd.f32 %v624_v12, %v542_v50  ;;  %v7328_v20 = vadd.f32 %v628_v13, %v546_v51  ;;  %v447_v27 = vld [vmem:[%s7011_s16 + $0x550] sm:$0xff]  ;;  %v479_v36 = vmul.f32 %v7310_v8, %v427_v21 }
  0xec   : > { %10342 = vst [vmem:[#allocation21_spill] sm:$0xff] %v7318_v15  ;;  %10343 = vst [vmem:[#allocation22_spill] sm:$0xff] %v7320_v16  ;;  %v483_v37 = vmul.f32 %v7310_v8, %v431_v22  ;;  %v491_v40 = vmul.f32 %v7310_v8, %v439_v23  ;;  %v495_v41 = vmul.f32 %v7310_v8, %v443_v26  ;;  %v7372_v60 = vld [vmem:[%s7011_s16 + $0x110] sm:$0xff]  ;;  %v7391_v26 = vld [vmem:[%s7011_s16 + $0x118] sm:$0xff] }
  0xed   : > { %10344 = vst [vmem:[#allocation23_spill] sm:$0xff] %v7326_v19  ;;  %10345 = vst [vmem:[#allocation24_spill] sm:$0xff] %v7328_v20  ;;  %v7333_v24 = vpop.permute.xlu0 %695  ;;  %v7335_v25 = vpop.permute.xlu1 %700  ;;  %v499_v43 = vmul.f32 %v7310_v8, %v447_v27  ;;  %v480_v44 = vmul.f32 %v7312_v9, %v428_v28  ;;  %v484_v49 = vmul.f32 %v7312_v9, %v432_v31  ;;  %v5222_v61 = vld [vmem:[%s7011_s16 + $0x1f0] sm:$0xff]  ;;  %v7553_v16 = vld [vmem:[%s7011_s16 + $0x20] sm:$0xff] }
  0xee   : > { %3441 = vperm.xlu0 %6420, %v3423_v17   ;;  %v492_v50 = vmul.f32 %v7312_v9, %v440_v32  ;;  %v496_v51 = vmul.f32 %v7312_v9, %v444_v34  ;;  %v500_v56 = vmul.f32 %v7312_v9, %v448_v38  ;;  %10348 = vst [vmem:[#allocation27_spill] sm:$0xff] %v7372_v60  ;;  %v5230_v7 = vld [vmem:[%s7011_s16 + $0x3b0] sm:$0xff]  ;;  %10349 = vst [vmem:[#allocation28_spill] sm:$0xff] %v7391_v26 }
  0xef   : > { %v473_v62 = vmul.f32 %v7227_v10, %v7348_v39  ;;  %v5234_v12 = vld [vmem:[%s7011_s16 + $0x490] sm:$0xff]  ;;  %v533_v17 = vadd.f32 %v7229_v11, %v485_v35  ;;  %v474_v28 = vmul.f32 %v7252_v29, %v7359_v47  ;;  %v486_v31 = vmul.f32 %v7252_v29, %v434_v48  ;;  %v5223_v35 = vld [vmem:[%s7011_s16 + $0x1f8] sm:$0xff]  ;;  %10380 = vst [vmem:[#allocation59_spill] sm:$0xff] %v7553_v16 }
  0xf0   : > { %v5238_v13 = vld [vmem:[%s7011_s16 + $0x570] sm:$0xff]  ;;  %v5239_v29 = vld [vmem:[%s7011_s16 + $0x578] sm:$0xff] }
  0xf1   : > { %v7354_v45 = vpop.permute.xlu0 %513  ;;  %v7356_v46 = vpop.permute.xlu1 %518  ;;  %v423_v48 = vld [vmem:[%s7011_s16 + $0x10] sm:$0xff]  ;;  %v7692_v39 = vld [vmem:[%s7011_s16 + $0x78] sm:$0xff] }
  0xf2   : > { %v527_v54 = vadd.f32 %v7354_v45, %v479_v36  ;;  %v531_v57 = vadd.f32 %v7354_v45, %v483_v37  ;;  %v539_v58 = vadd.f32 %v7354_v45, %v491_v40  ;;  %v543_v59 = vadd.f32 %v7354_v45, %v495_v41  ;;  %v5231_v41 = vld [vmem:[%s7011_s16 + $0x3b8] sm:$0xff]  ;;  %10399 = vst [vmem:[#allocation78_spill] sm:$0xff] %v7692_v39 }
  0xf3   : > { %v547_v63 = vadd.f32 %v7354_v45, %v499_v43  ;;  %v528_v0 = vadd.f32 %v7356_v46, %v480_v44  ;;  %v532_v4 = vadd.f32 %v7356_v46, %v484_v49  ;;  %v540_v21 = vadd.f32 %v7356_v46, %v492_v50  ;;  %v5235_v43 = vld [vmem:[%s7011_s16 + $0x498] sm:$0xff] }
  0xf4   : > { %v544_v22 = vadd.f32 %v7356_v46, %v496_v51  ;;  %v548_v10 = vadd.f32 %v7356_v46, %v500_v56  ;;  %v615_v36 = vmul.f32 %v5224_v55, %v7279_v52  ;;  %v616_v44 = vmul.f32 %v5225_v18, %v7281_v53  ;;  %v435_v55 = vld [vmem:[%s7011_s16 + $0x2b0] sm:$0xff]  ;;  %v424_v56 = vld [vmem:[%s7011_s16 + $0x18] sm:$0xff] }
  0xf5   : > { %v7388_v23 = vpop.permute.xlu0 %595  ;;  %v7393_v27 = vpop.permute.xlu1 %600 }
  0xf6   : > { %v609_v32 = vmul.f32 %v7372_v60, %v7388_v23  ;;  %v613_v34 = vmul.f32 %v5222_v61, %v7388_v23  ;;  %v621_v37 = vmul.f32 %v5230_v7, %v7388_v23  ;;  %v625_v38 = vmul.f32 %v5234_v12, %v7388_v23  ;;  %v436_v61 = vld [vmem:[%s7011_s16 + $0x2b8] sm:$0xff]  ;;  %v7661_v60 = vld [vmem:[%s7011_s16 + $0x150] sm:$0xff] }
  0xf7   : > { %v629_v40 = vmul.f32 %v5238_v13, %v7388_v23  ;;  %v610_v51 = vmul.f32 %v7391_v26, %v7393_v27  ;;  %10394 = vst [vmem:[#allocation73_spill] sm:$0xff] %v7661_v60 }
  0xf8   : > { %v7411_v49 = vadd.f32 %v609_v32, %v527_v54  ;;  %v7413_v50 = vadd.f32 %v613_v34, %v531_v57  ;;  %v7420_v7 = vadd.f32 %v621_v37, %v539_v58  ;;  %v7422_v12 = vadd.f32 %v625_v38, %v543_v59  ;;  %v7432_v32 = vld [vmem:[%s7011_s16 + $0x120] sm:$0xff] }
  0xf9   : > { %v7424_v13 = vadd.f32 %v629_v40, %v547_v63  ;;  %v614_v54 = vmul.f32 %v5223_v35, %v7393_v27  ;;  %v7427_v18 = vpop.permute.xlu0 %805  ;;  %v7429_v57 = vpop.permute.xlu1 %810  ;;  %10354 = vst [vmem:[#allocation33_spill] sm:$0xff] %v7432_v32  ;;  %v7435_v34 = vld [vmem:[%s7011_s16 + $0x200] sm:$0xff]  ;;  %v622_v37 = vmul.f32 %v5231_v41, %v7393_v27  ;;  %v626_v59 = vmul.f32 %v5235_v43, %v7393_v27 }
  0xfa   : > { %10350 = vst [vmem:[#allocation29_spill] sm:$0xff] %v7413_v50  ;;  %10351 = vst [vmem:[#allocation30_spill] sm:$0xff] %v7420_v7  ;;  %v5256_v58 = vld [vmem:[%s7011_s16 + $0x2e0] sm:$0xff]  ;;  %v630_v63 = vmul.f32 %v5239_v29, %v7393_v27  ;;  %v7442_v35 = vadd.f32 %v7229_v11, %v473_v62  ;;  %v534_v38 = vadd.f32 %v7254_v30, %v486_v31  ;;  %v7458_v29 = vld [vmem:[%s7011_s16 + $0x128] sm:$0xff] }
  0xfb   : > { %10352 = vst [vmem:[#allocation31_spill] sm:$0xff] %v7422_v12  ;;  %10353 = vst [vmem:[#allocation32_spill] sm:$0xff] %v7424_v13  ;;  %v5260_v40 = vld [vmem:[%s7011_s16 + $0x3c0] sm:$0xff]  ;;  %v7448_v13 = vadd.f32 %v610_v51, %v528_v0  ;;  %v7450_v20 = vadd.f32 %v614_v54, %v532_v4  ;;  %v7453_v41 = vadd.f32 %v7254_v30, %v474_v28  ;;  %v7461_v11 = vld [vmem:[%s7011_s16 + $0x208] sm:$0xff] }
  0xfc   : > { %10355 = vst [vmem:[#allocation34_spill] sm:$0xff] %v7435_v34  ;;  %v7455_v43 = vadd.f32 %v615_v36, %v533_v17  ;;  %10357 = vst [vmem:[#allocation36_spill] sm:$0xff] %v7458_v29  ;;  %v5226_v62 = vld [vmem:[%s7011_s16 + $0x2d0] sm:$0xff]  ;;  %v7464_v31 = vadd.f32 %v622_v37, %v540_v21  ;;  %v7466_v6 = vadd.f32 %v626_v59, %v544_v22  ;;  %v5257_v36 = vld [vmem:[%s7011_s16 + $0x2e8] sm:$0xff] }
  0xfd   : > { %10356 = vst [vmem:[#allocation35_spill] sm:$0xff] %v7450_v20  ;;  %10358 = vst [vmem:[#allocation37_spill] sm:$0xff] %v7461_v11  ;;  %v7468_v0 = vadd.f32 %v630_v63, %v548_v10  ;;  %v7470_v4 = vadd.f32 %v616_v44, %v534_v38  ;;  %v475_v30 = vmul.f32 %v7310_v8, %v423_v48  ;;  %v5261_v51 = vld [vmem:[%s7011_s16 + $0x3c8] sm:$0xff]  ;;  %v5227_v21 = vld [vmem:[%s7011_s16 + $0x2d8] sm:$0xff]  ;;  %v7478_v22 = vpop.permute.xlu0 %705  ;;  %v7480_v54 = vpop.permute.xlu1 %710 }
  0xfe   : > { %10359 = vst [vmem:[#allocation38_spill] sm:$0xff] %v7464_v31  ;;  %10360 = vst [vmem:[#allocation39_spill] sm:$0xff] %v7466_v6  ;;  %v487_v17 = vmul.f32 %v7310_v8, %v435_v55  ;;  %v476_v28 = vmul.f32 %v7312_v9, %v424_v56  ;;  %v488_v10 = vmul.f32 %v7312_v9, %v436_v61  ;;  %v5265_v55 = vld [vmem:[%s7011_s16 + $0x4a8] sm:$0xff]  ;;  %v7497_v37 = vld [vmem:[%s7011_s16 + $0x30] sm:$0xff] }
  0xff   : > { %10361 = vst [vmem:[#allocation40_spill] sm:$0xff] %v7468_v0  ;;  %10362 = vst [vmem:[#allocation41_spill] sm:$0xff] %v7478_v22  ;;  %v7485_v44 = vmul.f32 %v7432_v32, %v7333_v24  ;;  %v7489_v8 = vmul.f32 %v7435_v34, %v7333_v24  ;;  %v7492_v48 = vmul.f32 %v5256_v58, %v7333_v24  ;;  %v5269_v56 = vld [vmem:[%s7011_s16 + $0x588] sm:$0xff]  ;;  %v7510_v58 = vld [vmem:[%s7011_s16 + $0x38] sm:$0xff] }
 0x100   : > { %10363 = vst [vmem:[#allocation42_spill] sm:$0xff] %v7480_v54  ;;  %10365 = vst [vmem:[#allocation44_spill] sm:$0xff] %v7497_v37  ;;  %v7500_v9 = vmul.f32 %v5260_v40, %v7333_v24  ;;  %v7503_v61 = vmul.f32 %v5264_v42, %v7333_v24  ;;  %v7506_v59 = vmul.f32 %v5268_v33, %v7333_v24  ;;  %v7513_v38 = vld [vmem:[%s7011_s16 + $0x140] sm:$0xff]  ;;  %v7546_v31 = vld [vmem:[%s7011_s16 + $0x148] sm:$0xff] }
 0x101   : > { %10364 = vst [vmem:[#allocation43_spill] sm:$0xff] %v7489_v8  ;;  %v617_v63 = vmul.f32 %v5226_v62, %v7388_v23  ;;  %10369 = vst [vmem:[#allocation48_spill] sm:$0xff] %v7510_v58  ;;  %v7516_v0 = vld [vmem:[%s7011_s16 + $0x220] sm:$0xff]  ;;  %v7520_v40 = vmul.f32 %v7458_v29, %v7335_v25  ;;  %v7524_v42 = vmul.f32 %v7461_v11, %v7335_v25  ;;  %v7550_v7 = vpop.permute.xlu1 %920  ;;  %v7601_v20 = vld [vmem:[%s7011_s16 + $0x138] sm:$0xff] }
 0x102   : > { %10366 = vst [vmem:[#allocation45_spill] sm:$0xff] %v7500_v9  ;;  %10367 = vst [vmem:[#allocation46_spill] sm:$0xff] %v7503_v61  ;;  %v7527_v33 = vmul.f32 %v5257_v36, %v7335_v25  ;;  %v618_v62 = vmul.f32 %v5227_v21, %v7393_v27  ;;  %v5292_v6 = vld [vmem:[%s7011_s16 + $0x3e0] sm:$0xff]  ;;  %v7536_v19 = vmul.f32 %v5261_v51, %v7335_v25  ;;  %v7548_v21 = vpop.permute.xlu0 %915  ;;  %v7556_v51 = vld [vmem:[%s7011_s16 + $0x28] sm:$0xff] }
 0x103   : > { %10368 = vst [vmem:[#allocation47_spill] sm:$0xff] %v7506_v59  ;;  %10370 = vst [vmem:[#allocation49_spill] sm:$0xff] %v7513_v38  ;;  %v7531_v59 = vld [vmem:[%s7011_s16 + $0x300] sm:$0xff]  ;;  %v7539_v61 = vmul.f32 %v5265_v55, %v7335_v25  ;;  %v7542_v5 = vmul.f32 %v5269_v56, %v7335_v25  ;;  %v535_v36 = vadd.f32 %v7354_v45, %v487_v17  ;;  %v7570_v9 = vld [vmem:[%s7011_s16 + $0x130] sm:$0xff] }
 0x104   : > { %10371 = vst [vmem:[#allocation50_spill] sm:$0xff] %v7516_v0  ;;  %10372 = vst [vmem:[#allocation51_spill] sm:$0xff] %v7524_v42  ;;  %v5296_v12 = vld [vmem:[%s7011_s16 + $0x4c0] sm:$0xff]  ;;  %v523_v55 = vadd.f32 %v7354_v45, %v475_v30  ;;  %v524_v56 = vadd.f32 %v7356_v46, %v476_v28  ;;  %v536_v17 = vadd.f32 %v7356_v46, %v488_v10  ;;  %v7589_v10 = vld [vmem:[%s7011_s16 + $0x48] sm:$0xff] }
 0x105   : > { %10373 = vst [vmem:[#allocation52_spill] sm:$0xff] %v7531_v59  ;;  %10374 = vst [vmem:[#allocation53_spill] sm:$0xff] %v7536_v19  ;;  %v7567_v19 = vld [vmem:[%s7011_s16 + $0x50] sm:$0xff]  ;;  %v7572_v3 = vadd.f32 %v617_v63, %v535_v36  ;;  %v606_v45 = vmul.f32 %v7510_v58, %v7393_v27  ;;  %v7578_v30 = vmul.f32 %v7513_v38, %v7427_v18  ;;  %v7586_v28 = vld [vmem:[%s7011_s16 + $0x40] sm:$0xff] }
 0x106   : > { %10375 = vst [vmem:[#allocation54_spill] sm:$0xff] %v7539_v61  ;;  %10376 = vst [vmem:[#allocation55_spill] sm:$0xff] %v7542_v5  ;;  %v605_v5 = vmul.f32 %v7497_v37, %v7388_v23  ;;  %v7564_v61 = vld [vmem:[%s7011_s16 + $0x308] sm:$0xff]  ;;  %v7582_v46 = vmul.f32 %v7516_v0, %v7427_v18  ;;  %v5258_v23 = vld [vmem:[%s7011_s16 + $0x2f0] sm:$0xff]  ;;  %v7591_v63 = vadd.f32 %v618_v62, %v536_v17 }
 0x107   : > { %10377 = vst [vmem:[#allocation56_spill] sm:$0xff] %v7546_v31  ;;  %10378 = vst [vmem:[#allocation57_spill] sm:$0xff] %v7548_v21  ;;  %v7595_v27 = vmul.f32 %v7531_v59, %v7427_v18  ;;  %v7598_v36 = vld [vmem:[%s7011_s16 + $0x58] sm:$0xff]  ;;  %v604_v42 = vmul.f32 %v7556_v51, %v7281_v53  ;;  %v7609_v62 = vmul.f32 %v5292_v6, %v7427_v18  ;;  %v7624_v53 = vpop.permute.xlu1 %820  ;;  %v7627_v6 = vld [vmem:[%s7011_s16 + $0x60] sm:$0xff] }
 0x108   : > { %10379 = vst [vmem:[#allocation58_spill] sm:$0xff] %v7550_v7  ;;  %10381 = vst [vmem:[#allocation60_spill] sm:$0xff] %v7556_v51  ;;  %v5259_v50 = vld [vmem:[%s7011_s16 + $0x2f8] sm:$0xff]  ;;  %v7612_v17 = vmul.f32 %v5296_v12, %v7427_v18  ;;  %v7616_v15 = vmul.f32 %v7546_v31, %v7429_v57  ;;  %v7620_v8 = vmul.f32 %v7564_v61, %v7429_v57  ;;  %v7630_v12 = vld [vmem:[%s7011_s16 + $0x68] sm:$0xff] }
 0x109   : > { %10382 = vst [vmem:[#allocation61_spill] sm:$0xff] %v7564_v61  ;;  %10383 = vst [vmem:[#allocation62_spill] sm:$0xff] %v7567_v19  ;;  %v713_v2 = vmul.f32 %v7586_v28, %v7333_v24  ;;  %v714_v61 = vmul.f32 %v7589_v10, %v7335_v25  ;;  %v7643_v59 = vld [vmem:[%s7011_s16 + $0x80] sm:$0xff]  ;;  %v7646_v11 = vld [vmem:[%s7011_s16 + $0x88] sm:$0xff]  ;;  %v7649_v0 = vmul.f32 %v5258_v23, %v7478_v22 }
 0x10a   : > { %10384 = vst [vmem:[#allocation63_spill] sm:$0xff] %v7570_v9  ;;  %10385 = vst [vmem:[#allocation64_spill] sm:$0xff] %v7582_v46  ;;  %v603_v46 = vmul.f32 %v7553_v16, %v7279_v52  ;;  %v7622_v52 = vpop.permute.xlu0 %815  ;;  %v716_v34 = vmul.f32 %v7598_v36, %v7480_v54  ;;  %v7655_v26 = vmul.f32 %v7601_v20, %v7480_v54  ;;  %v5290_v25 = vld [vmem:[%s7011_s16 + $0x310] sm:$0xff]  ;;  %v7665_v58 = vld [vmem:[%s7011_s16 + $0x158] sm:$0xff] }
 0x10b   : > { %10386 = vst [vmem:[#allocation65_spill] sm:$0xff] %v7586_v28  ;;  %10387 = vst [vmem:[#allocation66_spill] sm:$0xff] %v7589_v10  ;;  %v7658_v24 = vmul.f32 %v5259_v50, %v7480_v54  ;;  %v5291_v37 = vld [vmem:[%s7011_s16 + $0x318] sm:$0xff]  ;;  %v824_v50 = vmul.f32 %v7630_v12, %v7429_v57  ;;  %v7682_v47 = vpop.permute.xlu1 %1030  ;;  %v7689_v16 = vld [vmem:[%s7011_s16 + $0x70] sm:$0xff]  ;;  %v7696_v31 = vmul.f32 %v7661_v60, %v7622_v52 }
 0x10c   : > { %10388 = vst [vmem:[#allocation67_spill] sm:$0xff] %v7598_v36  ;;  %10389 = vst [vmem:[#allocation68_spill] sm:$0xff] %v7601_v20  ;;  %v631_v23 = vadd.f32 %v603_v46, %v7442_v35  ;;  %v823_v36 = vmul.f32 %v7627_v6, %v7427_v18  ;;  %v7675_v20 = vld [vmem:[%s7011_s16 + $0xa0] sm:$0xff]  ;;  %v933_v35 = vmul.f32 %v7643_v59, %v7548_v21  ;;  %v7705_v32 = vld [vmem:[%s7011_s16 + $0x328] sm:$0xff] }
 0x10d   : > { %10390 = vst [vmem:[#allocation69_spill] sm:$0xff] %v7609_v62  ;;  %10391 = vst [vmem:[#allocation70_spill] sm:$0xff] %v7612_v17  ;;  %v715_v17 = vmul.f32 %v7567_v19, %v7478_v22  ;;  %v7636_v62 = vmul.f32 %v7570_v9, %v7478_v22  ;;  %v632_v9 = vadd.f32 %v604_v42, %v7453_v41  ;;  %v7678_v19 = vld [vmem:[%s7011_s16 + $0xa8] sm:$0xff]  ;;  %v7702_v38 = vld [vmem:[%s7011_s16 + $0x320] sm:$0xff] }
 0x10e   : > { %10392 = vst [vmem:[#allocation71_spill] sm:$0xff] %v7622_v52  ;;  %10393 = vst [vmem:[#allocation72_spill] sm:$0xff] %v7624_v53  ;;  %v7680_v51 = vpop.permute.xlu0 %1025  ;;  %v934_v41 = vmul.f32 %v7646_v11, %v7550_v7  ;;  %v633_v42 = vadd.f32 %v605_v5, %v523_v55  ;;  %v634_v46 = vadd.f32 %v606_v45, %v524_v56 }
 0x10f   : > { %10395 = vst [vmem:[#allocation74_spill] sm:$0xff] %v7665_v58  ;;  %10396 = vst [vmem:[#allocation75_spill] sm:$0xff] %v7680_v51  ;;  %v7699_v29 = vmul.f32 %v5290_v25, %v7622_v52  ;;  %v741_v10 = vadd.f32 %v713_v2, %v631_v23  ;;  %v742_v54 = vadd.f32 %v714_v61, %v632_v9  ;;  %v7719_v9 = vld [vmem:[%s7011_s16 + $0x90] sm:$0xff]  ;;  %v7722_v61 = vld [vmem:[%s7011_s16 + $0x98] sm:$0xff]  ;;  %v7730_v60 = vpop.permute.xlu1 %930 }
 0x110   : > { %10397 = vst [vmem:[#allocation76_spill] sm:$0xff] %v7682_v47  ;;  %10398 = vst [vmem:[#allocation77_spill] sm:$0xff] %v7689_v16  ;;  %v7709_v5 = vmul.f32 %v7665_v58, %v7624_v53  ;;  %v7712_v55 = vmul.f32 %v5291_v37, %v7624_v53  ;;  %v1043_v56 = vmul.f32 %v7675_v20, %v7680_v51 }
 0x111   : > { %10400 = vst [vmem:[#allocation79_spill] sm:$0xff] %v7702_v38  ;;  %10401 = vst [vmem:[#allocation80_spill] sm:$0xff] %v7705_v32  ;;  %v1044_v2 = vmul.f32 %v7678_v19, %v7682_v47  ;;  %v851_v45 = vadd.f32 %v823_v36, %v741_v10  ;;  %v852_v25 = vadd.f32 %v824_v50, %v742_v54  ;;  %v7741_v36 = vld [vmem:[%s7011_s16 + $0x340] sm:$0xff]  ;;  %v7744_v50 = vld [vmem:[%s7011_s16 + $0x348] sm:$0xff] }
 0x112   : > { %v825_v23 = vmul.f32 %v7689_v16, %v7622_v52  ;;  %v826_v37 = vmul.f32 %v7692_v39, %v7624_v53  ;;  %v7728_v58 = vpop.permute.xlu0 %925  ;;  %10403 = vst [vmem:[#allocation82_spill] sm:$0xff] %v7730_v60  ;;  %v753_v28 = vadd.f32 %v7492_v48, %v7455_v43  ;;  %v754_v22 = vadd.f32 %v7527_v33, %v7470_v4  ;;  %v7751_v33 = vld [vmem:[%s7011_s16 + $0xc0] sm:$0xff] }
 0x113   : > { %10402 = vst [vmem:[#allocation81_spill] sm:$0xff] %v7728_v58  ;;  %v945_v54 = vmul.f32 %v7702_v38, %v7548_v21  ;;  %v946_v10 = vmul.f32 %v7705_v32, %v7550_v7  ;;  %10404 = vst [vmem:[#allocation83_spill] sm:$0xff] %v7741_v36  ;;  %v743_v39 = vadd.f32 %v715_v17, %v633_v42  ;;  %v7754_v38 = vld [vmem:[%s7011_s16 + $0xc8] sm:$0xff] }
 0x114   : > { %10405 = vst [vmem:[#allocation84_spill] sm:$0xff] %v7744_v50  ;;  %v744_v16 = vadd.f32 %v716_v34, %v634_v46  ;;  %v935_v53 = vmul.f32 %v7719_v9, %v7728_v58  ;;  %v936_v43 = vmul.f32 %v7722_v61, %v7730_v60  ;;  %v961_v48 = vadd.f32 %v933_v35, %v851_v45  ;;  %v7764_v46 = vpop.permute.xlu1 %1140 }
 0x115   : > { %v962_v4 = vadd.f32 %v934_v41, %v852_v25  ;;  %v863_v32 = vadd.f32 %v7595_v27, %v753_v28  ;;  %v864_v52 = vadd.f32 %v7620_v8, %v754_v22  ;;  %v853_v17 = vadd.f32 %v825_v23, %v743_v39  ;;  %v7767_v8 = vld [vmem:[%s7011_s16 + $0x360] sm:$0xff] }
 0x116   : > { %v854_v34 = vadd.f32 %v826_v37, %v744_v16  ;;  %v1055_v42 = vmul.f32 %v7741_v36, %v7680_v51  ;;  %v1056_v35 = vmul.f32 %v7744_v50, %v7682_v47  ;;  %v7762_v41 = vpop.permute.xlu0 %1135  ;;  %v1071_v45 = vadd.f32 %v1043_v56, %v961_v48  ;;  %10406 = vst [vmem:[#allocation85_spill] sm:$0xff] %v7767_v8  ;;  %v7774_v37 = vld [vmem:[%s7011_s16 + $0x368] sm:$0xff]  ;;  %v5322_v50 = vld [vmem:[%s7011_s16 + $0x330] sm:$0xff]  ;;  %v7823_v36 = vld [vmem:[%s7011_s16 + $0xd8] sm:$0xff] }
 0x117   : > { %v1072_v28 = vadd.f32 %v1044_v2, %v962_v4  ;;  %v973_v27 = vadd.f32 %v945_v54, %v863_v32  ;;  %v974_v22 = vadd.f32 %v946_v10, %v864_v52  ;;  %v1153_v16 = vmul.f32 %v7751_v33, %v7762_v41  ;;  %10407 = vst [vmem:[#allocation86_spill] sm:$0xff] %v7774_v37  ;;  %v7778_v56 = vld [vmem:[%s7011_s16 + $0xb0] sm:$0xff]  ;;  %v7781_v32 = vld [vmem:[%s7011_s16 + $0xb8] sm:$0xff] }
 0x118   : > { %v1154_v39 = vmul.f32 %v7754_v38, %v7764_v46  ;;  %v963_v25 = vadd.f32 %v935_v53, %v853_v17  ;;  %v964_v23 = vadd.f32 %v936_v43, %v854_v34  ;;  %v755_v52 = vadd.f32 %v7649_v0, %v7572_v3  ;;  %v7794_v17 = vld [vmem:[%s7011_s16 + $0x160] sm:$0xff]  ;;  %v5323_v3 = vld [vmem:[%s7011_s16 + $0x338] sm:$0xff]  ;;  %v7798_v0 = vld [vmem:[%s7011_s16 + $0x168] sm:$0xff] }
 0x119   : > { %v756_v2 = vadd.f32 %v7658_v24, %v7591_v63  ;;  %v745_v53 = vadd.f32 %v7485_v44, %v7296_v1  ;;  %v746_v54 = vadd.f32 %v7520_v40, %v7316_v14  ;;  %v1181_v10 = vadd.f32 %v1153_v16, %v1071_v45  ;;  %v7802_v24 = vpop.permute.xlu1 %1040  ;;  %v7807_v14 = vld [vmem:[%s7011_s16 + $0x180] sm:$0xff]  ;;  %v7811_v40 = vld [vmem:[%s7011_s16 + $0x188] sm:$0xff] }
 0x11a   : > { %v1182_v43 = vadd.f32 %v1154_v39, %v1072_v28  ;;  %v1083_v48 = vadd.f32 %v1055_v42, %v973_v27  ;;  %v1165_v4 = vmul.f32 %v7767_v8, %v7762_v41  ;;  %v7800_v63 = vpop.permute.xlu0 %1035  ;;  %10409 = vst [vmem:[#allocation88_spill] sm:$0xff] %v7802_v24  ;;  %v1166_v1 = vmul.f32 %v7774_v37, %v7764_v46  ;;  %v7820_v39 = vld [vmem:[%s7011_s16 + $0xd0] sm:$0xff] }
 0x11b   : > { %10408 = vst [vmem:[#allocation87_spill] sm:$0xff] %v7800_v63  ;;  %v947_v44 = vmul.f32 %v5322_v50, %v7728_v58  ;;  %v855_v34 = vadd.f32 %v7578_v30, %v745_v53  ;;  %v856_v42 = vadd.f32 %v7616_v15, %v746_v54  ;;  %v1045_v28 = vmul.f32 %v7778_v56, %v7800_v63  ;;  %v7838_v54 = vld [vmem:[%s7011_s16 + $0x1a8] sm:$0xff]  ;;  %v5387_v58 = vld [vmem:[%s7011_s16 + $0x378] sm:$0xff] }
 0x11c   : > { %v6268_v45 = vpack.c.bf16 %v1182_v43, %v1181_v10  ;;  %v1046_v27 = vmul.f32 %v7781_v32, %v7802_v24  ;;  %v1084_v16 = vadd.f32 %v1056_v35, %v974_v22  ;;  %v865_v50 = vadd.f32 %v7699_v29, %v755_v52  ;;  %v7834_v35 = vld [vmem:[%s7011_s16 + $0x1a0] sm:$0xff] }
 0x11d   : > { %v948_v37 = vmul.f32 %v5323_v3, %v7730_v60  ;;  %v937_v15 = vmul.f32 %v7794_v17, %v7548_v21  ;;  %v938_v30 = vmul.f32 %v7798_v0, %v7550_v7  ;;  %v7831_v53 = vadd.f32 %v1165_v4, %v1083_v48  ;;  %v7846_v43 = vpop.permute.xlu1 %1150  ;;  %v5355_v3 = vld [vmem:[%s7011_s16 + $0x358] sm:$0xff]  ;;  %v7860_v60 = vld [vmem:[%s7011_s16 + $0x370] sm:$0xff] }
 0x11e   : > { %6269 = vmatpush3.bf16.msra.mxu0 %v6268_v45  ;;  %v866_v22 = vadd.f32 %v7712_v55, %v756_v2  ;;  %v1047_v29 = vmul.f32 %v7807_v14, %v7680_v51  ;;  %v1048_v52 = vmul.f32 %v7811_v40, %v7682_v47  ;;  %v7844_v10 = vpop.permute.xlu0 %1145  ;;  %v10410_v48 = vmov 0.0|0.0   ;;  %v7852_v2 = vld [vmem:[%s7011_s16 + $0x350] sm:$0xff]  ;;  %10412 = vst [vmem:[#allocation90_spill] sm:$0xff] %v7860_v60 }
 0x11f   : > { %6270 = vmatprep.subr.bf16.mxu0 %v10410_v48  ;;  %v7849_v4 = vadd.f32 %v1166_v1, %v1084_v16  ;;  %v975_v55 = vadd.f32 %v947_v44, %v865_v50  ;;  %10411 = vst [vmem:[#allocation89_spill] sm:$0xff] %v7852_v2  ;;  %v965_v45 = vadd.f32 %v937_v15, %v855_v34 }
 0x120   : > { %v966_v51 = vadd.f32 %v938_v30, %v856_v42  ;;  %v1073_v7 = vadd.f32 %v1045_v28, %v963_v25  ;;  %v1074_v21 = vadd.f32 %v1046_v27, %v964_v23  ;;  %v1155_v47 = vmul.f32 %v7820_v39, %v7844_v10 }
 0x121   : > { %v1156_v8 = vmul.f32 %v7823_v36, %v7846_v43  ;;  %v1075_v1 = vadd.f32 %v1047_v29, %v965_v45  ;;  %v1157_v34 = vmul.f32 %v7834_v35, %v7762_v41  ;;  %v1158_v25 = vmul.f32 %v7838_v54, %v7764_v46  ;;  %v7872_v50 = vpop.permute.xlu1 %1247 }
 0x122   : > { %v1076_v44 = vadd.f32 %v1048_v52, %v966_v51  ;;  %v1183_v23 = vadd.f32 %v1155_v47, %v1073_v7  ;;  %v1057_v28 = vmul.f32 %v7852_v2, %v7800_v63  ;;  %v1058_v27 = vmul.f32 %v5355_v3, %v7802_v24  ;;  %v7870_v16 = vpop.permute.xlu0 %2005  ;;  %v5300_v7 = vld [vmem:[%s7011_s16 + $0x5a0] sm:$0xff] }
 0x123   : > { %v1184_v42 = vadd.f32 %v1156_v8, %v1074_v21  ;;  %10413 = vst [vmem:[#allocation91_spill] sm:$0xff] %v7870_v16  ;;  %v7874_v15 = vadd.f32 %v1157_v34, %v1075_v1  ;;  %v747_v30 = vadd.f32 %v7636_v62, %v7411_v49  ;;  %v748_v47 = vadd.f32 %v7655_v26, %v7448_v13  ;;  %v7884_v21 = vld [vmem:[%s7011_s16 + $0x228] sm:$0xff]  ;;  %v7925_v34 = vld [vmem:[#allocation5] sm:$0xff] }
 0x124   : > { %v7876_v51 = vadd.f32 %v1158_v25, %v1076_v44  ;;  %v5293_v8 = vld [vmem:[%s7011_s16 + $0x3e8] sm:$0xff]  ;;  %v1277_v29 = vmul.f32 %v7627_v6, %v7872_v50  ;;  %v976_v52 = vadd.f32 %v948_v37, %v866_v22  ;;  %v1167_v3 = vmul.f32 %v7860_v60, %v7844_v10  ;;  %v7919_v44 = vld [vmem:[%s7011_s16 + $0x210] sm:$0xff] }
 0x125   : > { %10414 = vst [vmem:[#allocation92_spill] sm:$0xff] %v7874_v15  ;;  %v1168_v45 = vmul.f32 %v5387_v58, %v7846_v43  ;;  %v5297_v1 = vld [vmem:[%s7011_s16 + $0x4c8] sm:$0xff]  ;;  %v1281_v49 = vmul.f32 %v7643_v59, %v7872_v50  ;;  %v1285_v26 = vmul.f32 %v7675_v20, %v7872_v50  ;;  %v1289_v13 = vmul.f32 %v7751_v33, %v7872_v50  ;;  %v8010_v60 = vld [vmem:[%s7011_s16 + $0x230] sm:$0xff] }
 0x126   : > { %10415 = vst [vmem:[#allocation93_spill] sm:$0xff] %v7876_v51  ;;  %v6271_v62 = vpack.c.bf16 %v1184_v42, %v1183_v23  ;;  %v1085_v6 = vadd.f32 %v1057_v28, %v975_v55  ;;  %v7902_v22 = vadd.f32 %v7696_v31, %v747_v30  ;;  %v7905_v58 = vadd.f32 %v7709_v5, %v748_v47  ;;  %v5301_v20 = vld [vmem:[%s7011_s16 + $0x5a8] sm:$0xff]  ;;  %v7921_v31 = vpop.permute.xlu0 %1252  ;;  %v7923_v5 = vpop.permute.xlu1 %1295  ;;  %v5262_v23 = vld [vmem:[%s7011_s16 + $0x3d0] sm:$0xff] }
 0x127   : > { %v7908_v59 = vmul.f32 %v5300_v7, %v7427_v18  ;;  %v7913_v33 = vmul.f32 %v7884_v21, %v7429_v57  ;;  %v7916_v55 = vmul.f32 %v5293_v8, %v7429_v57  ;;  %v1086_v18 = vadd.f32 %v1058_v27, %v976_v52  ;;  %v5266_v47 = vld [vmem:[%s7011_s16 + $0x4b0] sm:$0xff] }
 0x128   : > { %6272 = vmatpush3.bf16.msra.mxu0 %v6271_v62  ;;  %v7928_v25 = vmul.f32 %v5297_v1, %v7429_v57  ;;  %v1278_v42 = vmul.f32 %v7630_v12, %v7921_v31  ;;  %v6286_v28 = vpack.c.bf16 %v7849_v4, %v7831_v53  ;;  %v1195_v30 = vadd.f32 %v1167_v3, %v1085_v6  ;;  %v5270_v7 = vld [vmem:[%s7011_s16 + $0x590] sm:$0xff]  ;;  %v10420_v62 = vld [vmem:[#allocation41_spill] sm:$0xff] }
 0x129   : > { %10416 = vst [vmem:[#allocation94_spill] sm:$0xff] %v7908_v59  ;;  %10417 = vst [vmem:[#allocation95_spill] sm:$0xff] %v7916_v55  ;;  %6285 = vmatprep.subr.bf16.mxu0 %v10410_v48  ;;  %v1282_v8 = vmul.f32 %v7646_v11, %v7921_v31  ;;  %v1286_v27 = vmul.f32 %v7678_v19, %v7921_v31  ;;  %v1290_v52 = vmul.f32 %v7754_v38, %v7921_v31  ;;  %v5302_v59 = vld [vmem:[%s7011_s16 + $0x5b0] sm:$0xff] }
 0x12a   : > { %10418 = vst [vmem:[#allocation96_spill] sm:$0xff] %v7928_v25  ;;  %v1196_v1 = vadd.f32 %v1168_v45, %v1086_v18  ;;  %v7945_v12 = vmul.f32 %v5301_v20, %v7429_v57  ;;  %v7949_v53 = vmul.f32 %v7919_v44, %v10420_v62  ;;  %v1325_v4 = vadd.f32 %v7923_v5, %v1277_v29  ;;  %v7960_v3 = vpop.permute.xlu0 %1300  ;;  %v7962_v45 = vpop.permute.xlu1 %1377  ;;  %v7973_v20 = vld [vmem:[%s7011_s16 + $0x218] sm:$0xff] }
 0x12b   : > { %v1329_v11 = vadd.f32 %v7923_v5, %v1281_v49  ;;  %6010 = vmatmul.mubr.msk.f32.vlgmr.msra.gmra.mrb[0].mxu0 %vm2008_vm1, %v7925_v34  ;;  %v7956_v19 = vmul.f32 %v5262_v23, %v10420_v62  ;;  %v1333_v38 = vadd.f32 %v7923_v5, %v1285_v26  ;;  %v1337_v57 = vadd.f32 %v7923_v5, %v1289_v13  ;;  %v10427_v26 = vld [vmem:[#allocation65_spill] sm:$0xff]  ;;  %v5263_v23 = vld [vmem:[%s7011_s16 + $0x3d8] sm:$0xff] }
 0x12c   : > { %10419 = vst [vmem:[#allocation97_spill] sm:$0xff] %v7945_v12  ;;  %10421 = vst [vmem:[#allocation41_spill] sm:$0xff] %v7949_v53  ;;  %6287 = vmatpush3.bf16.msra.mxu0 %v6286_v28  ;;  %v10423_v29 = vmov 0.0   ;;  %v7967_v49 = vmul.f32 %v5266_v47, %v10420_v62  ;;  %v7970_v6 = vmul.f32 %v5270_v7, %v10420_v62  ;;  %v1273_v13 = vmul.f32 %v10427_v26, %v7872_v50  ;;  %v5267_v62 = vld [vmem:[%s7011_s16 + $0x4b8] sm:$0xff]  ;;  %v10428_v26 = vld [vmem:[#allocation33_spill] sm:$0xff] }
 0x12d   : > { %10422 = vst [vmem:[#allocation98_spill] sm:$0xff] %v7956_v19  ;;  %6066 = vmatprep.mubr.msk.f32.mxu0 %vm6803_vm0, %v10423_v29  ;;  %10426 = vst [vmem:[#allocation101_spill] sm:$0xff] %v7973_v20  ;;  %v1326_v18 = vadd.f32 %v7960_v3, %v1278_v42  ;;  %6288 = vmatprep.subr.bf16.mxu0 %v10410_v48  ;;  %v1330_v28 = vadd.f32 %v7960_v3, %v1282_v8  ;;  %v10429_v42 = vld [vmem:[#allocation49_spill] sm:$0xff]  ;;  %v10430_v48 = vld [vmem:[#allocation42_spill] sm:$0xff] }
 0x12e   : > { %10424 = vst [vmem:[#allocation99_spill] sm:$0xff] %v7967_v49  ;;  %10425 = vst [vmem:[#allocation100_spill] sm:$0xff] %v7970_v6  ;;  %v1334_v37 = vadd.f32 %v7960_v3, %v1286_v27  ;;  %v1338_v47 = vadd.f32 %v7960_v3, %v1290_v52  ;;  %v6289_v7 = vpack.c.bf16 %v1196_v1, %v1195_v30  ;;  %v10432_v52 = vld [vmem:[#allocation66_spill] sm:$0xff] }
 0x12f   : > { %v1321_v29 = vadd.f32 %v7923_v5, %v1273_v13  ;;  %v1403_v15 = vmul.f32 %v10428_v26, %v7962_v45  ;;  %v1407_v51 = vmul.f32 %v10429_v42, %v7962_v45  ;;  %v1411_v8 = vmul.f32 %v7794_v17, %v7962_v45  ;;  %v8001_v26 = vpop.permute.xlu0 %1382  ;;  %v8003_v17 = vpop.permute.xlu1 %1257  ;;  %v5271_v42 = vld [vmem:[%s7011_s16 + $0x598] sm:$0xff] }
 0x130   : > { %v7993_v27 = vmul.f32 %v7973_v20, %v10430_v48  ;;  %v1274_v30 = vmul.f32 %v10432_v52, %v7921_v31  ;;  %v1415_v1 = vmul.f32 %v7807_v14, %v7962_v45  ;;  %v1419_v13 = vmul.f32 %v7834_v35, %v7962_v45  ;;  %6290 = vmatpush3.bf16.msra.mxu0 %v6289_v7  ;;  %v5294_v52 = vld [vmem:[%s7011_s16 + $0x3f0] sm:$0xff] }
 0x131   : > { %10433 = vst [vmem:[#allocation33_spill] sm:$0xff] %v8003_v17  ;;  %v8007_v16 = vmul.f32 %v5263_v23, %v10430_v48  ;;  %v8013_v2 = vadd.f32 %v1403_v15, %v1321_v29  ;;  %v8015_v14 = vadd.f32 %v1407_v51, %v1325_v4  ;;  %v8017_v20 = vadd.f32 %v1411_v8, %v1329_v11  ;;  %v5298_v23 = vld [vmem:[%s7011_s16 + $0x4d0] sm:$0xff]  ;;  %v8030_v15 = vld [vmem:[%s7011_s16 + $0x238] sm:$0xff]  ;;  %v10442_v51 = vld [vmem:[#allocation36_spill] sm:$0xff] }
 0x132   : > { %10431 = vst [vmem:[#allocation65_spill] sm:$0xff] %v7993_v27  ;;  %v8020_v35 = vmul.f32 %v5267_v62, %v10430_v48  ;;  %v1322_v7 = vadd.f32 %v7960_v3, %v1274_v30  ;;  %v8023_v6 = vadd.f32 %v1415_v1, %v1333_v38  ;;  %v8025_v12 = vadd.f32 %v1419_v13, %v1337_v57  ;;  %v10443_v11 = vld [vmem:[#allocation56_spill] sm:$0xff]  ;;  %v10445_v8 = vld [vmem:[#allocation71_spill] sm:$0xff] }
 0x133   : > { %10434 = vst [vmem:[#allocation49_spill] sm:$0xff] %v8007_v16  ;;  %10435 = vst [vmem:[#allocation42_spill] sm:$0xff] %v8013_v2  ;;  %v1404_v4 = vmul.f32 %v10442_v51, %v8001_v26  ;;  %v1408_v29 = vmul.f32 %v10443_v11, %v8001_v26  ;;  %v1412_v62 = vmul.f32 %v7798_v0, %v8001_v26  ;;  %6067 = vmatmul.mubr.msk.f32.vlgmr.msra.gmra.mrb[2].mxu0 %vm2008_vm1, %v7925_v34  ;;  %v5295_v13 = vld [vmem:[%s7011_s16 + $0x3f8] sm:$0xff]  ;;  %v8055_v51 = vpop.permute.xlu0 %1262 }
 0x134   : > { %10436 = vst [vmem:[#allocation66_spill] sm:$0xff] %v8015_v14  ;;  %10437 = vst [vmem:[#allocation102_spill] sm:$0xff] %v8017_v20  ;;  %v1416_v38 = vmul.f32 %v7811_v40, %v8001_v26  ;;  %v8043_v57 = vmul.f32 %v5271_v42, %v10430_v48  ;;  %v8047_v30 = vmul.f32 %v8010_v60, %v10445_v8  ;;  %v8057_v40 = vpop.permute.xlu1 %1487  ;;  %v5299_v34 = vld [vmem:[%s7011_s16 + $0x4d8] sm:$0xff]  ;;  %v10455_v20 = vld [vmem:[#allocation72_spill] sm:$0xff] }
 0x135   : > { %10438 = vst [vmem:[#allocation103_spill] sm:$0xff] %v8020_v35  ;;  %10439 = vst [vmem:[#allocation104_spill] sm:$0xff] %v8023_v6  ;;  %v8050_v1 = vmul.f32 %v5294_v52, %v10445_v8  ;;  %v1420_v0 = vmul.f32 %v7838_v54, %v8001_v26  ;;  %v5303_v48 = vld [vmem:[%s7011_s16 + $0x5b8] sm:$0xff]  ;;  %v8061_v42 = vadd.f32 %v1404_v4, %v1322_v7  ;;  %v5422_v7 = vld [vmem:[%s7011_s16 + $0x170] sm:$0xff] }
 0x136   : > { %10440 = vst [vmem:[#allocation105_spill] sm:$0xff] %v8025_v12  ;;  %10441 = vst [vmem:[#allocation106_spill] sm:$0xff] %v8030_v15  ;;  %v8063_v11 = vadd.f32 %v1408_v29, %v1326_v18  ;;  %v8065_v12 = vadd.f32 %v1412_v62, %v1330_v28  ;;  %v8067_v52 = vadd.f32 %v1416_v38, %v1334_v37  ;;  %v8093_v4 = vld [vmem:[%s7011_s16 + $0x178] sm:$0xff]  ;;  %v10461_v62 = vld [vmem:[#allocation25_spill] sm:$0xff] }
 0x137   : > { %10444 = vst [vmem:[#allocation36_spill] sm:$0xff] %v8043_v57  ;;  %10446 = vst [vmem:[#allocation56_spill] sm:$0xff] %v8047_v30  ;;  %v8070_v6 = vmul.f32 %v5298_v23, %v10445_v8  ;;  %v8073_v54 = vmul.f32 %v5302_v59, %v10445_v8  ;;  %v8077_v14 = vmul.f32 %v8030_v15, %v10455_v20  ;;  %v5426_v23 = vld [vmem:[%s7011_s16 + $0x190] sm:$0xff]  ;;  %v8112_v8 = vld [vmem:[%s7011_s16 + $0x198] sm:$0xff] }
 0x138   : > { %10447 = vst [vmem:[#allocation71_spill] sm:$0xff] %v8050_v1  ;;  %10448 = vst [vmem:[#allocation107_spill] sm:$0xff] %v8055_v51  ;;  %v8079_v2 = vadd.f32 %v1420_v0, %v1338_v47  ;;  %v8083_v18 = vmul.f32 %v5295_v13, %v10455_v20  ;;  %v1283_v37 = vmul.f32 %v7719_v9, %v8003_v17  ;;  %v10463_v13 = vld [vmem:[#allocation59_spill] sm:$0xff]  ;;  %v10469_v15 = vld [vmem:[#allocation60_spill] sm:$0xff] }
 0x139   : > { %10449 = vst [vmem:[#allocation108_spill] sm:$0xff] %v8061_v42  ;;  %10450 = vst [vmem:[#allocation109_spill] sm:$0xff] %v8063_v11  ;;  %v1287_v59 = vmul.f32 %v7778_v56, %v8003_v17  ;;  %v1291_v28 = vmul.f32 %v7820_v39, %v8003_v17  ;;  %v8096_v47 = vmul.f32 %v5299_v34, %v10455_v20  ;;  %v8107_v56 = vpop.permute.xlu0 %1492  ;;  %v8109_v39 = vpop.permute.xlu1 %1305  ;;  %v10468_v11 = vld [vmem:[#allocation26_spill] sm:$0xff]  ;;  %v8160_v57 = vld [vmem:[%s7011_s16 + $0x288] sm:$0xff] }
 0x13a   : > { %10451 = vst [vmem:[#allocation110_spill] sm:$0xff] %v8065_v12  ;;  %10452 = vst [vmem:[#allocation111_spill] sm:$0xff] %v8067_v52  ;;  %v8099_v29 = vmul.f32 %v5303_v48, %v10455_v20  ;;  %v1265_v9 = vmul.f32 %v7872_v50, %v10461_v62  ;;  %v8105_v38 = vmul.f32 %v7722_v61, %v8055_v51  ;;  %v8121_v61 = vld [vmem:[%s7011_s16 + $0x240] sm:$0xff]  ;;  %v10464_v62 = vld [vmem:[#allocation81_spill] sm:$0xff] }
 0x13b   : > { %10453 = vst [vmem:[#allocation112_spill] sm:$0xff] %v8070_v6  ;;  %10454 = vst [vmem:[#allocation113_spill] sm:$0xff] %v8073_v54  ;;  %v1269_v0 = vmul.f32 %v10463_v13, %v7872_v50  ;;  %v1288_v20 = vmul.f32 %v7781_v32, %v8055_v51  ;;  %v1292_v34 = vmul.f32 %v7823_v36, %v8055_v51  ;;  %v8124_v48 = vld [vmem:[%s7011_s16 + $0x260] sm:$0xff]  ;;  %v10467_v32 = vld [vmem:[#allocation82_spill] sm:$0xff] }
 0x13c   : > { %10456 = vst [vmem:[#allocation72_spill] sm:$0xff] %v8077_v14  ;;  %10457 = vst [vmem:[#allocation114_spill] sm:$0xff] %v8079_v2  ;;  %v939_v2 = vmul.f32 %v5422_v7, %v10464_v62  ;;  %v8128_v52 = vld [vmem:[%s7011_s16 + $0x280] sm:$0xff]  ;;  %v8132_v12 = vmul.f32 %v8121_v61, %v8057_v40  ;;  %v8136_v50 = vmul.f32 %v8124_v48, %v8057_v40  ;;  %v8154_v54 = vld [vmem:[%s7011_s16 + $0x248] sm:$0xff] }
 0x13d   : > { %10458 = vst [vmem:[#allocation115_spill] sm:$0xff] %v8083_v18  ;;  %10459 = vst [vmem:[#allocation116_spill] sm:$0xff] %v8096_v47  ;;  %v8140_v13 = vmul.f32 %v8093_v4, %v10467_v32  ;;  %v8143_v36 = vmul.f32 %v5426_v23, %v7800_v63  ;;  %v1266_v42 = vmul.f32 %v7921_v31, %v10468_v11  ;;  %v8179_v6 = vpop.permute.xlu0 %1310  ;;  %v8185_v18 = vpop.permute.xlu1 %1387  ;;  %v6646_v1 = vld [vmem:[%s7011_s16 + $0xe0] sm:$0xff]  ;;  %v8210_v30 = vld [vmem:[%s7011_s16 + $0x1b0] sm:$0xff] }
 0x13e   : > { %10460 = vst [vmem:[#allocation117_spill] sm:$0xff] %v8099_v29  ;;  %10462 = vst [vmem:[#allocation25_spill] sm:$0xff] %v8109_v39  ;;  %v1270_v29 = vmul.f32 %v10469_v15, %v7921_v31  ;;  %v8164_v47 = vmul.f32 %v8112_v8, %v7802_v24  ;;  %v1313_v11 = vadd.f32 %v7923_v5, %v1265_v9  ;;  %v10475_v9 = vld [vmem:[#allocation62_spill] sm:$0xff] }
 0x13f   : > { %10465 = vst [vmem:[#allocation59_spill] sm:$0xff] %v8132_v12  ;;  %10466 = vst [vmem:[#allocation118_spill] sm:$0xff] %v8136_v50  ;;  %v8151_v12 = vmul.f32 %v8128_v52, %v8057_v40  ;;  %v8157_v50 = vld [vmem:[%s7011_s16 + $0x268] sm:$0xff]  ;;  %v8169_v31 = vmul.f32 %v8154_v54, %v8107_v56  ;;  %v1317_v35 = vadd.f32 %v7923_v5, %v1269_v0 }
 0x140   : > { %v8173_v15 = vmul.f32 %v8157_v50, %v8107_v56  ;;  %10474 = vst [vmem:[#allocation121_spill] sm:$0xff] %v8179_v6  ;;  %v1314_v49 = vadd.f32 %v7960_v3, %v1266_v42  ;;  %v1275_v25 = vmul.f32 %v10475_v9, %v8003_v17  ;;  %10476 = vst [vmem:[#allocation62_spill] sm:$0xff] %v8185_v18  ;;  %v6647_v42 = vld [vmem:[%s7011_s16 + $0x100] sm:$0xff]  ;;  %v6648_v9 = vld [vmem:[%s7011_s16 + $0xe8] sm:$0xff] }
 0x141   : > { %10470 = vst [vmem:[#allocation26_spill] sm:$0xff] %v8151_v12  ;;  %10471 = vst [vmem:[#allocation60_spill] sm:$0xff] %v8169_v31  ;;  %v8177_v12 = vmul.f32 %v8160_v57, %v8107_v56  ;;  %v8188_v31 = vadd.f32 %v939_v2, %v7902_v22  ;;  %v1335_v19 = vadd.f32 %v8109_v39, %v1287_v59  ;;  %v10478_v2 = vld [vmem:[#allocation67_spill] sm:$0xff]  ;;  %v8207_v14 = vpop.permute.xlu0 %1392 }
 0x142   : > { %10472 = vst [vmem:[#allocation119_spill] sm:$0xff] %v8173_v15  ;;  %v1395_v15 = vmul.f32 %v6646_v1, %v7962_v45  ;;  %v1339_v5 = vadd.f32 %v8109_v39, %v1291_v28  ;;  %v1399_v0 = vmul.f32 %v6647_v42, %v7962_v45  ;;  %v1396_v55 = vmul.f32 %v6648_v9, %v8001_v26  ;;  %v10480_v45 = vld [vmem:[#allocation63_spill] sm:$0xff]  ;;  %v10481_v9 = vld [vmem:[#allocation73_spill] sm:$0xff] }
 0x143   : > { %10473 = vst [vmem:[#allocation120_spill] sm:$0xff] %v8177_v12  ;;  %v10477_v12 = vld [vmem:[#allocation77_spill] sm:$0xff]  ;;  %v1276_v22 = vmul.f32 %v10478_v2, %v8055_v51  ;;  %v1323_v24 = vadd.f32 %v8109_v39, %v1275_v25  ;;  %v1336_v59 = vadd.f32 %v8179_v6, %v1288_v20  ;;  %v1340_v28 = vadd.f32 %v8179_v6, %v1292_v34  ;;  %v10482_v34 = vld [vmem:[#allocation78_spill] sm:$0xff] }
 0x144   : > { %v1279_v16 = vmul.f32 %v10477_v12, %v8003_v17  ;;  %v1331_v12 = vadd.f32 %v8109_v39, %v1283_v37  ;;  %10479 = vst [vmem:[#allocation77_spill] sm:$0xff] %v8207_v14  ;;  %v1405_v42 = vmul.f32 %v10480_v45, %v8185_v18  ;;  %v1409_v2 = vmul.f32 %v10481_v9, %v8185_v18  ;;  %v6649_v37 = vld [vmem:[%s7011_s16 + $0x108] sm:$0xff] }
 0x145   : > { %v1413_v25 = vmul.f32 %v5422_v7, %v8185_v18  ;;  %v1400_v20 = vmul.f32 %v6649_v37, %v8001_v26  ;;  %v1280_v63 = vmul.f32 %v10482_v34, %v8055_v51  ;;  %v1324_v32 = vadd.f32 %v8179_v6, %v1276_v22  ;;  %v8237_v34 = vld [vmem:[%s7011_s16 + $0x1b8] sm:$0xff]  ;;  %v10488_v22 = vld [vmem:[#allocation68_spill] sm:$0xff] }
 0x146   : > { %v1327_v1 = vadd.f32 %v8109_v39, %v1279_v16  ;;  %v1417_v16 = vmul.f32 %v5426_v23, %v8185_v18  ;;  %v1421_v62 = vmul.f32 %v8210_v30, %v8185_v18  ;;  %v8225_v45 = vadd.f32 %v1405_v42, %v1323_v24  ;;  %v1598_v23 = vpop.permute.xlu1 %1597  ;;  %v10489_v24 = vld [vmem:[#allocation74_spill] sm:$0xff] }
 0x147   : > { %v8229_v9 = vadd.f32 %v1413_v25, %v1331_v12  ;;  %v1328_v26 = vadd.f32 %v8179_v6, %v1280_v63  ;;  %v1406_v53 = vmul.f32 %v10488_v22, %v8207_v14  ;;  %v1410_v42 = vmul.f32 %v10489_v24, %v8207_v14 }
 0x148   : > { %10483 = vst [vmem:[#allocation67_spill] sm:$0xff] %v8225_v45  ;;  %v8227_v27 = vadd.f32 %v1409_v2, %v1327_v1  ;;  %v8231_v7 = vadd.f32 %v1417_v16, %v1335_v19  ;;  %v8234_v37 = vadd.f32 %v1421_v62, %v1339_v5  ;;  %v1332_v1 = vadd.f32 %v8179_v6, %v8105_v38  ;;  %v1603_v62 = vpop.permute.xlu0 %1602  ;;  %v5436_v38 = vld [vmem:[%s7011_s16 + $0x1c0] sm:$0xff]  ;;  %v8463_v45 = vld [vmem:[%s7011_s16 + $0x428] sm:$0xff] }
 0x149   : > { %10485 = vst [vmem:[#allocation73_spill] sm:$0xff] %v8229_v9  ;;  %v1414_v19 = vmul.f32 %v8093_v4, %v8207_v14  ;;  %v1418_v12 = vmul.f32 %v8112_v8, %v8207_v14  ;;  %v1422_v63 = vmul.f32 %v8237_v34, %v8207_v14  ;;  %v1318_v5 = vadd.f32 %v7960_v3, %v1270_v29  ;;  %v10532_v9 = vld [vmem:[#allocation21_spill] sm:$0xff] }
 0x14a   : > { %10484 = vst [vmem:[#allocation63_spill] sm:$0xff] %v8227_v27  ;;  %10486 = vst [vmem:[#allocation78_spill] sm:$0xff] %v8231_v7  ;;  %v8252_v2 = vadd.f32 %v1395_v15, %v1313_v11  ;;  %v8254_v25 = vadd.f32 %v1406_v53, %v1324_v32  ;;  %v8256_v16 = vadd.f32 %v1410_v42, %v1328_v26  ;;  %v10495_v32 = vld [vmem:[#allocation44_spill] sm:$0xff]  ;;  %v5437_v15 = vld [vmem:[%s7011_s16 + $0x1c8] sm:$0xff] }
 0x14b   : > { %10487 = vst [vmem:[#allocation122_spill] sm:$0xff] %v8234_v37  ;;  %v8259_v22 = vadd.f32 %v1414_v19, %v1332_v1  ;;  %v8261_v4 = vadd.f32 %v1418_v12, %v1336_v59  ;;  %v8263_v8 = vadd.f32 %v1422_v63, %v1340_v28  ;;  %v968_v24 = vadd.f32 %v8140_v13, %v7905_v58  ;;  %v10496_v59 = vld [vmem:[#allocation48_spill] sm:$0xff]  ;;  %v10497_v28 = vld [vmem:[#allocation27_spill] sm:$0xff]  ;;  %v10499_v13 = vld [vmem:[#allocation85_spill] sm:$0xff] }
 0x14c   : > { %10490 = vst [vmem:[#allocation68_spill] sm:$0xff] %v8254_v25  ;;  %10491 = vst [vmem:[#allocation74_spill] sm:$0xff] %v8256_v16  ;;  %v8267_v3 = vadd.f32 %v1399_v0, %v1317_v35  ;;  %v8269_v29 = vadd.f32 %v1396_v55, %v1314_v49  ;;  %v8271_v53 = vadd.f32 %v1400_v20, %v1318_v5  ;;  %v10498_v58 = vld [vmem:[#allocation28_spill] sm:$0xff]  ;;  %v8285_v49 = vpop.permute.xlu1 %1497  ;;  %v10502_v19 = vld [vmem:[#allocation34_spill] sm:$0xff] }
 0x14d   : > { %10492 = vst [vmem:[#allocation123_spill] sm:$0xff] %v8259_v22  ;;  %10493 = vst [vmem:[#allocation124_spill] sm:$0xff] %v8261_v4  ;;  %v1271_v11 = vmul.f32 %v10495_v32, %v8003_v17  ;;  %v1272_v26 = vmul.f32 %v10496_v59, %v8055_v51  ;;  %v1401_v42 = vmul.f32 %v10497_v28, %v8185_v18  ;;  %v6650_v20 = vld [vmem:[%s7011_s16 + $0x1e0] sm:$0xff]  ;;  %v10503_v32 = vld [vmem:[#allocation86_spill] sm:$0xff]  ;;  %v8316_v17 = vpop.permute.xlu0 %1502 }
 0x14e   : > { %10494 = vst [vmem:[#allocation125_spill] sm:$0xff] %v8263_v8  ;;  %v1402_v35 = vmul.f32 %v10498_v58, %v8207_v14  ;;  %v8283_v55 = vmul.f32 %v10499_v13, %v1598_v23  ;;  %10501 = vst [vmem:[#allocation48_spill] sm:$0xff] %v8285_v49  ;;  %v8288_v0 = vmul.f32 %v5436_v38, %v8057_v40  ;;  %v5468_v63 = vld [vmem:[%s7011_s16 + $0x2a0] sm:$0xff]  ;;  %v10505_v28 = vld [vmem:[#allocation50_spill] sm:$0xff] }
 0x14f   : > { %v8292_v1 = vmul.f32 %v6650_v20, %v8057_v40  ;;  %v8296_v12 = vmul.f32 %v10502_v19, %v8057_v40  ;;  %v5472_v5 = vld [vmem:[%s7011_s16 + $0x2c0] sm:$0xff]  ;;  %v8301_v59 = vmul.f32 %v10503_v32, %v1603_v62  ;;  %v8305_v38 = vmul.f32 %v10505_v28, %v8057_v40  ;;  %v8314_v18 = vld [vmem:[%s7011_s16 + $0x290] sm:$0xff]  ;;  %10507 = vst [vmem:[#allocation85_spill] sm:$0xff] %v8316_v17  ;;  %v6651_v14 = vld [vmem:[%s7011_s16 + $0x1e8] sm:$0xff] }
 0x150   : > { %10500 = vst [vmem:[#allocation44_spill] sm:$0xff] %v8283_v55  ;;  %v8308_v58 = vmul.f32 %v5437_v15, %v8107_v56  ;;  %v1319_v13 = vadd.f32 %v8109_v39, %v1271_v11  ;;  %v1320_v20 = vadd.f32 %v8179_v6, %v1272_v26  ;;  %v5476_v19 = vld [vmem:[%s7011_s16 + $0x2e0] sm:$0xff]  ;;  %v8320_v32 = vmul.f32 %v6651_v14, %v8107_v56  ;;  %v10508_v40 = vld [vmem:[#allocation37_spill] sm:$0xff]  ;;  %v10513_v55 = vld [vmem:[#allocation79_spill] sm:$0xff] }
 0x151   : > { %10504 = vst [vmem:[#allocation27_spill] sm:$0xff] %v8301_v59  ;;  %10506 = vst [vmem:[#allocation28_spill] sm:$0xff] %v8305_v38  ;;  %v8324_v28 = vmul.f32 %v10508_v40, %v8107_v56  ;;  %v8328_v15 = vmul.f32 %v7884_v21, %v8107_v56  ;;  %v5469_v11 = vld [vmem:[%s7011_s16 + $0x2a8] sm:$0xff]  ;;  %v8335_v6 = vmul.f32 %v8314_v18, %v8285_v49  ;;  %v5463_v21 = vld [vmem:[%s7011_s16 + $0x298] sm:$0xff] }
 0x152   : > { %v5473_v26 = vld [vmem:[%s7011_s16 + $0x2c8] sm:$0xff]  ;;  %v8337_v51 = vadd.f32 %v1401_v42, %v1319_v13  ;;  %v8339_v8 = vadd.f32 %v1402_v35, %v1320_v20  ;;  %v8341_v14 = vmul.f32 %v5468_v63, %v1598_v23  ;;  %v8343_v40 = vmul.f32 %v5472_v5, %v1598_v23  ;;  %v10511_v37 = vld [vmem:[#allocation52_spill] sm:$0xff]  ;;  %v10516_v35 = vld [vmem:[#allocation83_spill] sm:$0xff] }
 0x153   : > { %10509 = vst [vmem:[#allocation34_spill] sm:$0xff] %v8328_v15  ;;  %v5477_v39 = vld [vmem:[%s7011_s16 + $0x2e8] sm:$0xff]  ;;  %10510 = vst [vmem:[#allocation86_spill] sm:$0xff] %v8335_v6  ;;  %v8346_v56 = vmul.f32 %v5476_v19, %v1598_v23  ;;  %v8349_v59 = vmul.f32 %v10511_v37, %v1598_v23  ;;  %v8352_v4 = vmul.f32 %v10513_v55, %v1598_v23  ;;  %v10521_v37 = vld [vmem:[#allocation80_spill] sm:$0xff] }
 0x154   : > { %v8355_v42 = vmul.f32 %v5463_v21, %v8316_v17  ;;  %v8358_v13 = vmul.f32 %v10516_v35, %v1598_v23  ;;  %v8360_v63 = vmul.f32 %v5469_v11, %v1603_v62  ;;  %v8362_v5 = vmul.f32 %v5473_v26, %v1603_v62  ;;  %v10519_v19 = vld [vmem:[#allocation61_spill] sm:$0xff]  ;;  %v10523_v55 = vld [vmem:[#allocation84_spill] sm:$0xff]  ;;  %v5454_v23 = vld [vmem:[%s7011_s16 + $0x250] sm:$0xff] }
 0x155   : > { %10512 = vst [vmem:[#allocation50_spill] sm:$0xff] %v8349_v59  ;;  %10514 = vst [vmem:[#allocation37_spill] sm:$0xff] %v8352_v4  ;;  %v8364_v20 = vmul.f32 %v5477_v39, %v1603_v62  ;;  %v8367_v6 = vmul.f32 %v10519_v19, %v1603_v62  ;;  %v8370_v7 = vmul.f32 %v10521_v37, %v1603_v62  ;;  %v5458_v11 = vld [vmem:[%s7011_s16 + $0x270] sm:$0xff]  ;;  %v10546_v59 = vld [vmem:[#allocation87_spill] sm:$0xff] }
 0x156   : > { %10515 = vst [vmem:[#allocation52_spill] sm:$0xff] %v8355_v42  ;;  %10517 = vst [vmem:[#allocation79_spill] sm:$0xff] %v8358_v13  ;;  %v8373_v22 = vmul.f32 %v10523_v55, %v1603_v62  ;;  %v1159_v42 = vmul.f32 %v8210_v30, %v7844_v10  ;;  %v6652_v35 = vld [vmem:[%s7011_s16 + $0x1f0] sm:$0xff]  ;;  %v8385_v39 = vmul.f32 %v7919_v44, %v8285_v49  ;;  %v10531_v13 = vld [vmem:[#allocation43_spill] sm:$0xff] }
 0x157   : > { %10518 = vst [vmem:[#allocation83_spill] sm:$0xff] %v8364_v20  ;;  %10520 = vst [vmem:[#allocation61_spill] sm:$0xff] %v8367_v6  ;;  %v8381_v26 = vmul.f32 %v6652_v35, %v8285_v49  ;;  %v8389_v19 = vmul.f32 %v8010_v60, %v8285_v49  ;;  %v1077_v62 = vadd.f32 %v8143_v36, %v8188_v31  ;;  %v10534_v36 = vld [vmem:[#allocation57_spill] sm:$0xff]  ;;  %v8456_v25 = vld [vmem:[%s7011_s16 + $0x420] sm:$0xff] }
 0x158   : > { %10522 = vst [vmem:[#allocation80_spill] sm:$0xff] %v8370_v7  ;;  %10524 = vst [vmem:[#allocation84_spill] sm:$0xff] %v8373_v22  ;;  %v8394_v30 = vmul.f32 %v5454_v23, %v8285_v49  ;;  %v8397_v37 = vmul.f32 %v5458_v11, %v8285_v49  ;;  %v1078_v55 = vadd.f32 %v8164_v47, %v968_v24  ;;  %v10530_v22 = vld [vmem:[#allocation17_spill] sm:$0xff]  ;;  %v10533_v7 = vld [vmem:[#allocation51_spill] sm:$0xff] }
 0x159   : > { %10525 = vst [vmem:[#allocation126_spill] sm:$0xff] %v8385_v39  ;;  %10526 = vst [vmem:[#allocation127_spill] sm:$0xff] %v8389_v19  ;;  %v1160_v44 = vmul.f32 %v8237_v34, %v7846_v43  ;;  %v8402_v35 = vadd.f32 %v1159_v42, %v1077_v62  ;;  %v749_v60 = vadd.f32 %v10531_v13, %v10530_v22  ;;  %v10537_v24 = vld [vmem:[#allocation75_spill] sm:$0xff]  ;;  %v10538_v42 = vld [vmem:[#allocation76_spill] sm:$0xff] }
 0x15a   : > { %10527 = vst [vmem:[#allocation128_spill] sm:$0xff] %v8394_v30  ;;  %10528 = vst [vmem:[#allocation129_spill] sm:$0xff] %v8397_v37  ;;  %v750_v4 = vadd.f32 %v10533_v7, %v10532_v9  ;;  %v941_v31 = vmul.f32 %v8121_v61, %v10534_v36  ;;  %v8411_v30 = vld [vmem:[%s7011_s16 + $0x258] sm:$0xff]  ;;  %v10536_v37 = vld [vmem:[#allocation58_spill] sm:$0xff]  ;;  %v1051_v34 = vmul.f32 %v8124_v48, %v10537_v24 }
 0x15b   : > { %10529 = vst [vmem:[#allocation130_spill] sm:$0xff] %v8402_v35  ;;  %v8413_v49 = vadd.f32 %v1160_v44, %v1078_v55  ;;  %v942_v47 = vmul.f32 %v8154_v54, %v10536_v37  ;;  %v1052_v22 = vmul.f32 %v8157_v50, %v10538_v42  ;;  %v8422_v13 = vld [vmem:[%s7011_s16 + $0x278] sm:$0xff]  ;;  %v10539_v9 = vld [vmem:[#allocation64_spill] sm:$0xff]  ;;  %v1161_v62 = vmul.f32 %v8128_v52, %v7762_v41  ;;  %v10540_v48 = vld [vmem:[#allocation29_spill] sm:$0xff] }
 0x15c   : > { %v859_v7 = vadd.f32 %v10539_v9, %v749_v60  ;;  %v860_v61 = vadd.f32 %v7913_v33, %v750_v4  ;;  %v1162_v54 = vmul.f32 %v8160_v57, %v7764_v46  ;;  %v10541_v44 = vld [vmem:[#allocation41_spill] sm:$0xff]  ;;  %v10542_v50 = vld [vmem:[#allocation35_spill] sm:$0xff]  ;;  %v10545_v9 = vld [vmem:[#allocation82_spill] sm:$0xff]  ;;  %v1053_v15 = vmul.f32 %v5458_v11, %v10546_v59  ;;  %10554 = vst [vmem:[#allocation51_spill] sm:$0xff] %v8456_v25 }
 0x15d   : > { %10535 = vst [vmem:[#allocation17_spill] sm:$0xff] %v8413_v49  ;;  %v751_v16 = vadd.f32 %v10541_v44, %v10540_v48  ;;  %v10543_v19 = vld [vmem:[#allocation65_spill] sm:$0xff]  ;;  %v944_v52 = vmul.f32 %v8411_v30, %v10545_v9  ;;  %v8441_v57 = vld [vmem:[%s7011_s16 + $0x400] sm:$0xff]  ;;  %v1164_v11 = vmul.f32 %v5463_v21, %v7846_v43  ;;  %10557 = vst [vmem:[#allocation57_spill] sm:$0xff] %v8463_v45 }
 0x15e   : > { %v752_v27 = vadd.f32 %v10543_v19, %v10542_v50  ;;  %v10544_v6 = vld [vmem:[#allocation81_spill] sm:$0xff]  ;;  %v969_v33 = vadd.f32 %v941_v31, %v859_v7  ;;  %v970_v4 = vadd.f32 %v942_v47, %v860_v61  ;;  %10547 = vst [vmem:[#allocation43_spill] sm:$0xff] %v8441_v57  ;;  %v10548_v55 = vld [vmem:[#allocation56_spill] sm:$0xff]  ;;  %v10552_v61 = vld [vmem:[#allocation18_spill] sm:$0xff] }
 0x15f   : > { %v943_v60 = vmul.f32 %v5454_v23, %v10544_v6  ;;  %v861_v35 = vadd.f32 %v10548_v55, %v751_v16  ;;  %v10549_v48 = vld [vmem:[#allocation72_spill] sm:$0xff]  ;;  %v1163_v23 = vmul.f32 %v8314_v18, %v7844_v10  ;;  %v8450_v31 = vld [vmem:[%s7011_s16 + $0x408] sm:$0xff]  ;;  %v10555_v55 = vld [vmem:[#allocation22_spill] sm:$0xff]  ;;  %v949_v18 = vmul.f32 %v8441_v57, %v10534_v36 }
 0x160   : > { %v862_v44 = vadd.f32 %v10549_v48, %v752_v27  ;;  %v10550_v49 = vld [vmem:[#allocation88_spill] sm:$0xff]  ;;  %10551 = vst [vmem:[#allocation21_spill] sm:$0xff] %v8450_v31  ;;  %v1079_v47 = vadd.f32 %v1051_v34, %v969_v33  ;;  %v1080_v7 = vadd.f32 %v1052_v22, %v970_v4  ;;  %v10553_v50 = vld [vmem:[#allocation45_spill] sm:$0xff]  ;;  %v8578_v20 = vld [vmem:[%s7011_s16 + $0x4f0] sm:$0xff] }
 0x161   : > { %v1054_v19 = vmul.f32 %v8422_v13, %v10550_v49  ;;  %v757_v38 = vadd.f32 %v10553_v50, %v10552_v61  ;;  %v971_v16 = vadd.f32 %v943_v60, %v861_v35  ;;  %v10556_v48 = vld [vmem:[#allocation53_spill] sm:$0xff]  ;;  %v8466_v34 = vld [vmem:[%s7011_s16 + $0x440] sm:$0xff]  ;;  %v950_v60 = vmul.f32 %v8450_v31, %v10536_v37  ;;  %v10563_v50 = vld [vmem:[#allocation95_spill] sm:$0xff] }
 0x162   : > { %v972_v27 = vadd.f32 %v944_v52, %v862_v44  ;;  %v758_v39 = vadd.f32 %v10556_v48, %v10555_v55  ;;  %10558 = vst [vmem:[#allocation58_spill] sm:$0xff] %v8466_v34  ;;  %v8468_v22 = vadd.f32 %v1161_v62, %v1079_v47  ;;  %v8470_v21 = vadd.f32 %v1162_v54, %v1080_v7  ;;  %v10561_v33 = vld [vmem:[#allocation69_spill] sm:$0xff]  ;;  %v8478_v52 = vpop.permute.xlu1 %1707  ;;  %v8484_v54 = vld [vmem:[%s7011_s16 + $0x410] sm:$0xff]  ;;  %v8486_v47 = vpop.permute.xlu0 %1712  ;;  %v8562_v31 = vld [vmem:[%s7011_s16 + $0x520] sm:$0xff] }
 0x163   : > { %v867_v35 = vadd.f32 %v10561_v33, %v757_v38  ;;  %v8476_v4 = vld [vmem:[%s7011_s16 + $0x448] sm:$0xff]  ;;  %v1081_v44 = vadd.f32 %v1053_v15, %v971_v16  ;;  %v1059_v62 = vmul.f32 %v8456_v25, %v10537_v24  ;;  %10564 = vst [vmem:[#allocation29_spill] sm:$0xff] %v8484_v54  ;;  %v1060_v15 = vmul.f32 %v8463_v45, %v10538_v42  ;;  %v8498_v16 = vld [vmem:[%s7011_s16 + $0x430] sm:$0xff] }
 0x164   : > { %10559 = vst [vmem:[#allocation75_spill] sm:$0xff] %v8468_v22  ;;  %10560 = vst [vmem:[#allocation76_spill] sm:$0xff] %v8470_v21  ;;  %v1082_v61 = vadd.f32 %v1054_v19, %v972_v27  ;;  %v868_v55 = vadd.f32 %v10563_v50, %v758_v39  ;;  %v1169_v19 = vmul.f32 %v8466_v34, %v7762_v41  ;;  %v8495_v39 = vld [vmem:[%s7011_s16 + $0x418] sm:$0xff]  ;;  %v10570_v38 = vld [vmem:[#allocation30_spill] sm:$0xff] }
 0x165   : > { %10562 = vst [vmem:[#allocation64_spill] sm:$0xff] %v8476_v4  ;;  %v977_v7 = vadd.f32 %v949_v18, %v867_v35  ;;  %10565 = vst [vmem:[#allocation41_spill] sm:$0xff] %v8495_v39  ;;  %v8500_v27 = vadd.f32 %v1163_v23, %v1081_v44  ;;  %v1170_v50 = vmul.f32 %v8476_v4, %v7764_v46  ;;  %v8507_v18 = vld [vmem:[%s7011_s16 + $0x438] sm:$0xff]  ;;  %v10571_v22 = vld [vmem:[#allocation98_spill] sm:$0xff] }
 0x166   : > { %10566 = vst [vmem:[#allocation35_spill] sm:$0xff] %v8498_v16  ;;  %v8502_v48 = vadd.f32 %v1164_v11, %v1082_v61  ;;  %v978_v33 = vadd.f32 %v950_v60, %v868_v55  ;;  %10569 = vst [vmem:[#allocation82_spill] sm:$0xff] %v8507_v18  ;;  %v759_v21 = vadd.f32 %v10571_v22, %v10570_v38  ;;  %v10572_v34 = vld [vmem:[#allocation38_spill] sm:$0xff]  ;;  %v10573_v45 = vld [vmem:[#allocation49_spill] sm:$0xff] }
 0x167   : > { %10567 = vst [vmem:[#allocation65_spill] sm:$0xff] %v8500_v27  ;;  %v1087_v35 = vadd.f32 %v1059_v62, %v977_v7  ;;  %v760_v25 = vadd.f32 %v10573_v45, %v10572_v34  ;;  %v951_v23 = vmul.f32 %v8484_v54, %v10544_v6  ;;  %v8516_v11 = vld [vmem:[%s7011_s16 + $0x450] sm:$0xff]  ;;  %v8519_v60 = vld [vmem:[%s7011_s16 + $0x458] sm:$0xff]  ;;  %v952_v55 = vmul.f32 %v8495_v39, %v10545_v9  ;;  %v8528_v62 = vld [vmem:[%s7011_s16 + $0x4e0] sm:$0xff]  ;;  %v8542_v27 = vpop.permute.xlu1 %1607 }
 0x168   : > { %10568 = vst [vmem:[#allocation81_spill] sm:$0xff] %v8502_v48  ;;  %10574 = vst [vmem:[#allocation87_spill] sm:$0xff] %v8516_v11  ;;  %v1088_v61 = vadd.f32 %v1060_v15, %v978_v33  ;;  %v1061_v22 = vmul.f32 %v8498_v16, %v10546_v59  ;;  %v10578_v34 = vld [vmem:[#allocation71_spill] sm:$0xff]  ;;  %v1062_v44 = vmul.f32 %v8507_v18, %v10550_v49  ;;  %v8537_v15 = vld [vmem:[%s7011_s16 + $0x4e8] sm:$0xff]  ;;  %v8555_v18 = vpop.permute.xlu0 %1612 }
 0x169   : > { %10575 = vst [vmem:[#allocation56_spill] sm:$0xff] %v8519_v60  ;;  %10576 = vst [vmem:[#allocation72_spill] sm:$0xff] %v8528_v62  ;;  %v8530_v45 = vadd.f32 %v1169_v19, %v1087_v35  ;;  %v869_v38 = vadd.f32 %v10578_v34, %v759_v21  ;;  %v10579_v7 = vld [vmem:[#allocation115_spill] sm:$0xff]  ;;  %v8540_v33 = vld [vmem:[%s7011_s16 + $0x500] sm:$0xff]  ;;  %v1171_v19 = vmul.f32 %v8516_v11, %v7844_v10 }
 0x16a   : > { %v870_v4 = vadd.f32 %v10579_v7, %v760_v25  ;;  %10580 = vst [vmem:[#allocation18_spill] sm:$0xff] %v8537_v15  ;;  %10581 = vst [vmem:[#allocation45_spill] sm:$0xff] %v8540_v33  ;;  %v8544_v48 = vadd.f32 %v1170_v50, %v1088_v61  ;;  %v1172_v21 = vmul.f32 %v8519_v60, %v7846_v43  ;;  %v10584_v35 = vld [vmem:[#allocation19_spill] sm:$0xff]  ;;  %v10585_v25 = vld [vmem:[#allocation46_spill] sm:$0xff] }
 0x16b   : > { %10577 = vst [vmem:[#allocation88_spill] sm:$0xff] %v8530_v45  ;;  %10582 = vst [vmem:[#allocation22_spill] sm:$0xff] %v8542_v27  ;;  %v761_v34 = vadd.f32 %v10585_v25, %v10584_v35  ;;  %v8553_v7 = vld [vmem:[%s7011_s16 + $0x508] sm:$0xff]  ;;  %v979_v16 = vadd.f32 %v951_v23, %v869_v38  ;;  %v10587_v54 = vld [vmem:[#allocation23_spill] sm:$0xff]  ;;  %v953_v11 = vmul.f32 %v8528_v62, %v10534_v36 }
 0x16c   : > { %10583 = vst [vmem:[#allocation53_spill] sm:$0xff] %v8544_v48  ;;  %10586 = vst [vmem:[#allocation69_spill] sm:$0xff] %v8553_v7  ;;  %v980_v39 = vadd.f32 %v952_v55, %v870_v4  ;;  %v10588_v50 = vld [vmem:[#allocation54_spill] sm:$0xff]  ;;  %v8565_v60 = vld [vmem:[%s7011_s16 + $0x528] sm:$0xff]  ;;  %v954_v23 = vmul.f32 %v8537_v15, %v10536_v37  ;;  %v1063_v4 = vmul.f32 %v8540_v33, %v10537_v24 }
 0x16d   : > { %v762_v61 = vadd.f32 %v10588_v50, %v10587_v54  ;;  %10589 = vst [vmem:[#allocation95_spill] sm:$0xff] %v8562_v31  ;;  %10590 = vst [vmem:[#allocation30_spill] sm:$0xff] %v8565_v60  ;;  %v10591_v25 = vld [vmem:[#allocation70_spill] sm:$0xff]  ;;  %v1089_v54 = vadd.f32 %v1061_v22, %v979_v16  ;;  %v10592_v38 = vld [vmem:[#allocation96_spill] sm:$0xff]  ;;  %v1064_v62 = vmul.f32 %v8553_v7, %v10538_v42 }
 0x16e   : > { %v871_v57 = vadd.f32 %v10591_v25, %v761_v34  ;;  %v1090_v55 = vadd.f32 %v1062_v44, %v980_v39  ;;  %10593 = vst [vmem:[#allocation98_spill] sm:$0xff] %v8578_v20  ;;  %v8581_v35 = vld [vmem:[%s7011_s16 + $0x4f8] sm:$0xff]  ;;  %v1173_v25 = vmul.f32 %v8562_v31, %v7762_v41  ;;  %v1174_v45 = vmul.f32 %v8565_v60, %v7764_v46  ;;  %v8590_v44 = vld [vmem:[%s7011_s16 + $0x510] sm:$0xff]  ;;  %v8604_v60 = vpop.permute.xlu1 %1817 }
 0x16f   : > { %v872_v50 = vadd.f32 %v10592_v38, %v762_v61  ;;  %10594 = vst [vmem:[#allocation38_spill] sm:$0xff] %v8581_v35  ;;  %v10595_v16 = vld [vmem:[#allocation31_spill] sm:$0xff]  ;;  %10597 = vst [vmem:[#allocation49_spill] sm:$0xff] %v8590_v44  ;;  %v8592_v61 = vadd.f32 %v1171_v19, %v1089_v54  ;;  %v8602_v31 = vld [vmem:[%s7011_s16 + $0x530] sm:$0xff]  ;;  %v955_v19 = vmul.f32 %v8578_v20, %v10544_v6  ;;  %v8614_v54 = vpop.permute.xlu0 %1822 }
 0x170   : > { %v981_v34 = vadd.f32 %v953_v11, %v871_v57  ;;  %v10596_v22 = vld [vmem:[#allocation99_spill] sm:$0xff]  ;;  %v8594_v38 = vadd.f32 %v1172_v21, %v1090_v55  ;;  %10603 = vst [vmem:[#allocation46_spill] sm:$0xff] %v8602_v31  ;;  %v956_v21 = vmul.f32 %v8581_v35, %v10545_v9 }
 0x171   : > { %v763_v39 = vadd.f32 %v10596_v22, %v10595_v16  ;;  %10598 = vst [vmem:[#allocation71_spill] sm:$0xff] %v8592_v61  ;;  %v982_v48 = vadd.f32 %v954_v23, %v872_v50  ;;  %v10600_v7 = vld [vmem:[#allocation39_spill] sm:$0xff]  ;;  %v10604_v16 = vld [vmem:[#allocation112_spill] sm:$0xff] }
 0x172   : > { %10599 = vst [vmem:[#allocation115_spill] sm:$0xff] %v8594_v38  ;;  %v10601_v57 = vld [vmem:[#allocation103_spill] sm:$0xff]  ;;  %v1091_v15 = vadd.f32 %v1063_v4, %v981_v34  ;;  %v10606_v4 = vld [vmem:[#allocation116_spill] sm:$0xff]  ;;  %v1065_v34 = vmul.f32 %v8590_v44, %v10546_v59 }
 0x173   : > { %v764_v11 = vadd.f32 %v10601_v57, %v10600_v7  ;;  %v8599_v33 = vld [vmem:[%s7011_s16 + $0x518] sm:$0xff]  ;;  %v873_v22 = vadd.f32 %v10604_v16, %v763_v39  ;;  %v1092_v55 = vadd.f32 %v1064_v62, %v982_v48  ;;  %v8622_v39 = vld [vmem:[%s7011_s16 + $0x5c0] sm:$0xff]  ;;  %v8625_v57 = vld [vmem:[%s7011_s16 + $0x5c8] sm:$0xff]  ;;  %v1175_v7 = vmul.f32 %v8602_v31, %v7844_v10 }
 0x174   : > { %10602 = vst [vmem:[#allocation19_spill] sm:$0xff] %v8599_v33  ;;  %v8612_v23 = vld [vmem:[%s7011_s16 + $0x538] sm:$0xff]  ;;  %10607 = vst [vmem:[#allocation54_spill] sm:$0xff] %v8625_v57  ;;  %v8627_v16 = vadd.f32 %v1173_v25, %v1091_v15  ;;  %v1066_v20 = vmul.f32 %v8599_v33, %v10550_v49  ;;  %v8634_v48 = vld [vmem:[%s7011_s16 + $0x5e0] sm:$0xff] }
 0x175   : > { %10605 = vst [vmem:[#allocation23_spill] sm:$0xff] %v8612_v23  ;;  %v874_v50 = vadd.f32 %v10606_v4, %v764_v11  ;;  %v983_v35 = vadd.f32 %v955_v19, %v873_v22  ;;  %10609 = vst [vmem:[#allocation96_spill] sm:$0xff] %v8634_v48  ;;  %v8636_v62 = vadd.f32 %v1174_v45, %v1092_v55  ;;  %v10611_v61 = vld [vmem:[#allocation20_spill] sm:$0xff]  ;;  %v10612_v15 = vld [vmem:[#allocation47_spill] sm:$0xff] }
 0x176   : > { %10608 = vst [vmem:[#allocation70_spill] sm:$0xff] %v8627_v16  ;;  %v1176_v4 = vmul.f32 %v8612_v23, %v7846_v43  ;;  %v765_v25 = vadd.f32 %v10612_v15, %v10611_v61  ;;  %v8643_v22 = vld [vmem:[%s7011_s16 + $0x5e8] sm:$0xff]  ;;  %v8646_v19 = vld [vmem:[%s7011_s16 + $0x600] sm:$0xff]  ;;  %v10616_v31 = vld [vmem:[#allocation55_spill] sm:$0xff]  ;;  %v957_v45 = vmul.f32 %v8622_v39, %v10534_v36  ;;  %v8668_v36 = vpop.permute.xlu1 %1717 }
 0x177   : > { %10610 = vst [vmem:[#allocation31_spill] sm:$0xff] %v8636_v62  ;;  %v984_v11 = vadd.f32 %v956_v21, %v874_v50  ;;  %10613 = vst [vmem:[#allocation99_spill] sm:$0xff] %v8643_v22  ;;  %v1093_v38 = vadd.f32 %v1065_v34, %v983_v35  ;;  %v10615_v33 = vld [vmem:[#allocation24_spill] sm:$0xff]  ;;  %v958_v21 = vmul.f32 %v8625_v57, %v10536_v37  ;;  %v8655_v55 = vld [vmem:[%s7011_s16 + $0x608] sm:$0xff] }
 0x178   : > { %10614 = vst [vmem:[#allocation39_spill] sm:$0xff] %v8646_v19  ;;  %v766_v44 = vadd.f32 %v10616_v31, %v10615_v33  ;;  %10617 = vst [vmem:[#allocation103_spill] sm:$0xff] %v8655_v55  ;;  %v10618_v15 = vld [vmem:[#allocation94_spill] sm:$0xff]  ;;  %v1067_v35 = vmul.f32 %v8634_v48, %v10537_v24  ;;  %v8666_v33 = vld [vmem:[%s7011_s16 + $0x5d8] sm:$0xff]  ;;  %v8680_v24 = vpop.permute.xlu0 %1722 }
 0x179   : > { %v1094_v50 = vadd.f32 %v1066_v20, %v984_v11  ;;  %v875_v23 = vadd.f32 %v10618_v15, %v765_v25  ;;  %v8663_v31 = vld [vmem:[%s7011_s16 + $0x5d0] sm:$0xff]  ;;  %10619 = vst [vmem:[#allocation112_spill] sm:$0xff] %v8666_v33  ;;  %v8670_v37 = vadd.f32 %v1175_v7, %v1093_v38  ;;  %v10621_v34 = vld [vmem:[#allocation97_spill] sm:$0xff]  ;;  %v1068_v20 = vmul.f32 %v8643_v22, %v10538_v42  ;;  %v10623_v7 = vld [vmem:[#allocation32_spill] sm:$0xff] }
 0x17a   : > { %v876_v57 = vadd.f32 %v10621_v34, %v766_v44  ;;  %v1177_v11 = vmul.f32 %v8646_v19, %v7762_v41  ;;  %v8678_v25 = vld [vmem:[%s7011_s16 + $0x5f0] sm:$0xff]  ;;  %v1178_v38 = vmul.f32 %v8655_v55, %v7764_v46  ;;  %v10624_v16 = vld [vmem:[#allocation100_spill] sm:$0xff]  ;;  %v8689_v34 = vld [vmem:[%s7011_s16 + $0x5f8] sm:$0xff] }
 0x17b   : > { %10620 = vst [vmem:[#allocation116_spill] sm:$0xff] %v8670_v37  ;;  %v8682_v15 = vadd.f32 %v1176_v4, %v1094_v50  ;;  %v985_v61 = vadd.f32 %v957_v45, %v875_v23  ;;  %v767_v44 = vadd.f32 %v10624_v16, %v10623_v7  ;;  %v8692_v42 = vld [vmem:[%s7011_s16 + $0x610] sm:$0xff]  ;;  %v10625_v62 = vld [vmem:[#allocation40_spill] sm:$0xff]  ;;  %v959_v4 = vmul.f32 %v8663_v31, %v10544_v6  ;;  %v8701_v46 = vld [vmem:[%s7011_s16 + $0x618] sm:$0xff] }
 0x17c   : > { %v986_v41 = vadd.f32 %v958_v21, %v876_v57  ;;  %v10626_v19 = vld [vmem:[#allocation36_spill] sm:$0xff]  ;;  %v960_v23 = vmul.f32 %v8666_v33, %v10545_v9  ;;  %10627 = vst [vmem:[#allocation47_spill] sm:$0xff] %v8701_v46  ;;  %v10628_v50 = vld [vmem:[#allocation113_spill] sm:$0xff]  ;;  %v1069_v57 = vmul.f32 %v8678_v25, %v10546_v59  ;;  %v1070_v6 = vmul.f32 %v8689_v34, %v10550_v49 }
 0x17d   : > { %10622 = vst [vmem:[#allocation20_spill] sm:$0xff] %v8682_v15  ;;  %v768_v22 = vadd.f32 %v10626_v19, %v10625_v62  ;;  %v1095_v45 = vadd.f32 %v1067_v35, %v985_v61  ;;  %v877_v7 = vadd.f32 %v10628_v50, %v767_v44  ;;  %v5500_v21 = vld [vmem:[%s7011_s16 + $0x380] sm:$0xff]  ;;  %v10629_v19 = vld [vmem:[#allocation117_spill] sm:$0xff]  ;;  %v1179_v9 = vmul.f32 %v8692_v42, %v7844_v10 }
 0x17e   : > { %v1096_v62 = vadd.f32 %v1068_v20, %v986_v41  ;;  %v5501_v48 = vld [vmem:[%s7011_s16 + $0x388] sm:$0xff]  ;;  %v5532_v33 = vld [vmem:[%s7011_s16 + $0x460] sm:$0xff]  ;;  %v1180_v59 = vmul.f32 %v8701_v46, %v7846_v43  ;;  %v8723_v20 = vpop.permute.xlu1 %1927  ;;  %v1725_v44 = vmul.f32 %v5500_v21, %v8478_v52  ;;  %v8730_v41 = vpop.permute.xlu0 %1932 }
 0x17f   : > { %v878_v55 = vadd.f32 %v10629_v19, %v768_v22  ;;  %v8716_v16 = vadd.f32 %v1177_v11, %v1095_v45  ;;  %v987_v61 = vadd.f32 %v959_v4, %v877_v7  ;;  %v1533_v22 = vadd.f32 %v8288_v0, %v8252_v2  ;;  %v5533_v35 = vld [vmem:[%s7011_s16 + $0x468] sm:$0xff]  ;;  %v5564_v0 = vld [vmem:[%s7011_s16 + $0x540] sm:$0xff]  ;;  %v6653_v7 = vld [vmem:[%s7011_s16 + $0x1f8] sm:$0xff] }
 0x180   : > { %v8725_v49 = vadd.f32 %v1178_v38, %v1096_v62  ;;  %v1534_v11 = vadd.f32 %v8308_v58, %v8269_v29  ;;  %v1726_v45 = vmul.f32 %v5501_v48, %v8486_v47  ;;  %v1835_v2 = vmul.f32 %v5532_v33, %v8604_v60  ;;  %v5565_v50 = vld [vmem:[%s7011_s16 + $0x548] sm:$0xff]  ;;  %v5474_v38 = vld [vmem:[%s7011_s16 + $0x2d0] sm:$0xff]  ;;  %v5508_v15 = vld [vmem:[%s7011_s16 + $0x3c0] sm:$0xff] }
 0x181   : > { %10630 = vst [vmem:[#allocation24_spill] sm:$0xff] %v8716_v16  ;;  %v988_v10 = vadd.f32 %v960_v23, %v878_v55  ;;  %v1097_v4 = vadd.f32 %v1069_v57, %v987_v61  ;;  %v1643_v43 = vadd.f32 %v8341_v14, %v1533_v22  ;;  %v1836_v58 = vmul.f32 %v5533_v35, %v8614_v54  ;;  %v10632_v48 = vld [vmem:[#allocation101_spill] sm:$0xff]  ;;  %v10635_v61 = vld [vmem:[#allocation106_spill] sm:$0xff] }
 0x182   : > { %10631 = vst [vmem:[#allocation55_spill] sm:$0xff] %v8725_v49  ;;  %v1644_v29 = vadd.f32 %v8360_v63, %v1534_v11  ;;  %v8744_v14 = vmul.f32 %v6653_v7, %v8316_v17  ;;  %v8748_v33 = vmul.f32 %v10632_v48, %v8316_v17  ;;  %v1945_v63 = vmul.f32 %v5564_v0, %v8723_v20  ;;  %v6654_v11 = vld [vmem:[%s7011_s16 + $0x2f0] sm:$0xff]  ;;  %v5504_v0 = vld [vmem:[%s7011_s16 + $0x3a0] sm:$0xff]  ;;  %v10636_v7 = vld [vmem:[#allocation89_spill] sm:$0xff] }
 0x183   : > { %v1098_v23 = vadd.f32 %v1070_v6, %v988_v10  ;;  %v8750_v57 = vadd.f32 %v1179_v9, %v1097_v4  ;;  %v1753_v21 = vadd.f32 %v1725_v44, %v1643_v43  ;;  %v1946_v6 = vmul.f32 %v5565_v50, %v8730_v41  ;;  %v5475_v10 = vld [vmem:[%s7011_s16 + $0x2d8] sm:$0xff]  ;;  %v8774_v4 = vpop.permute.xlu1 %1827  ;;  %v6655_v50 = vld [vmem:[%s7011_s16 + $0x310] sm:$0xff] }
 0x184   : > { %v1754_v19 = vadd.f32 %v1726_v45, %v1644_v29  ;;  %v8758_v22 = vmul.f32 %v10635_v61, %v8316_v17  ;;  %v8762_v9 = vmul.f32 %v8411_v30, %v8316_v17  ;;  %v1621_v35 = vmul.f32 %v5474_v38, %v8542_v27  ;;  %v6657_v43 = vld [vmem:[%s7011_s16 + $0x2f8] sm:$0xff]  ;;  %v5570_v49 = vld [vmem:[%s7011_s16 + $0x570] sm:$0xff] }
 0x185   : > { %10633 = vst [vmem:[#allocation94_spill] sm:$0xff] %v8750_v57  ;;  %v8752_v62 = vadd.f32 %v1180_v59, %v1098_v23  ;;  %v8766_v59 = vmul.f32 %v8422_v13, %v8316_v17  ;;  %v8772_v44 = vmul.f32 %v6654_v11, %v8542_v27  ;;  %v1863_v45 = vadd.f32 %v1835_v2, %v1753_v21  ;;  %v5505_v13 = vld [vmem:[%s7011_s16 + $0x3a8] sm:$0xff]  ;;  %v6656_v23 = vld [vmem:[%s7011_s16 + $0x330] sm:$0xff]  ;;  %v8796_v21 = vpop.permute.xlu0 %1832 }
 0x186   : > { %v1864_v30 = vadd.f32 %v1836_v58, %v1754_v19  ;;  %v8782_v38 = vmul.f32 %v6655_v50, %v8542_v27  ;;  %v8786_v29 = vmul.f32 %v6656_v23, %v8542_v27  ;;  %v8790_v48 = vmul.f32 %v10636_v7, %v8542_v27  ;;  %v10637_v2 = vld [vmem:[#allocation90_spill] sm:$0xff]  ;;  %v5536_v19 = vld [vmem:[%s7011_s16 + $0x480] sm:$0xff]  ;;  %v5537_v7 = vld [vmem:[%s7011_s16 + $0x488] sm:$0xff] }
 0x187   : > { %10634 = vst [vmem:[#allocation97_spill] sm:$0xff] %v8752_v62  ;;  %v8794_v58 = vmul.f32 %v10637_v2, %v8542_v27  ;;  %v1622_v61 = vmul.f32 %v5475_v10, %v8555_v18  ;;  %v8800_v11 = vadd.f32 %v1945_v63, %v1863_v45  ;;  %v1537_v23 = vadd.f32 %v8292_v1, %v8267_v3  ;;  %v5569_v45 = vld [vmem:[%s7011_s16 + $0x568] sm:$0xff]  ;;  %v6660_v62 = vld [vmem:[%s7011_s16 + $0x358] sm:$0xff]  ;;  %v8838_v1 = vpop.permute.xlu1 %1937 }
 0x188   : > { %v8802_v50 = vadd.f32 %v1946_v6, %v1864_v30  ;;  %v8809_v2 = vmul.f32 %v6657_v43, %v8555_v18  ;;  %v1538_v55 = vadd.f32 %v8320_v32, %v8271_v53  ;;  %v1729_v63 = vmul.f32 %v5504_v0, %v8478_v52  ;;  %v5568_v6 = vld [vmem:[%s7011_s16 + $0x560] sm:$0xff]  ;;  %v6658_v30 = vld [vmem:[%s7011_s16 + $0x318] sm:$0xff]  ;;  %v5506_v53 = vld [vmem:[%s7011_s16 + $0x3b0] sm:$0xff] }
 0x189   : > { %10638 = vst [vmem:[#allocation32_spill] sm:$0xff] %v8800_v11  ;;  %v1730_v10 = vmul.f32 %v5505_v13, %v8486_v47  ;;  %v8819_v3 = vmul.f32 %v6658_v30, %v8555_v18  ;;  %v1647_v43 = vadd.f32 %v8343_v40, %v1537_v23  ;;  %v1839_v57 = vmul.f32 %v5536_v19, %v8604_v60  ;;  %v5507_v32 = vld [vmem:[%s7011_s16 + $0x3b8] sm:$0xff]  ;;  %v5538_v23 = vld [vmem:[%s7011_s16 + $0x490] sm:$0xff]  ;;  %v8846_v27 = vpop.permute.xlu0 %1942 }
 0x18a   : > { %10639 = vst [vmem:[#allocation100_spill] sm:$0xff] %v8802_v50  ;;  %v6659_v0 = vld [vmem:[%s7011_s16 + $0x338] sm:$0xff]  ;;  %v8833_v16 = vmul.f32 %v6660_v62, %v8555_v18  ;;  %v1648_v30 = vadd.f32 %v8362_v5, %v1538_v55  ;;  %v1840_v40 = vmul.f32 %v5537_v7, %v8614_v54  ;;  %v1949_v11 = vmul.f32 %v5568_v6, %v8723_v20 }
 0x18b   : > { %v8829_v13 = vmul.f32 %v6659_v0, %v8555_v18  ;;  %v1757_v19 = vadd.f32 %v1729_v63, %v1647_v43  ;;  %v1950_v0 = vmul.f32 %v5569_v45, %v8730_v41  ;;  %v1539_v50 = vadd.f32 %v8381_v26, %v8337_v51  ;;  %v5539_v62 = vld [vmem:[%s7011_s16 + $0x498] sm:$0xff] }
 0x18c   : > { %v1758_v5 = vadd.f32 %v1730_v10, %v1648_v30  ;;  %v1540_v55 = vadd.f32 %v8744_v14, %v8339_v8  ;;  %v1731_v7 = vmul.f32 %v5506_v53, %v8668_v36  ;;  %v1732_v63 = vmul.f32 %v5507_v32, %v8680_v24  ;;  %v5571_v6 = vld [vmem:[%s7011_s16 + $0x578] sm:$0xff]  ;;  %v5509_v53 = vld [vmem:[%s7011_s16 + $0x3c8] sm:$0xff]  ;;  %v5540_v32 = vld [vmem:[%s7011_s16 + $0x4a0] sm:$0xff] }
 0x18d   : > { %v6661_v43 = vld [vmem:[%s7011_s16 + $0x378] sm:$0xff]  ;;  %v1867_v51 = vadd.f32 %v1839_v57, %v1757_v19  ;;  %v1649_v26 = vadd.f32 %v1621_v35, %v1539_v50  ;;  %v1841_v37 = vmul.f32 %v5538_v23, %v8774_v4  ;;  %v1842_v8 = vmul.f32 %v5539_v62, %v8796_v21  ;;  %v10640_v57 = vld [vmem:[#allocation42_spill] sm:$0xff]  ;;  %v5541_v50 = vld [vmem:[%s7011_s16 + $0x4a8] sm:$0xff] }
 0x18e   : > { %v8855_v45 = vmul.f32 %v6661_v43, %v8555_v18  ;;  %v1868_v10 = vadd.f32 %v1840_v40, %v1758_v5  ;;  %v1650_v30 = vadd.f32 %v1622_v61, %v1540_v55  ;;  %v1951_v14 = vmul.f32 %v5570_v49, %v8838_v1  ;;  %v10641_v23 = vld [vmem:[#allocation108_spill] sm:$0xff]  ;;  %v5573_v62 = vld [vmem:[%s7011_s16 + $0x588] sm:$0xff] }
 0x18f   : > { %v8863_v17 = vadd.f32 %v1949_v11, %v1867_v51  ;;  %v1759_v46 = vadd.f32 %v1731_v7, %v1649_v26  ;;  %v1952_v43 = vmul.f32 %v5571_v6, %v8846_v27  ;;  %v1541_v35 = vadd.f32 %v8296_v12, %v10640_v57  ;;  %v5572_v11 = vld [vmem:[%s7011_s16 + $0x580] sm:$0xff]  ;;  %v10642_v6 = vld [vmem:[#allocation83_spill] sm:$0xff]  ;;  %v5510_v51 = vld [vmem:[%s7011_s16 + $0x3d0] sm:$0xff] }
 0x190   : > { %v8869_v40 = vadd.f32 %v1950_v0, %v1868_v10  ;;  %v1760_v61 = vadd.f32 %v1732_v63, %v1650_v30  ;;  %v1542_v49 = vadd.f32 %v8324_v28, %v10641_v23  ;;  %v1733_v19 = vmul.f32 %v5508_v15, %v8478_v52  ;;  %v5511_v26 = vld [vmem:[%s7011_s16 + $0x3d8] sm:$0xff]  ;;  %v10644_v57 = vld [vmem:[#allocation126_spill] sm:$0xff]  ;;  %v10750_v0 = vld [vmem:[#allocation33_spill] sm:$0xff] }
 0x191   : > { %v1869_v5 = vadd.f32 %v1841_v37, %v1759_v46  ;;  %v1651_v55 = vadd.f32 %v8346_v56, %v1541_v35  ;;  %v1734_v7 = vmul.f32 %v5509_v53, %v8486_v47  ;;  %v1843_v12 = vmul.f32 %v5540_v32, %v8604_v60  ;;  %v5542_v37 = vld [vmem:[%s7011_s16 + $0x4b0] sm:$0xff]  ;;  %v10643_v32 = vld [vmem:[#allocation67_spill] sm:$0xff] }
 0x192   : > { %v1870_v63 = vadd.f32 %v1842_v8, %v1760_v61  ;;  %v1652_v28 = vadd.f32 %v10642_v6, %v1542_v49  ;;  %v1844_v15 = vmul.f32 %v5541_v50, %v8614_v54  ;;  %v1953_v10 = vmul.f32 %v5572_v11, %v8723_v20  ;;  %v10645_v50 = vld [vmem:[#allocation68_spill] sm:$0xff]  ;;  %v5543_v23 = vld [vmem:[%s7011_s16 + $0x4b8] sm:$0xff]  ;;  %v5513_v6 = vld [vmem:[%s7011_s16 + $0x3e8] sm:$0xff] }
 0x193   : > { %v8886_v46 = vadd.f32 %v1951_v14, %v1869_v5  ;;  %v1761_v56 = vadd.f32 %v1733_v19, %v1651_v55  ;;  %v1954_v30 = vmul.f32 %v5573_v62, %v8730_v41  ;;  %v1543_v35 = vadd.f32 %v10644_v57, %v10643_v32  ;;  %v5574_v14 = vld [vmem:[%s7011_s16 + $0x590] sm:$0xff]  ;;  %v5575_v49 = vld [vmem:[%s7011_s16 + $0x598] sm:$0xff]  ;;  %v10647_v57 = vld [vmem:[#allocation28_spill] sm:$0xff] }
 0x194   : > { %v8890_v53 = vadd.f32 %v1952_v43, %v1870_v63  ;;  %v1762_v8 = vadd.f32 %v1734_v7, %v1652_v28  ;;  %v1544_v61 = vadd.f32 %v8748_v33, %v10645_v50  ;;  %v1735_v11 = vmul.f32 %v5510_v51, %v8668_v36  ;;  %v5512_v63 = vld [vmem:[%s7011_s16 + $0x3e0] sm:$0xff]  ;;  %v5577_v50 = vld [vmem:[%s7011_s16 + $0x5a8] sm:$0xff]  ;;  %v6664_v5 = vld [vmem:[%s7011_s16 + $0x10] sm:$0xff] }
 0x195   : > { %v1871_v19 = vadd.f32 %v1843_v12, %v1761_v56  ;;  %v1736_v62 = vmul.f32 %v5511_v26, %v8680_v24  ;;  %v1845_v43 = vmul.f32 %v5542_v37, %v8774_v4  ;;  %v1653_v7 = vadd.f32 %v8772_v44, %v1543_v35  ;;  %v5544_v12 = vld [vmem:[%s7011_s16 + $0x4c0] sm:$0xff] }
 0x196   : > { %v1872_v55 = vadd.f32 %v1844_v15, %v1762_v8  ;;  %v1654_v33 = vadd.f32 %v8809_v2, %v1544_v61  ;;  %v1846_v51 = vmul.f32 %v5543_v23, %v8796_v21  ;;  %v1955_v26 = vmul.f32 %v5574_v14, %v8838_v1  ;;  %v10646_v8 = vld [vmem:[#allocation66_spill] sm:$0xff]  ;;  %v5545_v2 = vld [vmem:[%s7011_s16 + $0x4c8] sm:$0xff]  ;;  %v5576_v35 = vld [vmem:[%s7011_s16 + $0x5a0] sm:$0xff] }
 0x197   : > { %v8909_v28 = vadd.f32 %v1953_v10, %v1871_v19  ;;  %v1956_v37 = vmul.f32 %v5575_v49, %v8846_v27  ;;  %v1763_v32 = vadd.f32 %v1735_v11, %v1653_v7  ;;  %v1545_v44 = vadd.f32 %v10647_v57, %v10646_v8  ;;  %v10648_v10 = vld [vmem:[#allocation109_spill] sm:$0xff]  ;;  %v10649_v61 = vld [vmem:[#allocation34_spill] sm:$0xff] }
 0x198   : > { %v8914_v56 = vadd.f32 %v1954_v30, %v1872_v55  ;;  %v1764_v15 = vadd.f32 %v1736_v62, %v1654_v33  ;;  %v1546_v19 = vadd.f32 %v10649_v61, %v10648_v10  ;;  %v1737_v23 = vmul.f32 %v5512_v63, %v8478_v52  ;;  %v10650_v55 = vld [vmem:[#allocation50_spill] sm:$0xff]  ;;  %v10651_v33 = vld [vmem:[#allocation61_spill] sm:$0xff] }
 0x199   : > { %v1738_v14 = vmul.f32 %v5513_v6, %v8486_v47  ;;  %v1847_v30 = vmul.f32 %v5544_v12, %v8604_v60  ;;  %v1873_v11 = vadd.f32 %v1845_v43, %v1763_v32  ;;  %v1655_v7 = vadd.f32 %v10650_v55, %v1545_v44  ;;  %v5514_v6 = vld [vmem:[%s7011_s16 + $0x3f0] sm:$0xff]  ;;  %v5515_v12 = vld [vmem:[%s7011_s16 + $0x3f8] sm:$0xff]  ;;  %v8938_v43 = vld [vmem:[%s10173_s7] sm:$0xff] }
 0x19a   : > { %v1874_v62 = vadd.f32 %v1846_v51, %v1764_v15  ;;  %v1656_v8 = vadd.f32 %v10651_v33, %v1546_v19  ;;  %v1848_v57 = vmul.f32 %v5545_v2, %v8614_v54  ;;  %v1957_v10 = vmul.f32 %v5576_v35, %v8723_v20  ;;  %v5546_v44 = vld [vmem:[%s7011_s16 + $0x4d0] sm:$0xff]  ;;  %6014 = vmatprep.mubr.msk.f32.mxu1 %vm2115_vm2, %v8938_v43  ;;  %v10652_v35 = vld [vmem:[#allocation63_spill] sm:$0xff] }
 0x19b   : > { %v1958_v63 = vmul.f32 %v5577_v50, %v8730_v41  ;;  %v8940_v51 = vadd.f32 %v1955_v26, %v1873_v11  ;;  %v1765_v15 = vadd.f32 %v1737_v23, %v1655_v7  ;;  %6071 = vmatprep.mubr.msk.f32.mxu0 %vm2115_vm2, %v8938_v43  ;;  %v10653_v50 = vld [vmem:[#allocation127_spill] sm:$0xff]  ;;  %v10654_v19 = vld [vmem:[#allocation74_spill] sm:$0xff]  ;;  %v1740_v7 = vmul.f32 %v5515_v12, %v8680_v24 }
 0x19c   : > { %v8942_v32 = vadd.f32 %v1956_v37, %v1874_v62  ;;  %v1766_v2 = vadd.f32 %v1738_v14, %v1656_v8  ;;  %v1547_v61 = vadd.f32 %v10653_v50, %v10652_v35  ;;  %v1548_v55 = vadd.f32 %v8758_v22, %v10654_v19  ;;  %v5547_v33 = vld [vmem:[%s7011_s16 + $0x4d8] sm:$0xff]  ;;  %v5578_v26 = vld [vmem:[%s7011_s16 + $0x5b0] sm:$0xff] }
 0x19d   : > { %v5579_v11 = vld [vmem:[%s7011_s16 + $0x5b8] sm:$0xff]  ;;  %v1875_v23 = vadd.f32 %v1847_v30, %v1765_v15  ;;  %v1739_v62 = vmul.f32 %v5514_v6, %v8668_v36  ;;  %v1849_v35 = vmul.f32 %v5546_v44, %v8774_v4  ;;  %v1850_v22 = vmul.f32 %v5547_v33, %v8796_v21  ;;  %v10655_v12 = vld [vmem:[#allocation102_spill] sm:$0xff] }
 0x19e   : > { %v1876_v49 = vadd.f32 %v1848_v57, %v1766_v2  ;;  %v1657_v14 = vadd.f32 %v8782_v38, %v1547_v61  ;;  %v1658_v8 = vadd.f32 %v8819_v3, %v1548_v55  ;;  %v1959_v19 = vmul.f32 %v5578_v26, %v8838_v1  ;;  %v10656_v57 = vld [vmem:[#allocation59_spill] sm:$0xff]  ;;  %v10657_v38 = vld [vmem:[#allocation110_spill] sm:$0xff]  ;;  %v10658_v61 = vld [vmem:[#allocation60_spill] sm:$0xff] }
 0x19f   : > { %v8963_v50 = vadd.f32 %v1957_v10, %v1875_v23  ;;  %v1960_v37 = vmul.f32 %v5579_v11, %v8846_v27  ;;  %v1549_v2 = vadd.f32 %v10656_v57, %v10655_v12  ;;  %v1550_v3 = vadd.f32 %v10658_v61, %v10657_v38  ;;  %v10659_v44 = vld [vmem:[#allocation43_spill] sm:$0xff]  ;;  %v10660_v55 = vld [vmem:[#allocation21_spill] sm:$0xff]  ;;  %v10661_v26 = vld [vmem:[#allocation72_spill] sm:$0xff] }
 0x1a0   : > { %v8968_v30 = vadd.f32 %v1958_v63, %v1876_v49  ;;  %v1767_v6 = vadd.f32 %v1739_v62, %v1657_v14  ;;  %v1768_v15 = vadd.f32 %v1740_v7, %v1658_v8  ;;  %v1741_v10 = vmul.f32 %v10659_v44, %v8478_v52  ;;  %v10662_v62 = vld [vmem:[#allocation37_spill] sm:$0xff]  ;;  %v10663_v14 = vld [vmem:[#allocation80_spill] sm:$0xff]  ;;  %v10664_v12 = vld [vmem:[#allocation18_spill] sm:$0xff] }
 0x1a1   : > { %v1742_v33 = vmul.f32 %v10660_v55, %v8486_v47  ;;  %v1851_v23 = vmul.f32 %v10661_v26, %v8604_v60  ;;  %v1659_v7 = vadd.f32 %v10662_v62, %v1549_v2  ;;  %v1660_v8 = vadd.f32 %v10663_v14, %v1550_v3  ;;  %v10665_v61 = vld [vmem:[#allocation54_spill] sm:$0xff]  ;;  %v10668_v2 = vld [vmem:[#allocation123_spill] sm:$0xff]  ;;  %v10669_v62 = vld [vmem:[#allocation29_spill] sm:$0xff] }
 0x1a2   : > { %v1877_v63 = vadd.f32 %v1849_v35, %v1767_v6  ;;  %v1878_v11 = vadd.f32 %v1850_v22, %v1768_v15  ;;  %v1852_v57 = vmul.f32 %v10664_v12, %v8614_v54  ;;  %v1961_v38 = vmul.f32 %v8622_v39, %v8723_v20  ;;  %v10666_v35 = vld [vmem:[#allocation73_spill] sm:$0xff]  ;;  %v10667_v22 = vld [vmem:[#allocation128_spill] sm:$0xff] }
 0x1a3   : > { %v1962_v44 = vmul.f32 %v10665_v61, %v8730_v41  ;;  %v1769_v49 = vadd.f32 %v1741_v10, %v1659_v7  ;;  %v1551_v6 = vadd.f32 %v10667_v22, %v10666_v35  ;;  %v1770_v15 = vadd.f32 %v1742_v33, %v1660_v8  ;;  %v10670_v39 = vld [vmem:[#allocation41_spill] sm:$0xff]  ;;  %v10671_v10 = vld [vmem:[#allocation98_spill] sm:$0xff] }
 0x1a4   : > { %v8990_v55 = vadd.f32 %v1959_v19, %v1877_v63  ;;  %v8992_v26 = vadd.f32 %v1960_v37, %v1878_v11  ;;  %v1552_v3 = vadd.f32 %v8762_v9, %v10668_v2  ;;  %v1743_v14 = vmul.f32 %v10669_v62, %v8668_v36  ;;  %v10672_v9 = vld [vmem:[#allocation38_spill] sm:$0xff]  ;;  %v10673_v2 = vld [vmem:[#allocation112_spill] sm:$0xff] }
 0x1a5   : > { %v1744_v12 = vmul.f32 %v10670_v39, %v8680_v24  ;;  %v1879_v63 = vadd.f32 %v1851_v23, %v1769_v49  ;;  %v1661_v37 = vadd.f32 %v8786_v29, %v1551_v6  ;;  %v1853_v11 = vmul.f32 %v10671_v10, %v8774_v4  ;;  %v10674_v49 = vld [vmem:[#allocation104_spill] sm:$0xff]  ;;  %v10675_v29 = vld [vmem:[#allocation118_spill] sm:$0xff]  ;;  %v10678_v39 = vld [vmem:[#allocation51_spill] sm:$0xff] }
 0x1a6   : > { %v1880_v7 = vadd.f32 %v1852_v57, %v1770_v15  ;;  %v1662_v33 = vadd.f32 %v8829_v13, %v1552_v3  ;;  %v1854_v8 = vmul.f32 %v10672_v9, %v8796_v21  ;;  %v1963_v61 = vmul.f32 %v8663_v31, %v8838_v1  ;;  %v10676_v15 = vld [vmem:[#allocation111_spill] sm:$0xff] }
 0x1a7   : > { %v9012_v35 = vadd.f32 %v1961_v38, %v1879_v63  ;;  %v1771_v22 = vadd.f32 %v1743_v14, %v1661_v37  ;;  %v1964_v23 = vmul.f32 %v10673_v2, %v8846_v27  ;;  %v1553_v6 = vadd.f32 %v10675_v29, %v10674_v49  ;;  %v10677_v13 = vld [vmem:[#allocation119_spill] sm:$0xff]  ;;  %v10680_v14 = vld [vmem:[#allocation57_spill] sm:$0xff] }
 0x1a8   : > { %v9018_v62 = vadd.f32 %v1962_v44, %v1880_v7  ;;  %v1772_v57 = vadd.f32 %v1744_v12, %v1662_v33  ;;  %v1554_v3 = vadd.f32 %v10677_v13, %v10676_v15  ;;  %v1745_v10 = vmul.f32 %v10678_v39, %v8478_v52  ;;  %v10679_v31 = vld [vmem:[#allocation79_spill] sm:$0xff]  ;;  %v10681_v37 = vld [vmem:[#allocation45_spill] sm:$0xff]  ;;  %v10682_v12 = vld [vmem:[#allocation84_spill] sm:$0xff] }
 0x1a9   : > { %v1881_v9 = vadd.f32 %v1853_v11, %v1771_v22  ;;  %v1663_v38 = vadd.f32 %v10679_v31, %v1553_v6  ;;  %v1746_v63 = vmul.f32 %v10680_v14, %v8486_v47  ;;  %v1855_v2 = vmul.f32 %v10681_v37, %v8604_v60  ;;  %v10683_v49 = vld [vmem:[#allocation69_spill] sm:$0xff]  ;;  %v10684_v22 = vld [vmem:[#allocation96_spill] sm:$0xff]  ;;  %v10685_v13 = vld [vmem:[#allocation99_spill] sm:$0xff] }
 0x1aa   : > { %v1882_v7 = vadd.f32 %v1854_v8, %v1772_v57  ;;  %v1664_v33 = vadd.f32 %v10682_v12, %v1554_v3  ;;  %v1856_v29 = vmul.f32 %v10683_v49, %v8614_v54  ;;  %v1965_v6 = vmul.f32 %v10684_v22, %v8723_v20  ;;  %v10686_v37 = vld [vmem:[#allocation78_spill] sm:$0xff]  ;;  %v10687_v44 = vld [vmem:[#allocation129_spill] sm:$0xff]  ;;  %v10688_v57 = vld [vmem:[#allocation124_spill] sm:$0xff] }
 0x1ab   : > { %v9034_v15 = vadd.f32 %v1963_v61, %v1881_v9  ;;  %v1773_v11 = vadd.f32 %v1745_v10, %v1663_v38  ;;  %v1966_v39 = vmul.f32 %v10685_v13, %v8730_v41  ;;  %v1555_v8 = vadd.f32 %v10687_v44, %v10686_v37  ;;  %v10689_v61 = vld [vmem:[#allocation35_spill] sm:$0xff]  ;;  %v10690_v10 = vld [vmem:[#allocation82_spill] sm:$0xff]  ;;  %v10691_v49 = vld [vmem:[#allocation49_spill] sm:$0xff] }
 0x1ac   : > { %v9040_v31 = vadd.f32 %v1964_v23, %v1882_v7  ;;  %v1774_v14 = vadd.f32 %v1746_v63, %v1664_v33  ;;  %v1556_v3 = vadd.f32 %v8766_v59, %v10688_v57  ;;  %v1747_v9 = vmul.f32 %v10689_v61, %v8668_v36  ;;  %v10692_v59 = vld [vmem:[#allocation19_spill] sm:$0xff]  ;;  %v10740_v23 = vld [vmem:[#allocation88_spill] sm:$0xff] }
 0x1ad   : > { %v1883_v12 = vadd.f32 %v1855_v2, %v1773_v11  ;;  %v1748_v38 = vmul.f32 %v10690_v10, %v8680_v24  ;;  %v1857_v22 = vmul.f32 %v10691_v49, %v8774_v4  ;;  %v1665_v7 = vadd.f32 %v8790_v48, %v1555_v8  ;;  %v10695_v8 = vld [vmem:[#allocation114_spill] sm:$0xff]  ;;  %v10698_v10 = vld [vmem:[#allocation64_spill] sm:$0xff] }
 0x1ae   : > { %v1884_v63 = vadd.f32 %v1856_v29, %v1774_v14  ;;  %v1666_v44 = vadd.f32 %v8833_v16, %v1556_v3  ;;  %v1858_v2 = vmul.f32 %v10692_v59, %v8796_v21  ;;  %v1967_v11 = vmul.f32 %v8678_v25, %v8838_v1  ;;  %v10693_v29 = vld [vmem:[#allocation105_spill] sm:$0xff]  ;;  %v10694_v14 = vld [vmem:[#allocation26_spill] sm:$0xff]  ;;  %v10696_v16 = vld [vmem:[#allocation120_spill] sm:$0xff] }
 0x1af   : > { %v9056_v33 = vadd.f32 %v1965_v6, %v1883_v12  ;;  %v1968_v13 = vmul.f32 %v8689_v34, %v8846_v27  ;;  %v1775_v57 = vadd.f32 %v1747_v9, %v1665_v7  ;;  %v1557_v48 = vadd.f32 %v10694_v14, %v10693_v29  ;;  %v10697_v3 = vld [vmem:[#allocation58_spill] sm:$0xff]  ;;  %v10699_v25 = vld [vmem:[#allocation95_spill] sm:$0xff]  ;;  %v10739_v34 = vld [vmem:[#allocation53_spill] sm:$0xff] }
 0x1b0   : > { %v9064_v37 = vadd.f32 %v1966_v39, %v1884_v63  ;;  %v1776_v61 = vadd.f32 %v1748_v38, %v1666_v44  ;;  %v1558_v6 = vadd.f32 %v10696_v16, %v10695_v8  ;;  %v1749_v12 = vmul.f32 %v10697_v3, %v8478_v52  ;;  %v10700_v38 = vld [vmem:[#allocation44_spill] sm:$0xff]  ;;  %v10701_v7 = vld [vmem:[#allocation27_spill] sm:$0xff]  ;;  %v10702_v29 = vld [vmem:[#allocation30_spill] sm:$0xff] }
 0x1b1   : > { %v1750_v49 = vmul.f32 %v10698_v10, %v8486_v47  ;;  %v1859_v59 = vmul.f32 %v10699_v25, %v8604_v60  ;;  %v1885_v39 = vadd.f32 %v1857_v22, %v1775_v57  ;;  %v1667_v63 = vadd.f32 %v10700_v38, %v1557_v48  ;;  %v10703_v52 = vld [vmem:[#allocation39_spill] sm:$0xff]  ;;  %v10705_v22 = vld [vmem:[#allocation122_spill] sm:$0xff]  ;;  %v10707_v48 = vld [vmem:[#allocation125_spill] sm:$0xff] }
 0x1b2   : > { %v1886_v9 = vadd.f32 %v1858_v2, %v1776_v61  ;;  %v1668_v44 = vadd.f32 %v10701_v7, %v1558_v6  ;;  %v1860_v14 = vmul.f32 %v10702_v29, %v8614_v54  ;;  %v1969_v8 = vmul.f32 %v10703_v52, %v8723_v20  ;;  %v10704_v47 = vld [vmem:[#allocation103_spill] sm:$0xff]  ;;  %v10706_v2 = vld [vmem:[#allocation86_spill] sm:$0xff]  ;;  %v10708_v6 = vld [vmem:[#allocation52_spill] sm:$0xff] }
 0x1b3   : > { %v1970_v16 = vmul.f32 %v10704_v47, %v8730_v41  ;;  %v9086_v3 = vadd.f32 %v1967_v11, %v1885_v39  ;;  %v1777_v10 = vadd.f32 %v1749_v12, %v1667_v63  ;;  %v1559_v57 = vadd.f32 %v10706_v2, %v10705_v22  ;;  %v10709_v54 = vld [vmem:[#allocation87_spill] sm:$0xff]  ;;  %v10710_v20 = vld [vmem:[#allocation56_spill] sm:$0xff] }
 0x1b4   : > { %v9088_v60 = vadd.f32 %v1968_v13, %v1886_v9  ;;  %v1778_v61 = vadd.f32 %v1750_v49, %v1668_v44  ;;  %v1560_v25 = vadd.f32 %v10708_v6, %v10707_v48  ;;  %v1751_v38 = vmul.f32 %v10709_v54, %v8668_v36  ;;  %v10711_v49 = vld [vmem:[#allocation46_spill] sm:$0xff]  ;;  %v10712_v63 = vld [vmem:[#allocation23_spill] sm:$0xff] }
 0x1b5   : > { %v1752_v7 = vmul.f32 %v10710_v20, %v8680_v24  ;;  %v1887_v11 = vadd.f32 %v1859_v59, %v1777_v10  ;;  %v1669_v13 = vadd.f32 %v8794_v58, %v1559_v57  ;;  %v1861_v9 = vmul.f32 %v10711_v49, %v8774_v4  ;;  %v10713_v58 = vld [vmem:[#allocation47_spill] sm:$0xff]  ;;  %v9127_v49 = vld [vmem:[%s10173_s7 + $0x8] sm:$0xff] }
 0x1b6   : > { %v1888_v12 = vadd.f32 %v1860_v14, %v1778_v61  ;;  %v1670_v39 = vadd.f32 %v8855_v45, %v1560_v25  ;;  %v1862_v44 = vmul.f32 %v10712_v63, %v8796_v21  ;;  %v1971_v52 = vmul.f32 %v8692_v42, %v8838_v1  ;;  %v9132_v63 = vld [vmem:[%s10173_s7 + $0x10] sm:$0xff] }
 0x1b7   : > { %v9106_v29 = vadd.f32 %v1969_v8, %v1887_v11  ;;  %v1779_v22 = vadd.f32 %v1751_v38, %v1669_v13  ;;  %v1972_v14 = vmul.f32 %v10713_v58, %v8846_v27 }
 0x1b8   : > { %v9110_v47 = vadd.f32 %v1970_v16, %v1888_v12  ;;  %v1780_v59 = vadd.f32 %v1752_v7, %v1670_v39  ;;  %v10714_v16 = vld [vmem:[#allocation91_spill] sm:$0xff] }
 0x1b9   : > { %v1889_v10 = vadd.f32 %v1861_v9, %v1779_v22  ;;  %v10716_v22 = vld [vmem:[#allocation93_spill] sm:$0xff] }
 0x1ba   : > { %v1890_v2 = vadd.f32 %v1862_v44, %v1780_v59  ;;  %v10717_v59 = vld [vmem:[#allocation92_spill] sm:$0xff] }
 0x1bb   : > { %v9116_v57 = vadd.f32 %v1971_v52, %v1889_v10  ;;  %v10715_v52 = vmov 0.0|0.0   ;;  %v10718_v58 = vpack.c.bf16 %v10716_v22, %v10717_v59 }
 0x1bc   : > { %v9118_v61 = vadd.f32 %v1972_v14, %v1890_v2  ;;  %v9145_v14 = vld [vmem:[%s10173_s7 + $0x18] sm:$0xff] }
 0x1fe   : > { %v2078_v42 = vpop.f32.mrb[0].mxu0 }
 0x1ff   : > { %v2079_v48 = vadd.f32 %v2078_v42, %v10714_v16  ;;  %v6011_v6 = vpop.f32.mrb[1].mxu0  ;;  %v10719_v42 = vld [vmem:[#allocation17_spill] sm:$0xff] }
 0x201   : > { %v2082_v25 = vadd.f32 3.0, %v2079_v48 }
 0x203   : > { %v2083_v54 = vmax.f32 %v2082_v25, 0.0  ;;  %v10722_v25 = vmov 0.0  }
 0x205   : > { %v2084_v38 = vmin.f32 %v2083_v54, 6.0  ;;  %v9155_v54 = vld [vmem:[#allocation5] sm:$0xff] }
 0x206   : > { %v2671_v20 = vpop.f32.mrb[2].mxu0 }
 0x207   : > { %v2672_v7 = vadd.f32 %v2671_v20, %v10714_v16  ;;  %v2085_v11 = vmul.f32 0.16666667, %v2084_v38  ;;  %v6068_v13 = vpop.f32.mrb[3].mxu0 }
 0x209   : > { %v2675_v12 = vadd.f32 3.0, %v2672_v7  ;;  %v2086_v39 = vmul.f32 %v2085_v11, %v2079_v48  ;;  %v10720_v48 = vld [vmem:[#allocation130_spill] sm:$0xff] }
 0x20a   : > { %v10721_v6 = vpack.c.bf16 %v10719_v42, %v10720_v48 }
 0x20b   : > { %v2676_v9 = vmax.f32 %v2675_v12, 0.0  ;;  %6012 = vmatprep.subr.mxu1 %v2086_v39 }
 0x20c   : > { %6013 = vmatpush3.msra.mxu1 %v2086_v39 }
 0x20d   : > { %v2677_v44 = vmin.f32 %v2676_v9, 6.0  ;;  %6015 = vmatmul.mubr.msk.f32.vlgmr.msra.gmra.mrb[0].mxu1 %vm2115_vm2, %v9127_v49  ;;  %6273 = vmatprep.subr.bf16.mxu1 %v10715_v52 }
 0x20e   : > { %6275 = vmatpush3.bf16.msra.mxu1 %v10718_v58  ;;  %6017 = vmatprep.mubr.msk.f32.mxu1 %vm2115_vm2, %v9132_v63 }
 0x20f   : > { %v2678_v10 = vmul.f32 0.16666667, %v2677_v44  ;;  %6276 = vmatprep.subr.bf16.mxu1 %v10715_v52 }
 0x211   : > { %v2679_v2 = vmul.f32 %v2678_v10, %v2672_v7  ;;  %6018 = vmatmul.mubr.msk.f32.gmra.mrb[2].mxu1 %vm2115_vm2, %v9145_v14 }
 0x212   : > { %6278 = vmatpush3.bf16.msra.mxu1 %v10721_v6  ;;  %6028 = vmatprep.mubr.msk.f32.mxu1 %vm6803_vm0, %v10722_v25  ;;  %v10729_v6 = vld [vmem:[#allocation76_spill] sm:$0xff] }
 0x213   : > { %6069 = vmatprep.subr.mxu0 %v2679_v2 }
 0x214   : > { %6070 = vmatpush3.msra.mxu0 %v2679_v2 }
 0x215   : > { %6029 = vmatmul.mubr.msk.f32.vlgmr.msra.gmra.mrb[4].mxu1 %vm2008_vm1, %v9155_v54  ;;  %6072 = vmatmul.mubr.msk.f32.vlgmr.msra.gmra.mrb[4].mxu0 %vm2115_vm2, %v9127_v49 }
 0x216   : > { %6074 = vmatprep.mubr.msk.f32.mxu0 %vm2115_vm2, %v9132_v63  ;;  %6033 = vmatprep.mubr.msk.f32.mxu1 %vm2115_vm2, %v8938_v43 }
 0x219   : > { %6075 = vmatmul.mubr.msk.f32.gmra.mrb[6].mxu0 %vm2115_vm2, %v9145_v14 }
 0x21a   : > { %6090 = vmatprep.mubr.msk.f32.mxu0 %vm2115_vm2, %v8938_v43 }
 0x2e0   : > { %v9169_v38 = vpop.f32.mrb[0].mxu1 }
 0x2e1   : > { %v9171_v20 = vpop.f32.mrb[1].mxu1 }
 0x2e4   : > { %v9173_v7 = vpop.f32.mrb[2].mxu1 }
 0x2e5   : > { %10723 = vst [vmem:[#allocation40_spill] sm:$0xff] %v9173_v7  ;;  %v9175_v11 = vpop.f32.mrb[3].mxu1 }
 0x2e6   : > { %10724 = vst [vmem:[#allocation36_spill] sm:$0xff] %v9175_v11  ;;  %v10756_v11 = vld [vmem:[#allocation20_spill] sm:$0xff] }
 0x2e8   : > { %v2303_v13 = vpop.f32.mrb[4].mxu1  ;;  %v9177_v12 = vpop.f32.mrb[4].mxu0 }
 0x2e9   : > { %10725 = vst [vmem:[#allocation113_spill] sm:$0xff] %v9177_v12  ;;  %v2304_v39 = vadd.f32 %v2303_v13, %v10714_v16  ;;  %v6030_v9 = vpop.f32.mrb[5].mxu1  ;;  %v9180_v44 = vpop.f32.mrb[5].mxu0  ;;  %v10730_v13 = vld [vmem:[#allocation75_spill] sm:$0xff] }
 0x2ea   : > { %10726 = vst [vmem:[#allocation117_spill] sm:$0xff] %v9180_v44  ;;  %v10731_v9 = vpack.c.bf16 %v10729_v6, %v10730_v13  ;;  %v5470_v44 = vld [vmem:[%s7011_s16 + $0x2b0] sm:$0xff] }
 0x2eb   : > { %v2307_v22 = vadd.f32 3.0, %v2304_v39 }
 0x2ec   : > { %v9182_v59 = vpop.f32.mrb[6].mxu0 }
 0x2ed   : > { %10727 = vst [vmem:[#allocation101_spill] sm:$0xff] %v9182_v59  ;;  %v2308_v58 = vmax.f32 %v2307_v22, 0.0  ;;  %v9184_v10 = vpop.f32.mrb[7].mxu0  ;;  %v10733_v22 = vld [vmem:[#allocation65_spill] sm:$0xff] }
 0x2ee   : > { %10728 = vst [vmem:[#allocation106_spill] sm:$0xff] %v9184_v10 }
 0x2ef   : > { %v2309_v2 = vmin.f32 %v2308_v58, 6.0 }
 0x2f1   : > { %v2310_v42 = vmul.f32 0.16666667, %v2309_v2 }
 0x2f3   : > { %v2311_v48 = vmul.f32 %v2310_v42, %v2304_v39  ;;  %v10732_v39 = vld [vmem:[#allocation81_spill] sm:$0xff] }
 0x2f4   : > { %v10734_v58 = vpack.c.bf16 %v10732_v39, %v10733_v22 }
 0x2f5   : > { %6031 = vmatprep.subr.mxu1 %v2311_v48 }
 0x2f6   : > { %6032 = vmatpush3.msra.mxu1 %v2311_v48 }
 0x2f7   : > { %6034 = vmatmul.mubr.msk.f32.vlgmr.msra.gmra.mrb[6].mxu1 %vm2115_vm2, %v9127_v49  ;;  %6279 = vmatprep.subr.bf16.mxu1 %v10715_v52 }
 0x2f8   : > { %6281 = vmatpush3.bf16.msra.mxu1 %v10731_v9  ;;  %6036 = vmatprep.mubr.msk.f32.mxu1 %vm2115_vm2, %v9132_v63 }
 0x2f9   : > { %6282 = vmatprep.subr.bf16.mxu1 %v10715_v52 }
 0x2fb   : > { %6037 = vmatmul.mubr.msk.f32.gmra.mrb[8].mxu1 %vm2115_vm2, %v9145_v14 }
 0x2fc   : > { %6284 = vmatpush3.bf16.msra.mxu1 %v10734_v58  ;;  %6047 = vmatprep.mubr.msk.f32.mxu1 %vm6803_vm0, %v10722_v25 }
 0x2ff   : > { %6048 = vmatmul.mubr.msk.f32.vlgmr.msra.gmra.mrb[10].mxu1 %vm2008_vm1, %v9155_v54 }
 0x300   : > { %6052 = vmatprep.mubr.msk.f32.mxu1 %vm2115_vm2, %v8938_v43 }
 0x3ca   : > { %v9206_v2 = vpop.f32.mrb[6].mxu1 }
 0x3cb   : > { %10735 = vst [vmem:[#allocation89_spill] sm:$0xff] %v9206_v2  ;;  %v9208_v42 = vpop.f32.mrb[7].mxu1 }
 0x3cc   : > { %10736 = vst [vmem:[#allocation90_spill] sm:$0xff] %v9208_v42  ;;  %v10751_v42 = vld [vmem:[#allocation62_spill] sm:$0xff] }
 0x3ce   : > { %v9210_v48 = vpop.f32.mrb[8].mxu1 }
 0x3cf   : > { %10737 = vst [vmem:[#allocation42_spill] sm:$0xff] %v9210_v48  ;;  %v9212_v6 = vpop.f32.mrb[9].mxu1  ;;  %v6665_v48 = vld [vmem:[%s7011_s16 + $0xf0] sm:$0xff] }
 0x3d0   : > { %10738 = vst [vmem:[#allocation108_spill] sm:$0xff] %v9212_v6  ;;  %v1267_v6 = vmul.f32 %v6664_v5, %v10750_v0  ;;  %v1397_v2 = vmul.f32 %v6665_v48, %v10751_v42  ;;  %v5503_v0 = vld [vmem:[%s7011_s16 + $0x398] sm:$0xff]  ;;  %v10757_v42 = vld [vmem:[#allocation116_spill] sm:$0xff] }
 0x3d1   : > { %v10758_v48 = vpack.c.bf16 %v10756_v11, %v10757_v42  ;;  %v10761_v11 = vld [vmem:[#allocation24_spill] sm:$0xff] }
 0x3d2   : > { %v2487_v13 = vpop.f32.mrb[10].mxu1 }
 0x3d3   : > { %v2488_v9 = vadd.f32 %v2487_v13, %v10714_v16  ;;  %v6049_v39 = vpop.f32.mrb[11].mxu1  ;;  %v10741_v13 = vpack.c.bf16 %v10739_v34, %v10740_v23  ;;  %v5407_v23 = vld [vmem:[%s7011_s16 + $0xf8] sm:$0xff] }
 0x3d4   : > { %v5439_v34 = vld [vmem:[%s7011_s16 + $0x1d8] sm:$0xff] }
 0x3d5   : > { %v2491_v22 = vadd.f32 3.0, %v2488_v9  ;;  %v10745_v39 = vld [vmem:[#allocation107_spill] sm:$0xff] }
 0x3d7   : > { %v2492_v58 = vmax.f32 %v2491_v22, 0.0 }
 0x3d9   : > { %v2493_v8 = vmin.f32 %v2492_v58, 6.0  ;;  %v10746_v58 = vld [vmem:[#allocation77_spill] sm:$0xff] }
 0x3db   : > { %v2494_v45 = vmul.f32 0.16666667, %v2493_v8 }
 0x3dd   : > { %v2495_v41 = vmul.f32 %v2494_v45, %v2488_v9  ;;  %v10743_v45 = vld [vmem:[#allocation71_spill] sm:$0xff] }
 0x3de   : > { %v6663_v9 = vld [vmem:[%s7011_s16 + $0x18] sm:$0xff] }
 0x3df   : > { %6050 = vmatprep.subr.mxu1 %v2495_v41  ;;  %v1268_v22 = vmul.f32 %v6663_v9, %v10745_v39  ;;  %v5471_v9 = vld [vmem:[%s7011_s16 + $0x2b8] sm:$0xff] }
 0x3e0   : > { %6051 = vmatpush3.msra.mxu1 %v2495_v41  ;;  %v10742_v41 = vld [vmem:[#allocation115_spill] sm:$0xff]  ;;  %v1618_v12 = vmul.f32 %v5471_v9, %v8555_v18  ;;  %v5534_v18 = vld [vmem:[%s7011_s16 + $0x470] sm:$0xff] }
 0x3e1   : > { %6053 = vmatmul.mubr.msk.f32.vlgmr.msra.gmra.mrb[12].mxu1 %vm2115_vm2, %v9127_v49  ;;  %6291 = vmatprep.subr.bf16.mxu1 %v10715_v52  ;;  %v10744_v8 = vpack.c.bf16 %v10742_v41, %v10743_v45  ;;  %v5438_v41 = vld [vmem:[%s7011_s16 + $0x1d0] sm:$0xff]  ;;  %v10747_v45 = vld [vmem:[#allocation31_spill] sm:$0xff] }
 0x3e2   : > { %6293 = vmatpush3.bf16.msra.mxu1 %v10741_v13  ;;  %6055 = vmatprep.mubr.msk.f32.mxu1 %vm2115_vm2, %v9132_v63  ;;  %v1398_v13 = vmul.f32 %v5407_v23, %v10746_v58  ;;  %v10752_v23 = vld [vmem:[#allocation121_spill] sm:$0xff]  ;;  %v5567_v9 = vld [vmem:[%s7011_s16 + $0x558] sm:$0xff] }
 0x3e3   : > { %6294 = vmatprep.subr.bf16.mxu1 %v10715_v52  ;;  %v1316_v39 = vadd.f32 %v10752_v23, %v1268_v22  ;;  %v10753_v58 = vld [vmem:[#allocation85_spill] sm:$0xff]  ;;  %v5535_v22 = vld [vmem:[%s7011_s16 + $0x478] sm:$0xff] }
 0x3e4   : > { %v1508_v10 = vmul.f32 %v5439_v34, %v10753_v58  ;;  %v5502_v34 = vld [vmem:[%s7011_s16 + $0x390] sm:$0xff] }
 0x3e5   : > { %6056 = vmatmul.mubr.msk.f32.gmra.mrb[14].mxu1 %vm2115_vm2, %v9145_v14  ;;  %v1426_v5 = vadd.f32 %v1398_v13, %v1316_v39  ;;  %v10760_v39 = vld [vmem:[#allocation55_spill] sm:$0xff] }
 0x3e6   : > { %6296 = vmatpush3.bf16.msra.mxu1 %v10744_v8  ;;  %6085 = vmatprep.mubr.msk.f32.mxu1 %vm6803_vm0, %v10722_v25  ;;  %v10748_v8 = vld [vmem:[#allocation70_spill] sm:$0xff] }
 0x3e7   : > { %6297 = vmatprep.subr.bf16.mxu1 %v10715_v52  ;;  %v10749_v19 = vpack.c.bf16 %v10747_v45, %v10748_v8  ;;  %v10754_v45 = vld [vmem:[#allocation25_spill] sm:$0xff]  ;;  %v10755_v8 = vld [vmem:[#allocation48_spill] sm:$0xff]  ;;  %v1536_v58 = vadd.f32 %v1508_v10, %v1426_v5  ;;  %v10764_v5 = vld [vmem:[#allocation94_spill] sm:$0xff] }
 0x3e8   : > { %v1507_v59 = vmul.f32 %v5438_v41, %v10755_v8  ;;  %v1728_v41 = vmul.f32 %v5503_v0, %v8680_v24  ;;  %v5566_v24 = vld [vmem:[%s7011_s16 + $0x550] sm:$0xff]  ;;  %v10763_v0 = vld [vmem:[#allocation97_spill] sm:$0xff]  ;;  %s6724_s16 = scalar_lea.vmem %s10106_s19, 25088 }
 0x3e9   : > { %6086 = vmatmul.mubr.msk.f32.vlgmr.msra.gmra.mrb[16].mxu1 %vm2008_vm1, %v9155_v54  ;;  %v10765_v42 = vpack.c.bf16 %v10763_v0, %v10764_v5  ;;  %p6725_p9 = scmp.ne.s32.totalorder %s10106_s19, %s6724_s16  ;;  %p6732_p0 = scmp.lt.s32.totalorder %s6730_s29, %s6724_s16 }
 0x3ea   : > { %6299 = vmatpush3.bf16.msra.mxu1 %v10749_v19  ;;  %6104 = vmatprep.mubr.msk.f32.mxu1 %vm6803_vm0, %v10722_v25  ;;  %v1315_v19 = vadd.f32 %v10754_v45, %v1267_v6  ;;  %v10759_v6 = vld [vmem:[#allocation22_spill] sm:$0xff]  ;;  %v10762_v45 = vpack.c.bf16 %v10760_v39, %v10761_v11 }
 0x3eb   : > { %6300 = vmatprep.subr.bf16.mxu1 %v10715_v52  ;;  %v1617_v23 = vmul.f32 %v5470_v44, %v10759_v6  ;;  %v1838_v44 = vmul.f32 %v5535_v22, %v8796_v21  ;;  %v10767_v22 = vld [vmem:[#allocation32_spill] sm:$0xff]  ;;  %p6726_p2 = pnand %p6725_p9, %p10792_p10  ;;  %p6733_p6 = por %p6732_p0, %p6731_p5 }
 0x3ec   : > { %v1425_v7 = vadd.f32 %v1397_v2, %v1315_v19  ;;  %v1646_v2 = vadd.f32 %v1618_v12, %v1536_v58  ;;  %v1727_v19 = vmul.f32 %v5502_v34, %v8668_v36  ;;  %v1947_v12 = vmul.f32 %v5566_v24, %v8838_v1  ;;  %v10766_v34 = vld [vmem:[#allocation100_spill] sm:$0xff] }
 0x3ed   : > { %v10769_v1 = vpack.c.bf16 %v8869_v40, %v8863_v17  ;;  %v10770_v58 = vpack.c.bf16 %v8890_v53, %v8886_v46  ;;  %v10772_v17 = vpack.c.bf16 %v8942_v32, %v8940_v51  ;;  %v10773_v40 = vpack.c.bf16 %v8968_v30, %v8963_v50  ;;  %p6727_p4 = pneg %p6726_p2 }
 0x3ee   : > { %6302 = vmatpush3.bf16.msra.mxu1 %v10758_v48  ;;  %v1535_v13 = vadd.f32 %v1507_v59, %v1425_v7  ;;  %v1756_v8 = vadd.f32 %v1728_v41, %v1646_v2  ;;  %v1837_v7 = vmul.f32 %v5534_v18, %v8774_v4  ;;  %v1948_v59 = vmul.f32 %v5567_v9, %v8846_v27 }
 0x3ef   : > { %6303 = vmatprep.subr.bf16.mxu1 %v10715_v52  ;;  %v10768_v4 = vpack.c.bf16 %v10766_v34, %v10767_v22  ;;  %v10771_v41 = vpack.c.bf16 %v8914_v56, %v8909_v28  ;;  %v10774_v46 = vpack.c.bf16 %v8992_v26, %v8990_v55  ;;  %v10775_v53 = vpack.c.bf16 %v9018_v62, %v9012_v35  ;;  %v9418_v34 = vld [vmem:[%s10175_s9 + $0x10] sm:$0xff]  ;;  %p6734_p13 = pnand %p6733_p6, %p6727_p4 }
 0x3f0   : > { %v1645_v10 = vadd.f32 %v1617_v23, %v1535_v13  ;;  %v1866_v6 = vadd.f32 %v1838_v44, %v1756_v8  ;;  %v10776_v28 = vpack.c.bf16 %v9040_v31, %v9034_v15  ;;  %v10777_v56 = vpack.c.bf16 %v9064_v37, %v9056_v33 }
 0x3f1   : > { %6105 = vmatmul.mubr.msk.f32.vlgmr.msra.gmra.mrb[18].mxu1 %vm2008_vm1, %v9155_v54  ;;  %v10778_v51 = vpack.c.bf16 %v9088_v60, %v9086_v3  ;;  %v10779_v32 = vpack.c.bf16 %v9110_v47, %v9106_v29  ;;  %v10780_v50 = vpack.c.bf16 %v9118_v61, %v9116_v57 }
 0x3f2   : > { %6305 = vmatpush3.bf16.msra.mxu1 %v10762_v45  ;;  %6123 = vmatprep.mubr.msk.f32.mxu1 %vm6803_vm0, %v10722_v25  ;;  %v1755_v48 = vadd.f32 %v1727_v19, %v1645_v10  ;;  %v1976_v21 = vadd.f32 %v1948_v59, %v1866_v6 }
 0x3f3   : > { %6306 = vmatprep.subr.bf16.mxu1 %v10715_v52 }
 0x3f4   : > { %v1865_v36 = vadd.f32 %v1837_v7, %v1755_v48 }
 0x3f6   : > { %6308 = vmatpush3.bf16.msra.mxu1 %v10765_v42  ;;  %v1975_v27 = vadd.f32 %v1947_v12, %v1865_v36  ;;  %v9404_v36 = vld [vmem:[%s10175_s9] sm:$0xff] }
 0x3f7   : > { %6309 = vmatprep.subr.bf16.mxu1 %v10715_v52 }
 0x3f8   : > { %v6313_v23 = vpack.c.bf16 %v1976_v21, %v1975_v27 }
 0x3f9   : > { %6124 = vmatmul.mubr.msk.f32.vlgmr.msra.gmra.mrb[20].mxu1 %vm2008_vm1, %v9155_v54 }
 0x3fa   : > { %6311 = vmatpush3.bf16.msra.mxu1 %v10768_v4  ;;  %6142 = vmatprep.mubr.msk.f32.mxu1 %vm6803_vm0, %v10722_v25  ;;  %v9427_v4 = vld [vmem:[%s10175_s9 + $0x18] sm:$0xff] }
 0x3fb   : > { %6312 = vmatprep.subr.bf16.mxu1 %v10715_v52 }
 0x3fe   : > { %6314 = vmatpush3.bf16.msra.mxu1 %v6313_v23 }
 0x3ff   : > { %6315 = vmatprep.subr.bf16.mxu1 %v10715_v52 }
 0x401   : > { %6143 = vmatmul.mubr.msk.f32.vlgmr.msra.gmra.mrb[22].mxu1 %vm2008_vm1, %v9155_v54 }
 0x402   : > { %6317 = vmatpush3.bf16.msra.mxu1 %v10769_v1  ;;  %6161 = vmatprep.mubr.msk.f32.mxu1 %vm6803_vm0, %v10722_v25 }
 0x403   : > { %6318 = vmatprep.subr.bf16.mxu1 %v10715_v52 }
 0x406   : > { %6320 = vmatpush3.bf16.msra.mxu1 %v10770_v58 }
 0x407   : > { %6321 = vmatprep.subr.bf16.mxu1 %v10715_v52 }
 0x409   : > { %6162 = vmatmul.mubr.msk.f32.vlgmr.msra.gmra.mrb[24].mxu1 %vm2008_vm1, %v9155_v54 }
 0x40a   : > { %6323 = vmatpush3.bf16.msra.mxu1 %v10771_v41  ;;  %6180 = vmatprep.mubr.msk.f32.mxu1 %vm6803_vm0, %v10722_v25 }
 0x40b   : > { %6324 = vmatprep.subr.bf16.mxu1 %v10715_v52 }
 0x40e   : > { %6326 = vmatpush3.bf16.msra.mxu1 %v10772_v17 }
 0x40f   : > { %6327 = vmatprep.subr.bf16.mxu1 %v10715_v52 }
 0x411   : > { %6181 = vmatmul.mubr.msk.f32.vlgmr.msra.gmra.mrb[26].mxu1 %vm2008_vm1, %v9155_v54 }
 0x412   : > { %6329 = vmatpush3.bf16.msra.mxu1 %v10773_v40  ;;  %6199 = vmatprep.mubr.msk.f32.mxu1 %vm6803_vm0, %v10722_v25 }
 0x413   : > { %6330 = vmatprep.subr.bf16.mxu1 %v10715_v52 }
 0x416   : > { %6332 = vmatpush3.bf16.msra.mxu1 %v10774_v46 }
 0x417   : > { %6333 = vmatprep.subr.bf16.mxu1 %v10715_v52 }
 0x419   : > { %6200 = vmatmul.mubr.msk.f32.vlgmr.msra.gmra.mrb[28].mxu1 %vm2008_vm1, %v9155_v54 }
 0x41a   : > { %6335 = vmatpush3.bf16.msra.mxu1 %v10775_v53  ;;  %6218 = vmatprep.mubr.msk.f32.mxu1 %vm6803_vm0, %v10722_v25 }
 0x41b   : > { %6336 = vmatprep.subr.bf16.mxu1 %v10715_v52 }
 0x41e   : > { %6338 = vmatpush3.bf16.msra.mxu1 %v10776_v28 }
 0x41f   : > { %6339 = vmatprep.subr.bf16.mxu1 %v10715_v52 }
 0x421   : > { %6219 = vmatmul.mubr.msk.f32.vlgmr.msra.gmra.mrb[30].mxu1 %vm2008_vm1, %v9155_v54 }
 0x422   : > { %6341 = vmatpush3.bf16.msra.mxu1 %v10777_v56  ;;  %6237 = vmatprep.mubr.msk.f32.mxu1 %vm6803_vm0, %v10722_v25 }
 0x423   : > { %6342 = vmatprep.subr.bf16.mxu1 %v10715_v52 }
 0x426   : > { %6344 = vmatpush3.bf16.msra.mxu1 %v10778_v51 }
 0x427   : > { %6345 = vmatprep.subr.bf16.mxu1 %v10715_v52 }
 0x429   : > { %6238 = vmatmul.mubr.msk.f32.vlgmr.msra.gmra.mrb[32].mxu1 %vm2008_vm1, %v9155_v54 }
 0x42a   : > { %6347 = vmatpush3.bf16.msra.mxu1 %v10779_v32  ;;  %6256 = vmatprep.mubr.msk.f32.mxu1 %vm6803_vm0, %v10722_v25 }
 0x42b   : > { %6348 = vmatprep.subr.bf16.mxu1 %v10715_v52 }
 0x42e   : > { %6350 = vmatpush3.bf16.msra.mxu1 %v10780_v50 }
 0x431   : > { %6257 = vmatmul.mubr.msk.f32.vlgmr.msra.gmra.mrb[34].mxu1 %vm2008_vm1, %v9155_v54 }
 0x4b4   : > { %v9368_v30 = vpop.f32.mrb[12].mxu1 }
 0x4b5   : > { %v9370_v55 = vpop.f32.mrb[13].mxu1 }
 0x4b8   : > { %v9372_v26 = vpop.f32.mrb[14].mxu1 }
 0x4b9   : > { %v9374_v35 = vpop.f32.mrb[15].mxu1 }
 0x4bc   : > { %v2855_v62 = vpop.f32.mrb[16].mxu1 }
 0x4bd   : > { %v2856_v15 = vadd.f32 %v2855_v62, %v10714_v16  ;;  %v6087_v31 = vpop.f32.mrb[17].mxu1 }
 0x4bf   : > { %v2859_v33 = vadd.f32 3.0, %v2856_v15 }
 0x4c1   : > { %v2860_v37 = vmax.f32 %v2859_v33, 0.0 }
 0x4c3   : > { %v2861_v3 = vmin.f32 %v2860_v37, 6.0 }
 0x4c4   : > { %v3039_v60 = vpop.f32.mrb[18].mxu1 }
 0x4c5   : > { %v2862_v29 = vmul.f32 0.16666667, %v2861_v3  ;;  %v3040_v47 = vadd.f32 %v3039_v60, %v10714_v16  ;;  %v6106_v57 = vpop.f32.mrb[19].mxu1 }
 0x4c7   : > { %v2863_v61 = vmul.f32 %v2862_v29, %v2856_v15  ;;  %v3043_v52 = vadd.f32 3.0, %v3040_v47 }
 0x4c9   : > { %v3044_v25 = vmax.f32 %v3043_v52, 0.0  ;;  %6088 = vmatprep.subr.mxu0 %v2863_v61 }
 0x4ca   : > { %6089 = vmatpush3.msra.mxu0 %v2863_v61 }
 0x4cb   : > { %v3045_v54 = vmin.f32 %v3044_v25, 6.0  ;;  %6091 = vmatmul.mubr.msk.f32.vlgmr.msra.gmra.mrb[8].mxu0 %vm2115_vm2, %v9127_v49 }
 0x4cc   : > { %v3223_v13 = vpop.f32.mrb[20].mxu1  ;;  %6093 = vmatprep.mubr.msk.f32.mxu0 %vm2115_vm2, %v9132_v63 }
 0x4cd   : > { %v3046_v18 = vmul.f32 0.16666667, %v3045_v54  ;;  %v3224_v9 = vadd.f32 %v3223_v13, %v10714_v16  ;;  %v6125_v39 = vpop.f32.mrb[21].mxu1 }
 0x4cf   : > { %v3047_v11 = vmul.f32 %v3046_v18, %v3040_v47  ;;  %v3227_v45 = vadd.f32 3.0, %v3224_v9  ;;  %6094 = vmatmul.mubr.msk.f32.gmra.mrb[10].mxu0 %vm2115_vm2, %v9145_v14 }
 0x4d0   : > { %6109 = vmatprep.mubr.msk.f32.mxu0 %vm2115_vm2, %v8938_v43 }
 0x4d1   : > { %v3228_v2 = vmax.f32 %v3227_v45, 0.0  ;;  %6107 = vmatprep.subr.mxu0 %v3047_v11 }
 0x4d2   : > { %6108 = vmatpush3.msra.mxu0 %v3047_v11 }
 0x4d3   : > { %v3229_v19 = vmin.f32 %v3228_v2, 6.0  ;;  %6110 = vmatmul.mubr.msk.f32.vlgmr.msra.gmra.mrb[12].mxu0 %vm2115_vm2, %v9127_v49 }
 0x4d4   : > { %v3407_v44 = vpop.f32.mrb[22].mxu1  ;;  %6112 = vmatprep.mubr.msk.f32.mxu0 %vm2115_vm2, %v9132_v63 }
 0x4d5   : > { %v3230_v24 = vmul.f32 0.16666667, %v3229_v19  ;;  %v3408_v10 = vadd.f32 %v3407_v44, %v10714_v16  ;;  %v6144_v8 = vpop.f32.mrb[23].mxu1 }
 0x4d7   : > { %v3231_v7 = vmul.f32 %v3230_v24, %v3224_v9  ;;  %v3411_v59 = vadd.f32 3.0, %v3408_v10  ;;  %6113 = vmatmul.mubr.msk.f32.gmra.mrb[14].mxu0 %vm2115_vm2, %v9145_v14 }
 0x4d8   : > { %6128 = vmatprep.mubr.msk.f32.mxu0 %vm2115_vm2, %v8938_v43 }
 0x4d9   : > { %v3412_v0 = vmax.f32 %v3411_v59, 0.0  ;;  %6126 = vmatprep.subr.mxu0 %v3231_v7  ;;  %v9486_v59 = vpop.permute.xlu1 %2097 }
 0x4da   : > { %6127 = vmatpush3.msra.mxu0 %v3231_v7  ;;  %v9484_v7 = vpop.permute.xlu0 %2102 }
 0x4db   : > { %v3413_v5 = vmin.f32 %v3412_v0, 6.0  ;;  %6129 = vmatmul.mubr.msk.f32.vlgmr.msra.gmra.mrb[16].mxu0 %vm2115_vm2, %v9127_v49  ;;  %v9413_v49 = vld [vmem:[%s10175_s9 + $0x8] sm:$0xff]  ;;  %v2200_v0 = vadd.f32 %v9169_v38, %v9484_v7 }
 0x4dc   : > { %v3631_v42 = vpop.f32.mrb[24].mxu1  ;;  %6131 = vmatprep.mubr.msk.f32.mxu0 %vm2115_vm2, %v9132_v63 }
 0x4dd   : > { %v3414_v48 = vmul.f32 0.16666667, %v3413_v5  ;;  %v3632_v6 = vadd.f32 %v3631_v42, %v10714_v16  ;;  %v6163_v12 = vpop.f32.mrb[25].mxu1  ;;  %v2195_v42 = vadd.f32 %v9171_v20, %v9486_v59 }
 0x4de   : > { %v9490_v5 = vpop.permute.xlu0 %2112 }
 0x4df   : > { %v3415_v43 = vmul.f32 %v3414_v48, %v3408_v10  ;;  %v3635_v21 = vadd.f32 3.0, %v3632_v6  ;;  %6132 = vmatmul.mubr.msk.f32.gmra.mrb[18].mxu0 %vm2115_vm2, %v9145_v14  ;;  %v2214_v48 = vsub.f32 0.0, %v2200_v0 }
 0x4e0   : > { %6147 = vmatprep.mubr.msk.f32.mxu0 %vm2115_vm2, %v9404_v36 }
 0x4e1   : > { %v3636_v63 = vmax.f32 %v3635_v21, 0.0  ;;  %6145 = vmatprep.subr.mxu0 %v3415_v43  ;;  %v10782_v21 = vld [vmem:[#allocation36_spill] sm:$0xff] }
 0x4e2   : > { %6146 = vmatpush3.msra.mxu0 %v3415_v43  ;;  %v2213_v43 = vsub.f32 0.0, %v2195_v42 }
 0x4e3   : > { %v3637_v22 = vmin.f32 %v3636_v63, 6.0  ;;  %6148 = vmatmul.mubr.msk.f32.vlgmr.msra.gmra.mrb[20].mxu0 %vm2115_vm2, %v9413_v49  ;;  %v2219_v63 = vmul.f32 1.442695, %v2214_v48 }
 0x4e4   : > { %v3815_v14 = vpop.f32.mrb[26].mxu1  ;;  %6150 = vmatprep.mubr.msk.f32.mxu0 %vm2115_vm2, %v9418_v34 }
 0x4e5   : > { %v3638_v27 = vmul.f32 0.16666667, %v3637_v22  ;;  %v3816_v23 = vadd.f32 %v3815_v14, %v10714_v16  ;;  %v6182_v1 = vpop.f32.mrb[27].mxu1  ;;  %v10783_v22 = vld [vmem:[#allocation113_spill] sm:$0xff]  ;;  %v2217_v14 = vmul.f32 1.442695, %v2213_v43  ;;  %6422 = vpow2.f32 %v2219_v63 }
 0x4e6   : > { %v2752_v38 = vadd.f32 %v10783_v22, %v9484_v7 }
 0x4e7   : > { %v3639_v58 = vmul.f32 %v3638_v27, %v3632_v6  ;;  %v3819_v41 = vadd.f32 3.0, %v3816_v23  ;;  %6151 = vmatmul.mubr.msk.f32.gmra.mrb[22].mxu0 %vm2115_vm2, %v9427_v4  ;;  %v10781_v6 = vld [vmem:[#allocation40_spill] sm:$0xff]  ;;  %v10784_v27 = vld [vmem:[#allocation117_spill] sm:$0xff]  ;;  %6424 = vpow2.f32 %v2217_v14 }
 0x4e8   : > { %6166 = vmatprep.mubr.msk.f32.mxu0 %vm2115_vm2, %v9404_v36  ;;  %v2210_v12 = vadd.f32 %v10781_v6, %v9490_v5  ;;  %v2747_v20 = vadd.f32 %v10784_v27, %v9486_v59  ;;  %v2766_v1 = vsub.f32 0.0, %v2752_v38 }
 0x4e9   : > { %v3820_v17 = vmax.f32 %v3819_v41, 0.0  ;;  %6164 = vmatprep.subr.mxu0 %v3639_v58 }
 0x4ea   : > { %6165 = vmatpush3.msra.mxu0 %v3639_v58  ;;  %v10785_v58 = vld [vmem:[#allocation101_spill] sm:$0xff] }
 0x4eb   : > { %v3821_v40 = vmin.f32 %v3820_v17, 6.0  ;;  %6167 = vmatmul.mubr.msk.f32.vlgmr.msra.gmra.mrb[24].mxu0 %vm2115_vm2, %v9413_v49  ;;  %v2762_v41 = vadd.f32 %v10785_v58, %v9490_v5  ;;  %v10786_v17 = vld [vmem:[#allocation106_spill] sm:$0xff] }
 0x4ec   : > { %v3999_v46 = vpop.f32.mrb[28].mxu1  ;;  %6169 = vmatprep.mubr.msk.f32.mxu0 %vm2115_vm2, %v9418_v34 }
 0x4ed   : > { %v3822_v53 = vmul.f32 0.16666667, %v3821_v40  ;;  %v4000_v28 = vadd.f32 %v3999_v46, %v10714_v16  ;;  %v6201_v56 = vpop.f32.mrb[29].mxu1 }
 0x4ef   : > { %v3823_v51 = vmul.f32 %v3822_v53, %v3816_v23  ;;  %v4003_v32 = vadd.f32 3.0, %v4000_v28  ;;  %6170 = vmatmul.mubr.msk.f32.gmra.mrb[26].mxu0 %vm2115_vm2, %v9427_v4  ;;  %v2765_v53 = vsub.f32 0.0, %v2747_v20 }
 0x4f0   : > { %6185 = vmatprep.mubr.msk.f32.mxu0 %vm2115_vm2, %v9404_v36 }
 0x4f1   : > { %v4004_v50 = vmax.f32 %v4003_v32, 0.0  ;;  %6183 = vmatprep.subr.mxu0 %v3823_v51  ;;  %v2768_v32 = vsub.f32 0.0, %v2762_v41 }
 0x4f2   : > { %6184 = vmatpush3.msra.mxu0 %v3823_v51  ;;  %v2771_v51 = vmul.f32 1.442695, %v2766_v1 }
 0x4f3   : > { %v4005_v62 = vmin.f32 %v4004_v50, 6.0  ;;  %6186 = vmatmul.mubr.msk.f32.vlgmr.msra.gmra.mrb[28].mxu0 %vm2115_vm2, %v9413_v49 }
 0x4f4   : > { %v4183_v15 = vpop.f32.mrb[30].mxu1  ;;  %6188 = vmatprep.mubr.msk.f32.mxu0 %vm2115_vm2, %v9418_v34 }
 0x4f5   : > { %v4006_v31 = vmul.f32 0.16666667, %v4005_v62  ;;  %v4184_v33 = vadd.f32 %v4183_v15, %v10714_v16  ;;  %v6220_v37 = vpop.f32.mrb[31].mxu1  ;;  %v10788_v62 = vld [vmem:[#allocation90_spill] sm:$0xff] }
 0x4f6   : > { %v2379_v15 = vadd.f32 %v10788_v62, %v9486_v59  ;;  %v10789_v37 = vld [vmem:[#allocation42_spill] sm:$0xff] }
 0x4f7   : > { %v4007_v3 = vmul.f32 %v4006_v31, %v4000_v28  ;;  %v4187_v60 = vadd.f32 3.0, %v4184_v33  ;;  %6189 = vmatmul.mubr.msk.f32.gmra.mrb[30].mxu0 %vm2115_vm2, %v9427_v4  ;;  %v10787_v28 = vld [vmem:[#allocation89_spill] sm:$0xff]  ;;  %v2769_v31 = vmul.f32 1.442695, %v2765_v53 }
 0x4f8   : > { %6204 = vmatprep.mubr.msk.f32.mxu0 %vm2115_vm2, %v9404_v36  ;;  %v2384_v56 = vadd.f32 %v10787_v28, %v9484_v7 }
 0x4f9   : > { %v4188_v29 = vmax.f32 %v4187_v60, 0.0  ;;  %6202 = vmatprep.subr.mxu0 %v4007_v3  ;;  %v2775_v60 = vmul.f32 1.442695, %v2768_v32 }
 0x4fa   : > { %6203 = vmatpush3.msra.mxu0 %v4007_v3  ;;  %v2394_v3 = vadd.f32 %v10789_v37, %v9490_v5 }
 0x4fb   : > { %v4189_v47 = vmin.f32 %v4188_v29, 6.0  ;;  %6205 = vmatmul.mubr.msk.f32.vlgmr.msra.gmra.mrb[32].mxu0 %vm2115_vm2, %v9413_v49  ;;  %v6423_v29 = vpop.eup %6422 }
 0x4fc   : > { %v4367_v57 = vpop.f32.mrb[32].mxu1  ;;  %6207 = vmatprep.mubr.msk.f32.mxu0 %vm2115_vm2, %v9418_v34 }
 0x4fd   : > { %v4190_v61 = vmul.f32 0.16666667, %v4189_v47  ;;  %v4368_v52 = vadd.f32 %v4367_v57, %v10714_v16  ;;  %v6239_v25 = vpop.f32.mrb[33].mxu1  ;;  %v2397_v57 = vsub.f32 0.0, %v2379_v15 }
 0x4ff   : > { %v4191_v54 = vmul.f32 %v4190_v61, %v4184_v33  ;;  %v4371_v13 = vadd.f32 3.0, %v4368_v52  ;;  %6208 = vmatmul.mubr.msk.f32.gmra.mrb[34].mxu0 %vm2115_vm2, %v9427_v4  ;;  %v2398_v33 = vsub.f32 0.0, %v2384_v56  ;;  %v10790_v61 = vld [vmem:[#allocation108_spill] sm:$0xff] }
 0x500   : > { %6223 = vmatprep.mubr.msk.f32.mxu0 %vm2115_vm2, %v9404_v36 }
 0x501   : > { %v4372_v18 = vmax.f32 %v4371_v13, 0.0  ;;  %6221 = vmatprep.subr.mxu0 %v4191_v54  ;;  %v2403_v25 = vmul.f32 1.442695, %v2398_v33  ;;  %v2568_v13 = vadd.f32 %v9368_v30, %v9484_v7 }
 0x502   : > { %6222 = vmatpush3.msra.mxu0 %v4191_v54  ;;  %v2400_v54 = vsub.f32 0.0, %v2394_v3 }
 0x503   : > { %v4373_v9 = vmin.f32 %v4372_v18, 6.0  ;;  %6224 = vmatmul.mubr.msk.f32.vlgmr.msra.gmra.mrb[36].mxu0 %vm2115_vm2, %v9413_v49  ;;  %v6425_v18 = vpop.eup %6424 }
 0x504   : > { %v4551_v39 = vpop.f32.mrb[34].mxu1  ;;  %6226 = vmatprep.mubr.msk.f32.mxu0 %vm2115_vm2, %v9418_v34 }
 0x505   : > { %v4374_v11 = vmul.f32 0.16666667, %v4373_v9  ;;  %v4552_v45 = vadd.f32 %v4551_v39, %v10714_v16  ;;  %v6258_v2 = vpop.f32.mrb[35].mxu1  ;;  %v2226_v9 = vadd.f32 1.0, %v6423_v29 }
 0x506   : > { %v2563_v2 = vadd.f32 %v9370_v55, %v9486_v59 }
 0x507   : > { %v4375_v19 = vmul.f32 %v4374_v11, %v4368_v52  ;;  %v4555_v44 = vadd.f32 3.0, %v4552_v45  ;;  %6227 = vmatmul.mubr.msk.f32.gmra.mrb[38].mxu0 %vm2115_vm2, %v9427_v4  ;;  %v2401_v11 = vmul.f32 1.442695, %v2397_v57 }
 0x508   : > { %6242 = vmatprep.mubr.msk.f32.mxu0 %vm2115_vm2, %v9404_v36  ;;  %v2581_v48 = vsub.f32 0.0, %v2563_v2 }
 0x509   : > { %v4556_v24 = vmax.f32 %v4555_v44, 0.0  ;;  %6240 = vmatprep.subr.mxu0 %v4375_v19  ;;  %v2582_v44 = vsub.f32 0.0, %v2568_v13 }
 0x50a   : > { %6241 = vmatpush3.msra.mxu0 %v4375_v19  ;;  %v2407_v19 = vmul.f32 1.442695, %v2400_v54 }
 0x50b   : > { %v4557_v10 = vmin.f32 %v4556_v24, 6.0  ;;  %6243 = vmatmul.mubr.msk.f32.vlgmr.msra.gmra.mrb[40].mxu0 %vm2115_vm2, %v9413_v49  ;;  %v2578_v24 = vadd.f32 %v9372_v26, %v9490_v5  ;;  %v2587_v6 = vmul.f32 1.442695, %v2582_v44 }
 0x50c   : > { %6245 = vmatprep.mubr.msk.f32.mxu0 %vm2115_vm2, %v9418_v34 }
 0x50d   : > { %v4558_v16 = vmul.f32 0.16666667, %v4557_v10  ;;  %v2225_v10 = vadd.f32 1.0, %v6425_v18  ;;  %v2584_v55 = vsub.f32 0.0, %v2578_v24 }
 0x50f   : > { %v4559_v8 = vmul.f32 %v4558_v16, %v4552_v45  ;;  %6246 = vmatmul.mubr.msk.f32.gmra.mrb[42].mxu0 %vm2115_vm2, %v9427_v4 }
 0x510   : > { %6261 = vmatprep.mubr.msk.f32.mxu0 %vm2115_vm2, %v9404_v36  ;;  %v9496_v36 = vpop.permute.xlu1 %2107 }
 0x511   : > { %6259 = vmatprep.subr.mxu0 %v4559_v8  ;;  %v2757_v40 = vadd.f32 %v10786_v17, %v9496_v36  ;;  %v2389_v52 = vadd.f32 %v10790_v61, %v9496_v36 }
 0x512   : > { %6260 = vmatpush3.msra.mxu0 %v4559_v8  ;;  %v2573_v8 = vadd.f32 %v9374_v35, %v9496_v36 }
 0x513   : > { %6262 = vmatmul.mubr.msk.f32.vlgmr.msra.gmra.mrb[44].mxu0 %vm2115_vm2, %v9413_v49  ;;  %v2205_v49 = vadd.f32 %v10782_v21, %v9496_v36  ;;  %v2767_v50 = vsub.f32 0.0, %v2757_v40  ;;  %v2399_v45 = vsub.f32 0.0, %v2389_v52 }
 0x514   : > { %6264 = vmatprep.mubr.msk.f32.mxu0 %vm2115_vm2, %v9418_v34  ;;  %v2216_v34 = vsub.f32 0.0, %v2210_v12  ;;  %v2583_v26 = vsub.f32 0.0, %v2573_v8 }
 0x515   : > { %v2773_v47 = vmul.f32 1.442695, %v2767_v50  ;;  %v2405_v42 = vmul.f32 1.442695, %v2399_v45 }
 0x516   : > { %v2223_v23 = vmul.f32 1.442695, %v2216_v34  ;;  %v2591_v34 = vmul.f32 1.442695, %v2584_v55  ;;  %v2589_v14 = vmul.f32 1.442695, %v2583_v26 }
 0x517   : > { %6265 = vmatmul.mubr.msk.f32.gmra.mrb[46].mxu0 %vm2115_vm2, %v9427_v4  ;;  %v2215_v4 = vsub.f32 0.0, %v2205_v49  ;;  %v2585_v49 = vmul.f32 1.442695, %v2581_v48 }
 0x518   : > { %6426 = vpow2.f32 %v2223_v23 }
 0x519   : > { %v2221_v46 = vmul.f32 1.442695, %v2215_v4 }
 0x51b   : > { %6428 = vpow2.f32 %v2221_v46 }
 0x51c   : > { %6430 = vpow2.f32 %v2771_v51 }
 0x51d   : > { %6432 = vpow2.f32 %v2769_v31 }
 0x51e   : > { %6434 = vpow2.f32 %v2775_v60 }
 0x51f   : > { %6436 = vpow2.f32 %v2773_v47 }
 0x520   : > { %6438 = vpow2.f32 %v2403_v25 }
 0x521   : > { %6440 = vrcp.f32 %v2226_v9 }
 0x522   : > { %v6427_v39 = vpop.eup %6426  ;;  %6442 = vpow2.f32 %v2401_v11 }
 0x523   : > { %v2228_v30 = vadd.f32 1.0, %v6427_v39  ;;  %6444 = vpow2.f32 %v2407_v19 }
 0x524   : > { %6446 = vrcp.f32 %v2225_v10 }
 0x525   : > { %v6429_v16 = vpop.eup %6428  ;;  %6448 = vrcp.f32 %v2228_v30 }
 0x526   : > { %v6431_v0 = vpop.eup %6430  ;;  %v2227_v12 = vadd.f32 1.0, %v6429_v16  ;;  %6450 = vpow2.f32 %v2405_v42 }
 0x527   : > { %v6433_v43 = vpop.eup %6432  ;;  %v2778_v21 = vadd.f32 1.0, %v6431_v0  ;;  %6452 = vpow2.f32 %v2587_v6 }
 0x528   : > { %v6435_v63 = vpop.eup %6434  ;;  %6454 = vrcp.f32 %v2227_v12  ;;  %v2777_v35 = vadd.f32 1.0, %v6433_v43 }
 0x529   : > { %v6437_v22 = vpop.eup %6436  ;;  %6456 = vrcp.f32 %v2778_v21  ;;  %v2780_v4 = vadd.f32 1.0, %v6435_v63 }
 0x52a   : > { %v6439_v38 = vpop.eup %6438  ;;  %6458 = vpow2.f32 %v2585_v49  ;;  %v2779_v23 = vadd.f32 1.0, %v6437_v22 }
 0x52b   : > { %v9524_v20 = vpop.eup %6440  ;;  %6460 = vpow2.f32 %v2591_v34  ;;  %v2410_v17 = vadd.f32 1.0, %v6439_v38 }
 0x52c   : > { %v6443_v41 = vpop.eup %6442  ;;  %6462 = vrcp.f32 %v2777_v35 }
 0x52d   : > { %v6445_v46 = vpop.eup %6444  ;;  %6464 = vpow2.f32 %v2589_v14  ;;  %v2409_v50 = vadd.f32 1.0, %v6443_v41 }
 0x52e   : > { %v9528_v28 = vpop.eup %6446  ;;  %6466 = vrcp.f32 %v2780_v4  ;;  %v2412_v37 = vadd.f32 1.0, %v6445_v46 }
 0x52f   : > { %v9530_v32 = vpop.eup %6448  ;;  %6468 = vrcp.f32 %v2779_v23 }
 0x530   : > { %v6451_v33 = vpop.eup %6450  ;;  %6470 = vrcp.f32 %v2410_v17 }
 0x531   : > { %v6453_v29 = vpop.eup %6452  ;;  %v2411_v54 = vadd.f32 1.0, %v6451_v33 }
 0x532   : > { %v9534_v57 = vpop.eup %6454  ;;  %v2594_v11 = vadd.f32 1.0, %v6453_v29 }
 0x533   : > { %v9536_v25 = vpop.eup %6456 }
 0x534   : > { %v6459_v39 = vpop.eup %6458 }
 0x535   : > { %v6461_v19 = vpop.eup %6460  ;;  %v2593_v8 = vadd.f32 1.0, %v6459_v39 }
 0x536   : > { %v9540_v24 = vpop.eup %6462  ;;  %v2596_v55 = vadd.f32 1.0, %v6461_v19 }
 0x537   : > { %v6465_v30 = vpop.eup %6464 }
 0x538   : > { %v9543_v6 = vpop.eup %6466  ;;  %v2595_v63 = vadd.f32 1.0, %v6465_v30 }
 0x539   : > { %v9546_v21 = vpop.eup %6468 }
 0x53a   : > { %v9548_v49 = vpop.eup %6470 }
 0x59e   : > { %v6092_v27 = vpop.f32.mrb[8].mxu0 }
 0x59f   : > { %v2936_v1 = vadd.f32 %v6092_v27, %v9484_v7  ;;  %v2930_v58 = vpop.f32.mrb[9].mxu0 }
 0x5a0   : > { %v2931_v40 = vadd.f32 %v2930_v58, %v9486_v59 }
 0x5a1   : > { %v2950_v53 = vsub.f32 0.0, %v2936_v1 }
 0x5a2   : > { %v2949_v56 = vsub.f32 0.0, %v2931_v40  ;;  %v6095_v51 = vpop.f32.mrb[10].mxu0 }
 0x5a3   : > { %v2955_v62 = vmul.f32 1.442695, %v2950_v53  ;;  %v2946_v15 = vadd.f32 %v6095_v51, %v9490_v5  ;;  %v2940_v31 = vpop.f32.mrb[11].mxu0 }
 0x5a4   : > { %v2953_v3 = vmul.f32 1.442695, %v2949_v56  ;;  %v2941_v60 = vadd.f32 %v2940_v31, %v9496_v36  ;;  %v9557_v31 = vpop.permute.xlu0 %3431 }
 0x5a5   : > { %6472 = vpow2.f32 %v2955_v62  ;;  %v2952_v47 = vsub.f32 0.0, %v2946_v15 }
 0x5a6   : > { %6474 = vpow2.f32 %v2953_v3  ;;  %v2951_v61 = vsub.f32 0.0, %v2941_v60  ;;  %v6111_v52 = vpop.f32.mrb[12].mxu0  ;;  %v9562_v60 = vpop.permute.xlu1 %3426 }
 0x5a7   : > { %6476 = vrcp.f32 %v2409_v50  ;;  %v2959_v13 = vmul.f32 1.442695, %v2952_v47  ;;  %v3120_v18 = vadd.f32 %v6111_v52, %v9484_v7  ;;  %v3114_v9 = vpop.f32.mrb[13].mxu0 }
 0x5a8   : > { %6478 = vrcp.f32 %v2412_v37  ;;  %v2957_v45 = vmul.f32 1.442695, %v2951_v61  ;;  %v3115_v2 = vadd.f32 %v3114_v9, %v9486_v59 }
 0x5a9   : > { %6480 = vpow2.f32 %v2959_v13  ;;  %v3134_v44 = vsub.f32 0.0, %v3120_v18 }
 0x5aa   : > { %6482 = vpow2.f32 %v2957_v45  ;;  %v3133_v10 = vsub.f32 0.0, %v3115_v2  ;;  %v6114_v16 = vpop.f32.mrb[14].mxu0 }
 0x5ab   : > { %6484 = vrcp.f32 %v2411_v54  ;;  %v3139_v0 = vmul.f32 1.442695, %v3134_v44  ;;  %v3130_v42 = vadd.f32 %v6114_v16, %v9490_v5  ;;  %v3124_v48 = vpop.f32.mrb[15].mxu0 }
 0x5ac   : > { %6486 = vrcp.f32 %v2594_v11  ;;  %v3137_v12 = vmul.f32 1.442695, %v3133_v10  ;;  %v3125_v43 = vadd.f32 %v3124_v48, %v9496_v36  ;;  %v9572_v10 = vpop.permute.xlu0 %3441 }
 0x5ad   : > { %6488 = vpow2.f32 %v3139_v0  ;;  %v3136_v26 = vsub.f32 0.0, %v3130_v42  ;;  %v9574_v42 = vpop.permute.xlu1 %3436 }
 0x5ae   : > { %6490 = vpow2.f32 %v3137_v12  ;;  %v3135_v34 = vsub.f32 0.0, %v3125_v43  ;;  %v6130_v22 = vpop.f32.mrb[16].mxu0 }
 0x5af   : > { %v6473_v35 = vpop.eup %6472  ;;  %6492 = vrcp.f32 %v2593_v8  ;;  %v3143_v38 = vmul.f32 1.442695, %v3136_v26  ;;  %v3304_v14 = vadd.f32 %v6130_v22, %v9484_v7  ;;  %v3298_v4 = vpop.f32.mrb[17].mxu0 }
 0x5b0   : > { %v6475_v27 = vpop.eup %6474  ;;  %6494 = vrcp.f32 %v2596_v55  ;;  %v2962_v23 = vadd.f32 1.0, %v6473_v35  ;;  %v3141_v1 = vmul.f32 1.442695, %v3135_v34  ;;  %v3299_v58 = vadd.f32 %v3298_v4, %v9486_v59 }
 0x5b1   : > { %v9552_v41 = vpop.eup %6476  ;;  %6496 = vpow2.f32 %v3143_v38  ;;  %v3318_v17 = vsub.f32 0.0, %v3304_v14  ;;  %v2961_v46 = vadd.f32 1.0, %v6475_v27 }
 0x5b2   : > { %v9554_v40 = vpop.eup %6478  ;;  %6498 = vrcp.f32 %v2595_v63  ;;  %v3317_v53 = vsub.f32 0.0, %v3299_v58  ;;  %v6133_v56 = vpop.f32.mrb[18].mxu0 }
 0x5b3   : > { %v6481_v51 = vpop.eup %6480  ;;  %6500 = vrcp.f32 %v2962_v23  ;;  %v3323_v7 = vmul.f32 1.442695, %v3318_v17  ;;  %v3314_v50 = vadd.f32 %v6133_v56, %v9490_v5  ;;  %v3308_v62 = vpop.f32.mrb[19].mxu0 }
 0x5b4   : > { %v6483_v15 = vpop.eup %6482  ;;  %v2964_v59 = vadd.f32 1.0, %v6481_v51  ;;  %6502 = vpow2.f32 %v3141_v1  ;;  %v3321_v33 = vmul.f32 1.442695, %v3317_v53  ;;  %v3309_v37 = vadd.f32 %v3308_v62, %v9496_v36 }
 0x5b5   : > { %v9560_v3 = vpop.eup %6484  ;;  %6504 = vpow2.f32 %v3323_v7  ;;  %v3320_v29 = vsub.f32 0.0, %v3314_v50  ;;  %v2963_v61 = vadd.f32 1.0, %v6483_v15 }
 0x5b6   : > { %v9564_v47 = vpop.eup %6486  ;;  %6506 = vrcp.f32 %v2961_v46  ;;  %v3319_v5 = vsub.f32 0.0, %v3309_v37  ;;  %v6149_v52 = vpop.f32.mrb[20].mxu0 }
 0x5b7   : > { %v6489_v54 = vpop.eup %6488  ;;  %6508 = vrcp.f32 %v2964_v59  ;;  %v3327_v13 = vmul.f32 1.442695, %v3320_v29  ;;  %v3528_v18 = vadd.f32 %v6149_v52, %v9557_v31  ;;  %v3522_v9 = vpop.f32.mrb[21].mxu0 }
 0x5b8   : > { %v6491_v39 = vpop.eup %6490  ;;  %v3146_v36 = vadd.f32 1.0, %v6489_v54  ;;  %6510 = vpow2.f32 %v3321_v33  ;;  %v3325_v11 = vmul.f32 1.442695, %v3319_v5  ;;  %v3523_v45 = vadd.f32 %v3522_v9, %v9562_v60 }
 0x5b9   : > { %v9568_v2 = vpop.eup %6492  ;;  %6512 = vpow2.f32 %v3327_v13  ;;  %v3542_v19 = vsub.f32 0.0, %v3528_v18  ;;  %v3145_v16 = vadd.f32 1.0, %v6491_v39 }
 0x5ba   : > { %v9570_v44 = vpop.eup %6494  ;;  %6514 = vrcp.f32 %v2963_v61  ;;  %v3541_v30 = vsub.f32 0.0, %v3523_v45  ;;  %v6152_v8 = vpop.f32.mrb[22].mxu0 }
 0x5bb   : > { %v6497_v0 = vpop.eup %6496  ;;  %6516 = vrcp.f32 %v3146_v36  ;;  %v3547_v48 = vmul.f32 1.442695, %v3542_v19  ;;  %v3538_v55 = vadd.f32 %v6152_v8, %v9572_v10  ;;  %v3532_v12 = vpop.f32.mrb[23].mxu0 }
 0x5bc   : > { %v9577_v43 = vpop.eup %6498  ;;  %v3148_v26 = vadd.f32 1.0, %v6497_v0  ;;  %6518 = vpow2.f32 %v3325_v11  ;;  %v3545_v63 = vmul.f32 1.442695, %v3541_v30  ;;  %v3533_v34 = vadd.f32 %v3532_v12, %v9574_v42 }
 0x5bd   : > { %v9580_v22 = vpop.eup %6500  ;;  %6520 = vpow2.f32 %v3547_v48  ;;  %v3544_v35 = vsub.f32 0.0, %v3538_v55 }
 0x5be   : > { %v6503_v38 = vpop.eup %6502  ;;  %6522 = vrcp.f32 %v3145_v16  ;;  %v3543_v14 = vsub.f32 0.0, %v3533_v34  ;;  %v6168_v4 = vpop.f32.mrb[24].mxu0 }
 0x5bf   : > { %v6505_v27 = vpop.eup %6504  ;;  %v3147_v23 = vadd.f32 1.0, %v6503_v38  ;;  %6524 = vpow2.f32 %v3545_v63  ;;  %v3551_v1 = vmul.f32 1.442695, %v3544_v35  ;;  %v3712_v58 = vadd.f32 %v6168_v4, %v9557_v31  ;;  %v3706_v17 = vpop.f32.mrb[25].mxu0 }
 0x5c0   : > { %v9583_v46 = vpop.eup %6506  ;;  %6526 = vrcp.f32 %v3148_v26  ;;  %v3330_v53 = vadd.f32 1.0, %v6505_v27  ;;  %v3549_v56 = vmul.f32 1.442695, %v3543_v14  ;;  %v3707_v51 = vadd.f32 %v3706_v17, %v9562_v60 }
 0x5c1   : > { %v9586_v7 = vpop.eup %6508  ;;  %6528 = vrcp.f32 %v3147_v23  ;;  %v3726_v50 = vsub.f32 0.0, %v3712_v58 }
 0x5c2   : > { %v6511_v62 = vpop.eup %6510  ;;  %6530 = vrcp.f32 %v3330_v53  ;;  %v3725_v15 = vsub.f32 0.0, %v3707_v51  ;;  %v6171_v59 = vpop.f32.mrb[26].mxu0 }
 0x5c3   : > { %v6513_v33 = vpop.eup %6512  ;;  %v3329_v37 = vadd.f32 1.0, %v6511_v62  ;;  %6532 = vpow2.f32 %v3551_v1  ;;  %v3731_v29 = vmul.f32 1.442695, %v3726_v50  ;;  %v3722_v61 = vadd.f32 %v6171_v59, %v9572_v10  ;;  %v3716_v5 = vpop.f32.mrb[27].mxu0 }
 0x5c4   : > { %v9589_v52 = vpop.eup %6514  ;;  %v3332_v54 = vadd.f32 1.0, %v6513_v33  ;;  %6534 = vpow2.f32 %v3549_v56  ;;  %v3729_v13 = vmul.f32 1.442695, %v3725_v15  ;;  %v3717_v18 = vadd.f32 %v3716_v5, %v9574_v42 }
 0x5c5   : > { %v9592_v9 = vpop.eup %6516  ;;  %6536 = vrcp.f32 %v3329_v37  ;;  %v3728_v39 = vsub.f32 0.0, %v3722_v61 }
 0x5c6   : > { %v6519_v36 = vpop.eup %6518  ;;  %6538 = vrcp.f32 %v3332_v54  ;;  %v3727_v11 = vsub.f32 0.0, %v3717_v18  ;;  %v6187_v45 = vpop.f32.mrb[28].mxu0 }
 0x5c7   : > { %v6521_v19 = vpop.eup %6520  ;;  %v3331_v16 = vadd.f32 1.0, %v6519_v36  ;;  %6540 = vpow2.f32 %v3731_v29  ;;  %v3735_v30 = vmul.f32 1.442695, %v3728_v39  ;;  %v3896_v8 = vadd.f32 %v6187_v45, %v9557_v31  ;;  %v3890_v0 = vpop.f32.mrb[29].mxu0 }
 0x5c8   : > { %v9595_v48 = vpop.eup %6522  ;;  %v3554_v55 = vadd.f32 1.0, %v6521_v19  ;;  %6542 = vpow2.f32 %v3729_v13  ;;  %v3891_v12 = vadd.f32 %v3890_v0, %v9562_v60  ;;  %v3733_v63 = vmul.f32 1.442695, %v3727_v11 }
 0x5c9   : > { %v6525_v26 = vpop.eup %6524  ;;  %6544 = vrcp.f32 %v3331_v16  ;;  %v3910_v34 = vsub.f32 0.0, %v3896_v8 }
 0x5ca   : > { %v9598_v35 = vpop.eup %6526  ;;  %6546 = vrcp.f32 %v3554_v55  ;;  %v3553_v38 = vadd.f32 1.0, %v6525_v26  ;;  %v3909_v14 = vsub.f32 0.0, %v3891_v12  ;;  %v6190_v4 = vpop.f32.mrb[30].mxu0 }
 0x5cb   : > { %v9600_v27 = vpop.eup %6528  ;;  %6548 = vpow2.f32 %v3735_v30  ;;  %v3915_v23 = vmul.f32 1.442695, %v3910_v34  ;;  %v3906_v1 = vadd.f32 %v6190_v4, %v9572_v10  ;;  %v3900_v58 = vpop.f32.mrb[31].mxu0 }
 0x5cc   : > { %v9603_v17 = vpop.eup %6530  ;;  %6550 = vrcp.f32 %v3553_v38  ;;  %v3913_v53 = vmul.f32 1.442695, %v3909_v14  ;;  %v3901_v56 = vadd.f32 %v3900_v58, %v9574_v42 }
 0x5cd   : > { %v6533_v51 = vpop.eup %6532  ;;  %6552 = vpow2.f32 %v3733_v63  ;;  %v3912_v50 = vsub.f32 0.0, %v3906_v1 }
 0x5ce   : > { %v6535_v62 = vpop.eup %6534  ;;  %v3556_v15 = vadd.f32 1.0, %v6533_v51  ;;  %6554 = vpow2.f32 %v3915_v23  ;;  %v3911_v59 = vsub.f32 0.0, %v3901_v56  ;;  %v6206_v33 = vpop.f32.mrb[32].mxu0 }
 0x5cf   : > { %v9606_v37 = vpop.eup %6536  ;;  %v3555_v29 = vadd.f32 1.0, %v6535_v62  ;;  %6556 = vpow2.f32 %v3913_v53  ;;  %v3919_v61 = vmul.f32 1.442695, %v3912_v50  ;;  %v4080_v5 = vadd.f32 %v6206_v33, %v9557_v31  ;;  %v4074_v54 = vpop.f32.mrb[33].mxu0 }
 0x5d0   : > { %v9609_v13 = vpop.eup %6538  ;;  %6558 = vrcp.f32 %v3556_v15  ;;  %v3917_v18 = vmul.f32 1.442695, %v3911_v59  ;;  %v4075_v39 = vadd.f32 %v4074_v54, %v9562_v60 }
 0x5d1   : > { %v6541_v36 = vpop.eup %6540  ;;  %6560 = vrcp.f32 %v3555_v29  ;;  %v4094_v11 = vsub.f32 0.0, %v4080_v5 }
 0x5d2   : > { %v6543_v45 = vpop.eup %6542  ;;  %v3738_v19 = vadd.f32 1.0, %v6541_v36  ;;  %6562 = vpow2.f32 %v3919_v61  ;;  %v4093_v16 = vsub.f32 0.0, %v4075_v39  ;;  %v6209_v30 = vpop.f32.mrb[34].mxu0 }
 0x5d3   : > { %v9612_v8 = vpop.eup %6544  ;;  %v3737_v0 = vadd.f32 1.0, %v6543_v45  ;;  %6564 = vpow2.f32 %v3917_v18  ;;  %v4099_v55 = vmul.f32 1.442695, %v4094_v11  ;;  %v4084_v12 = vpop.f32.mrb[35].mxu0  ;;  %v9617_v34 = vadd.f32 %v6209_v30, %v9572_v10 }
 0x5d4   : > { %v6547_v26 = vpop.eup %6546  ;;  %6566 = vrcp.f32 %v3738_v19  ;;  %v9614_v63 = vmul.f32 1.442695, %v4093_v16  ;;  %v9620_v38 = vadd.f32 %v4084_v12, %v9574_v42 }
 0x5d5   : > { %v6549_v14 = vpop.eup %6548  ;;  %v4670_v4 = vmul.f32 %v6547_v26, %v9524_v20  ;;  %v4732_v23 = vmul.f32 %v6547_v26, %v9548_v49  ;;  %v4795_v1 = vmul.f32 %v6547_v26, %v9564_v47  ;;  %v4858_v58 = vmul.f32 %v6547_v26, %v9536_v25 }
 0x5d6   : > { %v6551_v53 = vpop.eup %6550  ;;  %v4921_v56 = vmul.f32 %v6547_v26, %v9580_v22  ;;  %v4984_v51 = vmul.f32 %v6547_v26, %v9592_v9  ;;  %v5047_v50 = vmul.f32 %v6547_v26, %v9603_v17  ;;  %6568 = vrcp.f32 %v3737_v0  ;;  %v6225_v62 = vpop.f32.mrb[36].mxu0 }
 0x5d7   : > { %v6553_v15 = vpop.eup %6552  ;;  %4674 = vst [vmem:[%s9631_s15 + $0x8] sm:$0xff] %v4670_v4  ;;  %5691 = vst [vmem:[%s9631_s15 + $0xe8] sm:$0xff] %v4732_v23  ;;  %v4669_v59 = vmul.f32 %v6551_v53, %v9528_v28  ;;  %v4731_v33 = vmul.f32 %v6551_v53, %v9552_v41  ;;  %v4794_v29 = vmul.f32 %v6551_v53, %v9568_v2  ;;  %v9641_v5 = vpop.f32.mrb[37].mxu0  ;;  %v3740_v11 = vadd.f32 1.0, %v6549_v14 }
 0x5d8   : > { %5719 = vst [vmem:[%s9631_s15 + $0x1c8] sm:$0xff] %v4795_v1  ;;  %5747 = vst [vmem:[%s9631_s15 + $0x2a8] sm:$0xff] %v4858_v58  ;;  %v4857_v61 = vmul.f32 %v6551_v53, %v9540_v24  ;;  %v6555_v54 = vpop.eup %6554  ;;  %v4920_v18 = vmul.f32 %v6551_v53, %v9583_v46  ;;  %v4983_v39 = vmul.f32 %v6551_v53, %v9595_v48  ;;  %v3739_v19 = vadd.f32 1.0, %v6553_v15 }
 0x5d9   : > { %5775 = vst [vmem:[%s9631_s15 + $0x388] sm:$0xff] %v4921_v56  ;;  %5803 = vst [vmem:[%s9631_s15 + $0x468] sm:$0xff] %v4984_v51  ;;  %v5046_v36 = vmul.f32 %v6551_v53, %v9606_v37  ;;  %v6557_v45 = vpop.eup %6556  ;;  %v3922_v16 = vadd.f32 1.0, %v6555_v54  ;;  %6570 = vpow2.f32 %v4099_v55  ;;  %v4096_v30 = vsub.f32 0.0, %v9617_v34 }
 0x5da   : > { %5831 = vst [vmem:[%s9631_s15 + $0x548] sm:$0xff] %v5047_v50  ;;  %4673 = vst [vmem:[%s9631_s15] sm:$0xff] %v4669_v59  ;;  %v6559_v0 = vpop.eup %6558  ;;  %6572 = vrcp.f32 %v3740_v11  ;;  %v9657_v12 = vadd.f32 1.0, %v6557_v45  ;;  %v4095_v26 = vsub.f32 0.0, %v9620_v38  ;;  %v9661_v14 = vadd.f32 %v6225_v62, %v9557_v31  ;;  %v9663_v4 = vpop.f32.mrb[38].mxu0 }
 0x5db   : > { %5690 = vst [vmem:[%s9631_s15 + $0xe0] sm:$0xff] %v4731_v33  ;;  %5718 = vst [vmem:[%s9631_s15 + $0x1c0] sm:$0xff] %v4794_v29  ;;  %v6561_v55 = vpop.eup %6560  ;;  %v4672_v23 = vmul.f32 %v6559_v0, %v9530_v32  ;;  %v4734_v1 = vmul.f32 %v6559_v0, %v9554_v40  ;;  %v4797_v58 = vmul.f32 %v6559_v0, %v9570_v44  ;;  %v9669_v56 = vpop.f32.mrb[39].mxu0  ;;  %6574 = vrcp.f32 %v3739_v19 }
 0x5dc   : > { %5746 = vst [vmem:[%s9631_s15 + $0x2a0] sm:$0xff] %v4857_v61  ;;  %5774 = vst [vmem:[%s9631_s15 + $0x380] sm:$0xff] %v4920_v18  ;;  %v4860_v53 = vmul.f32 %v6559_v0, %v9543_v6  ;;  %v6563_v51 = vpop.eup %6562  ;;  %v4923_v50 = vmul.f32 %v6559_v0, %v9586_v7  ;;  %v4986_v62 = vmul.f32 %v6559_v0, %v9598_v35  ;;  %6576 = vrcp.f32 %v3922_v16 }
 0x5dd   : > { %5802 = vst [vmem:[%s9631_s15 + $0x460] sm:$0xff] %v4983_v39  ;;  %5830 = vst [vmem:[%s9631_s15 + $0x540] sm:$0xff] %v5046_v36  ;;  %v5049_v15 = vmul.f32 %v6559_v0, %v9609_v13  ;;  %v4671_v59 = vmul.f32 %v6561_v55, %v9534_v57  ;;  %v6565_v33 = vpop.eup %6564  ;;  %v4733_v29 = vmul.f32 %v6561_v55, %v9560_v3  ;;  %v3924_v45 = vadd.f32 1.0, %v6563_v51 }
 0x5de   : > { %4676 = vst [vmem:[%s9631_s15 + $0x18] sm:$0xff] %v4672_v23  ;;  %5693 = vst [vmem:[%s9631_s15 + $0xf8] sm:$0xff] %v4734_v1  ;;  %v4796_v61 = vmul.f32 %v6561_v55, %v9577_v43  ;;  %v4859_v54 = vmul.f32 %v6561_v55, %v9546_v21  ;;  %v4922_v18 = vmul.f32 %v6561_v55, %v9589_v52  ;;  %v6567_v39 = vpop.eup %6566  ;;  %v9689_v0 = vpop.f32.mrb[40].mxu0  ;;  %6578 = vrcp.f32 %v9657_v12 }
 0x5df   : > { %5721 = vst [vmem:[%s9631_s15 + $0x1d8] sm:$0xff] %v4797_v58  ;;  %5749 = vst [vmem:[%s9631_s15 + $0x2b8] sm:$0xff] %v4860_v53  ;;  %v4985_v36 = vmul.f32 %v6561_v55, %v9600_v27  ;;  %v5048_v11 = vmul.f32 %v6561_v55, %v9612_v8  ;;  %v4678_v23 = vmul.f32 %v6567_v39, %v9524_v20  ;;  %v9699_v19 = vpop.f32.mrb[41].mxu0  ;;  %6580 = vrcp.f32 %v3924_v45 }
 0x5e0   : > { %5777 = vst [vmem:[%s9631_s15 + $0x398] sm:$0xff] %v4923_v50  ;;  %5805 = vst [vmem:[%s9631_s15 + $0x478] sm:$0xff] %v4986_v62  ;;  %v4741_v1 = vmul.f32 %v6567_v39, %v9548_v49  ;;  %v4804_v58 = vmul.f32 %v6567_v39, %v9564_v47  ;;  %v4867_v55 = vmul.f32 %v6567_v39, %v9536_v25  ;;  %v6569_v53 = vpop.eup %6568  ;;  %6582 = vpow2.f32 %v9614_v63 }
 0x5e1   : > { %5833 = vst [vmem:[%s9631_s15 + $0x558] sm:$0xff] %v5049_v15  ;;  %4675 = vst [vmem:[%s9631_s15 + $0x10] sm:$0xff] %v4671_v59  ;;  %v4930_v51 = vmul.f32 %v6567_v39, %v9580_v22  ;;  %v4993_v50 = vmul.f32 %v6567_v39, %v9592_v9  ;;  %v5056_v62 = vmul.f32 %v6567_v39, %v9603_v17 }
 0x5e2   : > { %5692 = vst [vmem:[%s9631_s15 + $0xf0] sm:$0xff] %v4733_v29  ;;  %5720 = vst [vmem:[%s9631_s15 + $0x1d0] sm:$0xff] %v4796_v61  ;;  %v4677_v15 = vmul.f32 %v6569_v53, %v9528_v28  ;;  %v4740_v59 = vmul.f32 %v6569_v53, %v9552_v41  ;;  %v4803_v29 = vmul.f32 %v6569_v53, %v9568_v2  ;;  %v9721_v39 = vpop.f32.mrb[42].mxu0 }
 0x5e3   : > { %5748 = vst [vmem:[%s9631_s15 + $0x2b0] sm:$0xff] %v4859_v54  ;;  %5776 = vst [vmem:[%s9631_s15 + $0x390] sm:$0xff] %v4922_v18  ;;  %v4866_v61 = vmul.f32 %v6569_v53, %v9540_v24  ;;  %v4929_v16 = vmul.f32 %v6569_v53, %v9583_v46  ;;  %v4992_v54 = vmul.f32 %v6569_v53, %v9595_v48 }
 0x5e4   : > { %5804 = vst [vmem:[%s9631_s15 + $0x470] sm:$0xff] %v4985_v36  ;;  %5832 = vst [vmem:[%s9631_s15 + $0x550] sm:$0xff] %v5048_v11  ;;  %v5055_v18 = vmul.f32 %v6569_v53, %v9606_v37  ;;  %v6571_v36 = vpop.eup %6570  ;;  %v3923_v11 = vadd.f32 1.0, %v6565_v33  ;;  %v4278_v33 = vsub.f32 0.0, %v9661_v14  ;;  %v9740_v34 = vadd.f32 %v9641_v5, %v9562_v60 }
 0x5e5   : > { %5667 = vst [vmem:[%s9631_s15 + $0x28] sm:$0xff] %v4678_v23  ;;  %5695 = vst [vmem:[%s9631_s15 + $0x108] sm:$0xff] %v4741_v1  ;;  %v4103_v23 = vmul.f32 1.442695, %v4096_v30  ;;  %v4101_v1 = vmul.f32 1.442695, %v4095_v26 }
 0x5e6   : > { %5723 = vst [vmem:[%s9631_s15 + $0x1e8] sm:$0xff] %v4804_v58  ;;  %5751 = vst [vmem:[%s9631_s15 + $0x2c8] sm:$0xff] %v4867_v55  ;;  %v9731_v58 = vpop.f32.mrb[43].mxu0  ;;  %v6573_v55 = vpop.eup %6572  ;;  %v4106_v12 = vadd.f32 1.0, %v6571_v36  ;;  %6584 = vrcp.f32 %v3923_v11 }
 0x5e7   : > { %5779 = vst [vmem:[%s9631_s15 + $0x3a8] sm:$0xff] %v4930_v51  ;;  %5807 = vst [vmem:[%s9631_s15 + $0x488] sm:$0xff] %v4993_v50  ;;  %v4680_v38 = vmul.f32 %v6573_v55, %v9530_v32  ;;  %v4743_v30 = vmul.f32 %v6573_v55, %v9554_v40  ;;  %v4806_v26 = vmul.f32 %v6573_v55, %v9570_v44  ;;  %v9749_v5 = vpop.f32.mrb[44].mxu0  ;;  %v4283_v51 = vmul.f32 1.442695, %v4278_v33 }
 0x5e8   : > { %5835 = vst [vmem:[%s9631_s15 + $0x568] sm:$0xff] %v5056_v62  ;;  %5666 = vst [vmem:[%s9631_s15 + $0x20] sm:$0xff] %v4677_v15  ;;  %v4869_v45 = vmul.f32 %v6573_v55, %v9543_v6  ;;  %v4932_v53 = vmul.f32 %v6573_v55, %v9586_v7  ;;  %v4995_v63 = vmul.f32 %v6573_v55, %v9598_v35  ;;  %6586 = vrcp.f32 %v4106_v12  ;;  %v9760_v15 = vpop.f32.mrb[45].mxu0 }
 0x5e9   : > { %5694 = vst [vmem:[%s9631_s15 + $0x100] sm:$0xff] %v4740_v59  ;;  %5722 = vst [vmem:[%s9631_s15 + $0x1e0] sm:$0xff] %v4803_v29  ;;  %v5058_v14 = vmul.f32 %v6573_v55, %v9609_v13  ;;  %v4277_v50 = vsub.f32 0.0, %v9740_v34  ;;  %v9758_v62 = vadd.f32 %v9663_v4, %v9572_v10  ;;  %v6575_v59 = vpop.eup %6574  ;;  %6588 = vpow2.f32 %v4103_v23 }
 0x5ea   : > { %5750 = vst [vmem:[%s9631_s15 + $0x2c0] sm:$0xff] %v4866_v61  ;;  %5778 = vst [vmem:[%s9631_s15 + $0x3a0] sm:$0xff] %v4929_v16  ;;  %v9767_v29 = vadd.f32 %v9669_v56, %v9574_v42  ;;  %v9771_v61 = vadd.f32 %v9689_v0, %v9557_v31  ;;  %v9775_v4 = vadd.f32 %v9699_v19, %v9562_v60  ;;  %v6577_v11 = vpop.eup %6576  ;;  %6590 = vpow2.f32 %v4101_v1  ;;  %v9784_v19 = vpop.f32.mrb[46].mxu0 }
 0x5eb   : > { %5806 = vst [vmem:[%s9631_s15 + $0x480] sm:$0xff] %v4992_v54  ;;  %5834 = vst [vmem:[%s9631_s15 + $0x560] sm:$0xff] %v5055_v18  ;;  %v4679_v16 = vmul.f32 %v6575_v59, %v9534_v57  ;;  %v4742_v54 = vmul.f32 %v6575_v59, %v9560_v3  ;;  %v4805_v18 = vmul.f32 %v6575_v59, %v9577_v43  ;;  %v6579_v1 = vpop.eup %6578  ;;  %6592 = vpow2.f32 %v4283_v51 }
 0x5ec   : > { %5669 = vst [vmem:[%s9631_s15 + $0x38] sm:$0xff] %v4680_v38  ;;  %5697 = vst [vmem:[%s9631_s15 + $0x118] sm:$0xff] %v4743_v30  ;;  %v4868_v36 = vmul.f32 %v6575_v59, %v9546_v21  ;;  %v4931_v56 = vmul.f32 %v6575_v59, %v9589_v52  ;;  %v4994_v0 = vmul.f32 %v6575_v59, %v9600_v27  ;;  %v9794_v30 = vpop.f32.mrb[47].mxu0 }
 0x5ed   : > { %5725 = vst [vmem:[%s9631_s15 + $0x1f8] sm:$0xff] %v4806_v26  ;;  %5753 = vst [vmem:[%s9631_s15 + $0x2d8] sm:$0xff] %v4869_v45  ;;  %v5057_v23 = vmul.f32 %v6575_v59, %v9612_v8  ;;  %v4687_v55 = vmul.f32 %v6577_v11, %v9524_v20  ;;  %v4750_v12 = vmul.f32 %v6577_v11, %v9548_v49 }
 0x5ee   : > { %5781 = vst [vmem:[%s9631_s15 + $0x3b8] sm:$0xff] %v4932_v53  ;;  %5809 = vst [vmem:[%s9631_s15 + $0x498] sm:$0xff] %v4995_v63  ;;  %v4813_v33 = vmul.f32 %v6577_v11, %v9564_v47  ;;  %v4876_v38 = vmul.f32 %v6577_v11, %v9536_v25  ;;  %v4939_v26 = vmul.f32 %v6577_v11, %v9580_v22  ;;  %v6581_v63 = vpop.eup %6580 }
 0x5ef   : > { %5837 = vst [vmem:[%s9631_s15 + $0x578] sm:$0xff] %v5058_v14  ;;  %5668 = vst [vmem:[%s9631_s15 + $0x30] sm:$0xff] %v4679_v16  ;;  %v5002_v45 = vmul.f32 %v6577_v11, %v9592_v9  ;;  %v5065_v53 = vmul.f32 %v6577_v11, %v9603_v17  ;;  %v4686_v14 = vmul.f32 %v6579_v1, %v9528_v28 }
 0x5f0   : > { %5696 = vst [vmem:[%s9631_s15 + $0x110] sm:$0xff] %v4742_v54  ;;  %5724 = vst [vmem:[%s9631_s15 + $0x1f0] sm:$0xff] %v4805_v18  ;;  %v4749_v59 = vmul.f32 %v6579_v1, %v9552_v41  ;;  %v4812_v16 = vmul.f32 %v6579_v1, %v9568_v2  ;;  %v4875_v54 = vmul.f32 %v6579_v1, %v9540_v24  ;;  %v6583_v18 = vpop.eup %6582 }
 0x5f1   : > { %5752 = vst [vmem:[%s9631_s15 + $0x2d0] sm:$0xff] %v4868_v36  ;;  %5780 = vst [vmem:[%s9631_s15 + $0x3b0] sm:$0xff] %v4931_v56  ;;  %v4938_v51 = vmul.f32 %v6579_v1, %v9583_v46  ;;  %v5001_v36 = vmul.f32 %v6579_v1, %v9595_v48  ;;  %v5064_v11 = vmul.f32 %v6579_v1, %v9606_v37 }
 0x5f2   : > { %5808 = vst [vmem:[%s9631_s15 + $0x490] sm:$0xff] %v4994_v0  ;;  %5836 = vst [vmem:[%s9631_s15 + $0x570] sm:$0xff] %v5057_v23  ;;  %v4689_v56 = vmul.f32 %v6581_v63, %v9530_v32  ;;  %v4752_v0 = vmul.f32 %v6581_v63, %v9554_v40  ;;  %v4815_v23 = vmul.f32 %v6581_v63, %v9570_v44 }
 0x5f3   : > { %5671 = vst [vmem:[%s9631_s15 + $0x48] sm:$0xff] %v4687_v55  ;;  %5699 = vst [vmem:[%s9631_s15 + $0x128] sm:$0xff] %v4750_v12  ;;  %v4878_v55 = vmul.f32 %v6581_v63, %v9543_v6  ;;  %v4941_v12 = vmul.f32 %v6581_v63, %v9586_v7  ;;  %v5067_v1 = vmul.f32 %v6581_v63, %v9609_v13 }
 0x5f4   : > { %5727 = vst [vmem:[%s9631_s15 + $0x208] sm:$0xff] %v4813_v33  ;;  %5755 = vst [vmem:[%s9631_s15 + $0x2e8] sm:$0xff] %v4876_v38  ;;  %v6585_v33 = vpop.eup %6584  ;;  %v5004_v38 = vmul.f32 %v6581_v63, %v9598_v35 }
 0x5f5   : > { %5783 = vst [vmem:[%s9631_s15 + $0x3c8] sm:$0xff] %v4939_v26  ;;  %5811 = vst [vmem:[%s9631_s15 + $0x4a8] sm:$0xff] %v5002_v45  ;;  %v4105_v26 = vadd.f32 1.0, %v6583_v18  ;;  %v4281_v45 = vmul.f32 1.442695, %v4277_v50  ;;  %v4877_v63 = vmul.f32 %v6585_v33, %v9546_v21  ;;  %v4940_v34 = vmul.f32 %v6585_v33, %v9589_v52 }
 0x5f6   : > { %5839 = vst [vmem:[%s9631_s15 + $0x588] sm:$0xff] %v5065_v53  ;;  %5670 = vst [vmem:[%s9631_s15 + $0x40] sm:$0xff] %v4686_v14  ;;  %v6587_v53 = vpop.eup %6586  ;;  %v4688_v14 = vmul.f32 %v6585_v33, %v9534_v57  ;;  %v5003_v50 = vmul.f32 %v6585_v33, %v9600_v27  ;;  %v5066_v18 = vmul.f32 %v6585_v33, %v9612_v8 }
 0x5f7   : > { %5698 = vst [vmem:[%s9631_s15 + $0x120] sm:$0xff] %v4749_v59  ;;  %5726 = vst [vmem:[%s9631_s15 + $0x200] sm:$0xff] %v4812_v16  ;;  %v4751_v59 = vmul.f32 %v6585_v33, %v9560_v3  ;;  %v4814_v16 = vmul.f32 %v6585_v33, %v9577_v43  ;;  %6594 = vrcp.f32 %v4105_v26  ;;  %v4458_v26 = vadd.f32 %v9721_v39, %v9572_v10 }
 0x5f8   : > { %5754 = vst [vmem:[%s9631_s15 + $0x2e0] sm:$0xff] %v4875_v54  ;;  %5782 = vst [vmem:[%s9631_s15 + $0x3c0] sm:$0xff] %v4938_v51  ;;  %v6589_v54 = vpop.eup %6588  ;;  %v4696_v51 = vmul.f32 %v6587_v53, %v9524_v20  ;;  %6596 = vpow2.f32 %v4281_v45  ;;  %v9885_v39 = vadd.f32 %v9784_v19, %v9572_v10 }
 0x5f9   : > { %5810 = vst [vmem:[%s9631_s15 + $0x4a0] sm:$0xff] %v5001_v36  ;;  %5838 = vst [vmem:[%s9631_s15 + $0x580] sm:$0xff] %v5064_v11  ;;  %v4759_v36 = vmul.f32 %v6587_v53, %v9548_v49  ;;  %v4822_v11 = vmul.f32 %v6587_v53, %v9564_v47  ;;  %v4108_v33 = vadd.f32 1.0, %v6589_v54 }
 0x5fa   : > { %5673 = vst [vmem:[%s9631_s15 + $0x58] sm:$0xff] %v4689_v56  ;;  %5701 = vst [vmem:[%s9631_s15 + $0x138] sm:$0xff] %v4752_v0  ;;  %v4885_v56 = vmul.f32 %v6587_v53, %v9536_v25  ;;  %v4948_v0 = vmul.f32 %v6587_v53, %v9580_v22 }
 0x5fb   : > { %5729 = vst [vmem:[%s9631_s15 + $0x218] sm:$0xff] %v4815_v23  ;;  %5757 = vst [vmem:[%s9631_s15 + $0x2f8] sm:$0xff] %v4878_v55  ;;  %v6591_v23 = vpop.eup %6590  ;;  %v5011_v55 = vmul.f32 %v6587_v53, %v9592_v9  ;;  %6598 = vrcp.f32 %v4108_v33 }
 0x5fc   : > { %5785 = vst [vmem:[%s9631_s15 + $0x3d8] sm:$0xff] %v4941_v12  ;;  %5813 = vst [vmem:[%s9631_s15 + $0x4b8] sm:$0xff] %v5004_v38  ;;  %v5074_v12 = vmul.f32 %v6587_v53, %v9603_v17  ;;  %v4107_v38 = vadd.f32 1.0, %v6591_v23  ;;  %v4461_v53 = vsub.f32 0.0, %v9775_v4 }
 0x5fd   : > { %5841 = vst [vmem:[%s9631_s15 + $0x598] sm:$0xff] %v5067_v1  ;;  %5672 = vst [vmem:[%s9631_s15 + $0x50] sm:$0xff] %v4688_v14  ;;  %v4280_v1 = vsub.f32 0.0, %v9758_v62  ;;  %v4279_v14 = vsub.f32 0.0, %v9767_v29  ;;  %v4464_v62 = vsub.f32 0.0, %v4458_v26  ;;  %v4453_v29 = vadd.f32 %v9731_v58, %v9574_v42 }
 0x5fe   : > { %5700 = vst [vmem:[%s9631_s15 + $0x130] sm:$0xff] %v4751_v59  ;;  %5728 = vst [vmem:[%s9631_s15 + $0x210] sm:$0xff] %v4814_v16  ;;  %v6593_v59 = vpop.eup %6592  ;;  %v4462_v16 = vsub.f32 0.0, %v9771_v61  ;;  %6600 = vrcp.f32 %v4107_v38  ;;  %v9881_v61 = vadd.f32 %v9760_v15, %v9562_v60 }
 0x5ff   : > { %5756 = vst [vmem:[%s9631_s15 + $0x2f0] sm:$0xff] %v4877_v63  ;;  %5784 = vst [vmem:[%s9631_s15 + $0x3d0] sm:$0xff] %v4940_v34  ;;  %v4290_v63 = vadd.f32 1.0, %v6593_v59  ;;  %v4287_v54 = vmul.f32 1.442695, %v4280_v1 }
 0x600   : > { %5812 = vst [vmem:[%s9631_s15 + $0x4b0] sm:$0xff] %v5003_v50  ;;  %5840 = vst [vmem:[%s9631_s15 + $0x590] sm:$0xff] %v5066_v18  ;;  %v4285_v34 = vmul.f32 1.442695, %v4279_v14  ;;  %v4467_v45 = vmul.f32 1.442695, %v4462_v16  ;;  %v9877_v18 = vadd.f32 %v9749_v5, %v9557_v31 }
 0x601   : > { %5675 = vst [vmem:[%s9631_s15 + $0x68] sm:$0xff] %v4696_v51  ;;  %5703 = vst [vmem:[%s9631_s15 + $0x148] sm:$0xff] %v4759_v36  ;;  %v4465_v50 = vmul.f32 1.442695, %v4461_v53  ;;  %6602 = vrcp.f32 %v4290_v63  ;;  %v4471_v4 = vmul.f32 1.442695, %v4464_v62  ;;  %v9889_v36 = vadd.f32 %v9794_v30, %v9574_v42  ;;  %v6595_v31 = vpop.eup %6594 }
 0x602   : > { %5731 = vst [vmem:[%s9631_s15 + $0x228] sm:$0xff] %v4822_v11  ;;  %5759 = vst [vmem:[%s9631_s15 + $0x308] sm:$0xff] %v4885_v56  ;;  %6604 = vpow2.f32 %v4287_v54  ;;  %v4463_v51 = vsub.f32 0.0, %v4453_v29  ;;  %v4646_v10 = vsub.f32 0.0, %v9877_v18  ;;  %v4645_v58 = vsub.f32 0.0, %v9881_v61  ;;  %v6597_v5 = vpop.eup %6596 }
 0x603   : > { %5787 = vst [vmem:[%s9631_s15 + $0x3e8] sm:$0xff] %v4948_v0  ;;  %5815 = vst [vmem:[%s9631_s15 + $0x4c8] sm:$0xff] %v5011_v55  ;;  %6606 = vpow2.f32 %v4285_v34  ;;  %v4695_v15 = vmul.f32 %v6595_v31, %v9528_v28  ;;  %v4758_v42 = vmul.f32 %v6595_v31, %v9552_v41  ;;  %v4821_v19 = vmul.f32 %v6595_v31, %v9568_v2 }
 0x604   : > { %5843 = vst [vmem:[%s9631_s15 + $0x5a8] sm:$0xff] %v5074_v12  ;;  %6608 = vpow2.f32 %v4467_v45  ;;  %v9891_v60 = vmul.f32 1.442695, %v4463_v51  ;;  %v4884_v30 = vmul.f32 %v6595_v31, %v9540_v24  ;;  %v4947_v56 = vmul.f32 %v6595_v31, %v9583_v46 }
 0x605   : > { %6610 = vpow2.f32 %v4465_v50  ;;  %v6599_v11 = vpop.eup %6598  ;;  %v5010_v0 = vmul.f32 %v6595_v31, %v9595_v48  ;;  %v5073_v23 = vmul.f32 %v6595_v31, %v9606_v37  ;;  %v4289_v55 = vadd.f32 1.0, %v6597_v5  ;;  %5674 = vst [vmem:[%s9631_s15 + $0x60] sm:$0xff] %v4695_v15  ;;  %5702 = vst [vmem:[%s9631_s15 + $0x140] sm:$0xff] %v4758_v42 }
 0x606   : > { %6612 = vpow2.f32 %v4471_v4  ;;  %5730 = vst [vmem:[%s9631_s15 + $0x220] sm:$0xff] %v4821_v19  ;;  %5758 = vst [vmem:[%s9631_s15 + $0x300] sm:$0xff] %v4884_v30  ;;  %v4698_v33 = vmul.f32 %v6599_v11, %v9530_v32  ;;  %v4761_v38 = vmul.f32 %v6599_v11, %v9554_v40  ;;  %v4824_v1 = vmul.f32 %v6599_v11, %v9570_v44 }
 0x607   : > { %v4887_v14 = vmul.f32 %v6599_v11, %v9543_v6  ;;  %5786 = vst [vmem:[%s9631_s15 + $0x3e0] sm:$0xff] %v4947_v56  ;;  %5814 = vst [vmem:[%s9631_s15 + $0x4c0] sm:$0xff] %v5010_v0  ;;  %v4950_v59 = vmul.f32 %v6599_v11, %v9586_v7  ;;  %v5013_v16 = vmul.f32 %v6599_v11, %v9598_v35  ;;  %6614 = vrcp.f32 %v4289_v55 }
 0x608   : > { %v6601_v12 = vpop.eup %6600  ;;  %5842 = vst [vmem:[%s9631_s15 + $0x5a0] sm:$0xff] %v5073_v23  ;;  %v5076_v53 = vmul.f32 %v6599_v11, %v9609_v13  ;;  %5677 = vst [vmem:[%s9631_s15 + $0x78] sm:$0xff] %v4698_v33  ;;  %6616 = vpow2.f32 %v9891_v60 }
 0x609   : > { %v4697_v26 = vmul.f32 %v6601_v12, %v9534_v57  ;;  %5705 = vst [vmem:[%s9631_s15 + $0x158] sm:$0xff] %v4761_v38  ;;  %5733 = vst [vmem:[%s9631_s15 + $0x238] sm:$0xff] %v4824_v1  ;;  %v4760_v54 = vmul.f32 %v6601_v12, %v9560_v3  ;;  %v4823_v34 = vmul.f32 %v6601_v12, %v9577_v43  ;;  %v4648_v38 = vsub.f32 0.0, %v9885_v39 }
 0x60a   : > { %5761 = vst [vmem:[%s9631_s15 + $0x318] sm:$0xff] %v4887_v14  ;;  %v4886_v45 = vmul.f32 %v6601_v12, %v9546_v21  ;;  %v4949_v50 = vmul.f32 %v6601_v12, %v9589_v52  ;;  %5789 = vst [vmem:[%s9631_s15 + $0x3f8] sm:$0xff] %v4950_v59  ;;  %v5012_v29 = vmul.f32 %v6601_v12, %v9600_v27  ;;  %v4647_v59 = vsub.f32 0.0, %v9889_v36 }
 0x60b   : > { %v6603_v63 = vpop.eup %6602  ;;  %5817 = vst [vmem:[%s9631_s15 + $0x4d8] sm:$0xff] %v5013_v16  ;;  %5845 = vst [vmem:[%s9631_s15 + $0x5b8] sm:$0xff] %v5076_v53  ;;  %v5075_v4 = vmul.f32 %v6601_v12, %v9612_v8  ;;  %v4651_v16 = vmul.f32 1.442695, %v4646_v10  ;;  %v4649_v53 = vmul.f32 1.442695, %v4645_v58 }
 0x60c   : > { %v6605_v62 = vpop.eup %6604  ;;  %5676 = vst [vmem:[%s9631_s15 + $0x70] sm:$0xff] %v4697_v26  ;;  %v4705_v51 = vmul.f32 %v6603_v63, %v9524_v20  ;;  %v4768_v31 = vmul.f32 %v6603_v63, %v9548_v49  ;;  %5704 = vst [vmem:[%s9631_s15 + $0x150] sm:$0xff] %v4760_v54  ;;  %v4831_v15 = vmul.f32 %v6603_v63, %v9564_v47  ;;  %v4655_v26 = vmul.f32 1.442695, %v4648_v38 }
 0x60d   : > { %v6607_v5 = vpop.eup %6606  ;;  %5732 = vst [vmem:[%s9631_s15 + $0x230] sm:$0xff] %v4823_v34  ;;  %5760 = vst [vmem:[%s9631_s15 + $0x310] sm:$0xff] %v4886_v45  ;;  %v4894_v42 = vmul.f32 %v6603_v63, %v9536_v25  ;;  %v4957_v19 = vmul.f32 %v6603_v63, %v9580_v22  ;;  %v5020_v30 = vmul.f32 %v6603_v63, %v9592_v9  ;;  %v4292_v0 = vadd.f32 1.0, %v6605_v62 }
 0x60e   : > { %5788 = vst [vmem:[%s9631_s15 + $0x3f0] sm:$0xff] %v4949_v50  ;;  %v6609_v11 = vpop.eup %6608  ;;  %5816 = vst [vmem:[%s9631_s15 + $0x4d0] sm:$0xff] %v5012_v29  ;;  %v5083_v56 = vmul.f32 %v6603_v63, %v9603_v17  ;;  %v4291_v23 = vadd.f32 1.0, %v6607_v5  ;;  %v4653_v60 = vmul.f32 1.442695, %v4647_v59 }
 0x60f   : > { %5844 = vst [vmem:[%s9631_s15 + $0x5b0] sm:$0xff] %v5075_v4  ;;  %5679 = vst [vmem:[%s9631_s15 + $0x88] sm:$0xff] %v4705_v51  ;;  %v6611_v12 = vpop.eup %6610  ;;  %v4474_v33 = vadd.f32 1.0, %v6609_v11  ;;  %6618 = vrcp.f32 %v4292_v0 }
 0x610   : > { %5707 = vst [vmem:[%s9631_s15 + $0x168] sm:$0xff] %v4768_v31  ;;  %5735 = vst [vmem:[%s9631_s15 + $0x248] sm:$0xff] %v4831_v15  ;;  %v6613_v1 = vpop.eup %6612  ;;  %v4473_v14 = vadd.f32 1.0, %v6611_v12  ;;  %6620 = vrcp.f32 %v4291_v23 }
 0x611   : > { %5763 = vst [vmem:[%s9631_s15 + $0x328] sm:$0xff] %v4894_v42  ;;  %5791 = vst [vmem:[%s9631_s15 + $0x408] sm:$0xff] %v4957_v19  ;;  %v4476_v55 = vadd.f32 1.0, %v6613_v1  ;;  %6622 = vrcp.f32 %v4474_v33  ;;  %v6615_v39 = vpop.eup %6614 }
 0x612   : > { %5819 = vst [vmem:[%s9631_s15 + $0x4e8] sm:$0xff] %v5020_v30  ;;  %5847 = vst [vmem:[%s9631_s15 + $0x5c8] sm:$0xff] %v5083_v56  ;;  %6624 = vrcp.f32 %v4473_v14  ;;  %v6617_v36 = vpop.eup %6616  ;;  %v4704_v18 = vmul.f32 %v6615_v39, %v9528_v28  ;;  %v4767_v10 = vmul.f32 %v6615_v39, %v9552_v41  ;;  %v4830_v61 = vmul.f32 %v6615_v39, %v9568_v2 }
 0x613   : > { %6626 = vrcp.f32 %v4476_v55  ;;  %v4893_v58 = vmul.f32 %v6615_v39, %v9540_v24  ;;  %v4956_v54 = vmul.f32 %v6615_v39, %v9583_v46  ;;  %v5019_v34 = vmul.f32 %v6615_v39, %v9595_v48 }
 0x614   : > { %6628 = vpow2.f32 %v4651_v16  ;;  %v5082_v45 = vmul.f32 %v6615_v39, %v9606_v37  ;;  %v9965_v50 = vadd.f32 1.0, %v6617_v36  ;;  %5678 = vst [vmem:[%s9631_s15 + $0x80] sm:$0xff] %v4704_v18  ;;  %5706 = vst [vmem:[%s9631_s15 + $0x160] sm:$0xff] %v4767_v10 }
 0x615   : > { %6630 = vpow2.f32 %v4649_v53  ;;  %5734 = vst [vmem:[%s9631_s15 + $0x240] sm:$0xff] %v4830_v61  ;;  %5762 = vst [vmem:[%s9631_s15 + $0x320] sm:$0xff] %v4893_v58 }
 0x616   : > { %6632 = vpow2.f32 %v4655_v26  ;;  %5790 = vst [vmem:[%s9631_s15 + $0x400] sm:$0xff] %v4956_v54  ;;  %5818 = vst [vmem:[%s9631_s15 + $0x4e0] sm:$0xff] %v5019_v34 }
 0x617   : > { %6634 = vpow2.f32 %v4653_v60  ;;  %5846 = vst [vmem:[%s9631_s15 + $0x5c0] sm:$0xff] %v5082_v45 }
 0x618   : > { %6636 = vrcp.f32 %v9965_v50 }
 0x619   : > { %v6619_v63 = vpop.eup %6618 }
 0x61a   : > { %v6621_v62 = vpop.eup %6620  ;;  %v4707_v29 = vmul.f32 %v6619_v63, %v9530_v32  ;;  %v4770_v4 = vmul.f32 %v6619_v63, %v9554_v40  ;;  %v4833_v51 = vmul.f32 %v6619_v63, %v9570_v44  ;;  %v4896_v31 = vmul.f32 %v6619_v63, %v9543_v6 }
 0x61b   : > { %v6623_v5 = vpop.eup %6622  ;;  %v4959_v15 = vmul.f32 %v6619_v63, %v9586_v7  ;;  %v5022_v42 = vmul.f32 %v6619_v63, %v9598_v35  ;;  %v5085_v19 = vmul.f32 %v6619_v63, %v9609_v13  ;;  %v4706_v30 = vmul.f32 %v6621_v62, %v9534_v57 }
 0x61c   : > { %v6625_v11 = vpop.eup %6624  ;;  %5681 = vst [vmem:[%s9631_s15 + $0x98] sm:$0xff] %v4707_v29  ;;  %5709 = vst [vmem:[%s9631_s15 + $0x178] sm:$0xff] %v4770_v4  ;;  %v4769_v56 = vmul.f32 %v6621_v62, %v9560_v3  ;;  %v4832_v0 = vmul.f32 %v6621_v62, %v9577_v43  ;;  %v4895_v23 = vmul.f32 %v6621_v62, %v9546_v21 }
 0x61d   : > { %5737 = vst [vmem:[%s9631_s15 + $0x258] sm:$0xff] %v4833_v51  ;;  %5765 = vst [vmem:[%s9631_s15 + $0x338] sm:$0xff] %v4896_v31  ;;  %v4958_v12 = vmul.f32 %v6621_v62, %v9589_v52  ;;  %v6627_v33 = vpop.eup %6626  ;;  %v5021_v38 = vmul.f32 %v6621_v62, %v9600_v27  ;;  %v5084_v1 = vmul.f32 %v6621_v62, %v9612_v8 }
 0x61e   : > { %5793 = vst [vmem:[%s9631_s15 + $0x418] sm:$0xff] %v4959_v15  ;;  %5821 = vst [vmem:[%s9631_s15 + $0x4f8] sm:$0xff] %v5022_v42  ;;  %v4714_v14 = vmul.f32 %v6623_v5, %v9524_v20  ;;  %v4777_v59 = vmul.f32 %v6623_v5, %v9548_v49  ;;  %v6629_v55 = vpop.eup %6628  ;;  %v4840_v16 = vmul.f32 %v6623_v5, %v9564_v47 }
 0x61f   : > { %5849 = vst [vmem:[%s9631_s15 + $0x5d8] sm:$0xff] %v5085_v19  ;;  %5680 = vst [vmem:[%s9631_s15 + $0x90] sm:$0xff] %v4706_v30  ;;  %v4903_v53 = vmul.f32 %v6623_v5, %v9536_v25  ;;  %v4966_v26 = vmul.f32 %v6623_v5, %v9580_v22  ;;  %v5029_v60 = vmul.f32 %v6623_v5, %v9592_v9  ;;  %v6631_v39 = vpop.eup %6630  ;;  %v4658_v19 = vadd.f32 1.0, %v6629_v55 }
 0x620   : > { %5708 = vst [vmem:[%s9631_s15 + $0x170] sm:$0xff] %v4769_v56  ;;  %5736 = vst [vmem:[%s9631_s15 + $0x250] sm:$0xff] %v4832_v0  ;;  %v5092_v36 = vmul.f32 %v6623_v5, %v9603_v17  ;;  %v4713_v18 = vmul.f32 %v6625_v11, %v9528_v28  ;;  %v4776_v10 = vmul.f32 %v6625_v11, %v9552_v41  ;;  %v6633_v58 = vpop.eup %6632  ;;  %v4657_v30 = vadd.f32 1.0, %v6631_v39 }
 0x621   : > { %5764 = vst [vmem:[%s9631_s15 + $0x330] sm:$0xff] %v4895_v23  ;;  %5792 = vst [vmem:[%s9631_s15 + $0x410] sm:$0xff] %v4958_v12  ;;  %v4839_v61 = vmul.f32 %v6625_v11, %v9568_v2  ;;  %v4902_v63 = vmul.f32 %v6625_v11, %v9540_v24  ;;  %v4965_v54 = vmul.f32 %v6625_v11, %v9583_v46  ;;  %v6635_v62 = vpop.eup %6634  ;;  %6638 = vrcp.f32 %v4658_v19 }
 0x622   : > { %5820 = vst [vmem:[%s9631_s15 + $0x4f0] sm:$0xff] %v5021_v38  ;;  %5848 = vst [vmem:[%s9631_s15 + $0x5d0] sm:$0xff] %v5084_v1  ;;  %v5028_v34 = vmul.f32 %v6625_v11, %v9595_v48  ;;  %v5091_v45 = vmul.f32 %v6625_v11, %v9606_v37  ;;  %v4716_v29 = vmul.f32 %v6627_v33, %v9530_v32  ;;  %v4660_v11 = vadd.f32 1.0, %v6633_v58  ;;  %v6637_v50 = vpop.eup %6636 }
 0x623   : > { %5683 = vst [vmem:[%s9631_s15 + $0xa8] sm:$0xff] %v4714_v14  ;;  %5711 = vst [vmem:[%s9631_s15 + $0x188] sm:$0xff] %v4777_v59  ;;  %v4779_v4 = vmul.f32 %v6627_v33, %v9554_v40  ;;  %v4842_v51 = vmul.f32 %v6627_v33, %v9570_v44  ;;  %v4905_v31 = vmul.f32 %v6627_v33, %v9543_v6  ;;  %v4659_v56 = vadd.f32 1.0, %v6635_v62 }
 0x624   : > { %5739 = vst [vmem:[%s9631_s15 + $0x268] sm:$0xff] %v4840_v16  ;;  %5767 = vst [vmem:[%s9631_s15 + $0x348] sm:$0xff] %v4903_v53  ;;  %v4968_v5 = vmul.f32 %v6627_v33, %v9586_v7  ;;  %v5031_v15 = vmul.f32 %v6627_v33, %v9598_v35  ;;  %v5094_v42 = vmul.f32 %v6627_v33, %v9609_v13  ;;  %6640 = vrcp.f32 %v4657_v30 }
 0x625   : > { %5795 = vst [vmem:[%s9631_s15 + $0x428] sm:$0xff] %v4966_v26  ;;  %5823 = vst [vmem:[%s9631_s15 + $0x508] sm:$0xff] %v5029_v60  ;;  %6642 = vrcp.f32 %v4660_v11  ;;  %v4715_v0 = vmul.f32 %v6637_v50, %v9534_v57  ;;  %v4778_v23 = vmul.f32 %v6637_v50, %v9560_v3  ;;  %v4841_v12 = vmul.f32 %v6637_v50, %v9577_v43 }
 0x626   : > { %5851 = vst [vmem:[%s9631_s15 + $0x5e8] sm:$0xff] %v5092_v36  ;;  %5682 = vst [vmem:[%s9631_s15 + $0xa0] sm:$0xff] %v4713_v18  ;;  %6644 = vrcp.f32 %v4659_v56  ;;  %v4904_v33 = vmul.f32 %v6637_v50, %v9546_v21  ;;  %v4967_v38 = vmul.f32 %v6637_v50, %v9589_v52  ;;  %v5030_v1 = vmul.f32 %v6637_v50, %v9600_v27 }
 0x627   : > { %5710 = vst [vmem:[%s9631_s15 + $0x180] sm:$0xff] %v4776_v10  ;;  %5738 = vst [vmem:[%s9631_s15 + $0x260] sm:$0xff] %v4839_v61  ;;  %v5093_v14 = vmul.f32 %v6637_v50, %v9612_v8 }
 0x628   : > { %5766 = vst [vmem:[%s9631_s15 + $0x340] sm:$0xff] %v4902_v63  ;;  %5794 = vst [vmem:[%s9631_s15 + $0x420] sm:$0xff] %v4965_v54 }
 0x629   : > { %5822 = vst [vmem:[%s9631_s15 + $0x500] sm:$0xff] %v5028_v34  ;;  %5850 = vst [vmem:[%s9631_s15 + $0x5e0] sm:$0xff] %v5091_v45 }
 0x62a   : > { %5685 = vst [vmem:[%s9631_s15 + $0xb8] sm:$0xff] %v4716_v29  ;;  %5713 = vst [vmem:[%s9631_s15 + $0x198] sm:$0xff] %v4779_v4 }
 0x62b   : > { %5741 = vst [vmem:[%s9631_s15 + $0x278] sm:$0xff] %v4842_v51  ;;  %5769 = vst [vmem:[%s9631_s15 + $0x358] sm:$0xff] %v4905_v31  ;;  %v6639_v59 = vpop.eup %6638 }
 0x62c   : > { %5797 = vst [vmem:[%s9631_s15 + $0x438] sm:$0xff] %v4968_v5  ;;  %5825 = vst [vmem:[%s9631_s15 + $0x518] sm:$0xff] %v5031_v15  ;;  %v4723_v16 = vmul.f32 %v6639_v59, %v9524_v20  ;;  %v4786_v53 = vmul.f32 %v6639_v59, %v9548_v49  ;;  %v4849_v26 = vmul.f32 %v6639_v59, %v9564_v47 }
 0x62d   : > { %5853 = vst [vmem:[%s9631_s15 + $0x5f8] sm:$0xff] %v5094_v42  ;;  %5684 = vst [vmem:[%s9631_s15 + $0xb0] sm:$0xff] %v4715_v0  ;;  %v4912_v60 = vmul.f32 %v6639_v59, %v9536_v25  ;;  %v4975_v36 = vmul.f32 %v6639_v59, %v9580_v22  ;;  %v5038_v18 = vmul.f32 %v6639_v59, %v9592_v9 }
 0x62e   : > { %5712 = vst [vmem:[%s9631_s15 + $0x190] sm:$0xff] %v4778_v23  ;;  %5740 = vst [vmem:[%s9631_s15 + $0x270] sm:$0xff] %v4841_v12  ;;  %v6641_v55 = vpop.eup %6640  ;;  %v5101_v10 = vmul.f32 %v6639_v59, %v9603_v17 }
 0x62f   : > { %5768 = vst [vmem:[%s9631_s15 + $0x350] sm:$0xff] %v4904_v33  ;;  %5796 = vst [vmem:[%s9631_s15 + $0x430] sm:$0xff] %v4967_v38  ;;  %v6643_v39 = vpop.eup %6642  ;;  %v4722_v20 = vmul.f32 %v6641_v55, %v9528_v28  ;;  %v4785_v25 = vmul.f32 %v6641_v55, %v9552_v41  ;;  %v4848_v47 = vmul.f32 %v6641_v55, %v9568_v2 }
 0x630   : > { %5824 = vst [vmem:[%s9631_s15 + $0x510] sm:$0xff] %v5030_v1  ;;  %5852 = vst [vmem:[%s9631_s15 + $0x5f0] sm:$0xff] %v5093_v14  ;;  %v6645_v49 = vpop.eup %6644  ;;  %v4911_v22 = vmul.f32 %v6641_v55, %v9540_v24  ;;  %v4974_v9 = vmul.f32 %v6641_v55, %v9583_v46  ;;  %v5037_v28 = vmul.f32 %v6641_v55, %v9595_v48 }
 0x631   : > { %5687 = vst [vmem:[%s9631_s15 + $0xc8] sm:$0xff] %v4723_v16  ;;  %5715 = vst [vmem:[%s9631_s15 + $0x1a8] sm:$0xff] %v4786_v53  ;;  %v5100_v41 = vmul.f32 %v6641_v55, %v9606_v37  ;;  %v4725_v17 = vmul.f32 %v6643_v39, %v9530_v32  ;;  %v4788_v2 = vmul.f32 %v6643_v39, %v9554_v40 }
 0x632   : > { %5743 = vst [vmem:[%s9631_s15 + $0x288] sm:$0xff] %v4849_v26  ;;  %5771 = vst [vmem:[%s9631_s15 + $0x368] sm:$0xff] %v4912_v60  ;;  %v4851_v24 = vmul.f32 %v6643_v39, %v9570_v44  ;;  %v4914_v46 = vmul.f32 %v6643_v39, %v9543_v6  ;;  %v4977_v48 = vmul.f32 %v6643_v39, %v9586_v7 }
 0x633   : > { %5799 = vst [vmem:[%s9631_s15 + $0x448] sm:$0xff] %v4975_v36  ;;  %5827 = vst [vmem:[%s9631_s15 + $0x528] sm:$0xff] %v5038_v18  ;;  %v5040_v37 = vmul.f32 %v6643_v39, %v9598_v35  ;;  %v5103_v32 = vmul.f32 %v6643_v39, %v9609_v13  ;;  %v4724_v6 = vmul.f32 %v6645_v49, %v9534_v57 }
 0x634   : > { %5855 = vst [vmem:[%s9631_s15 + $0x608] sm:$0xff] %v5101_v10  ;;  %5686 = vst [vmem:[%s9631_s15 + $0xc0] sm:$0xff] %v4722_v20  ;;  %v4787_v40 = vmul.f32 %v6645_v49, %v9560_v3  ;;  %v4850_v44 = vmul.f32 %v6645_v49, %v9577_v43  ;;  %v4913_v57 = vmul.f32 %v6645_v49, %v9546_v21 }
 0x635   : > { %5714 = vst [vmem:[%s9631_s15 + $0x1a0] sm:$0xff] %v4785_v25  ;;  %5742 = vst [vmem:[%s9631_s15 + $0x280] sm:$0xff] %v4848_v47  ;;  %v4976_v7 = vmul.f32 %v6645_v49, %v9589_v52  ;;  %v5039_v3 = vmul.f32 %v6645_v49, %v9600_v27  ;;  %v5102_v43 = vmul.f32 %v6645_v49, %v9612_v8 }
 0x636   : > { %5770 = vst [vmem:[%s9631_s15 + $0x360] sm:$0xff] %v4911_v22  ;;  %5798 = vst [vmem:[%s9631_s15 + $0x440] sm:$0xff] %v4974_v9 }
 0x637   : > { %5826 = vst [vmem:[%s9631_s15 + $0x520] sm:$0xff] %v5037_v28  ;;  %5854 = vst [vmem:[%s9631_s15 + $0x600] sm:$0xff] %v5100_v41 }
 0x638   : > { %5689 = vst [vmem:[%s9631_s15 + $0xd8] sm:$0xff] %v4725_v17  ;;  %5717 = vst [vmem:[%s9631_s15 + $0x1b8] sm:$0xff] %v4788_v2 }
 0x639   : > { %5745 = vst [vmem:[%s9631_s15 + $0x298] sm:$0xff] %v4851_v24  ;;  %5773 = vst [vmem:[%s9631_s15 + $0x378] sm:$0xff] %v4914_v46 }
 0x63a   : > { %5801 = vst [vmem:[%s9631_s15 + $0x458] sm:$0xff] %v4977_v48  ;;  %5829 = vst [vmem:[%s9631_s15 + $0x538] sm:$0xff] %v5040_v37 }
 0x63b   : > { %5857 = vst [vmem:[%s9631_s15 + $0x618] sm:$0xff] %v5103_v32  ;;  %5688 = vst [vmem:[%s9631_s15 + $0xd0] sm:$0xff] %v4724_v6 }
 0x63c   : > { %5716 = vst [vmem:[%s9631_s15 + $0x1b0] sm:$0xff] %v4787_v40  ;;  %5744 = vst [vmem:[%s9631_s15 + $0x290] sm:$0xff] %v4850_v44 }
 0x63d   : > { %5772 = vst [vmem:[%s9631_s15 + $0x370] sm:$0xff] %v4913_v57  ;;  %5800 = vst [vmem:[%s9631_s15 + $0x450] sm:$0xff] %v4976_v7 }
 0x63e   : > { %5828 = vst [vmem:[%s9631_s15 + $0x530] sm:$0xff] %v5039_v3  ;;  %5856 = vst [vmem:[%s9631_s15 + $0x610] sm:$0xff] %v5102_v43 }
 0x63f   : > { %6737 = shalt.err (!%p6734_p13)
}
 0x640   : > { %s6738_s12 = scalar_lea.hbm %s10096_s13, 25088  ;;  %s6742_s28 = scalar_lea.hbm %s10177_s11, 50176 }
 0x641   : > { %p6739_p7 = scmp.ne.s32.totalorder %s10096_s13, %s6738_s12  ;;  %p6743_p1 = scmp.lt.u32.totalorder %s10096_s13, %s10177_s11 }
 0x642   : > { %p6744_p11 = scmp.lt.u32.totalorder %s6742_s28, %s6738_s12  ;;  %p6746_p9 = scmp.lt.u32.totalorder %s6738_s12, %s10096_s13 }
 0x643   : > { %p6740_p3 = pnand %p6739_p7, %p10792_p10 }
 0x644   : > { %p6745_p8 = por %p6744_p11, %p6743_p1 }
 0x645   : > { %p6741_p12 = pneg %p6740_p3 }
 0x646   : > { %p6747_p2 = por %p6746_p9, %p6745_p8 }
 0x648   : > { %p6748_p4 = pnand %p6747_p2, %p6741_p12 }
 0x64a   : > { %6751 = shalt.err (!%p6748_p4)
}
 0x64b   : > { %s6806_s21 = smov 128   ;;  %s6807_s25 = smov 256  }
 0x64c   : > { %s6808_s16 = smov 8  }
 0x64d   : > { %6359 = dma.vmem_to_hbm [thread:$0]  (%p10792_p10), %s10106_s19, 25088, %s10096_s13, %s5110_s14, %s6806_s21, %s6807_s25, %s6808_s16  }
 0x64e PF: > { %s10793_s24 = sld [smem:[#allocation11_spill]]  ;;  %s10794_s17 = sld [smem:[#allocation16_spill]] }
 0x64f   : > { %p10796_p0 = scmp.ge.s32.totalorder %s6794_s20, 2 }
 0x654   : > { %s5137_s29 = sand.u32 1, %s10793_s24   ;;  %p10795_p5 = scmp.ne.s32.totalorder %s10794_s17, 0 }
 0x655   : > { %s5138_s12 = scalar_lea.sflag [#allocation4], %s5137_s29 }
 0x656   : > { %p6370_p6 = pnand %p10796_p0, %p10795_p5 }
 0x658   : > { %6777 = dma.done.wait (!%p6370_p6), %s5138_s12, 25088  }
 0x659   : > { %6779 = vsyncadd (!%p6370_p6), %s5138_s12, 4294942208  ;;  %s10797_s20 = sld [smem:[#allocation13_spill]]  ;;  %s10798_s22 = sld [smem:[#allocation12_spill]] }
 0x65a   : > { %s10799_s19 = sld [smem:[#allocation14_spill]]  ;;  %s10800_s17 = smov %s6786_s18 }
 0x65f   : > { %p25_p13 = scmp.ge.s32.totalorder %s10797_s20, 4   ;;  %s10801_s18 = smov %s10798_s22 }
 0x661   :  { %27 = sbr.rel (!%p25_p13) target bundleno = 6 (0x6), region = 185 }
 0x668   :  { %5143 = vsyncpa [#allocation3], 1 }
 0x669   :  { %5145 = vsyncpa [#allocation3 + $0x1], 1 }
 0x66a   :  { %5146 = vsyncpa [#allocation6], 1 }
 0x66b   :  { %5147 = vsyncpa [#allocation4], 1 }
 0x66c   :  { %5149 = vsyncpa [#allocation4 + $0x1], 1 }

</bundles_post_ra>
